<compile_context>
chip_gen: v5e
topology: v5e:2x2
jax: 0.10.0
libtpu: 0.0.40
codegen_flags: <defaults>
</compile_context>

<pallas_src>
import functools

import jax
import jax.numpy as jnp
import numpy as np
from jax.experimental import pallas as pl
from jax.experimental.pallas import tpu as pltpu

KSIZE = 7
PAD = KSIZE // 2


def _sigmoid(v):
    # Exact sigmoid: exp on the EUP, exact divide on the VPU.  The approximate
    # EUP reciprocal (~0.4% rel err) compounded through the two gates and blew
    # the tolerance; the exact divide costs nothing here (tiny element count).
    return 1.0 / (1.0 + jnp.exp(-v))


def cbam_kernel(x_ref, w1t_ref, w2_ref, wsp_ref, o_ref,
                avg_pad_ref, max_pad_ref, sa_flat_ref, *, H, W):
    # x_ref block: (Bt, C, H*W)  -- lane-dense (H*W is a multiple of 128).
    x = x_ref[...]
    Bt, C, HW = x.shape
    Hp, Wp = H + 2 * PAD, W + 2 * PAD

    # ---------------- Channel attention (VPU only; shapes too small for MXU) ----
    inv_hw = 1.0 / float(HW)
    avg_p = jnp.sum(x, axis=-1, keepdims=True) * inv_hw          # (Bt, C, 1)
    max_p = jnp.max(x, axis=-1, keepdims=True)                    # (Bt, C, 1)

    w1t = w1t_ref[...]                                            # (C, R) = fc1.weight.T
    w2 = w2_ref[...]                                              # (C, R) = fc2.weight

    def mlp(p):                                                   # p: (Bt, C, 1)
        h = jnp.sum(p * w1t[None, :, :], axis=1, keepdims=True)   # (Bt, 1, R)
        h = jnp.maximum(h, 0.0)
        return jnp.sum(h * w2[None, :, :], axis=-1, keepdims=True)  # (Bt, C, 1)

    ca = _sigmoid(mlp(avg_p) + mlp(max_p))                        # (Bt, C, 1)
    y = x * ca                                                    # (Bt, C, HW) lane-dense

    # ---------------- Spatial attention ----------------
    inv_c = 1.0 / float(C)
    avg_c = jnp.sum(y, axis=1) * inv_c                            # (Bt, HW)
    max_c = jnp.max(y, axis=1)                                    # (Bt, HW)

    # Zero-padded (H+6, W+6) maps in VMEM scratch.  The (tiny) scratch is
    # re-zeroed every step on purpose: with a "parallel" batch grid the second
    # TensorCore never executes program_id==0, so the "zero only on the first
    # step" trick would leave its borders uninitialized.
    avg_pad_ref[...] = jnp.zeros((Bt, Hp, Wp), jnp.float32)
    max_pad_ref[...] = jnp.zeros((Bt, Hp, Wp), jnp.float32)
    for h in range(H):                                            # tiny row-store plumbing
        row = slice(h * W, (h + 1) * W)
        avg_pad_ref[:, PAD + h, PAD:PAD + W] = avg_c[:, row]
        max_pad_ref[:, PAD + h, PAD:PAD + W] = max_c[:, row]

    # 7x7, 2-in / 1-out conv as shifted FMAs (cross-correlation, like torch).
    # dw (lane shift) hoisted to the outer loop: only 2*7 unaligned lane slices,
    # each consumed immediately by 7 sublane-offset slices; 4 accumulators break
    # the 98-deep serial add chain.
    accs = [jnp.zeros((Bt, H, W), jnp.float32) for _ in range(4)]
    for dw in range(KSIZE):
        for ci, pref in enumerate((avg_pad_ref, max_pad_ref)):
            sh = pref[:, :, dw:dw + W]                            # (Bt, Hp, W)
            for dh in range(KSIZE):
                tap = wsp_ref[ci * KSIZE * KSIZE + dh * KSIZE + dw]   # SMEM scalar
                k = (ci * KSIZE + dh) % 4
                accs[k] = accs[k] + tap * sh[:, dh:dh + H, :]
    conv = (accs[0] + accs[1]) + (accs[2] + accs[3])              # (Bt, H, W)

    # Repack the tiny conv map into lane-dense (Bt, H*W) via a small VMEM
    # scratch (avoids an in-kernel split/merge reshape), then apply the sigmoid
    # and the spatial gate at full lane density and store the block once.
    for h in range(H):
        sa_flat_ref[:, h * W:(h + 1) * W] = conv[:, h, :]
    sa = _sigmoid(sa_flat_ref[...])                               # (Bt, HW)
    o_ref[...] = (y * sa[:, None, :]).astype(o_ref.dtype)


def _pick_block_batch(B, per_image_bytes,
                      target_block_bytes=1 << 20,      # ~1 MiB blocks: near HBM roofline
                      io_vmem_budget=24 << 20):        # 2x dbl-buffered in+out, v7x-safe
    cap = max(1, min(target_block_bytes // per_image_bytes,
                     io_vmem_budget // (4 * per_image_bytes)))
    bt = 1
    for d in range(1, B + 1):
        if B % d == 0 and d <= cap:
            bt = d
    return bt


def cbam2d(x, w_fc1, w_fc2, w_spatial):
    """x: (B, C, H, W) f32; w_fc1: (R, C); w_fc2: (C, R); w_spatial: (1, 2, 7, 7)."""
    B, C, H, W = x.shape
    R = w_fc1.shape[0]
    HW = H * W
    if HW % 128 != 0:
        # TODO(synk): pad H*W up to a lane multiple for odd spatial sizes.
        raise NotImplementedError("H*W must be a multiple of 128")

    x_flat = x.reshape(B, C, HW)                         # contiguous reshape: free in HBM
    w1t = jnp.asarray(w_fc1, jnp.float32).T              # (C, R)
    w2 = jnp.asarray(w_fc2, jnp.float32)                 # (C, R)
    wsp_flat = jnp.asarray(w_spatial, jnp.float32).reshape(-1)   # (2*7*7,) taps in SMEM

    per_image_bytes = C * HW * 4
    Bt = _pick_block_batch(B, per_image_bytes)
    block_bytes = Bt * per_image_bytes
    Hp, Wp = H + 2 * PAD, W + 2 * PAD
    scratch_bytes = (2 * Bt * Hp * Wp + Bt * HW) * 4
    # Explicit VMEM budget: 2x double-buffered input + output blocks + scratch + slack.
    # TODO(synk): for very large single images (>6 MiB/block) tile H with a 3-row halo.
    vmem_limit = int(min(60 << 20,
                         max(32 << 20, 4 * block_bytes + scratch_bytes + (2 << 20))))

    kernel = functools.partial(cbam_kernel, H=H, W=W)

    out_flat = pl.pallas_call(
        kernel,
        out_shape=jax.ShapeDtypeStruct((B, C, HW), x.dtype),
        grid_spec=pltpu.PrefetchScalarGridSpec(
            num_scalar_prefetch=0,
            grid=(B // Bt,),
            in_specs=[
                pl.BlockSpec((Bt, C, HW), lambda b: (b, 0, 0)),       # x (lane-dense)
                pl.BlockSpec((C, R), lambda b: (0, 0)),               # fc1 weight (transposed)
                pl.BlockSpec((C, R), lambda b: (0, 0)),               # fc2 weight
                pl.BlockSpec(memory_space=pltpu.MemorySpace.SMEM),    # 7x7 conv taps
            ],
            out_specs=pl.BlockSpec((Bt, C, HW), lambda b: (b, 0, 0)),
            scratch_shapes=[
                pltpu.VMEM((Bt, Hp, Wp), jnp.float32),   # padded avg-over-C map
                pltpu.VMEM((Bt, Hp, Wp), jnp.float32),   # padded max-over-C map
                pltpu.VMEM((Bt, HW), jnp.float32),       # lane-dense conv/sa repack buffer
            ],
        ),
        compiler_params=pltpu.CompilerParams(
            dimension_semantics=("parallel",),           # batch steps are independent
            vmem_limit_bytes=vmem_limit,
        ),
    )(x_flat, w1t, w2, wsp_flat)

    return out_flat.reshape(B, C, H, W)


def cbam2d_ref(x, w_fc1, w_fc2, w_spatial):
    """Pure-JAX reference matching the PyTorch forward (HIGHEST precision so the
    check does not depend on XLA's default reduced-precision conv/einsum path)."""
    hi = jax.lax.Precision.HIGHEST
    avg = jnp.mean(x, axis=(2, 3), keepdims=True)        # (B, C, 1, 1)
    mx = jnp.max(x, axis=(2, 3), keepdims=True)

    def mlp(p):
        h = jnp.maximum(jnp.einsum('rc,bcij->brij', w_fc1, p, precision=hi), 0.0)
        return jnp.einsum('cr,brij->bcij', w_fc2, h, precision=hi)

    ca = jax.nn.sigmoid(mlp(avg) + mlp(mx))
    y = x * ca
    avg_c = jnp.mean(y, axis=1, keepdims=True)
    max_c = jnp.max(y, axis=1, keepdims=True)
    s = jnp.concatenate([avg_c, max_c], axis=1)          # (B, 2, H, W)
    conv = jax.lax.conv_general_dilated(
        s, w_spatial, (1, 1), 'SAME',
        dimension_numbers=('NCHW', 'OIHW', 'NCHW'),
        precision=hi)
    sa = jax.nn.sigmoid(conv)
    return y * sa


if __name__ == "__main__":
    B, C, H, W = 2, 32, 16, 16
    ratio = 16
    R = C // ratio

    key = jax.random.PRNGKey(0)
    kx, k1, k2, k3 = jax.random.split(key, 4)
    x = jax.random.normal(kx, (B, C, H, W), jnp.float32)
    # deterministic synthetic weights (shapes match PyTorch conv weights, squeezed for 1x1)
    w_fc1 = jax.random.normal(k1, (R, C), jnp.float32) * 0.2        # Conv2d(C, C//r, 1).weight[..., 0, 0]
    w_fc2 = jax.random.normal(k2, (C, R), jnp.float32) * 0.2        # Conv2d(C//r, C, 1).weight[..., 0, 0]
    w_spatial = jax.random.normal(k3, (1, 2, KSIZE, KSIZE), jnp.float32) * 0.1  # Conv2d(2, 1, 7).weight

    out = cbam2d(x, w_fc1, w_fc2, w_spatial)
    out = jax.block_until_ready(out)

    ref = cbam2d_ref(x, w_fc1, w_fc2, w_spatial)
    # Exact f32 sigmoids in the kernel now; remaining differences are summation
    # order only (few ulps).
    np.testing.assert_allclose(np.asarray(out), np.asarray(ref), rtol=1e-3, atol=1e-4)

    print("KERNEL_OK")
</pallas_src>

<mosaic_0001>
module attributes {stable_mosaic.version = 11 : i64} {
  func.func @cbam_kernel(%arg0: i32, %arg1: memref<2x32x256xf32, #tpu.memory_space<vmem>>, %arg2: memref<32x2xf32, #tpu.memory_space<vmem>>, %arg3: memref<32x2xf32, #tpu.memory_space<vmem>>, %arg4: memref<98xf32, #tpu.memory_space<smem>>, %arg5: memref<2x32x256xf32, #tpu.memory_space<vmem>>, %arg6: memref<2x22x22xf32, #tpu.memory_space<vmem>>, %arg7: memref<2x22x22xf32, #tpu.memory_space<vmem>>, %arg8: memref<2x256xf32, #tpu.memory_space<vmem>>) attributes {dimension_semantics = [#tpu.dimension_semantics<parallel>], iteration_bounds = array<i64: 1>, scalar_prefetch = 0 : i64, scratch_operands = 3 : i64, tpu.core_type = #tpu.core_type<tc>, window_params = [{transform_indices = @transform_0, window_bounds = array<i64: 2, 32, 256>}, {pipeline_mode = #tpu.pipeline_mode<synchronous>, transform_indices = @transform_1, window_bounds = array<i64: 32, 2>}, {pipeline_mode = #tpu.pipeline_mode<synchronous>, transform_indices = @transform_2, window_bounds = array<i64: 32, 2>}, {transform_indices = @transform_3, window_bounds = array<i64: 98>}, {transform_indices = @transform_4, window_bounds = array<i64: 2, 32, 256>}]} {
    %c0 = arith.constant 0 : index
    %c0_0 = arith.constant 0 : index
    %c0_1 = arith.constant 0 : index
    %0 = vector.load %arg1[%c0, %c0_0, %c0_1] : memref<2x32x256xf32, #tpu.memory_space<vmem>>, vector<2x32x256xf32>
    %cst = arith.constant dense<0.000000e+00> : vector<2x32xf32>
    %1 = vector.multi_reduction <add>, %0, %cst [2] : vector<2x32x256xf32> to vector<2x32xf32>
    %2 = vector.shape_cast %1 : vector<2x32xf32> to vector<2x32x1xf32>
    %cst_2 = arith.constant 3.906250e-03 : f32
    %3 = vector.broadcast %cst_2 : f32 to vector<2x32x1xf32>
    %4 = arith.mulf %2, %3 : vector<2x32x1xf32>
    %cst_3 = arith.constant dense<0xFF800000> : vector<2x32xf32>
    %5 = vector.multi_reduction <maximumf>, %0, %cst_3 [2] : vector<2x32x256xf32> to vector<2x32xf32>
    %6 = vector.shape_cast %5 : vector<2x32xf32> to vector<2x32x1xf32>
    %c0_4 = arith.constant 0 : index
    %c0_5 = arith.constant 0 : index
    %7 = vector.load %arg2[%c0_4, %c0_5] : memref<32x2xf32, #tpu.memory_space<vmem>>, vector<32x2xf32>
    %c0_6 = arith.constant 0 : index
    %c0_7 = arith.constant 0 : index
    %8 = vector.load %arg3[%c0_6, %c0_7] : memref<32x2xf32, #tpu.memory_space<vmem>>, vector<32x2xf32>
    %9 = vector.shape_cast %7 : vector<32x2xf32> to vector<1x32x2xf32>
    %10 = vector.broadcast %4 : vector<2x32x1xf32> to vector<2x32x2xf32>
    %11 = vector.broadcast %9 : vector<1x32x2xf32> to vector<2x32x2xf32>
    %12 = arith.mulf %10, %11 : vector<2x32x2xf32>
    %cst_8 = arith.constant dense<0.000000e+00> : vector<2x2xf32>
    %13 = vector.multi_reduction <add>, %12, %cst_8 [1] : vector<2x32x2xf32> to vector<2x2xf32>
    %14 = vector.shape_cast %13 : vector<2x2xf32> to vector<2x1x2xf32>
    %cst_9 = arith.constant 0.000000e+00 : f32
    %15 = vector.broadcast %cst_9 : f32 to vector<2x1x2xf32>
    %16 = arith.maximumf %14, %15 : vector<2x1x2xf32>
    %17 = vector.shape_cast %8 : vector<32x2xf32> to vector<1x32x2xf32>
    %18 = vector.broadcast %16 : vector<2x1x2xf32> to vector<2x32x2xf32>
    %19 = vector.broadcast %17 : vector<1x32x2xf32> to vector<2x32x2xf32>
    %20 = arith.mulf %18, %19 : vector<2x32x2xf32>
    %cst_10 = arith.constant dense<0.000000e+00> : vector<2x32xf32>
    %21 = vector.multi_reduction <add>, %20, %cst_10 [2] : vector<2x32x2xf32> to vector<2x32xf32>
    %22 = vector.shape_cast %21 : vector<2x32xf32> to vector<2x32x1xf32>
    %23 = vector.shape_cast %7 : vector<32x2xf32> to vector<1x32x2xf32>
    %24 = vector.broadcast %6 : vector<2x32x1xf32> to vector<2x32x2xf32>
    %25 = vector.broadcast %23 : vector<1x32x2xf32> to vector<2x32x2xf32>
    %26 = arith.mulf %24, %25 : vector<2x32x2xf32>
    %cst_11 = arith.constant dense<0.000000e+00> : vector<2x2xf32>
    %27 = vector.multi_reduction <add>, %26, %cst_11 [1] : vector<2x32x2xf32> to vector<2x2xf32>
    %28 = vector.shape_cast %27 : vector<2x2xf32> to vector<2x1x2xf32>
    %cst_12 = arith.constant 0.000000e+00 : f32
    %29 = vector.broadcast %cst_12 : f32 to vector<2x1x2xf32>
    %30 = arith.maximumf %28, %29 : vector<2x1x2xf32>
    %31 = vector.shape_cast %8 : vector<32x2xf32> to vector<1x32x2xf32>
    %32 = vector.broadcast %30 : vector<2x1x2xf32> to vector<2x32x2xf32>
    %33 = vector.broadcast %31 : vector<1x32x2xf32> to vector<2x32x2xf32>
    %34 = arith.mulf %32, %33 : vector<2x32x2xf32>
    %cst_13 = arith.constant dense<0.000000e+00> : vector<2x32xf32>
    %35 = vector.multi_reduction <add>, %34, %cst_13 [2] : vector<2x32x2xf32> to vector<2x32xf32>
    %36 = vector.shape_cast %35 : vector<2x32xf32> to vector<2x32x1xf32>
    %37 = arith.addf %22, %36 : vector<2x32x1xf32>
    %cst_14 = arith.constant 0.000000e+00 : f32
    %38 = vector.broadcast %cst_14 : f32 to vector<2x32x1xf32>
    %39 = arith.subf %38, %37 : vector<2x32x1xf32>
    %40 = math.exp %39 : vector<2x32x1xf32>
    %cst_15 = arith.constant 1.000000e+00 : f32
    %41 = vector.broadcast %cst_15 : f32 to vector<2x32x1xf32>
    %42 = arith.addf %41, %40 : vector<2x32x1xf32>
    %cst_16 = arith.constant 1.000000e+00 : f32
    %43 = vector.broadcast %cst_16 : f32 to vector<2x32x1xf32>
    %44 = arith.divf %43, %42 : vector<2x32x1xf32>
    %45 = vector.broadcast %44 : vector<2x32x1xf32> to vector<2x32x256xf32>
    %46 = arith.mulf %0, %45 : vector<2x32x256xf32>
    %cst_17 = arith.constant dense<0.000000e+00> : vector<2x256xf32>
    %47 = vector.multi_reduction <add>, %46, %cst_17 [1] : vector<2x32x256xf32> to vector<2x256xf32>
    %cst_18 = arith.constant 3.125000e-02 : f32
    %48 = vector.broadcast %cst_18 : f32 to vector<2x256xf32>
    %49 = arith.mulf %47, %48 : vector<2x256xf32>
    %cst_19 = arith.constant dense<0xFF800000> : vector<2x256xf32>
    %50 = vector.multi_reduction <maximumf>, %46, %cst_19 [1] : vector<2x32x256xf32> to vector<2x256xf32>
    %cst_20 = arith.constant 0.000000e+00 : f32
    %51 = vector.broadcast %cst_20 : f32 to vector<2x22x22xf32>
    %c0_21 = arith.constant 0 : index
    %c0_22 = arith.constant 0 : index
    %c0_23 = arith.constant 0 : index
    %52 = vector.load %arg6[%c0_21, %c0_22, %c0_23] : memref<2x22x22xf32, #tpu.memory_space<vmem>>, vector<2x22x22xf32>
    tpu.vector_store %arg6[%c0_21, %c0_22, %c0_23], %51 {strides = array<i32>} : memref<2x22x22xf32, #tpu.memory_space<vmem>>, vector<2x22x22xf32>,
    %cst_24 = arith.constant 0.000000e+00 : f32
    %53 = vector.broadcast %cst_24 : f32 to vector<2x22x22xf32>
    %c0_25 = arith.constant 0 : index
    %c0_26 = arith.constant 0 : index
    %c0_27 = arith.constant 0 : index
    %54 = vector.load %arg7[%c0_25, %c0_26, %c0_27] : memref<2x22x22xf32, #tpu.memory_space<vmem>>, vector<2x22x22xf32>
    tpu.vector_store %arg7[%c0_25, %c0_26, %c0_27], %53 {strides = array<i32>} : memref<2x22x22xf32, #tpu.memory_space<vmem>>, vector<2x22x22xf32>,
    %55 = vector.extract_strided_slice %49 {offsets = [0, 0], sizes = [2, 16], strides = [1, 1]} : vector<2x256xf32> to vector<2x16xf32>
    %c0_28 = arith.constant 0 : index
    %c3 = arith.constant 3 : index
    %c3_29 = arith.constant 3 : index
    %56 = vector.load %arg6[%c0_28, %c3, %c3_29] : memref<2x22x22xf32, #tpu.memory_space<vmem>>, vector<2x1x16xf32>
    %57 = vector.shape_cast %56 : vector<2x1x16xf32> to vector<2x16xf32>
    %58 = vector.shape_cast %55 : vector<2x16xf32> to vector<2x1x16xf32>
    tpu.vector_store %arg6[%c0_28, %c3, %c3_29], %58 {strides = array<i32>} : memref<2x22x22xf32, #tpu.memory_space<vmem>>, vector<2x1x16xf32>,
    %59 = vector.extract_strided_slice %50 {offsets = [0, 0], sizes = [2, 16], strides = [1, 1]} : vector<2x256xf32> to vector<2x16xf32>
    %c0_30 = arith.constant 0 : index
    %c3_31 = arith.constant 3 : index
    %c3_32 = arith.constant 3 : index
    %60 = vector.load %arg7[%c0_30, %c3_31, %c3_32] : memref<2x22x22xf32, #tpu.memory_space<vmem>>, vector<2x1x16xf32>
    %61 = vector.shape_cast %60 : vector<2x1x16xf32> to vector<2x16xf32>
    %62 = vector.shape_cast %59 : vector<2x16xf32> to vector<2x1x16xf32>
    tpu.vector_store %arg7[%c0_30, %c3_31, %c3_32], %62 {strides = array<i32>} : memref<2x22x22xf32, #tpu.memory_space<vmem>>, vector<2x1x16xf32>,
    %63 = vector.extract_strided_slice %49 {offsets = [0, 16], sizes = [2, 16], strides = [1, 1]} : vector<2x256xf32> to vector<2x16xf32>
    %c0_33 = arith.constant 0 : index
    %c4 = arith.constant 4 : index
    %c3_34 = arith.constant 3 : index
    %64 = vector.load %arg6[%c0_33, %c4, %c3_34] : memref<2x22x22xf32, #tpu.memory_space<vmem>>, vector<2x1x16xf32>
    %65 = vector.shape_cast %64 : vector<2x1x16xf32> to vector<2x16xf32>
    %66 = vector.shape_cast %63 : vector<2x16xf32> to vector<2x1x16xf32>
    tpu.vector_store %arg6[%c0_33, %c4, %c3_34], %66 {strides = array<i32>} : memref<2x22x22xf32, #tpu.memory_space<vmem>>, vector<2x1x16xf32>,
    %67 = vector.extract_strided_slice %50 {offsets = [0, 16], sizes = [2, 16], strides = [1, 1]} : vector<2x256xf32> to vector<2x16xf32>
    %c0_35 = arith.constant 0 : index
    %c4_36 = arith.constant 4 : index
    %c3_37 = arith.constant 3 : index
    %68 = vector.load %arg7[%c0_35, %c4_36, %c3_37] : memref<2x22x22xf32, #tpu.memory_space<vmem>>, vector<2x1x16xf32>
    %69 = vector.shape_cast %68 : vector<2x1x16xf32> to vector<2x16xf32>
    %70 = vector.shape_cast %67 : vector<2x16xf32> to vector<2x1x16xf32>
    tpu.vector_store %arg7[%c0_35, %c4_36, %c3_37], %70 {strides = array<i32>} : memref<2x22x22xf32, #tpu.memory_space<vmem>>, vector<2x1x16xf32>,
    %71 = vector.extract_strided_slice %49 {offsets = [0, 32], sizes = [2, 16], strides = [1, 1]} : vector<2x256xf32> to vector<2x16xf32>
    %c0_38 = arith.constant 0 : index
    %c5 = arith.constant 5 : index
    %c3_39 = arith.constant 3 : index
    %72 = vector.load %arg6[%c0_38, %c5, %c3_39] : memref<2x22x22xf32, #tpu.memory_space<vmem>>, vector<2x1x16xf32>
    %73 = vector.shape_cast %72 : vector<2x1x16xf32> to vector<2x16xf32>
    %74 = vector.shape_cast %71 : vector<2x16xf32> to vector<2x1x16xf32>
    tpu.vector_store %arg6[%c0_38, %c5, %c3_39], %74 {strides = array<i32>} : memref<2x22x22xf32, #tpu.memory_space<vmem>>, vector<2x1x16xf32>,
    %75 = vector.extract_strided_slice %50 {offsets = [0, 32], sizes = [2, 16], strides = [1, 1]} : vector<2x256xf32> to vector<2x16xf32>
    %c0_40 = arith.constant 0 : index
    %c5_41 = arith.constant 5 : index
    %c3_42 = arith.constant 3 : index
    %76 = vector.load %arg7[%c0_40, %c5_41, %c3_42] : memref<2x22x22xf32, #tpu.memory_space<vmem>>, vector<2x1x16xf32>
    %77 = vector.shape_cast %76 : vector<2x1x16xf32> to vector<2x16xf32>
    %78 = vector.shape_cast %75 : vector<2x16xf32> to vector<2x1x16xf32>
    tpu.vector_store %arg7[%c0_40, %c5_41, %c3_42], %78 {strides = array<i32>} : memref<2x22x22xf32, #tpu.memory_space<vmem>>, vector<2x1x16xf32>,
    %79 = vector.extract_strided_slice %49 {offsets = [0, 48], sizes = [2, 16], strides = [1, 1]} : vector<2x256xf32> to vector<2x16xf32>
    %c0_43 = arith.constant 0 : index
    %c6 = arith.constant 6 : index
    %c3_44 = arith.constant 3 : index
    %80 = vector.load %arg6[%c0_43, %c6, %c3_44] : memref<2x22x22xf32, #tpu.memory_space<vmem>>, vector<2x1x16xf32>
    %81 = vector.shape_cast %80 : vector<2x1x16xf32> to vector<2x16xf32>
    %82 = vector.shape_cast %79 : vector<2x16xf32> to vector<2x1x16xf32>
    tpu.vector_store %arg6[%c0_43, %c6, %c3_44], %82 {strides = array<i32>} : memref<2x22x22xf32, #tpu.memory_space<vmem>>, vector<2x1x16xf32>,
    %83 = vector.extract_strided_slice %50 {offsets = [0, 48], sizes = [2, 16], strides = [1, 1]} : vector<2x256xf32> to vector<2x16xf32>
    %c0_45 = arith.constant 0 : index
    %c6_46 = arith.constant 6 : index
    %c3_47 = arith.constant 3 : index
    %84 = vector.load %arg7[%c0_45, %c6_46, %c3_47] : memref<2x22x22xf32, #tpu.memory_space<vmem>>, vector<2x1x16xf32>
    %85 = vector.shape_cast %84 : vector<2x1x16xf32> to vector<2x16xf32>
    %86 = vector.shape_cast %83 : vector<2x16xf32> to vector<2x1x16xf32>
    tpu.vector_store %arg7[%c0_45, %c6_46, %c3_47], %86 {strides = array<i32>} : memref<2x22x22xf32, #tpu.memory_space<vmem>>, vector<2x1x16xf32>,
    %87 = vector.extract_strided_slice %49 {offsets = [0, 64], sizes = [2, 16], strides = [1, 1]} : vector<2x256xf32> to vector<2x16xf32>
    %c0_48 = arith.constant 0 : index
    %c7 = arith.constant 7 : index
    %c3_49 = arith.constant 3 : index
    %88 = vector.load %arg6[%c0_48, %c7, %c3_49] : memref<2x22x22xf32, #tpu.memory_space<vmem>>, vector<2x1x16xf32>
    %89 = vector.shape_cast %88 : vector<2x1x16xf32> to vector<2x16xf32>
    %90 = vector.shape_cast %87 : vector<2x16xf32> to vector<2x1x16xf32>
    tpu.vector_store %arg6[%c0_48, %c7, %c3_49], %90 {strides = array<i32>} : memref<2x22x22xf32, #tpu.memory_space<vmem>>, vector<2x1x16xf32>,
    %91 = vector.extract_strided_slice %50 {offsets = [0, 64], sizes = [2, 16], strides = [1, 1]} : vector<2x256xf32> to vector<2x16xf32>
    %c0_50 = arith.constant 0 : index
    %c7_51 = arith.constant 7 : index
    %c3_52 = arith.constant 3 : index
    %92 = vector.load %arg7[%c0_50, %c7_51, %c3_52] : memref<2x22x22xf32, #tpu.memory_space<vmem>>, vector<2x1x16xf32>
    %93 = vector.shape_cast %92 : vector<2x1x16xf32> to vector<2x16xf32>
    %94 = vector.shape_cast %91 : vector<2x16xf32> to vector<2x1x16xf32>
    tpu.vector_store %arg7[%c0_50, %c7_51, %c3_52], %94 {strides = array<i32>} : memref<2x22x22xf32, #tpu.memory_space<vmem>>, vector<2x1x16xf32>,
    %95 = vector.extract_strided_slice %49 {offsets = [0, 80], sizes = [2, 16], strides = [1, 1]} : vector<2x256xf32> to vector<2x16xf32>
    %c0_53 = arith.constant 0 : index
    %c8 = arith.constant 8 : index
    %c3_54 = arith.constant 3 : index
    %96 = vector.load %arg6[%c0_53, %c8, %c3_54] : memref<2x22x22xf32, #tpu.memory_space<vmem>>, vector<2x1x16xf32>
    %97 = vector.shape_cast %96 : vector<2x1x16xf32> to vector<2x16xf32>
    %98 = vector.shape_cast %95 : vector<2x16xf32> to vector<2x1x16xf32>
    tpu.vector_store %arg6[%c0_53, %c8, %c3_54], %98 {strides = array<i32>} : memref<2x22x22xf32, #tpu.memory_space<vmem>>, vector<2x1x16xf32>,
    %99 = vector.extract_strided_slice %50 {offsets = [0, 80], sizes = [2, 16], strides = [1, 1]} : vector<2x256xf32> to vector<2x16xf32>
    %c0_55 = arith.constant 0 : index
    %c8_56 = arith.constant 8 : index
    %c3_57 = arith.constant 3 : index
    %100 = vector.load %arg7[%c0_55, %c8_56, %c3_57] : memref<2x22x22xf32, #tpu.memory_space<vmem>>, vector<2x1x16xf32>
    %101 = vector.shape_cast %100 : vector<2x1x16xf32> to vector<2x16xf32>
    %102 = vector.shape_cast %99 : vector<2x16xf32> to vector<2x1x16xf32>
    tpu.vector_store %arg7[%c0_55, %c8_56, %c3_57], %102 {strides = array<i32>} : memref<2x22x22xf32, #tpu.memory_space<vmem>>, vector<2x1x16xf32>,
    %103 = vector.extract_strided_slice %49 {offsets = [0, 96], sizes = [2, 16], strides = [1, 1]} : vector<2x256xf32> to vector<2x16xf32>
    %c0_58 = arith.constant 0 : index
    %c9 = arith.constant 9 : index
    %c3_59 = arith.constant 3 : index
    %104 = vector.load %arg6[%c0_58, %c9, %c3_59] : memref<2x22x22xf32, #tpu.memory_space<vmem>>, vector<2x1x16xf32>
    %105 = vector.shape_cast %104 : vector<2x1x16xf32> to vector<2x16xf32>
    %106 = vector.shape_cast %103 : vector<2x16xf32> to vector<2x1x16xf32>
    tpu.vector_store %arg6[%c0_58, %c9, %c3_59], %106 {strides = array<i32>} : memref<2x22x22xf32, #tpu.memory_space<vmem>>, vector<2x1x16xf32>,
    %107 = vector.extract_strided_slice %50 {offsets = [0, 96], sizes = [2, 16], strides = [1, 1]} : vector<2x256xf32> to vector<2x16xf32>
    %c0_60 = arith.constant 0 : index
    %c9_61 = arith.constant 9 : index
    %c3_62 = arith.constant 3 : index
    %108 = vector.load %arg7[%c0_60, %c9_61, %c3_62] : memref<2x22x22xf32, #tpu.memory_space<vmem>>, vector<2x1x16xf32>
    %109 = vector.shape_cast %108 : vector<2x1x16xf32> to vector<2x16xf32>
    %110 = vector.shape_cast %107 : vector<2x16xf32> to vector<2x1x16xf32>
    tpu.vector_store %arg7[%c0_60, %c9_61, %c3_62], %110 {strides = array<i32>} : memref<2x22x22xf32, #tpu.memory_space<vmem>>, vector<2x1x16xf32>,
    %111 = vector.extract_strided_slice %49 {offsets = [0, 112], sizes = [2, 16], strides = [1, 1]} : vector<2x256xf32> to vector<2x16xf32>
    %c0_63 = arith.constant 0 : index
    %c10 = arith.constant 10 : index
    %c3_64 = arith.constant 3 : index
    %112 = vector.load %arg6[%c0_63, %c10, %c3_64] : memref<2x22x22xf32, #tpu.memory_space<vmem>>, vector<2x1x16xf32>
    %113 = vector.shape_cast %112 : vector<2x1x16xf32> to vector<2x16xf32>
    %114 = vector.shape_cast %111 : vector<2x16xf32> to vector<2x1x16xf32>
    tpu.vector_store %arg6[%c0_63, %c10, %c3_64], %114 {strides = array<i32>} : memref<2x22x22xf32, #tpu.memory_space<vmem>>, vector<2x1x16xf32>,
    %115 = vector.extract_strided_slice %50 {offsets = [0, 112], sizes = [2, 16], strides = [1, 1]} : vector<2x256xf32> to vector<2x16xf32>
    %c0_65 = arith.constant 0 : index
    %c10_66 = arith.constant 10 : index
    %c3_67 = arith.constant 3 : index
    %116 = vector.load %arg7[%c0_65, %c10_66, %c3_67] : memref<2x22x22xf32, #tpu.memory_space<vmem>>, vector<2x1x16xf32>
    %117 = vector.shape_cast %116 : vector<2x1x16xf32> to vector<2x16xf32>
    %118 = vector.shape_cast %115 : vector<2x16xf32> to vector<2x1x16xf32>
    tpu.vector_store %arg7[%c0_65, %c10_66, %c3_67], %118 {strides = array<i32>} : memref<2x22x22xf32, #tpu.memory_space<vmem>>, vector<2x1x16xf32>,
    %119 = vector.extract_strided_slice %49 {offsets = [0, 128], sizes = [2, 16], strides = [1, 1]} : vector<2x256xf32> to vector<2x16xf32>
    %c0_68 = arith.constant 0 : index
    %c11 = arith.constant 11 : index
    %c3_69 = arith.constant 3 : index
    %120 = vector.load %arg6[%c0_68, %c11, %c3_69] : memref<2x22x22xf32, #tpu.memory_space<vmem>>, vector<2x1x16xf32>
    %121 = vector.shape_cast %120 : vector<2x1x16xf32> to vector<2x16xf32>
    %122 = vector.shape_cast %119 : vector<2x16xf32> to vector<2x1x16xf32>
    tpu.vector_store %arg6[%c0_68, %c11, %c3_69], %122 {strides = array<i32>} : memref<2x22x22xf32, #tpu.memory_space<vmem>>, vector<2x1x16xf32>,
    %123 = vector.extract_strided_slice %50 {offsets = [0, 128], sizes = [2, 16], strides = [1, 1]} : vector<2x256xf32> to vector<2x16xf32>
    %c0_70 = arith.constant 0 : index
    %c11_71 = arith.constant 11 : index
    %c3_72 = arith.constant 3 : index
    %124 = vector.load %arg7[%c0_70, %c11_71, %c3_72] : memref<2x22x22xf32, #tpu.memory_space<vmem>>, vector<2x1x16xf32>
    %125 = vector.shape_cast %124 : vector<2x1x16xf32> to vector<2x16xf32>
    %126 = vector.shape_cast %123 : vector<2x16xf32> to vector<2x1x16xf32>
    tpu.vector_store %arg7[%c0_70, %c11_71, %c3_72], %126 {strides = array<i32>} : memref<2x22x22xf32, #tpu.memory_space<vmem>>, vector<2x1x16xf32>,
    %127 = vector.extract_strided_slice %49 {offsets = [0, 144], sizes = [2, 16], strides = [1, 1]} : vector<2x256xf32> to vector<2x16xf32>
    %c0_73 = arith.constant 0 : index
    %c12 = arith.constant 12 : index
    %c3_74 = arith.constant 3 : index
    %128 = vector.load %arg6[%c0_73, %c12, %c3_74] : memref<2x22x22xf32, #tpu.memory_space<vmem>>, vector<2x1x16xf32>
    %129 = vector.shape_cast %128 : vector<2x1x16xf32> to vector<2x16xf32>
    %130 = vector.shape_cast %127 : vector<2x16xf32> to vector<2x1x16xf32>
    tpu.vector_store %arg6[%c0_73, %c12, %c3_74], %130 {strides = array<i32>} : memref<2x22x22xf32, #tpu.memory_space<vmem>>, vector<2x1x16xf32>,
    %131 = vector.extract_strided_slice %50 {offsets = [0, 144], sizes = [2, 16], strides = [1, 1]} : vector<2x256xf32> to vector<2x16xf32>
    %c0_75 = arith.constant 0 : index
    %c12_76 = arith.constant 12 : index
    %c3_77 = arith.constant 3 : index
    %132 = vector.load %arg7[%c0_75, %c12_76, %c3_77] : memref<2x22x22xf32, #tpu.memory_space<vmem>>, vector<2x1x16xf32>
    %133 = vector.shape_cast %132 : vector<2x1x16xf32> to vector<2x16xf32>
    %134 = vector.shape_cast %131 : vector<2x16xf32> to vector<2x1x16xf32>
    tpu.vector_store %arg7[%c0_75, %c12_76, %c3_77], %134 {strides = array<i32>} : memref<2x22x22xf32, #tpu.memory_space<vmem>>, vector<2x1x16xf32>,
    %135 = vector.extract_strided_slice %49 {offsets = [0, 160], sizes = [2, 16], strides = [1, 1]} : vector<2x256xf32> to vector<2x16xf32>
    %c0_78 = arith.constant 0 : index
    %c13 = arith.constant 13 : index
    %c3_79 = arith.constant 3 : index
    %136 = vector.load %arg6[%c0_78, %c13, %c3_79] : memref<2x22x22xf32, #tpu.memory_space<vmem>>, vector<2x1x16xf32>
    %137 = vector.shape_cast %136 : vector<2x1x16xf32> to vector<2x16xf32>
    %138 = vector.shape_cast %135 : vector<2x16xf32> to vector<2x1x16xf32>
    tpu.vector_store %arg6[%c0_78, %c13, %c3_79], %138 {strides = array<i32>} : memref<2x22x22xf32, #tpu.memory_space<vmem>>, vector<2x1x16xf32>,
    %139 = vector.extract_strided_slice %50 {offsets = [0, 160], sizes = [2, 16], strides = [1, 1]} : vector<2x256xf32> to vector<2x16xf32>
    %c0_80 = arith.constant 0 : index
    %c13_81 = arith.constant 13 : index
    %c3_82 = arith.constant 3 : index
    %140 = vector.load %arg7[%c0_80, %c13_81, %c3_82] : memref<2x22x22xf32, #tpu.memory_space<vmem>>, vector<2x1x16xf32>
    %141 = vector.shape_cast %140 : vector<2x1x16xf32> to vector<2x16xf32>
    %142 = vector.shape_cast %139 : vector<2x16xf32> to vector<2x1x16xf32>
    tpu.vector_store %arg7[%c0_80, %c13_81, %c3_82], %142 {strides = array<i32>} : memref<2x22x22xf32, #tpu.memory_space<vmem>>, vector<2x1x16xf32>,
    %143 = vector.extract_strided_slice %49 {offsets = [0, 176], sizes = [2, 16], strides = [1, 1]} : vector<2x256xf32> to vector<2x16xf32>
    %c0_83 = arith.constant 0 : index
    %c14 = arith.constant 14 : index
    %c3_84 = arith.constant 3 : index
    %144 = vector.load %arg6[%c0_83, %c14, %c3_84] : memref<2x22x22xf32, #tpu.memory_space<vmem>>, vector<2x1x16xf32>
    %145 = vector.shape_cast %144 : vector<2x1x16xf32> to vector<2x16xf32>
    %146 = vector.shape_cast %143 : vector<2x16xf32> to vector<2x1x16xf32>
    tpu.vector_store %arg6[%c0_83, %c14, %c3_84], %146 {strides = array<i32>} : memref<2x22x22xf32, #tpu.memory_space<vmem>>, vector<2x1x16xf32>,
    %147 = vector.extract_strided_slice %50 {offsets = [0, 176], sizes = [2, 16], strides = [1, 1]} : vector<2x256xf32> to vector<2x16xf32>
    %c0_85 = arith.constant 0 : index
    %c14_86 = arith.constant 14 : index
    %c3_87 = arith.constant 3 : index
    %148 = vector.load %arg7[%c0_85, %c14_86, %c3_87] : memref<2x22x22xf32, #tpu.memory_space<vmem>>, vector<2x1x16xf32>
    %149 = vector.shape_cast %148 : vector<2x1x16xf32> to vector<2x16xf32>
    %150 = vector.shape_cast %147 : vector<2x16xf32> to vector<2x1x16xf32>
    tpu.vector_store %arg7[%c0_85, %c14_86, %c3_87], %150 {strides = array<i32>} : memref<2x22x22xf32, #tpu.memory_space<vmem>>, vector<2x1x16xf32>,
    %151 = vector.extract_strided_slice %49 {offsets = [0, 192], sizes = [2, 16], strides = [1, 1]} : vector<2x256xf32> to vector<2x16xf32>
    %c0_88 = arith.constant 0 : index
    %c15 = arith.constant 15 : index
    %c3_89 = arith.constant 3 : index
    %152 = vector.load %arg6[%c0_88, %c15, %c3_89] : memref<2x22x22xf32, #tpu.memory_space<vmem>>, vector<2x1x16xf32>
    %153 = vector.shape_cast %152 : vector<2x1x16xf32> to vector<2x16xf32>
    %154 = vector.shape_cast %151 : vector<2x16xf32> to vector<2x1x16xf32>
    tpu.vector_store %arg6[%c0_88, %c15, %c3_89], %154 {strides = array<i32>} : memref<2x22x22xf32, #tpu.memory_space<vmem>>, vector<2x1x16xf32>,
    %155 = vector.extract_strided_slice %50 {offsets = [0, 192], sizes = [2, 16], strides = [1, 1]} : vector<2x256xf32> to vector<2x16xf32>
    %c0_90 = arith.constant 0 : index
    %c15_91 = arith.constant 15 : index
    %c3_92 = arith.constant 3 : index
    %156 = vector.load %arg7[%c0_90, %c15_91, %c3_92] : memref<2x22x22xf32, #tpu.memory_space<vmem>>, vector<2x1x16xf32>
    %157 = vector.shape_cast %156 : vector<2x1x16xf32> to vector<2x16xf32>
    %158 = vector.shape_cast %155 : vector<2x16xf32> to vector<2x1x16xf32>
    tpu.vector_store %arg7[%c0_90, %c15_91, %c3_92], %158 {strides = array<i32>} : memref<2x22x22xf32, #tpu.memory_space<vmem>>, vector<2x1x16xf32>,
    %159 = vector.extract_strided_slice %49 {offsets = [0, 208], sizes = [2, 16], strides = [1, 1]} : vector<2x256xf32> to vector<2x16xf32>
    %c0_93 = arith.constant 0 : index
    %c16 = arith.constant 16 : index
    %c3_94 = arith.constant 3 : index
    %160 = vector.load %arg6[%c0_93, %c16, %c3_94] : memref<2x22x22xf32, #tpu.memory_space<vmem>>, vector<2x1x16xf32>
    %161 = vector.shape_cast %160 : vector<2x1x16xf32> to vector<2x16xf32>
    %162 = vector.shape_cast %159 : vector<2x16xf32> to vector<2x1x16xf32>
    tpu.vector_store %arg6[%c0_93, %c16, %c3_94], %162 {strides = array<i32>} : memref<2x22x22xf32, #tpu.memory_space<vmem>>, vector<2x1x16xf32>,
    %163 = vector.extract_strided_slice %50 {offsets = [0, 208], sizes = [2, 16], strides = [1, 1]} : vector<2x256xf32> to vector<2x16xf32>
    %c0_95 = arith.constant 0 : index
    %c16_96 = arith.constant 16 : index
    %c3_97 = arith.constant 3 : index
    %164 = vector.load %arg7[%c0_95, %c16_96, %c3_97] : memref<2x22x22xf32, #tpu.memory_space<vmem>>, vector<2x1x16xf32>
    %165 = vector.shape_cast %164 : vector<2x1x16xf32> to vector<2x16xf32>
    %166 = vector.shape_cast %163 : vector<2x16xf32> to vector<2x1x16xf32>
    tpu.vector_store %arg7[%c0_95, %c16_96, %c3_97], %166 {strides = array<i32>} : memref<2x22x22xf32, #tpu.memory_space<vmem>>, vector<2x1x16xf32>,
    %167 = vector.extract_strided_slice %49 {offsets = [0, 224], sizes = [2, 16], strides = [1, 1]} : vector<2x256xf32> to vector<2x16xf32>
    %c0_98 = arith.constant 0 : index
    %c17 = arith.constant 17 : index
    %c3_99 = arith.constant 3 : index
    %168 = vector.load %arg6[%c0_98, %c17, %c3_99] : memref<2x22x22xf32, #tpu.memory_space<vmem>>, vector<2x1x16xf32>
    %169 = vector.shape_cast %168 : vector<2x1x16xf32> to vector<2x16xf32>
    %170 = vector.shape_cast %167 : vector<2x16xf32> to vector<2x1x16xf32>
    tpu.vector_store %arg6[%c0_98, %c17, %c3_99], %170 {strides = array<i32>} : memref<2x22x22xf32, #tpu.memory_space<vmem>>, vector<2x1x16xf32>,
    %171 = vector.extract_strided_slice %50 {offsets = [0, 224], sizes = [2, 16], strides = [1, 1]} : vector<2x256xf32> to vector<2x16xf32>
    %c0_100 = arith.constant 0 : index
    %c17_101 = arith.constant 17 : index
    %c3_102 = arith.constant 3 : index
    %172 = vector.load %arg7[%c0_100, %c17_101, %c3_102] : memref<2x22x22xf32, #tpu.memory_space<vmem>>, vector<2x1x16xf32>
    %173 = vector.shape_cast %172 : vector<2x1x16xf32> to vector<2x16xf32>
    %174 = vector.shape_cast %171 : vector<2x16xf32> to vector<2x1x16xf32>
    tpu.vector_store %arg7[%c0_100, %c17_101, %c3_102], %174 {strides = array<i32>} : memref<2x22x22xf32, #tpu.memory_space<vmem>>, vector<2x1x16xf32>,
    %175 = vector.extract_strided_slice %49 {offsets = [0, 240], sizes = [2, 16], strides = [1, 1]} : vector<2x256xf32> to vector<2x16xf32>
    %c0_103 = arith.constant 0 : index
    %c18 = arith.constant 18 : index
    %c3_104 = arith.constant 3 : index
    %176 = vector.load %arg6[%c0_103, %c18, %c3_104] : memref<2x22x22xf32, #tpu.memory_space<vmem>>, vector<2x1x16xf32>
    %177 = vector.shape_cast %176 : vector<2x1x16xf32> to vector<2x16xf32>
    %178 = vector.shape_cast %175 : vector<2x16xf32> to vector<2x1x16xf32>
    tpu.vector_store %arg6[%c0_103, %c18, %c3_104], %178 {strides = array<i32>} : memref<2x22x22xf32, #tpu.memory_space<vmem>>, vector<2x1x16xf32>,
    %179 = vector.extract_strided_slice %50 {offsets = [0, 240], sizes = [2, 16], strides = [1, 1]} : vector<2x256xf32> to vector<2x16xf32>
    %c0_105 = arith.constant 0 : index
    %c18_106 = arith.constant 18 : index
    %c3_107 = arith.constant 3 : index
    %180 = vector.load %arg7[%c0_105, %c18_106, %c3_107] : memref<2x22x22xf32, #tpu.memory_space<vmem>>, vector<2x1x16xf32>
    %181 = vector.shape_cast %180 : vector<2x1x16xf32> to vector<2x16xf32>
    %182 = vector.shape_cast %179 : vector<2x16xf32> to vector<2x1x16xf32>
    tpu.vector_store %arg7[%c0_105, %c18_106, %c3_107], %182 {strides = array<i32>} : memref<2x22x22xf32, #tpu.memory_space<vmem>>, vector<2x1x16xf32>,
    %cst_108 = arith.constant 0.000000e+00 : f32
    %183 = vector.broadcast %cst_108 : f32 to vector<2x16x16xf32>
    %cst_109 = arith.constant 0.000000e+00 : f32
    %184 = vector.broadcast %cst_109 : f32 to vector<2x16x16xf32>
    %cst_110 = arith.constant 0.000000e+00 : f32
    %185 = vector.broadcast %cst_110 : f32 to vector<2x16x16xf32>
    %cst_111 = arith.constant 0.000000e+00 : f32
    %186 = vector.broadcast %cst_111 : f32 to vector<2x16x16xf32>
    %c0_112 = arith.constant 0 : index
    %c0_113 = arith.constant 0 : index
    %c0_114 = arith.constant 0 : index
    %187 = vector.load %arg6[%c0_112, %c0_113, %c0_114] : memref<2x22x22xf32, #tpu.memory_space<vmem>>, vector<2x22x16xf32>
    %c0_115 = arith.constant 0 : index
    %188 = memref.load %arg4[%c0_115] : memref<98xf32, #tpu.memory_space<smem>>
    %189 = vector.extract_strided_slice %187 {offsets = [0, 0, 0], sizes = [2, 16, 16], strides = [1, 1, 1]} : vector<2x22x16xf32> to vector<2x16x16xf32>
    %190 = vector.broadcast %188 : f32 to vector<2x16x16xf32>
    %191 = arith.mulf %190, %189 : vector<2x16x16xf32>
    %192 = arith.addf %183, %191 : vector<2x16x16xf32>
    %c7_116 = arith.constant 7 : index
    %193 = memref.load %arg4[%c7_116] : memref<98xf32, #tpu.memory_space<smem>>
    %194 = vector.extract_strided_slice %187 {offsets = [0, 1, 0], sizes = [2, 16, 16], strides = [1, 1, 1]} : vector<2x22x16xf32> to vector<2x16x16xf32>
    %195 = vector.broadcast %193 : f32 to vector<2x16x16xf32>
    %196 = arith.mulf %195, %194 : vector<2x16x16xf32>
    %197 = arith.addf %184, %196 : vector<2x16x16xf32>
    %c14_117 = arith.constant 14 : index
    %198 = memref.load %arg4[%c14_117] : memref<98xf32, #tpu.memory_space<smem>>
    %199 = vector.extract_strided_slice %187 {offsets = [0, 2, 0], sizes = [2, 16, 16], strides = [1, 1, 1]} : vector<2x22x16xf32> to vector<2x16x16xf32>
    %200 = vector.broadcast %198 : f32 to vector<2x16x16xf32>
    %201 = arith.mulf %200, %199 : vector<2x16x16xf32>
    %202 = arith.addf %185, %201 : vector<2x16x16xf32>
    %c21 = arith.constant 21 : index
    %203 = memref.load %arg4[%c21] : memref<98xf32, #tpu.memory_space<smem>>
    %204 = vector.extract_strided_slice %187 {offsets = [0, 3, 0], sizes = [2, 16, 16], strides = [1, 1, 1]} : vector<2x22x16xf32> to vector<2x16x16xf32>
    %205 = vector.broadcast %203 : f32 to vector<2x16x16xf32>
    %206 = arith.mulf %205, %204 : vector<2x16x16xf32>
    %207 = arith.addf %186, %206 : vector<2x16x16xf32>
    %c28 = arith.constant 28 : index
    %208 = memref.load %arg4[%c28] : memref<98xf32, #tpu.memory_space<smem>>
    %209 = vector.extract_strided_slice %187 {offsets = [0, 4, 0], sizes = [2, 16, 16], strides = [1, 1, 1]} : vector<2x22x16xf32> to vector<2x16x16xf32>
    %210 = vector.broadcast %208 : f32 to vector<2x16x16xf32>
    %211 = arith.mulf %210, %209 : vector<2x16x16xf32>
    %212 = arith.addf %192, %211 : vector<2x16x16xf32>
    %c35 = arith.constant 35 : index
    %213 = memref.load %arg4[%c35] : memref<98xf32, #tpu.memory_space<smem>>
    %214 = vector.extract_strided_slice %187 {offsets = [0, 5, 0], sizes = [2, 16, 16], strides = [1, 1, 1]} : vector<2x22x16xf32> to vector<2x16x16xf32>
    %215 = vector.broadcast %213 : f32 to vector<2x16x16xf32>
    %216 = arith.mulf %215, %214 : vector<2x16x16xf32>
    %217 = arith.addf %197, %216 : vector<2x16x16xf32>
    %c42 = arith.constant 42 : index
    %218 = memref.load %arg4[%c42] : memref<98xf32, #tpu.memory_space<smem>>
    %219 = vector.extract_strided_slice %187 {offsets = [0, 6, 0], sizes = [2, 16, 16], strides = [1, 1, 1]} : vector<2x22x16xf32> to vector<2x16x16xf32>
    %220 = vector.broadcast %218 : f32 to vector<2x16x16xf32>
    %221 = arith.mulf %220, %219 : vector<2x16x16xf32>
    %222 = arith.addf %202, %221 : vector<2x16x16xf32>
    %c0_118 = arith.constant 0 : index
    %c0_119 = arith.constant 0 : index
    %c0_120 = arith.constant 0 : index
    %223 = vector.load %arg7[%c0_118, %c0_119, %c0_120] : memref<2x22x22xf32, #tpu.memory_space<vmem>>, vector<2x22x16xf32>
    %c49 = arith.constant 49 : index
    %224 = memref.load %arg4[%c49] : memref<98xf32, #tpu.memory_space<smem>>
    %225 = vector.extract_strided_slice %223 {offsets = [0, 0, 0], sizes = [2, 16, 16], strides = [1, 1, 1]} : vector<2x22x16xf32> to vector<2x16x16xf32>
    %226 = vector.broadcast %224 : f32 to vector<2x16x16xf32>
    %227 = arith.mulf %226, %225 : vector<2x16x16xf32>
    %228 = arith.addf %207, %227 : vector<2x16x16xf32>
    %c56 = arith.constant 56 : index
    %229 = memref.load %arg4[%c56] : memref<98xf32, #tpu.memory_space<smem>>
    %230 = vector.extract_strided_slice %223 {offsets = [0, 1, 0], sizes = [2, 16, 16], strides = [1, 1, 1]} : vector<2x22x16xf32> to vector<2x16x16xf32>
    %231 = vector.broadcast %229 : f32 to vector<2x16x16xf32>
    %232 = arith.mulf %231, %230 : vector<2x16x16xf32>
    %233 = arith.addf %212, %232 : vector<2x16x16xf32>
    %c63 = arith.constant 63 : index
    %234 = memref.load %arg4[%c63] : memref<98xf32, #tpu.memory_space<smem>>
    %235 = vector.extract_strided_slice %223 {offsets = [0, 2, 0], sizes = [2, 16, 16], strides = [1, 1, 1]} : vector<2x22x16xf32> to vector<2x16x16xf32>
    %236 = vector.broadcast %234 : f32 to vector<2x16x16xf32>
    %237 = arith.mulf %236, %235 : vector<2x16x16xf32>
    %238 = arith.addf %217, %237 : vector<2x16x16xf32>
    %c70 = arith.constant 70 : index
    %239 = memref.load %arg4[%c70] : memref<98xf32, #tpu.memory_space<smem>>
    %240 = vector.extract_strided_slice %223 {offsets = [0, 3, 0], sizes = [2, 16, 16], strides = [1, 1, 1]} : vector<2x22x16xf32> to vector<2x16x16xf32>
    %241 = vector.broadcast %239 : f32 to vector<2x16x16xf32>
    %242 = arith.mulf %241, %240 : vector<2x16x16xf32>
    %243 = arith.addf %222, %242 : vector<2x16x16xf32>
    %c77 = arith.constant 77 : index
    %244 = memref.load %arg4[%c77] : memref<98xf32, #tpu.memory_space<smem>>
    %245 = vector.extract_strided_slice %223 {offsets = [0, 4, 0], sizes = [2, 16, 16], strides = [1, 1, 1]} : vector<2x22x16xf32> to vector<2x16x16xf32>
    %246 = vector.broadcast %244 : f32 to vector<2x16x16xf32>
    %247 = arith.mulf %246, %245 : vector<2x16x16xf32>
    %248 = arith.addf %228, %247 : vector<2x16x16xf32>
    %c84 = arith.constant 84 : index
    %249 = memref.load %arg4[%c84] : memref<98xf32, #tpu.memory_space<smem>>
    %250 = vector.extract_strided_slice %223 {offsets = [0, 5, 0], sizes = [2, 16, 16], strides = [1, 1, 1]} : vector<2x22x16xf32> to vector<2x16x16xf32>
    %251 = vector.broadcast %249 : f32 to vector<2x16x16xf32>
    %252 = arith.mulf %251, %250 : vector<2x16x16xf32>
    %253 = arith.addf %233, %252 : vector<2x16x16xf32>
    %c91 = arith.constant 91 : index
    %254 = memref.load %arg4[%c91] : memref<98xf32, #tpu.memory_space<smem>>
    %255 = vector.extract_strided_slice %223 {offsets = [0, 6, 0], sizes = [2, 16, 16], strides = [1, 1, 1]} : vector<2x22x16xf32> to vector<2x16x16xf32>
    %256 = vector.broadcast %254 : f32 to vector<2x16x16xf32>
    %257 = arith.mulf %256, %255 : vector<2x16x16xf32>
    %258 = arith.addf %238, %257 : vector<2x16x16xf32>
    %c0_121 = arith.constant 0 : index
    %c0_122 = arith.constant 0 : index
    %c1 = arith.constant 1 : index
    %259 = vector.load %arg6[%c0_121, %c0_122, %c1] : memref<2x22x22xf32, #tpu.memory_space<vmem>>, vector<2x22x16xf32>
    %c1_123 = arith.constant 1 : index
    %260 = memref.load %arg4[%c1_123] : memref<98xf32, #tpu.memory_space<smem>>
    %261 = vector.extract_strided_slice %259 {offsets = [0, 0, 0], sizes = [2, 16, 16], strides = [1, 1, 1]} : vector<2x22x16xf32> to vector<2x16x16xf32>
    %262 = vector.broadcast %260 : f32 to vector<2x16x16xf32>
    %263 = arith.mulf %262, %261 : vector<2x16x16xf32>
    %264 = arith.addf %253, %263 : vector<2x16x16xf32>
    %c8_124 = arith.constant 8 : index
    %265 = memref.load %arg4[%c8_124] : memref<98xf32, #tpu.memory_space<smem>>
    %266 = vector.extract_strided_slice %259 {offsets = [0, 1, 0], sizes = [2, 16, 16], strides = [1, 1, 1]} : vector<2x22x16xf32> to vector<2x16x16xf32>
    %267 = vector.broadcast %265 : f32 to vector<2x16x16xf32>
    %268 = arith.mulf %267, %266 : vector<2x16x16xf32>
    %269 = arith.addf %258, %268 : vector<2x16x16xf32>
    %c15_125 = arith.constant 15 : index
    %270 = memref.load %arg4[%c15_125] : memref<98xf32, #tpu.memory_space<smem>>
    %271 = vector.extract_strided_slice %259 {offsets = [0, 2, 0], sizes = [2, 16, 16], strides = [1, 1, 1]} : vector<2x22x16xf32> to vector<2x16x16xf32>
    %272 = vector.broadcast %270 : f32 to vector<2x16x16xf32>
    %273 = arith.mulf %272, %271 : vector<2x16x16xf32>
    %274 = arith.addf %243, %273 : vector<2x16x16xf32>
    %c22 = arith.constant 22 : index
    %275 = memref.load %arg4[%c22] : memref<98xf32, #tpu.memory_space<smem>>
    %276 = vector.extract_strided_slice %259 {offsets = [0, 3, 0], sizes = [2, 16, 16], strides = [1, 1, 1]} : vector<2x22x16xf32> to vector<2x16x16xf32>
    %277 = vector.broadcast %275 : f32 to vector<2x16x16xf32>
    %278 = arith.mulf %277, %276 : vector<2x16x16xf32>
    %279 = arith.addf %248, %278 : vector<2x16x16xf32>
    %c29 = arith.constant 29 : index
    %280 = memref.load %arg4[%c29] : memref<98xf32, #tpu.memory_space<smem>>
    %281 = vector.extract_strided_slice %259 {offsets = [0, 4, 0], sizes = [2, 16, 16], strides = [1, 1, 1]} : vector<2x22x16xf32> to vector<2x16x16xf32>
    %282 = vector.broadcast %280 : f32 to vector<2x16x16xf32>
    %283 = arith.mulf %282, %281 : vector<2x16x16xf32>
    %284 = arith.addf %264, %283 : vector<2x16x16xf32>
    %c36 = arith.constant 36 : index
    %285 = memref.load %arg4[%c36] : memref<98xf32, #tpu.memory_space<smem>>
    %286 = vector.extract_strided_slice %259 {offsets = [0, 5, 0], sizes = [2, 16, 16], strides = [1, 1, 1]} : vector<2x22x16xf32> to vector<2x16x16xf32>
    %287 = vector.broadcast %285 : f32 to vector<2x16x16xf32>
    %288 = arith.mulf %287, %286 : vector<2x16x16xf32>
    %289 = arith.addf %269, %288 : vector<2x16x16xf32>
    %c43 = arith.constant 43 : index
    %290 = memref.load %arg4[%c43] : memref<98xf32, #tpu.memory_space<smem>>
    %291 = vector.extract_strided_slice %259 {offsets = [0, 6, 0], sizes = [2, 16, 16], strides = [1, 1, 1]} : vector<2x22x16xf32> to vector<2x16x16xf32>
    %292 = vector.broadcast %290 : f32 to vector<2x16x16xf32>
    %293 = arith.mulf %292, %291 : vector<2x16x16xf32>
    %294 = arith.addf %274, %293 : vector<2x16x16xf32>
    %c0_126 = arith.constant 0 : index
    %c0_127 = arith.constant 0 : index
    %c1_128 = arith.constant 1 : index
    %295 = vector.load %arg7[%c0_126, %c0_127, %c1_128] : memref<2x22x22xf32, #tpu.memory_space<vmem>>, vector<2x22x16xf32>
    %c50 = arith.constant 50 : index
    %296 = memref.load %arg4[%c50] : memref<98xf32, #tpu.memory_space<smem>>
    %297 = vector.extract_strided_slice %295 {offsets = [0, 0, 0], sizes = [2, 16, 16], strides = [1, 1, 1]} : vector<2x22x16xf32> to vector<2x16x16xf32>
    %298 = vector.broadcast %296 : f32 to vector<2x16x16xf32>
    %299 = arith.mulf %298, %297 : vector<2x16x16xf32>
    %300 = arith.addf %279, %299 : vector<2x16x16xf32>
    %c57 = arith.constant 57 : index
    %301 = memref.load %arg4[%c57] : memref<98xf32, #tpu.memory_space<smem>>
    %302 = vector.extract_strided_slice %295 {offsets = [0, 1, 0], sizes = [2, 16, 16], strides = [1, 1, 1]} : vector<2x22x16xf32> to vector<2x16x16xf32>
    %303 = vector.broadcast %301 : f32 to vector<2x16x16xf32>
    %304 = arith.mulf %303, %302 : vector<2x16x16xf32>
    %305 = arith.addf %284, %304 : vector<2x16x16xf32>
    %c64 = arith.constant 64 : index
    %306 = memref.load %arg4[%c64] : memref<98xf32, #tpu.memory_space<smem>>
    %307 = vector.extract_strided_slice %295 {offsets = [0, 2, 0], sizes = [2, 16, 16], strides = [1, 1, 1]} : vector<2x22x16xf32> to vector<2x16x16xf32>
    %308 = vector.broadcast %306 : f32 to vector<2x16x16xf32>
    %309 = arith.mulf %308, %307 : vector<2x16x16xf32>
    %310 = arith.addf %289, %309 : vector<2x16x16xf32>
    %c71 = arith.constant 71 : index
    %311 = memref.load %arg4[%c71] : memref<98xf32, #tpu.memory_space<smem>>
    %312 = vector.extract_strided_slice %295 {offsets = [0, 3, 0], sizes = [2, 16, 16], strides = [1, 1, 1]} : vector<2x22x16xf32> to vector<2x16x16xf32>
    %313 = vector.broadcast %311 : f32 to vector<2x16x16xf32>
    %314 = arith.mulf %313, %312 : vector<2x16x16xf32>
    %315 = arith.addf %294, %314 : vector<2x16x16xf32>
    %c78 = arith.constant 78 : index
    %316 = memref.load %arg4[%c78] : memref<98xf32, #tpu.memory_space<smem>>
    %317 = vector.extract_strided_slice %295 {offsets = [0, 4, 0], sizes = [2, 16, 16], strides = [1, 1, 1]} : vector<2x22x16xf32> to vector<2x16x16xf32>
    %318 = vector.broadcast %316 : f32 to vector<2x16x16xf32>
    %319 = arith.mulf %318, %317 : vector<2x16x16xf32>
    %320 = arith.addf %300, %319 : vector<2x16x16xf32>
    %c85 = arith.constant 85 : index
    %321 = memref.load %arg4[%c85] : memref<98xf32, #tpu.memory_space<smem>>
    %322 = vector.extract_strided_slice %295 {offsets = [0, 5, 0], sizes = [2, 16, 16], strides = [1, 1, 1]} : vector<2x22x16xf32> to vector<2x16x16xf32>
    %323 = vector.broadcast %321 : f32 to vector<2x16x16xf32>
    %324 = arith.mulf %323, %322 : vector<2x16x16xf32>
    %325 = arith.addf %305, %324 : vector<2x16x16xf32>
    %c92 = arith.constant 92 : index
    %326 = memref.load %arg4[%c92] : memref<98xf32, #tpu.memory_space<smem>>
    %327 = vector.extract_strided_slice %295 {offsets = [0, 6, 0], sizes = [2, 16, 16], strides = [1, 1, 1]} : vector<2x22x16xf32> to vector<2x16x16xf32>
    %328 = vector.broadcast %326 : f32 to vector<2x16x16xf32>
    %329 = arith.mulf %328, %327 : vector<2x16x16xf32>
    %330 = arith.addf %310, %329 : vector<2x16x16xf32>
    %c0_129 = arith.constant 0 : index
    %c0_130 = arith.constant 0 : index
    %c2 = arith.constant 2 : index
    %331 = vector.load %arg6[%c0_129, %c0_130, %c2] : memref<2x22x22xf32, #tpu.memory_space<vmem>>, vector<2x22x16xf32>
    %c2_131 = arith.constant 2 : index
    %332 = memref.load %arg4[%c2_131] : memref<98xf32, #tpu.memory_space<smem>>
    %333 = vector.extract_strided_slice %331 {offsets = [0, 0, 0], sizes = [2, 16, 16], strides = [1, 1, 1]} : vector<2x22x16xf32> to vector<2x16x16xf32>
    %334 = vector.broadcast %332 : f32 to vector<2x16x16xf32>
    %335 = arith.mulf %334, %333 : vector<2x16x16xf32>
    %336 = arith.addf %325, %335 : vector<2x16x16xf32>
    %c9_132 = arith.constant 9 : index
    %337 = memref.load %arg4[%c9_132] : memref<98xf32, #tpu.memory_space<smem>>
    %338 = vector.extract_strided_slice %331 {offsets = [0, 1, 0], sizes = [2, 16, 16], strides = [1, 1, 1]} : vector<2x22x16xf32> to vector<2x16x16xf32>
    %339 = vector.broadcast %337 : f32 to vector<2x16x16xf32>
    %340 = arith.mulf %339, %338 : vector<2x16x16xf32>
    %341 = arith.addf %330, %340 : vector<2x16x16xf32>
    %c16_133 = arith.constant 16 : index
    %342 = memref.load %arg4[%c16_133] : memref<98xf32, #tpu.memory_space<smem>>
    %343 = vector.extract_strided_slice %331 {offsets = [0, 2, 0], sizes = [2, 16, 16], strides = [1, 1, 1]} : vector<2x22x16xf32> to vector<2x16x16xf32>
    %344 = vector.broadcast %342 : f32 to vector<2x16x16xf32>
    %345 = arith.mulf %344, %343 : vector<2x16x16xf32>
    %346 = arith.addf %315, %345 : vector<2x16x16xf32>
    %c23 = arith.constant 23 : index
    %347 = memref.load %arg4[%c23] : memref<98xf32, #tpu.memory_space<smem>>
    %348 = vector.extract_strided_slice %331 {offsets = [0, 3, 0], sizes = [2, 16, 16], strides = [1, 1, 1]} : vector<2x22x16xf32> to vector<2x16x16xf32>
    %349 = vector.broadcast %347 : f32 to vector<2x16x16xf32>
    %350 = arith.mulf %349, %348 : vector<2x16x16xf32>
    %351 = arith.addf %320, %350 : vector<2x16x16xf32>
    %c30 = arith.constant 30 : index
    %352 = memref.load %arg4[%c30] : memref<98xf32, #tpu.memory_space<smem>>
    %353 = vector.extract_strided_slice %331 {offsets = [0, 4, 0], sizes = [2, 16, 16], strides = [1, 1, 1]} : vector<2x22x16xf32> to vector<2x16x16xf32>
    %354 = vector.broadcast %352 : f32 to vector<2x16x16xf32>
    %355 = arith.mulf %354, %353 : vector<2x16x16xf32>
    %356 = arith.addf %336, %355 : vector<2x16x16xf32>
    %c37 = arith.constant 37 : index
    %357 = memref.load %arg4[%c37] : memref<98xf32, #tpu.memory_space<smem>>
    %358 = vector.extract_strided_slice %331 {offsets = [0, 5, 0], sizes = [2, 16, 16], strides = [1, 1, 1]} : vector<2x22x16xf32> to vector<2x16x16xf32>
    %359 = vector.broadcast %357 : f32 to vector<2x16x16xf32>
    %360 = arith.mulf %359, %358 : vector<2x16x16xf32>
    %361 = arith.addf %341, %360 : vector<2x16x16xf32>
    %c44 = arith.constant 44 : index
    %362 = memref.load %arg4[%c44] : memref<98xf32, #tpu.memory_space<smem>>
    %363 = vector.extract_strided_slice %331 {offsets = [0, 6, 0], sizes = [2, 16, 16], strides = [1, 1, 1]} : vector<2x22x16xf32> to vector<2x16x16xf32>
    %364 = vector.broadcast %362 : f32 to vector<2x16x16xf32>
    %365 = arith.mulf %364, %363 : vector<2x16x16xf32>
    %366 = arith.addf %346, %365 : vector<2x16x16xf32>
    %c0_134 = arith.constant 0 : index
    %c0_135 = arith.constant 0 : index
    %c2_136 = arith.constant 2 : index
    %367 = vector.load %arg7[%c0_134, %c0_135, %c2_136] : memref<2x22x22xf32, #tpu.memory_space<vmem>>, vector<2x22x16xf32>
    %c51 = arith.constant 51 : index
    %368 = memref.load %arg4[%c51] : memref<98xf32, #tpu.memory_space<smem>>
    %369 = vector.extract_strided_slice %367 {offsets = [0, 0, 0], sizes = [2, 16, 16], strides = [1, 1, 1]} : vector<2x22x16xf32> to vector<2x16x16xf32>
    %370 = vector.broadcast %368 : f32 to vector<2x16x16xf32>
    %371 = arith.mulf %370, %369 : vector<2x16x16xf32>
    %372 = arith.addf %351, %371 : vector<2x16x16xf32>
    %c58 = arith.constant 58 : index
    %373 = memref.load %arg4[%c58] : memref<98xf32, #tpu.memory_space<smem>>
    %374 = vector.extract_strided_slice %367 {offsets = [0, 1, 0], sizes = [2, 16, 16], strides = [1, 1, 1]} : vector<2x22x16xf32> to vector<2x16x16xf32>
    %375 = vector.broadcast %373 : f32 to vector<2x16x16xf32>
    %376 = arith.mulf %375, %374 : vector<2x16x16xf32>
    %377 = arith.addf %356, %376 : vector<2x16x16xf32>
    %c65 = arith.constant 65 : index
    %378 = memref.load %arg4[%c65] : memref<98xf32, #tpu.memory_space<smem>>
    %379 = vector.extract_strided_slice %367 {offsets = [0, 2, 0], sizes = [2, 16, 16], strides = [1, 1, 1]} : vector<2x22x16xf32> to vector<2x16x16xf32>
    %380 = vector.broadcast %378 : f32 to vector<2x16x16xf32>
    %381 = arith.mulf %380, %379 : vector<2x16x16xf32>
    %382 = arith.addf %361, %381 : vector<2x16x16xf32>
    %c72 = arith.constant 72 : index
    %383 = memref.load %arg4[%c72] : memref<98xf32, #tpu.memory_space<smem>>
    %384 = vector.extract_strided_slice %367 {offsets = [0, 3, 0], sizes = [2, 16, 16], strides = [1, 1, 1]} : vector<2x22x16xf32> to vector<2x16x16xf32>
    %385 = vector.broadcast %383 : f32 to vector<2x16x16xf32>
    %386 = arith.mulf %385, %384 : vector<2x16x16xf32>
    %387 = arith.addf %366, %386 : vector<2x16x16xf32>
    %c79 = arith.constant 79 : index
    %388 = memref.load %arg4[%c79] : memref<98xf32, #tpu.memory_space<smem>>
    %389 = vector.extract_strided_slice %367 {offsets = [0, 4, 0], sizes = [2, 16, 16], strides = [1, 1, 1]} : vector<2x22x16xf32> to vector<2x16x16xf32>
    %390 = vector.broadcast %388 : f32 to vector<2x16x16xf32>
    %391 = arith.mulf %390, %389 : vector<2x16x16xf32>
    %392 = arith.addf %372, %391 : vector<2x16x16xf32>
    %c86 = arith.constant 86 : index
    %393 = memref.load %arg4[%c86] : memref<98xf32, #tpu.memory_space<smem>>
    %394 = vector.extract_strided_slice %367 {offsets = [0, 5, 0], sizes = [2, 16, 16], strides = [1, 1, 1]} : vector<2x22x16xf32> to vector<2x16x16xf32>
    %395 = vector.broadcast %393 : f32 to vector<2x16x16xf32>
    %396 = arith.mulf %395, %394 : vector<2x16x16xf32>
    %397 = arith.addf %377, %396 : vector<2x16x16xf32>
    %c93 = arith.constant 93 : index
    %398 = memref.load %arg4[%c93] : memref<98xf32, #tpu.memory_space<smem>>
    %399 = vector.extract_strided_slice %367 {offsets = [0, 6, 0], sizes = [2, 16, 16], strides = [1, 1, 1]} : vector<2x22x16xf32> to vector<2x16x16xf32>
    %400 = vector.broadcast %398 : f32 to vector<2x16x16xf32>
    %401 = arith.mulf %400, %399 : vector<2x16x16xf32>
    %402 = arith.addf %382, %401 : vector<2x16x16xf32>
    %c0_137 = arith.constant 0 : index
    %c0_138 = arith.constant 0 : index
    %c3_139 = arith.constant 3 : index
    %403 = vector.load %arg6[%c0_137, %c0_138, %c3_139] : memref<2x22x22xf32, #tpu.memory_space<vmem>>, vector<2x22x16xf32>
    %c3_140 = arith.constant 3 : index
    %404 = memref.load %arg4[%c3_140] : memref<98xf32, #tpu.memory_space<smem>>
    %405 = vector.extract_strided_slice %403 {offsets = [0, 0, 0], sizes = [2, 16, 16], strides = [1, 1, 1]} : vector<2x22x16xf32> to vector<2x16x16xf32>
    %406 = vector.broadcast %404 : f32 to vector<2x16x16xf32>
    %407 = arith.mulf %406, %405 : vector<2x16x16xf32>
    %408 = arith.addf %397, %407 : vector<2x16x16xf32>
    %c10_141 = arith.constant 10 : index
    %409 = memref.load %arg4[%c10_141] : memref<98xf32, #tpu.memory_space<smem>>
    %410 = vector.extract_strided_slice %403 {offsets = [0, 1, 0], sizes = [2, 16, 16], strides = [1, 1, 1]} : vector<2x22x16xf32> to vector<2x16x16xf32>
    %411 = vector.broadcast %409 : f32 to vector<2x16x16xf32>
    %412 = arith.mulf %411, %410 : vector<2x16x16xf32>
    %413 = arith.addf %402, %412 : vector<2x16x16xf32>
    %c17_142 = arith.constant 17 : index
    %414 = memref.load %arg4[%c17_142] : memref<98xf32, #tpu.memory_space<smem>>
    %415 = vector.extract_strided_slice %403 {offsets = [0, 2, 0], sizes = [2, 16, 16], strides = [1, 1, 1]} : vector<2x22x16xf32> to vector<2x16x16xf32>
    %416 = vector.broadcast %414 : f32 to vector<2x16x16xf32>
    %417 = arith.mulf %416, %415 : vector<2x16x16xf32>
    %418 = arith.addf %387, %417 : vector<2x16x16xf32>
    %c24 = arith.constant 24 : index
    %419 = memref.load %arg4[%c24] : memref<98xf32, #tpu.memory_space<smem>>
    %420 = vector.extract_strided_slice %403 {offsets = [0, 3, 0], sizes = [2, 16, 16], strides = [1, 1, 1]} : vector<2x22x16xf32> to vector<2x16x16xf32>
    %421 = vector.broadcast %419 : f32 to vector<2x16x16xf32>
    %422 = arith.mulf %421, %420 : vector<2x16x16xf32>
    %423 = arith.addf %392, %422 : vector<2x16x16xf32>
    %c31 = arith.constant 31 : index
    %424 = memref.load %arg4[%c31] : memref<98xf32, #tpu.memory_space<smem>>
    %425 = vector.extract_strided_slice %403 {offsets = [0, 4, 0], sizes = [2, 16, 16], strides = [1, 1, 1]} : vector<2x22x16xf32> to vector<2x16x16xf32>
    %426 = vector.broadcast %424 : f32 to vector<2x16x16xf32>
    %427 = arith.mulf %426, %425 : vector<2x16x16xf32>
    %428 = arith.addf %408, %427 : vector<2x16x16xf32>
    %c38 = arith.constant 38 : index
    %429 = memref.load %arg4[%c38] : memref<98xf32, #tpu.memory_space<smem>>
    %430 = vector.extract_strided_slice %403 {offsets = [0, 5, 0], sizes = [2, 16, 16], strides = [1, 1, 1]} : vector<2x22x16xf32> to vector<2x16x16xf32>
    %431 = vector.broadcast %429 : f32 to vector<2x16x16xf32>
    %432 = arith.mulf %431, %430 : vector<2x16x16xf32>
    %433 = arith.addf %413, %432 : vector<2x16x16xf32>
    %c45 = arith.constant 45 : index
    %434 = memref.load %arg4[%c45] : memref<98xf32, #tpu.memory_space<smem>>
    %435 = vector.extract_strided_slice %403 {offsets = [0, 6, 0], sizes = [2, 16, 16], strides = [1, 1, 1]} : vector<2x22x16xf32> to vector<2x16x16xf32>
    %436 = vector.broadcast %434 : f32 to vector<2x16x16xf32>
    %437 = arith.mulf %436, %435 : vector<2x16x16xf32>
    %438 = arith.addf %418, %437 : vector<2x16x16xf32>
    %c0_143 = arith.constant 0 : index
    %c0_144 = arith.constant 0 : index
    %c3_145 = arith.constant 3 : index
    %439 = vector.load %arg7[%c0_143, %c0_144, %c3_145] : memref<2x22x22xf32, #tpu.memory_space<vmem>>, vector<2x22x16xf32>
    %c52 = arith.constant 52 : index
    %440 = memref.load %arg4[%c52] : memref<98xf32, #tpu.memory_space<smem>>
    %441 = vector.extract_strided_slice %439 {offsets = [0, 0, 0], sizes = [2, 16, 16], strides = [1, 1, 1]} : vector<2x22x16xf32> to vector<2x16x16xf32>
    %442 = vector.broadcast %440 : f32 to vector<2x16x16xf32>
    %443 = arith.mulf %442, %441 : vector<2x16x16xf32>
    %444 = arith.addf %423, %443 : vector<2x16x16xf32>
    %c59 = arith.constant 59 : index
    %445 = memref.load %arg4[%c59] : memref<98xf32, #tpu.memory_space<smem>>
    %446 = vector.extract_strided_slice %439 {offsets = [0, 1, 0], sizes = [2, 16, 16], strides = [1, 1, 1]} : vector<2x22x16xf32> to vector<2x16x16xf32>
    %447 = vector.broadcast %445 : f32 to vector<2x16x16xf32>
    %448 = arith.mulf %447, %446 : vector<2x16x16xf32>
    %449 = arith.addf %428, %448 : vector<2x16x16xf32>
    %c66 = arith.constant 66 : index
    %450 = memref.load %arg4[%c66] : memref<98xf32, #tpu.memory_space<smem>>
    %451 = vector.extract_strided_slice %439 {offsets = [0, 2, 0], sizes = [2, 16, 16], strides = [1, 1, 1]} : vector<2x22x16xf32> to vector<2x16x16xf32>
    %452 = vector.broadcast %450 : f32 to vector<2x16x16xf32>
    %453 = arith.mulf %452, %451 : vector<2x16x16xf32>
    %454 = arith.addf %433, %453 : vector<2x16x16xf32>
    %c73 = arith.constant 73 : index
    %455 = memref.load %arg4[%c73] : memref<98xf32, #tpu.memory_space<smem>>
    %456 = vector.extract_strided_slice %439 {offsets = [0, 3, 0], sizes = [2, 16, 16], strides = [1, 1, 1]} : vector<2x22x16xf32> to vector<2x16x16xf32>
    %457 = vector.broadcast %455 : f32 to vector<2x16x16xf32>
    %458 = arith.mulf %457, %456 : vector<2x16x16xf32>
    %459 = arith.addf %438, %458 : vector<2x16x16xf32>
    %c80 = arith.constant 80 : index
    %460 = memref.load %arg4[%c80] : memref<98xf32, #tpu.memory_space<smem>>
    %461 = vector.extract_strided_slice %439 {offsets = [0, 4, 0], sizes = [2, 16, 16], strides = [1, 1, 1]} : vector<2x22x16xf32> to vector<2x16x16xf32>
    %462 = vector.broadcast %460 : f32 to vector<2x16x16xf32>
    %463 = arith.mulf %462, %461 : vector<2x16x16xf32>
    %464 = arith.addf %444, %463 : vector<2x16x16xf32>
    %c87 = arith.constant 87 : index
    %465 = memref.load %arg4[%c87] : memref<98xf32, #tpu.memory_space<smem>>
    %466 = vector.extract_strided_slice %439 {offsets = [0, 5, 0], sizes = [2, 16, 16], strides = [1, 1, 1]} : vector<2x22x16xf32> to vector<2x16x16xf32>
    %467 = vector.broadcast %465 : f32 to vector<2x16x16xf32>
    %468 = arith.mulf %467, %466 : vector<2x16x16xf32>
    %469 = arith.addf %449, %468 : vector<2x16x16xf32>
    %c94 = arith.constant 94 : index
    %470 = memref.load %arg4[%c94] : memref<98xf32, #tpu.memory_space<smem>>
    %471 = vector.extract_strided_slice %439 {offsets = [0, 6, 0], sizes = [2, 16, 16], strides = [1, 1, 1]} : vector<2x22x16xf32> to vector<2x16x16xf32>
    %472 = vector.broadcast %470 : f32 to vector<2x16x16xf32>
    %473 = arith.mulf %472, %471 : vector<2x16x16xf32>
    %474 = arith.addf %454, %473 : vector<2x16x16xf32>
    %c0_146 = arith.constant 0 : index
    %c0_147 = arith.constant 0 : index
    %c4_148 = arith.constant 4 : index
    %475 = vector.load %arg6[%c0_146, %c0_147, %c4_148] : memref<2x22x22xf32, #tpu.memory_space<vmem>>, vector<2x22x16xf32>
    %c4_149 = arith.constant 4 : index
    %476 = memref.load %arg4[%c4_149] : memref<98xf32, #tpu.memory_space<smem>>
    %477 = vector.extract_strided_slice %475 {offsets = [0, 0, 0], sizes = [2, 16, 16], strides = [1, 1, 1]} : vector<2x22x16xf32> to vector<2x16x16xf32>
    %478 = vector.broadcast %476 : f32 to vector<2x16x16xf32>
    %479 = arith.mulf %478, %477 : vector<2x16x16xf32>
    %480 = arith.addf %469, %479 : vector<2x16x16xf32>
    %c11_150 = arith.constant 11 : index
    %481 = memref.load %arg4[%c11_150] : memref<98xf32, #tpu.memory_space<smem>>
    %482 = vector.extract_strided_slice %475 {offsets = [0, 1, 0], sizes = [2, 16, 16], strides = [1, 1, 1]} : vector<2x22x16xf32> to vector<2x16x16xf32>
    %483 = vector.broadcast %481 : f32 to vector<2x16x16xf32>
    %484 = arith.mulf %483, %482 : vector<2x16x16xf32>
    %485 = arith.addf %474, %484 : vector<2x16x16xf32>
    %c18_151 = arith.constant 18 : index
    %486 = memref.load %arg4[%c18_151] : memref<98xf32, #tpu.memory_space<smem>>
    %487 = vector.extract_strided_slice %475 {offsets = [0, 2, 0], sizes = [2, 16, 16], strides = [1, 1, 1]} : vector<2x22x16xf32> to vector<2x16x16xf32>
    %488 = vector.broadcast %486 : f32 to vector<2x16x16xf32>
    %489 = arith.mulf %488, %487 : vector<2x16x16xf32>
    %490 = arith.addf %459, %489 : vector<2x16x16xf32>
    %c25 = arith.constant 25 : index
    %491 = memref.load %arg4[%c25] : memref<98xf32, #tpu.memory_space<smem>>
    %492 = vector.extract_strided_slice %475 {offsets = [0, 3, 0], sizes = [2, 16, 16], strides = [1, 1, 1]} : vector<2x22x16xf32> to vector<2x16x16xf32>
    %493 = vector.broadcast %491 : f32 to vector<2x16x16xf32>
    %494 = arith.mulf %493, %492 : vector<2x16x16xf32>
    %495 = arith.addf %464, %494 : vector<2x16x16xf32>
    %c32 = arith.constant 32 : index
    %496 = memref.load %arg4[%c32] : memref<98xf32, #tpu.memory_space<smem>>
    %497 = vector.extract_strided_slice %475 {offsets = [0, 4, 0], sizes = [2, 16, 16], strides = [1, 1, 1]} : vector<2x22x16xf32> to vector<2x16x16xf32>
    %498 = vector.broadcast %496 : f32 to vector<2x16x16xf32>
    %499 = arith.mulf %498, %497 : vector<2x16x16xf32>
    %500 = arith.addf %480, %499 : vector<2x16x16xf32>
    %c39 = arith.constant 39 : index
    %501 = memref.load %arg4[%c39] : memref<98xf32, #tpu.memory_space<smem>>
    %502 = vector.extract_strided_slice %475 {offsets = [0, 5, 0], sizes = [2, 16, 16], strides = [1, 1, 1]} : vector<2x22x16xf32> to vector<2x16x16xf32>
    %503 = vector.broadcast %501 : f32 to vector<2x16x16xf32>
    %504 = arith.mulf %503, %502 : vector<2x16x16xf32>
    %505 = arith.addf %485, %504 : vector<2x16x16xf32>
    %c46 = arith.constant 46 : index
    %506 = memref.load %arg4[%c46] : memref<98xf32, #tpu.memory_space<smem>>
    %507 = vector.extract_strided_slice %475 {offsets = [0, 6, 0], sizes = [2, 16, 16], strides = [1, 1, 1]} : vector<2x22x16xf32> to vector<2x16x16xf32>
    %508 = vector.broadcast %506 : f32 to vector<2x16x16xf32>
    %509 = arith.mulf %508, %507 : vector<2x16x16xf32>
    %510 = arith.addf %490, %509 : vector<2x16x16xf32>
    %c0_152 = arith.constant 0 : index
    %c0_153 = arith.constant 0 : index
    %c4_154 = arith.constant 4 : index
    %511 = vector.load %arg7[%c0_152, %c0_153, %c4_154] : memref<2x22x22xf32, #tpu.memory_space<vmem>>, vector<2x22x16xf32>
    %c53 = arith.constant 53 : index
    %512 = memref.load %arg4[%c53] : memref<98xf32, #tpu.memory_space<smem>>
    %513 = vector.extract_strided_slice %511 {offsets = [0, 0, 0], sizes = [2, 16, 16], strides = [1, 1, 1]} : vector<2x22x16xf32> to vector<2x16x16xf32>
    %514 = vector.broadcast %512 : f32 to vector<2x16x16xf32>
    %515 = arith.mulf %514, %513 : vector<2x16x16xf32>
    %516 = arith.addf %495, %515 : vector<2x16x16xf32>
    %c60 = arith.constant 60 : index
    %517 = memref.load %arg4[%c60] : memref<98xf32, #tpu.memory_space<smem>>
    %518 = vector.extract_strided_slice %511 {offsets = [0, 1, 0], sizes = [2, 16, 16], strides = [1, 1, 1]} : vector<2x22x16xf32> to vector<2x16x16xf32>
    %519 = vector.broadcast %517 : f32 to vector<2x16x16xf32>
    %520 = arith.mulf %519, %518 : vector<2x16x16xf32>
    %521 = arith.addf %500, %520 : vector<2x16x16xf32>
    %c67 = arith.constant 67 : index
    %522 = memref.load %arg4[%c67] : memref<98xf32, #tpu.memory_space<smem>>
    %523 = vector.extract_strided_slice %511 {offsets = [0, 2, 0], sizes = [2, 16, 16], strides = [1, 1, 1]} : vector<2x22x16xf32> to vector<2x16x16xf32>
    %524 = vector.broadcast %522 : f32 to vector<2x16x16xf32>
    %525 = arith.mulf %524, %523 : vector<2x16x16xf32>
    %526 = arith.addf %505, %525 : vector<2x16x16xf32>
    %c74 = arith.constant 74 : index
    %527 = memref.load %arg4[%c74] : memref<98xf32, #tpu.memory_space<smem>>
    %528 = vector.extract_strided_slice %511 {offsets = [0, 3, 0], sizes = [2, 16, 16], strides = [1, 1, 1]} : vector<2x22x16xf32> to vector<2x16x16xf32>
    %529 = vector.broadcast %527 : f32 to vector<2x16x16xf32>
    %530 = arith.mulf %529, %528 : vector<2x16x16xf32>
    %531 = arith.addf %510, %530 : vector<2x16x16xf32>
    %c81 = arith.constant 81 : index
    %532 = memref.load %arg4[%c81] : memref<98xf32, #tpu.memory_space<smem>>
    %533 = vector.extract_strided_slice %511 {offsets = [0, 4, 0], sizes = [2, 16, 16], strides = [1, 1, 1]} : vector<2x22x16xf32> to vector<2x16x16xf32>
    %534 = vector.broadcast %532 : f32 to vector<2x16x16xf32>
    %535 = arith.mulf %534, %533 : vector<2x16x16xf32>
    %536 = arith.addf %516, %535 : vector<2x16x16xf32>
    %c88 = arith.constant 88 : index
    %537 = memref.load %arg4[%c88] : memref<98xf32, #tpu.memory_space<smem>>
    %538 = vector.extract_strided_slice %511 {offsets = [0, 5, 0], sizes = [2, 16, 16], strides = [1, 1, 1]} : vector<2x22x16xf32> to vector<2x16x16xf32>
    %539 = vector.broadcast %537 : f32 to vector<2x16x16xf32>
    %540 = arith.mulf %539, %538 : vector<2x16x16xf32>
    %541 = arith.addf %521, %540 : vector<2x16x16xf32>
    %c95 = arith.constant 95 : index
    %542 = memref.load %arg4[%c95] : memref<98xf32, #tpu.memory_space<smem>>
    %543 = vector.extract_strided_slice %511 {offsets = [0, 6, 0], sizes = [2, 16, 16], strides = [1, 1, 1]} : vector<2x22x16xf32> to vector<2x16x16xf32>
    %544 = vector.broadcast %542 : f32 to vector<2x16x16xf32>
    %545 = arith.mulf %544, %543 : vector<2x16x16xf32>
    %546 = arith.addf %526, %545 : vector<2x16x16xf32>
    %c0_155 = arith.constant 0 : index
    %c0_156 = arith.constant 0 : index
    %c5_157 = arith.constant 5 : index
    %547 = vector.load %arg6[%c0_155, %c0_156, %c5_157] : memref<2x22x22xf32, #tpu.memory_space<vmem>>, vector<2x22x16xf32>
    %c5_158 = arith.constant 5 : index
    %548 = memref.load %arg4[%c5_158] : memref<98xf32, #tpu.memory_space<smem>>
    %549 = vector.extract_strided_slice %547 {offsets = [0, 0, 0], sizes = [2, 16, 16], strides = [1, 1, 1]} : vector<2x22x16xf32> to vector<2x16x16xf32>
    %550 = vector.broadcast %548 : f32 to vector<2x16x16xf32>
    %551 = arith.mulf %550, %549 : vector<2x16x16xf32>
    %552 = arith.addf %541, %551 : vector<2x16x16xf32>
    %c12_159 = arith.constant 12 : index
    %553 = memref.load %arg4[%c12_159] : memref<98xf32, #tpu.memory_space<smem>>
    %554 = vector.extract_strided_slice %547 {offsets = [0, 1, 0], sizes = [2, 16, 16], strides = [1, 1, 1]} : vector<2x22x16xf32> to vector<2x16x16xf32>
    %555 = vector.broadcast %553 : f32 to vector<2x16x16xf32>
    %556 = arith.mulf %555, %554 : vector<2x16x16xf32>
    %557 = arith.addf %546, %556 : vector<2x16x16xf32>
    %c19 = arith.constant 19 : index
    %558 = memref.load %arg4[%c19] : memref<98xf32, #tpu.memory_space<smem>>
    %559 = vector.extract_strided_slice %547 {offsets = [0, 2, 0], sizes = [2, 16, 16], strides = [1, 1, 1]} : vector<2x22x16xf32> to vector<2x16x16xf32>
    %560 = vector.broadcast %558 : f32 to vector<2x16x16xf32>
    %561 = arith.mulf %560, %559 : vector<2x16x16xf32>
    %562 = arith.addf %531, %561 : vector<2x16x16xf32>
    %c26 = arith.constant 26 : index
    %563 = memref.load %arg4[%c26] : memref<98xf32, #tpu.memory_space<smem>>
    %564 = vector.extract_strided_slice %547 {offsets = [0, 3, 0], sizes = [2, 16, 16], strides = [1, 1, 1]} : vector<2x22x16xf32> to vector<2x16x16xf32>
    %565 = vector.broadcast %563 : f32 to vector<2x16x16xf32>
    %566 = arith.mulf %565, %564 : vector<2x16x16xf32>
    %567 = arith.addf %536, %566 : vector<2x16x16xf32>
    %c33 = arith.constant 33 : index
    %568 = memref.load %arg4[%c33] : memref<98xf32, #tpu.memory_space<smem>>
    %569 = vector.extract_strided_slice %547 {offsets = [0, 4, 0], sizes = [2, 16, 16], strides = [1, 1, 1]} : vector<2x22x16xf32> to vector<2x16x16xf32>
    %570 = vector.broadcast %568 : f32 to vector<2x16x16xf32>
    %571 = arith.mulf %570, %569 : vector<2x16x16xf32>
    %572 = arith.addf %552, %571 : vector<2x16x16xf32>
    %c40 = arith.constant 40 : index
    %573 = memref.load %arg4[%c40] : memref<98xf32, #tpu.memory_space<smem>>
    %574 = vector.extract_strided_slice %547 {offsets = [0, 5, 0], sizes = [2, 16, 16], strides = [1, 1, 1]} : vector<2x22x16xf32> to vector<2x16x16xf32>
    %575 = vector.broadcast %573 : f32 to vector<2x16x16xf32>
    %576 = arith.mulf %575, %574 : vector<2x16x16xf32>
    %577 = arith.addf %557, %576 : vector<2x16x16xf32>
    %c47 = arith.constant 47 : index
    %578 = memref.load %arg4[%c47] : memref<98xf32, #tpu.memory_space<smem>>
    %579 = vector.extract_strided_slice %547 {offsets = [0, 6, 0], sizes = [2, 16, 16], strides = [1, 1, 1]} : vector<2x22x16xf32> to vector<2x16x16xf32>
    %580 = vector.broadcast %578 : f32 to vector<2x16x16xf32>
    %581 = arith.mulf %580, %579 : vector<2x16x16xf32>
    %582 = arith.addf %562, %581 : vector<2x16x16xf32>
    %c0_160 = arith.constant 0 : index
    %c0_161 = arith.constant 0 : index
    %c5_162 = arith.constant 5 : index
    %583 = vector.load %arg7[%c0_160, %c0_161, %c5_162] : memref<2x22x22xf32, #tpu.memory_space<vmem>>, vector<2x22x16xf32>
    %c54 = arith.constant 54 : index
    %584 = memref.load %arg4[%c54] : memref<98xf32, #tpu.memory_space<smem>>
    %585 = vector.extract_strided_slice %583 {offsets = [0, 0, 0], sizes = [2, 16, 16], strides = [1, 1, 1]} : vector<2x22x16xf32> to vector<2x16x16xf32>
    %586 = vector.broadcast %584 : f32 to vector<2x16x16xf32>
    %587 = arith.mulf %586, %585 : vector<2x16x16xf32>
    %588 = arith.addf %567, %587 : vector<2x16x16xf32>
    %c61 = arith.constant 61 : index
    %589 = memref.load %arg4[%c61] : memref<98xf32, #tpu.memory_space<smem>>
    %590 = vector.extract_strided_slice %583 {offsets = [0, 1, 0], sizes = [2, 16, 16], strides = [1, 1, 1]} : vector<2x22x16xf32> to vector<2x16x16xf32>
    %591 = vector.broadcast %589 : f32 to vector<2x16x16xf32>
    %592 = arith.mulf %591, %590 : vector<2x16x16xf32>
    %593 = arith.addf %572, %592 : vector<2x16x16xf32>
    %c68 = arith.constant 68 : index
    %594 = memref.load %arg4[%c68] : memref<98xf32, #tpu.memory_space<smem>>
    %595 = vector.extract_strided_slice %583 {offsets = [0, 2, 0], sizes = [2, 16, 16], strides = [1, 1, 1]} : vector<2x22x16xf32> to vector<2x16x16xf32>
    %596 = vector.broadcast %594 : f32 to vector<2x16x16xf32>
    %597 = arith.mulf %596, %595 : vector<2x16x16xf32>
    %598 = arith.addf %577, %597 : vector<2x16x16xf32>
    %c75 = arith.constant 75 : index
    %599 = memref.load %arg4[%c75] : memref<98xf32, #tpu.memory_space<smem>>
    %600 = vector.extract_strided_slice %583 {offsets = [0, 3, 0], sizes = [2, 16, 16], strides = [1, 1, 1]} : vector<2x22x16xf32> to vector<2x16x16xf32>
    %601 = vector.broadcast %599 : f32 to vector<2x16x16xf32>
    %602 = arith.mulf %601, %600 : vector<2x16x16xf32>
    %603 = arith.addf %582, %602 : vector<2x16x16xf32>
    %c82 = arith.constant 82 : index
    %604 = memref.load %arg4[%c82] : memref<98xf32, #tpu.memory_space<smem>>
    %605 = vector.extract_strided_slice %583 {offsets = [0, 4, 0], sizes = [2, 16, 16], strides = [1, 1, 1]} : vector<2x22x16xf32> to vector<2x16x16xf32>
    %606 = vector.broadcast %604 : f32 to vector<2x16x16xf32>
    %607 = arith.mulf %606, %605 : vector<2x16x16xf32>
    %608 = arith.addf %588, %607 : vector<2x16x16xf32>
    %c89 = arith.constant 89 : index
    %609 = memref.load %arg4[%c89] : memref<98xf32, #tpu.memory_space<smem>>
    %610 = vector.extract_strided_slice %583 {offsets = [0, 5, 0], sizes = [2, 16, 16], strides = [1, 1, 1]} : vector<2x22x16xf32> to vector<2x16x16xf32>
    %611 = vector.broadcast %609 : f32 to vector<2x16x16xf32>
    %612 = arith.mulf %611, %610 : vector<2x16x16xf32>
    %613 = arith.addf %593, %612 : vector<2x16x16xf32>
    %c96 = arith.constant 96 : index
    %614 = memref.load %arg4[%c96] : memref<98xf32, #tpu.memory_space<smem>>
    %615 = vector.extract_strided_slice %583 {offsets = [0, 6, 0], sizes = [2, 16, 16], strides = [1, 1, 1]} : vector<2x22x16xf32> to vector<2x16x16xf32>
    %616 = vector.broadcast %614 : f32 to vector<2x16x16xf32>
    %617 = arith.mulf %616, %615 : vector<2x16x16xf32>
    %618 = arith.addf %598, %617 : vector<2x16x16xf32>
    %c0_163 = arith.constant 0 : index
    %c0_164 = arith.constant 0 : index
    %c6_165 = arith.constant 6 : index
    %619 = vector.load %arg6[%c0_163, %c0_164, %c6_165] : memref<2x22x22xf32, #tpu.memory_space<vmem>>, vector<2x22x16xf32>
    %c6_166 = arith.constant 6 : index
    %620 = memref.load %arg4[%c6_166] : memref<98xf32, #tpu.memory_space<smem>>
    %621 = vector.extract_strided_slice %619 {offsets = [0, 0, 0], sizes = [2, 16, 16], strides = [1, 1, 1]} : vector<2x22x16xf32> to vector<2x16x16xf32>
    %622 = vector.broadcast %620 : f32 to vector<2x16x16xf32>
    %623 = arith.mulf %622, %621 : vector<2x16x16xf32>
    %624 = arith.addf %613, %623 : vector<2x16x16xf32>
    %c13_167 = arith.constant 13 : index
    %625 = memref.load %arg4[%c13_167] : memref<98xf32, #tpu.memory_space<smem>>
    %626 = vector.extract_strided_slice %619 {offsets = [0, 1, 0], sizes = [2, 16, 16], strides = [1, 1, 1]} : vector<2x22x16xf32> to vector<2x16x16xf32>
    %627 = vector.broadcast %625 : f32 to vector<2x16x16xf32>
    %628 = arith.mulf %627, %626 : vector<2x16x16xf32>
    %629 = arith.addf %618, %628 : vector<2x16x16xf32>
    %c20 = arith.constant 20 : index
    %630 = memref.load %arg4[%c20] : memref<98xf32, #tpu.memory_space<smem>>
    %631 = vector.extract_strided_slice %619 {offsets = [0, 2, 0], sizes = [2, 16, 16], strides = [1, 1, 1]} : vector<2x22x16xf32> to vector<2x16x16xf32>
    %632 = vector.broadcast %630 : f32 to vector<2x16x16xf32>
    %633 = arith.mulf %632, %631 : vector<2x16x16xf32>
    %634 = arith.addf %603, %633 : vector<2x16x16xf32>
    %c27 = arith.constant 27 : index
    %635 = memref.load %arg4[%c27] : memref<98xf32, #tpu.memory_space<smem>>
    %636 = vector.extract_strided_slice %619 {offsets = [0, 3, 0], sizes = [2, 16, 16], strides = [1, 1, 1]} : vector<2x22x16xf32> to vector<2x16x16xf32>
    %637 = vector.broadcast %635 : f32 to vector<2x16x16xf32>
    %638 = arith.mulf %637, %636 : vector<2x16x16xf32>
    %639 = arith.addf %608, %638 : vector<2x16x16xf32>
    %c34 = arith.constant 34 : index
    %640 = memref.load %arg4[%c34] : memref<98xf32, #tpu.memory_space<smem>>
    %641 = vector.extract_strided_slice %619 {offsets = [0, 4, 0], sizes = [2, 16, 16], strides = [1, 1, 1]} : vector<2x22x16xf32> to vector<2x16x16xf32>
    %642 = vector.broadcast %640 : f32 to vector<2x16x16xf32>
    %643 = arith.mulf %642, %641 : vector<2x16x16xf32>
    %644 = arith.addf %624, %643 : vector<2x16x16xf32>
    %c41 = arith.constant 41 : index
    %645 = memref.load %arg4[%c41] : memref<98xf32, #tpu.memory_space<smem>>
    %646 = vector.extract_strided_slice %619 {offsets = [0, 5, 0], sizes = [2, 16, 16], strides = [1, 1, 1]} : vector<2x22x16xf32> to vector<2x16x16xf32>
    %647 = vector.broadcast %645 : f32 to vector<2x16x16xf32>
    %648 = arith.mulf %647, %646 : vector<2x16x16xf32>
    %649 = arith.addf %629, %648 : vector<2x16x16xf32>
    %c48 = arith.constant 48 : index
    %650 = memref.load %arg4[%c48] : memref<98xf32, #tpu.memory_space<smem>>
    %651 = vector.extract_strided_slice %619 {offsets = [0, 6, 0], sizes = [2, 16, 16], strides = [1, 1, 1]} : vector<2x22x16xf32> to vector<2x16x16xf32>
    %652 = vector.broadcast %650 : f32 to vector<2x16x16xf32>
    %653 = arith.mulf %652, %651 : vector<2x16x16xf32>
    %654 = arith.addf %634, %653 : vector<2x16x16xf32>
    %c0_168 = arith.constant 0 : index
    %c0_169 = arith.constant 0 : index
    %c6_170 = arith.constant 6 : index
    %655 = vector.load %arg7[%c0_168, %c0_169, %c6_170] : memref<2x22x22xf32, #tpu.memory_space<vmem>>, vector<2x22x16xf32>
    %c55 = arith.constant 55 : index
    %656 = memref.load %arg4[%c55] : memref<98xf32, #tpu.memory_space<smem>>
    %657 = vector.extract_strided_slice %655 {offsets = [0, 0, 0], sizes = [2, 16, 16], strides = [1, 1, 1]} : vector<2x22x16xf32> to vector<2x16x16xf32>
    %658 = vector.broadcast %656 : f32 to vector<2x16x16xf32>
    %659 = arith.mulf %658, %657 : vector<2x16x16xf32>
    %660 = arith.addf %639, %659 : vector<2x16x16xf32>
    %c62 = arith.constant 62 : index
    %661 = memref.load %arg4[%c62] : memref<98xf32, #tpu.memory_space<smem>>
    %662 = vector.extract_strided_slice %655 {offsets = [0, 1, 0], sizes = [2, 16, 16], strides = [1, 1, 1]} : vector<2x22x16xf32> to vector<2x16x16xf32>
    %663 = vector.broadcast %661 : f32 to vector<2x16x16xf32>
    %664 = arith.mulf %663, %662 : vector<2x16x16xf32>
    %665 = arith.addf %644, %664 : vector<2x16x16xf32>
    %c69 = arith.constant 69 : index
    %666 = memref.load %arg4[%c69] : memref<98xf32, #tpu.memory_space<smem>>
    %667 = vector.extract_strided_slice %655 {offsets = [0, 2, 0], sizes = [2, 16, 16], strides = [1, 1, 1]} : vector<2x22x16xf32> to vector<2x16x16xf32>
    %668 = vector.broadcast %666 : f32 to vector<2x16x16xf32>
    %669 = arith.mulf %668, %667 : vector<2x16x16xf32>
    %670 = arith.addf %649, %669 : vector<2x16x16xf32>
    %c76 = arith.constant 76 : index
    %671 = memref.load %arg4[%c76] : memref<98xf32, #tpu.memory_space<smem>>
    %672 = vector.extract_strided_slice %655 {offsets = [0, 3, 0], sizes = [2, 16, 16], strides = [1, 1, 1]} : vector<2x22x16xf32> to vector<2x16x16xf32>
    %673 = vector.broadcast %671 : f32 to vector<2x16x16xf32>
    %674 = arith.mulf %673, %672 : vector<2x16x16xf32>
    %675 = arith.addf %654, %674 : vector<2x16x16xf32>
    %c83 = arith.constant 83 : index
    %676 = memref.load %arg4[%c83] : memref<98xf32, #tpu.memory_space<smem>>
    %677 = vector.extract_strided_slice %655 {offsets = [0, 4, 0], sizes = [2, 16, 16], strides = [1, 1, 1]} : vector<2x22x16xf32> to vector<2x16x16xf32>
    %678 = vector.broadcast %676 : f32 to vector<2x16x16xf32>
    %679 = arith.mulf %678, %677 : vector<2x16x16xf32>
    %680 = arith.addf %660, %679 : vector<2x16x16xf32>
    %c90 = arith.constant 90 : index
    %681 = memref.load %arg4[%c90] : memref<98xf32, #tpu.memory_space<smem>>
    %682 = vector.extract_strided_slice %655 {offsets = [0, 5, 0], sizes = [2, 16, 16], strides = [1, 1, 1]} : vector<2x22x16xf32> to vector<2x16x16xf32>
    %683 = vector.broadcast %681 : f32 to vector<2x16x16xf32>
    %684 = arith.mulf %683, %682 : vector<2x16x16xf32>
    %685 = arith.addf %665, %684 : vector<2x16x16xf32>
    %c97 = arith.constant 97 : index
    %686 = memref.load %arg4[%c97] : memref<98xf32, #tpu.memory_space<smem>>
    %687 = vector.extract_strided_slice %655 {offsets = [0, 6, 0], sizes = [2, 16, 16], strides = [1, 1, 1]} : vector<2x22x16xf32> to vector<2x16x16xf32>
    %688 = vector.broadcast %686 : f32 to vector<2x16x16xf32>
    %689 = arith.mulf %688, %687 : vector<2x16x16xf32>
    %690 = arith.addf %670, %689 : vector<2x16x16xf32>
    %691 = arith.addf %685, %690 : vector<2x16x16xf32>
    %692 = arith.addf %675, %680 : vector<2x16x16xf32>
    %693 = arith.addf %691, %692 : vector<2x16x16xf32>
    %694 = vector.extract_strided_slice %693 {offsets = [0, 0, 0], sizes = [2, 1, 16], strides = [1, 1, 1]} : vector<2x16x16xf32> to vector<2x1x16xf32>
    %695 = vector.shape_cast %694 : vector<2x1x16xf32> to vector<2x16xf32>
    %c0_171 = arith.constant 0 : index
    %c0_172 = arith.constant 0 : index
    %696 = vector.load %arg8[%c0_171, %c0_172] : memref<2x256xf32, #tpu.memory_space<vmem>>, vector<2x16xf32>
    tpu.vector_store %arg8[%c0_171, %c0_172], %695 {strides = array<i32>} : memref<2x256xf32, #tpu.memory_space<vmem>>, vector<2x16xf32>,
    %697 = vector.extract_strided_slice %693 {offsets = [0, 1, 0], sizes = [2, 1, 16], strides = [1, 1, 1]} : vector<2x16x16xf32> to vector<2x1x16xf32>
    %698 = vector.shape_cast %697 : vector<2x1x16xf32> to vector<2x16xf32>
    %c0_173 = arith.constant 0 : index
    %c16_174 = arith.constant 16 : index
    %699 = vector.load %arg8[%c0_173, %c16_174] : memref<2x256xf32, #tpu.memory_space<vmem>>, vector<2x16xf32>
    tpu.vector_store %arg8[%c0_173, %c16_174], %698 {strides = array<i32>} : memref<2x256xf32, #tpu.memory_space<vmem>>, vector<2x16xf32>,
    %700 = vector.extract_strided_slice %693 {offsets = [0, 2, 0], sizes = [2, 1, 16], strides = [1, 1, 1]} : vector<2x16x16xf32> to vector<2x1x16xf32>
    %701 = vector.shape_cast %700 : vector<2x1x16xf32> to vector<2x16xf32>
    %c0_175 = arith.constant 0 : index
    %c32_176 = arith.constant 32 : index
    %702 = vector.load %arg8[%c0_175, %c32_176] : memref<2x256xf32, #tpu.memory_space<vmem>>, vector<2x16xf32>
    tpu.vector_store %arg8[%c0_175, %c32_176], %701 {strides = array<i32>} : memref<2x256xf32, #tpu.memory_space<vmem>>, vector<2x16xf32>,
    %703 = vector.extract_strided_slice %693 {offsets = [0, 3, 0], sizes = [2, 1, 16], strides = [1, 1, 1]} : vector<2x16x16xf32> to vector<2x1x16xf32>
    %704 = vector.shape_cast %703 : vector<2x1x16xf32> to vector<2x16xf32>
    %c0_177 = arith.constant 0 : index
    %c48_178 = arith.constant 48 : index
    %705 = vector.load %arg8[%c0_177, %c48_178] : memref<2x256xf32, #tpu.memory_space<vmem>>, vector<2x16xf32>
    tpu.vector_store %arg8[%c0_177, %c48_178], %704 {strides = array<i32>} : memref<2x256xf32, #tpu.memory_space<vmem>>, vector<2x16xf32>,
    %706 = vector.extract_strided_slice %693 {offsets = [0, 4, 0], sizes = [2, 1, 16], strides = [1, 1, 1]} : vector<2x16x16xf32> to vector<2x1x16xf32>
    %707 = vector.shape_cast %706 : vector<2x1x16xf32> to vector<2x16xf32>
    %c0_179 = arith.constant 0 : index
    %c64_180 = arith.constant 64 : index
    %708 = vector.load %arg8[%c0_179, %c64_180] : memref<2x256xf32, #tpu.memory_space<vmem>>, vector<2x16xf32>
    tpu.vector_store %arg8[%c0_179, %c64_180], %707 {strides = array<i32>} : memref<2x256xf32, #tpu.memory_space<vmem>>, vector<2x16xf32>,
    %709 = vector.extract_strided_slice %693 {offsets = [0, 5, 0], sizes = [2, 1, 16], strides = [1, 1, 1]} : vector<2x16x16xf32> to vector<2x1x16xf32>
    %710 = vector.shape_cast %709 : vector<2x1x16xf32> to vector<2x16xf32>
    %c0_181 = arith.constant 0 : index
    %c80_182 = arith.constant 80 : index
    %711 = vector.load %arg8[%c0_181, %c80_182] : memref<2x256xf32, #tpu.memory_space<vmem>>, vector<2x16xf32>
    tpu.vector_store %arg8[%c0_181, %c80_182], %710 {strides = array<i32>} : memref<2x256xf32, #tpu.memory_space<vmem>>, vector<2x16xf32>,
    %712 = vector.extract_strided_slice %693 {offsets = [0, 6, 0], sizes = [2, 1, 16], strides = [1, 1, 1]} : vector<2x16x16xf32> to vector<2x1x16xf32>
    %713 = vector.shape_cast %712 : vector<2x1x16xf32> to vector<2x16xf32>
    %c0_183 = arith.constant 0 : index
    %c96_184 = arith.constant 96 : index
    %714 = vector.load %arg8[%c0_183, %c96_184] : memref<2x256xf32, #tpu.memory_space<vmem>>, vector<2x16xf32>
    tpu.vector_store %arg8[%c0_183, %c96_184], %713 {strides = array<i32>} : memref<2x256xf32, #tpu.memory_space<vmem>>, vector<2x16xf32>,
    %715 = vector.extract_strided_slice %693 {offsets = [0, 7, 0], sizes = [2, 1, 16], strides = [1, 1, 1]} : vector<2x16x16xf32> to vector<2x1x16xf32>
    %716 = vector.shape_cast %715 : vector<2x1x16xf32> to vector<2x16xf32>
    %c0_185 = arith.constant 0 : index
    %c112 = arith.constant 112 : index
    %717 = vector.load %arg8[%c0_185, %c112] : memref<2x256xf32, #tpu.memory_space<vmem>>, vector<2x16xf32>
    tpu.vector_store %arg8[%c0_185, %c112], %716 {strides = array<i32>} : memref<2x256xf32, #tpu.memory_space<vmem>>, vector<2x16xf32>,
    %718 = vector.extract_strided_slice %693 {offsets = [0, 8, 0], sizes = [2, 1, 16], strides = [1, 1, 1]} : vector<2x16x16xf32> to vector<2x1x16xf32>
    %719 = vector.shape_cast %718 : vector<2x1x16xf32> to vector<2x16xf32>
    %c0_186 = arith.constant 0 : index
    %c128 = arith.constant 128 : index
    %720 = vector.load %arg8[%c0_186, %c128] : memref<2x256xf32, #tpu.memory_space<vmem>>, vector<2x16xf32>
    tpu.vector_store %arg8[%c0_186, %c128], %719 {strides = array<i32>} : memref<2x256xf32, #tpu.memory_space<vmem>>, vector<2x16xf32>,
    %721 = vector.extract_strided_slice %693 {offsets = [0, 9, 0], sizes = [2, 1, 16], strides = [1, 1, 1]} : vector<2x16x16xf32> to vector<2x1x16xf32>
    %722 = vector.shape_cast %721 : vector<2x1x16xf32> to vector<2x16xf32>
    %c0_187 = arith.constant 0 : index
    %c144 = arith.constant 144 : index
    %723 = vector.load %arg8[%c0_187, %c144] : memref<2x256xf32, #tpu.memory_space<vmem>>, vector<2x16xf32>
    tpu.vector_store %arg8[%c0_187, %c144], %722 {strides = array<i32>} : memref<2x256xf32, #tpu.memory_space<vmem>>, vector<2x16xf32>,
    %724 = vector.extract_strided_slice %693 {offsets = [0, 10, 0], sizes = [2, 1, 16], strides = [1, 1, 1]} : vector<2x16x16xf32> to vector<2x1x16xf32>
    %725 = vector.shape_cast %724 : vector<2x1x16xf32> to vector<2x16xf32>
    %c0_188 = arith.constant 0 : index
    %c160 = arith.constant 160 : index
    %726 = vector.load %arg8[%c0_188, %c160] : memref<2x256xf32, #tpu.memory_space<vmem>>, vector<2x16xf32>
    tpu.vector_store %arg8[%c0_188, %c160], %725 {strides = array<i32>} : memref<2x256xf32, #tpu.memory_space<vmem>>, vector<2x16xf32>,
    %727 = vector.extract_strided_slice %693 {offsets = [0, 11, 0], sizes = [2, 1, 16], strides = [1, 1, 1]} : vector<2x16x16xf32> to vector<2x1x16xf32>
    %728 = vector.shape_cast %727 : vector<2x1x16xf32> to vector<2x16xf32>
    %c0_189 = arith.constant 0 : index
    %c176 = arith.constant 176 : index
    %729 = vector.load %arg8[%c0_189, %c176] : memref<2x256xf32, #tpu.memory_space<vmem>>, vector<2x16xf32>
    tpu.vector_store %arg8[%c0_189, %c176], %728 {strides = array<i32>} : memref<2x256xf32, #tpu.memory_space<vmem>>, vector<2x16xf32>,
    %730 = vector.extract_strided_slice %693 {offsets = [0, 12, 0], sizes = [2, 1, 16], strides = [1, 1, 1]} : vector<2x16x16xf32> to vector<2x1x16xf32>
    %731 = vector.shape_cast %730 : vector<2x1x16xf32> to vector<2x16xf32>
    %c0_190 = arith.constant 0 : index
    %c192 = arith.constant 192 : index
    %732 = vector.load %arg8[%c0_190, %c192] : memref<2x256xf32, #tpu.memory_space<vmem>>, vector<2x16xf32>
    tpu.vector_store %arg8[%c0_190, %c192], %731 {strides = array<i32>} : memref<2x256xf32, #tpu.memory_space<vmem>>, vector<2x16xf32>,
    %733 = vector.extract_strided_slice %693 {offsets = [0, 13, 0], sizes = [2, 1, 16], strides = [1, 1, 1]} : vector<2x16x16xf32> to vector<2x1x16xf32>
    %734 = vector.shape_cast %733 : vector<2x1x16xf32> to vector<2x16xf32>
    %c0_191 = arith.constant 0 : index
    %c208 = arith.constant 208 : index
    %735 = vector.load %arg8[%c0_191, %c208] : memref<2x256xf32, #tpu.memory_space<vmem>>, vector<2x16xf32>
    tpu.vector_store %arg8[%c0_191, %c208], %734 {strides = array<i32>} : memref<2x256xf32, #tpu.memory_space<vmem>>, vector<2x16xf32>,
    %736 = vector.extract_strided_slice %693 {offsets = [0, 14, 0], sizes = [2, 1, 16], strides = [1, 1, 1]} : vector<2x16x16xf32> to vector<2x1x16xf32>
    %737 = vector.shape_cast %736 : vector<2x1x16xf32> to vector<2x16xf32>
    %c0_192 = arith.constant 0 : index
    %c224 = arith.constant 224 : index
    %738 = vector.load %arg8[%c0_192, %c224] : memref<2x256xf32, #tpu.memory_space<vmem>>, vector<2x16xf32>
    tpu.vector_store %arg8[%c0_192, %c224], %737 {strides = array<i32>} : memref<2x256xf32, #tpu.memory_space<vmem>>, vector<2x16xf32>,
    %739 = vector.extract_strided_slice %693 {offsets = [0, 15, 0], sizes = [2, 1, 16], strides = [1, 1, 1]} : vector<2x16x16xf32> to vector<2x1x16xf32>
    %740 = vector.shape_cast %739 : vector<2x1x16xf32> to vector<2x16xf32>
    %c0_193 = arith.constant 0 : index
    %c240 = arith.constant 240 : index
    %741 = vector.load %arg8[%c0_193, %c240] : memref<2x256xf32, #tpu.memory_space<vmem>>, vector<2x16xf32>
    tpu.vector_store %arg8[%c0_193, %c240], %740 {strides = array<i32>} : memref<2x256xf32, #tpu.memory_space<vmem>>, vector<2x16xf32>,
    %c0_194 = arith.constant 0 : index
    %c0_195 = arith.constant 0 : index
    %742 = vector.load %arg8[%c0_194, %c0_195] : memref<2x256xf32, #tpu.memory_space<vmem>>, vector<2x256xf32>
    %cst_196 = arith.constant 0.000000e+00 : f32
    %743 = vector.broadcast %cst_196 : f32 to vector<2x256xf32>
    %744 = arith.subf %743, %742 : vector<2x256xf32>
    %745 = math.exp %744 : vector<2x256xf32>
    %cst_197 = arith.constant 1.000000e+00 : f32
    %746 = vector.broadcast %cst_197 : f32 to vector<2x256xf32>
    %747 = arith.addf %746, %745 : vector<2x256xf32>
    %cst_198 = arith.constant 1.000000e+00 : f32
    %748 = vector.broadcast %cst_198 : f32 to vector<2x256xf32>
    %749 = arith.divf %748, %747 : vector<2x256xf32>
    %750 = vector.shape_cast %749 : vector<2x256xf32> to vector<2x1x256xf32>
    %751 = vector.broadcast %750 : vector<2x1x256xf32> to vector<2x32x256xf32>
    %752 = arith.mulf %46, %751 : vector<2x32x256xf32>
    %c0_199 = arith.constant 0 : index
    %c0_200 = arith.constant 0 : index
    %c0_201 = arith.constant 0 : index
    %753 = vector.load %arg5[%c0_199, %c0_200, %c0_201] : memref<2x32x256xf32, #tpu.memory_space<vmem>>, vector<2x32x256xf32>
    tpu.vector_store %arg5[%c0_199, %c0_200, %c0_201], %752 {strides = array<i32>} : memref<2x32x256xf32, #tpu.memory_space<vmem>>, vector<2x32x256xf32>,
    return
  }
  func.func @transform_0(%arg0: i32) -> (i32, i32, i32) {
    %c0_i32 = arith.constant 0 : i32
    %c0_i32_0 = arith.constant 0 : i32
    %c0_i32_1 = arith.constant 0 : i32
    return %arg0, %c0_i32, %c0_i32_0 : i32, i32, i32
  }
  func.func @transform_1(%arg0: i32) -> (i32, i32) {
    %c0_i32 = arith.constant 0 : i32
    %c0_i32_0 = arith.constant 0 : i32
    %c0_i32_1 = arith.constant 0 : i32
    return %c0_i32, %c0_i32_0 : i32, i32
  }
  func.func @transform_2(%arg0: i32) -> (i32, i32) {
    %c0_i32 = arith.constant 0 : i32
    %c0_i32_0 = arith.constant 0 : i32
    %c0_i32_1 = arith.constant 0 : i32
    return %c0_i32, %c0_i32_0 : i32, i32
  }
  func.func @transform_3(%arg0: i32) -> i32 {
    %c0_i32 = arith.constant 0 : i32
    %c0_i32_0 = arith.constant 0 : i32
    return %c0_i32 : i32
  }
  func.func @transform_4(%arg0: i32) -> (i32, i32, i32) {
    %c0_i32 = arith.constant 0 : i32
    %c0_i32_0 = arith.constant 0 : i32
    %c0_i32_1 = arith.constant 0 : i32
    return %arg0, %c0_i32, %c0_i32_0 : i32, i32, i32
  }
}

</mosaic_0001>

<bundles_post_ra>
// kernel: tpu_custom_call.1
= control target key start
LH: loop header
LB: loop body
LE: loop exit
PB: predicated region body
PF: predicated region fallthrough
CT: control target
= control target key end

     0   :  { %9 = vsyncpa [#allocation6], 0  ;;  %s9951_s0 = inlined_call_operand.hbm [shape: f32[2,32,256], index: 0, kind: input, shape index: {}]   ;;  %s9952_s1 = inlined_call_operand.vmem [shape: f32[32,2], index: 1, kind: input, shape index: {}]   ;;  %s9953_s2 = inlined_call_operand.vmem [shape: f32[32,2], index: 2, kind: input, shape index: {}]   ;;  %s9954_s3 = inlined_call_operand.vmem [shape: f32[98], index: 3, kind: input, shape index: {}]   ;;  %s9955_s4 = inlined_call_operand.hbm [shape: f32[2,32,256], index: 4, kind: output, shape index: {}]  }
   0x1   :  { %10 = vsyncpa [#allocation8], 0 }
   0x2   :  { %11 = vsyncpa [#allocation7], 0  ;;  %s16_s17 = sshll.u32 %s9951_s0, 4  ;;  %s5436_s18 = smov [#allocation5]   ;;  %s17_s17 = int_to_ptr.hbm [resolvable:$true] %s16_s17 }
   0x3   :  { %s18_s19 = sshll.u32 %s5436_s18, 4  ;;  %s34_s22 = sshll.u32 %s9954_s3, 4  ;;  %s19_s19 = int_to_ptr.vmem [resolvable:$true] %s18_s19  ;;  %s35_s22 = int_to_ptr.vmem [resolvable:$true] %s34_s22 }
   0x4   :  { %s5437_s23 = smov 256   ;;  %s5438_s24 = smov 16  }
   0x5   :  { %24 = dma.hbm_to_vmem [thread:$0]  %s17_s17, 2048, %s19_s19, [#allocation6], %s5437_s23, %s5437_s23, %s5438_s24  }
   0x6   :  { %s5439_s25 = smov [#allocation9]  }
   0x7   :  { %37 = dma.vmem_to_smem %s35_s22, 16, %s5439_s25, [#allocation8]  }
   0x8   :  { %5430 = dma.done.wait [#allocation6], 2048  }
   0x9   :  { %5431 = vsyncadd [#allocation6], 4294965248 }
   0xa   :  { %5432 = dma.done.wait [#allocation8], 16  }
   0xb   :  { %5433 = vsyncadd [#allocation8], 4294967280 }
   0xc   :  { %46 = sfence }
   0xd   :  { %v5496_v0 = vld [vmem:[#allocation5 + $0x40] sm:$0xff]  ;;  %v5498_v1 = vld [vmem:[#allocation5 + $0x48] sm:$0xff]  ;;  %v5514_v9 = vld [vmem:[#allocation5 + $0x50] sm:$0xff]  ;;  %vm135_vm0 = vcmask 15360   ;;  %s5441_s13 = smov 115   ;;  %s5442_s14 = smov 83  }
   0xe   :  { %v5500_v2 = vld [vmem:[#allocation5 + $0x20] sm:$0xff]  ;;  %v75_v3 = vadd.f32 %v5498_v1, %v5496_v0  ;;  %v5504_v4 = vld [vmem:[#allocation5 + $0x28] sm:$0xff]  ;;  %v5516_v10 = vld [vmem:[#allocation5 + $0x58] sm:$0xff]  ;;  %v107_v30 = vmax.f32 %v5496_v0, %v5498_v1  ;;  %s5443_s15 = smov 99   ;;  %s5444_s16 = smov 67  }
   0xf   :  { %v5506_v5 = vld [vmem:[#allocation5] sm:$0xff]  ;;  %v5508_v6 = vld [vmem:[#allocation5 + $0x8] sm:$0xff]  ;;  %v69_v7 = vadd.f32 %v5504_v4, %v5500_v2  ;;  %v5518_v11 = vld [vmem:[#allocation5 + $0x30] sm:$0xff]  ;;  %v78_v15 = vadd.f32 %v5516_v10, %v5514_v9  ;;  %v101_v26 = vmax.f32 %v5500_v2, %v5504_v4  ;;  %v110_v29 = vmax.f32 %v5514_v9, %v5516_v10  ;;  %s5445_s17 = smov 35   ;;  %s5446_s18 = smov 51  }
  0x10   :  { %v63_v8 = vadd.f32 %v5508_v6, %v5506_v5  ;;  %76 = vadd.xlane.f32.xlu2 %v75_v3  ;;  %v5520_v12 = vld [vmem:[#allocation5 + $0x38] sm:$0xff]  ;;  %v5522_v13 = vld [vmem:[#allocation5 + $0x10] sm:$0xff]  ;;  %v5536_v20 = vld [vmem:[#allocation5 + $0x60] sm:$0xff]  ;;  %v95_v22 = vmax.f32 %v5506_v5, %v5508_v6  ;;  %s5447_s19 = smov 19   ;;  %s5177_s20 = sld [smem:[#allocation9 + $0x1]] }
  0x11   :  { %70 = vadd.xlane.f32.xlu1 %v69_v7  ;;  %v5524_v14 = vld [vmem:[#allocation5 + $0x18] sm:$0xff]  ;;  %v72_v16 = vadd.f32 %v5520_v12, %v5518_v11  ;;  %v5532_v18 = vld [vmem:[#allocation5 + $0x70] sm:$0xff]  ;;  %v5538_v21 = vld [vmem:[#allocation5 + $0x68] sm:$0xff]  ;;  %v104_v25 = vmax.f32 %v5518_v11, %v5520_v12  ;;  %s5449_s21 = smov 127   ;;  %s5178_s22 = sld [smem:[#allocation9 + $0x8]] }
  0x12   :  { %64 = vadd.xlane.f32.xlu0 %v63_v8  ;;  %v66_v17 = vadd.f32 %v5524_v14, %v5522_v13  ;;  %v5534_v19 = vld [vmem:[#allocation5 + $0x78] sm:$0xff]  ;;  %v81_v24 = vadd.f32 %v5538_v21, %v5536_v20  ;;  %v98_v27 = vmax.f32 %v5522_v13, %v5524_v14  ;;  %v113_v28 = vmax.f32 %v5536_v20, %v5538_v21  ;;  %v121_v48 = vld [vmem:[%s9952_s1 + $0x10] sm:$0xff]  ;;  %v122_v51 = vld [vmem:[%s9952_s1 + $0x18] sm:$0xff]  ;;  %s6035_s25 = sld [smem:[#allocation9 + $0x38]] }
  0x13   :  { %v84_v23 = vadd.f32 %v5534_v19, %v5532_v18  ;;  %v116_v31 = vmax.f32 %v5532_v18, %v5534_v19  ;;  %v120_v39 = vld [vmem:[%s9952_s1 + $0x8] sm:$0xff]  ;;  %v119_v44 = vld [vmem:[%s9952_s1] sm:$0xff]  ;;  %s5179_s0 = sld [smem:[#allocation9 + $0xf]] }
  0x14   :  { %s5175_s3 = sld [smem:[#allocation9 + $0x54]] }
  0x15   :  { %s5172_s26 = sld [smem:[#allocation9 + $0x3f]] }
  0x16   :  { %s5176_s27 = sld [smem:[#allocation9 + $0x5b]] }
  0x17   :  { %s5173_s28 = sld [smem:[#allocation9 + $0x46]] }
  0x18   :  { %79 = vadd.xlane.f32.xlu2 %v78_v15  ;;  %s5167_s29 = sld [smem:[#allocation9 + $0x1c]] }
  0x19   :  { %73 = vadd.xlane.f32.xlu1 %v72_v16  ;;  %s801_s30 = sld [smem:[#allocation9]] }
  0x1a   :  { %67 = vadd.xlane.f32.xlu0 %v66_v17  ;;  %s5164_s5 = sld [smem:[#allocation9 + $0x7]] }
  0x1b   :  { %s5168_s1 = sld [smem:[#allocation9 + $0x23]] }
  0x1c   :  { %s5169_s6 = sld [smem:[#allocation9 + $0x2a]] }
  0x1d   :  { %s6083_s7 = sld [smem:[#allocation9 + $0x16]] }
  0x1e   :  { %s6100_s8 = sld [smem:[#allocation9 + $0xe]] }
  0x1f   :  { %s5184_s9 = sld [smem:[#allocation9 + $0x32]] }
  0x20   :  { %96 = vmax.xlane.f32.xlu2 %v95_v22  ;;  %s5186_s10 = sld [smem:[#allocation9 + $0x40]] }
  0x21   :  { %85 = vadd.xlane.f32.xlu1 %v84_v23  ;;  %s5185_s11 = sld [smem:[#allocation9 + $0x39]] }
  0x22   :  { %82 = vadd.xlane.f32.xlu0 %v81_v24  ;;  %s5187_s12 = sld [smem:[#allocation9 + $0x47]] }
  0x28   :  { %105 = vmax.xlane.f32.xlu2 %v104_v25 }
  0x29   :  { %102 = vmax.xlane.f32.xlu1 %v101_v26 }
  0x2a   :  { %99 = vmax.xlane.f32.xlu0 %v98_v27 }
  0x30   :  { %114 = vmax.xlane.f32.xlu2 %v113_v28 }
  0x31   :  { %111 = vmax.xlane.f32.xlu1 %v110_v29 }
  0x32   :  { %108 = vmax.xlane.f32.xlu0 %v107_v30 }
  0x3a   :  { %117 = vmax.xlane.f32.xlu0 %v116_v31 }
  0x83   :  { %v77_v32 = vpop.xlane.xlu2 %76 }
  0x84   :  { %v71_v33 = vpop.xlane.xlu1 %70  ;;  %v91_v54 = vmul.f32 0.00390625, %v77_v32 }
  0x85   :  { %v65_v34 = vpop.xlane.xlu0 %64  ;;  %v89_v46 = vmul.f32 0.00390625, %v71_v33 }
  0x86   :  { %v87_v41 = vmul.f32 0.00390625, %v65_v34  ;;  %v131_v24 = vmul.f32 %v119_v44, %v91_v54 }
  0x87   :  { %v129_v55 = vmul.f32 %v121_v48, %v89_v46 }
  0x88   :  { %v127_v47 = vmul.f32 %v119_v44, %v87_v41 }
  0x89   :  { %v139_v17 = vsel %vm135_vm0, %v129_v55, 0.0 }
  0x8a   :  { %v136_v56 = vsel %vm135_vm0, %v127_v47, 0.0 }
  0x8b   :  { %v80_v35 = vpop.xlane.xlu2 %79 }
  0x8c   :  { %v74_v36 = vpop.xlane.xlu1 %73  ;;  %v92_v57 = vmul.f32 0.00390625, %v80_v35 }
  0x8d   :  { %v68_v37 = vpop.xlane.xlu0 %67  ;;  %v90_v49 = vmul.f32 0.00390625, %v74_v36 }
  0x8e   :  { %v88_v38 = vmul.f32 0.00390625, %v68_v37  ;;  %v132_v22 = vmul.f32 %v120_v39, %v92_v57 }
  0x8f   :  { %v130_v3 = vmul.f32 %v122_v51, %v90_v49 }
  0x90   :  { %v128_v45 = vmul.f32 %v120_v39, %v88_v38  ;;  %v150_v32 = vsel %vm135_vm0, %v132_v22, 0.0  ;;  %v124_v22 = vld [vmem:[%s9953_s2 + $0x8] sm:$0xff] }
  0x91   :  { %v141_v27 = vsel %vm135_vm0, %v130_v3, 0.0 }
  0x92   :  { %v137_v50 = vsel %vm135_vm0, %v128_v45, 0.0 }
  0x93   :  { %v97_v40 = vpop.xlane.xlu2 %96  ;;  %v138_v60 = vadd.f32 %v137_v50, %v136_v56 }
  0x94   :  { %v86_v42 = vpop.xlane.xlu1 %85  ;;  %v196_v52 = vmul.f32 %v119_v44, %v97_v40  ;;  %v149_v40 = vsel %vm135_vm0, %v131_v24, 0.0 }
  0x95   :  { %v83_v43 = vpop.xlane.xlu0 %82  ;;  %v140_v25 = vadd.f32 %v139_v17, %v138_v60  ;;  %v94_v28 = vmul.f32 0.00390625, %v86_v42  ;;  %v151_v46 = vadd.f32 %v150_v32, %v149_v40  ;;  %v5591_v17 = vld [vmem:[%s9953_s2 + $0x10] sm:$0xff] }
  0x96   :  { %v93_v7 = vmul.f32 0.00390625, %v83_v43  ;;  %v204_v8 = vsel %vm135_vm0, %v196_v52, 0.0 }
  0x97   :  { %v142_v36 = vadd.f32 %v141_v27, %v140_v25  ;;  %v134_v41 = vmul.f32 %v122_v51, %v94_v28 }
  0x98   :  { %v133_v29 = vmul.f32 %v121_v48, %v93_v7 }
  0x99   :  { %v143_v52 = vrot.slane %v142_v36, 4  ;;  %v154_v54 = vsel %vm135_vm0, %v134_v41, 0.0 }
  0x9a   :  { %v152_v43 = vsel %vm135_vm0, %v133_v29, 0.0 }
  0x9b   :  { %v106_v53 = vpop.xlane.xlu2 %105 }
  0x9c   :  { %v103_v58 = vpop.xlane.xlu1 %102  ;;  %v199_v63 = vmul.f32 %v122_v51, %v106_v53  ;;  %v153_v53 = vadd.f32 %v152_v43, %v151_v46 }
  0x9d   :  { %v100_v59 = vpop.xlane.xlu0 %99  ;;  %v198_v61 = vmul.f32 %v121_v48, %v103_v58  ;;  %v144_v58 = vadd.f32 %v143_v52, %v142_v36  ;;  %v126_v36 = vld [vmem:[%s9953_s2 + $0x18] sm:$0xff] }
  0x9e   :  { %v197_v62 = vmul.f32 %v120_v39, %v100_v59  ;;  %v209_v26 = vsel %vm135_vm0, %v199_v63, 0.0  ;;  %v155_v59 = vadd.f32 %v154_v54, %v153_v53 }
  0x9f   :  { %v207_v15 = vsel %vm135_vm0, %v198_v61, 0.0  ;;  %v145_v7 = vrot.slane %v144_v58, 2 }
  0xa0   :  { %v205_v16 = vsel %vm135_vm0, %v197_v62, 0.0 }
  0xa1   :  { %v206_v23 = vadd.f32 %v205_v16, %v204_v8  ;;  %v156_v8 = vrot.slane %v155_v59, 4  ;;  %v146_v28 = vadd.f32 %v145_v7, %v144_v58 }
  0xa3   :  { %v208_v30 = vadd.f32 %v207_v15, %v206_v23  ;;  %v115_v31 = vpop.xlane.xlu2 %114  ;;  %v157_v27 = vadd.f32 %v156_v8, %v155_v59 }
  0xa4   :  { %v112_v34 = vpop.xlane.xlu1 %111  ;;  %v202_v49 = vmul.f32 %v121_v48, %v115_v31 }
  0xa5   :  { %v210_v33 = vadd.f32 %v209_v26, %v208_v30  ;;  %v109_v35 = vpop.xlane.xlu0 %108  ;;  %v201_v37 = vmul.f32 %v120_v39, %v112_v34  ;;  %v158_v34 = vrot.slane %v157_v27, 2 }
  0xa6   :  { %v200_v38 = vmul.f32 %v119_v44, %v109_v35  ;;  %v220_v44 = vsel %vm135_vm0, %v202_v49, 0.0 }
  0xa7   :  { %v211_v45 = vrot.slane %v210_v33, 4  ;;  %v218_v42 = vsel %vm135_vm0, %v201_v37, 0.0  ;;  %v147_v37 = vrot.slane %v146_v28, 1  ;;  %v159_v41 = vadd.f32 %v158_v34, %v157_v27 }
  0xa8   :  { %v217_v47 = vsel %vm135_vm0, %v200_v38, 0.0 }
  0xa9   :  { %v212_v50 = vadd.f32 %v211_v45, %v210_v33  ;;  %v219_v39 = vadd.f32 %v218_v42, %v217_v47  ;;  %v148_v45 = vadd.f32 %v147_v37, %v146_v28  ;;  %v160_v53 = vrot.slane %v159_v41, 1 }
  0xab   :  { %v213_v55 = vrot.slane %v212_v50, 2  ;;  %v221_v62 = vadd.f32 %v220_v44, %v219_v39  ;;  %v162_v52 = vmax.f32 %v148_v45, 0.0  ;;  %v161_v44 = vadd.f32 %v160_v53, %v159_v41 }
  0xad   :  { %v214_v56 = vadd.f32 %v213_v55, %v212_v50  ;;  %v118_v57 = vpop.xlane.xlu0 %117  ;;  %v165_v55 = vmul.f32 %v162_v52, %v124_v22  ;;  %v163_v59 = vmax.f32 %v161_v44, 0.0 }
  0xae   :  { %v203_v60 = vmul.f32 %v122_v51, %v118_v57  ;;  %v123_v51 = vld [vmem:[%s9953_s2] sm:$0xff]  ;;  %s5440_s2 = smov 3  }
  0xaf   :  { %v215_v61 = vrot.slane %v214_v56, 1  ;;  %v175_v57 = vsel %vm135_vm0, %v165_v55, 0.0  ;;  %v169_v7 = vmul.f32 %v163_v59, %v124_v22  ;;  %v171_v8 = vmul.f32 %v163_v59, %v126_v36 }
  0xb0   :  { %v222_v63 = vsel %vm135_vm0, %v203_v60, 0.0  ;;  %v166_v60 = vmul.f32 %v162_v52, %v5591_v17 }
  0xb1   :  { %v216_v3 = vadd.f32 %v215_v61, %v214_v56  ;;  %v223_v48 = vadd.f32 %v222_v63, %v221_v62  ;;  %v168_v61 = vmul.f32 %v163_v59, %v123_v51  ;;  %v164_v62 = vmul.f32 %v162_v52, %v123_v51 }
  0xb2   :  { %v178_v63 = vsel %vm135_vm0, %v166_v60, 0.0 }
  0xb3   :  { %v224_v15 = vrot.slane %v223_v48, 4  ;;  %v230_v16 = vmax.f32 %v216_v3, 0.0  ;;  %v184_v3 = vsel %vm135_vm0, %v168_v61, 0.0 }
  0xb5   :  { %v225_v23 = vadd.f32 %v224_v15, %v223_v48  ;;  %v234_v24 = vmul.f32 %v230_v16, %v5591_v17  ;;  %v233_v25 = vmul.f32 %v230_v16, %v124_v22  ;;  %v232_v26 = vmul.f32 %v230_v16, %v123_v51 }
  0xb6   :  { %v235_v38 = vmul.f32 %v230_v16, %v126_v36  ;;  %v172_v48 = vsel %vm135_vm0, %v164_v62, 0.0  ;;  %v167_v15 = vmul.f32 %v162_v52, %v126_v36  ;;  %v187_v16 = vsel %vm135_vm0, %v169_v7, 0.0 }
  0xb7   :  { %v226_v29 = vrot.slane %v225_v23, 2  ;;  %v246_v30 = vsel %vm135_vm0, %v234_v24, 0.0  ;;  %v243_v31 = vsel %vm135_vm0, %v233_v25, 0.0  ;;  %v240_v32 = vsel %vm135_vm0, %v232_v26, 0.0 }
  0xb8   :  { %247 = vadd.xlane.f32.xlu2 %v246_v30  ;;  %244 = vadd.xlane.f32.xlu1 %v243_v31  ;;  %v249_v46 = vsel %vm135_vm0, %v235_v38, 0.0  ;;  %v181_v24 = vsel %vm135_vm0, %v167_v15, 0.0 }
  0xb9   :  { %v227_v33 = vadd.f32 %v226_v29, %v225_v23  ;;  %241 = vadd.xlane.f32.xlu0 %v240_v32  ;;  %v193_v23 = vsel %vm135_vm0, %v171_v8, 0.0 }
  0xbb   :  { %v228_v35 = vrot.slane %v227_v33, 1 }
  0xbd   :  { %v229_v40 = vadd.f32 %v228_v35, %v227_v33 }
  0xbf   :  { %v231_v43 = vmax.f32 %v229_v40, 0.0 }
  0xc1   :  { %250 = vadd.xlane.f32.xlu0 %v249_v46  ;;  %v237_v42 = vmul.f32 %v231_v43, %v124_v22  ;;  %v236_v47 = vmul.f32 %v231_v43, %v123_v51  ;;  %v238_v54 = vmul.f32 %v231_v43, %v5591_v17  ;;  %v239_v39 = vmul.f32 %v231_v43, %v126_v36 }
  0xc2   :  { %v170_v51 = vmul.f32 %v163_v59, %v5591_v17 }
  0xc3   :  { %v255_v49 = vsel %vm135_vm0, %v237_v42, 0.0  ;;  %v252_v50 = vsel %vm135_vm0, %v236_v47, 0.0  ;;  %v258_v56 = vsel %vm135_vm0, %v238_v54, 0.0  ;;  %v261_v58 = vsel %vm135_vm0, %v239_v39, 0.0 }
  0xc4   :  { %256 = vadd.xlane.f32.xlu2 %v255_v49  ;;  %253 = vadd.xlane.f32.xlu1 %v252_v50  ;;  %v190_v25 = vsel %vm135_vm0, %v170_v51, 0.0 }
  0xc9   :  { %259 = vadd.xlane.f32.xlu0 %v258_v56 }
  0xcc   :  { %176 = vadd.xlane.f32.xlu2 %v175_v57  ;;  %262 = vadd.xlane.f32.xlu1 %v261_v58 }
  0xd1   :  { %179 = vadd.xlane.f32.xlu0 %v178_v63 }
  0xd4   :  { %185 = vadd.xlane.f32.xlu2 %v184_v3  ;;  %173 = vadd.xlane.f32.xlu1 %v172_v48 }
  0xd9   :  { %188 = vadd.xlane.f32.xlu0 %v187_v16 }
  0xdc   :  { %194 = vadd.xlane.f32.xlu2 %v193_v23  ;;  %182 = vadd.xlane.f32.xlu1 %v181_v24 }
  0xe4   :  { %191 = vadd.xlane.f32.xlu1 %v190_v25 }
 0x12b   :  { %v248_v27 = vpop.xlane.xlu2 %247  ;;  %v245_v28 = vpop.xlane.xlu1 %244 }
 0x12c   :  { %v242_v26 = vpop.xlane.xlu0 %241 }
 0x134   :  { %v251_v22 = vpop.xlane.xlu0 %250 }
 0x137   :  { %v257_v29 = vpop.xlane.xlu2 %256  ;;  %v254_v30 = vpop.xlane.xlu1 %253 }
 0x13c   :  { %v260_v31 = vpop.xlane.xlu0 %259 }
 0x13f   :  { %v177_v32 = vpop.xlane.xlu2 %176  ;;  %v263_v33 = vpop.xlane.xlu1 %262 }
 0x140   :  { %v265_v34 = vadd.f32 %v245_v28, %v177_v32 }
 0x142   :  { %v273_v35 = vsub.f32 0.0, %v265_v34 }
 0x144   :  { %v282_v36 = vmul.f32 1.442695, %v273_v35  ;;  %v180_v37 = vpop.xlane.xlu0 %179 }
 0x145   :  { %v266_v38 = vadd.f32 %v248_v27, %v180_v37 }
 0x146   :  { %5287 = vpow2.f32 %v282_v36 }
 0x147   :  { %v274_v40 = vsub.f32 0.0, %v266_v38  ;;  %v186_v17 = vpop.xlane.xlu2 %185  ;;  %v174_v41 = vpop.xlane.xlu1 %173 }
 0x148   :  { %v268_v43 = vadd.f32 %v254_v30, %v186_v17  ;;  %v264_v45 = vadd.f32 %v242_v26, %v174_v41 }
 0x149   :  { %v284_v46 = vmul.f32 1.442695, %v274_v40 }
 0x14a   :  { %v276_v42 = vsub.f32 0.0, %v268_v43  ;;  %v272_v47 = vsub.f32 0.0, %v264_v45 }
 0x14b   :  { %5289 = vpow2.f32 %v284_v46 }
 0x14c   :  { %v5288_v49 = vpop.eup %5287  ;;  %v288_v50 = vmul.f32 1.442695, %v276_v42  ;;  %v280_v52 = vmul.f32 1.442695, %v272_v47  ;;  %v189_v53 = vpop.xlane.xlu0 %188 }
 0x14d   :  { %v5622_v54 = vadd.f32 1.0, %v5288_v49  ;;  %v269_v55 = vadd.f32 %v257_v29, %v189_v53 }
 0x14e   :  { %5291 = vpow2.f32 %v288_v50 }
 0x14f   :  { %v195_v39 = vpop.xlane.xlu2 %194  ;;  %v183_v44 = vpop.xlane.xlu1 %182  ;;  %5293 = vpow2.f32 %v280_v52  ;;  %v277_v56 = vsub.f32 0.0, %v269_v55  ;;  %v328_v45 = vand.u32 2147483647, %v5622_v54  ;;  %v330_v46 = vand.u32 2147483648, %v5622_v54 }
 0x150   :  { %v271_v57 = vadd.f32 %v263_v33, %v195_v39  ;;  %v267_v58 = vadd.f32 %v251_v22, %v183_v44  ;;  %5295 = vrcp.f32 %v5622_v54  ;;  %vm324_vm1 = vweird.f32 %v5622_v54 }
 0x151   :  { %v5290_v59 = vpop.eup %5289  ;;  %v290_v61 = vmul.f32 1.442695, %v277_v56  ;;  %vm5669_vm4 = vcmp.eq.f32.partialorder %v328_v45, 8.507059e+37  ;;  %v331_v56 = vor.u32 1.1754944e-38, %v330_v46 }
 0x152   :  { %v5625_v60 = vadd.f32 1.0, %v5290_v59  ;;  %v279_v62 = vsub.f32 0.0, %v271_v57  ;;  %v275_v63 = vsub.f32 0.0, %v267_v58 }
 0x154   :  { %5297 = vrcp.f32 %v5625_v60  ;;  %v5292_v3 = vpop.eup %5291  ;;  %v294_v48 = vmul.f32 1.442695, %v279_v62  ;;  %v286_v7 = vmul.f32 1.442695, %v275_v63  ;;  %v343_v42 = vand.u32 2147483647, %v5625_v60 }
 0x155   :  { %5299 = vpow2.f32 %v290_v61  ;;  %v5294_v8 = vpop.eup %5293  ;;  %v5632_v51 = vadd.f32 1.0, %v5292_v3  ;;  %v345_v55 = vand.u32 2147483648, %v5625_v60  ;;  %vm339_vm6 = vweird.f32 %v5625_v60 }
 0x156   :  { %v5628_v15 = vpop.eup %5295  ;;  %v5630_v23 = vadd.f32 1.0, %v5294_v8  ;;  %5301 = vpow2.f32 %v294_v48  ;;  %vm5697_vm10 = vcmp.eq.f32.partialorder %v343_v42, 8.507059e+37 }
 0x157   :  { %v192_v16 = vpop.xlane.xlu1 %191  ;;  %5303 = vpow2.f32 %v286_v7  ;;  %v320_v26 = vmul.f32 %v5628_v15, %v5622_v54  ;;  %vm325_vm2 = vweird.f32 %v5628_v15  ;;  %vm369_vm13 = vweird.f32 %v5632_v51 }
 0x158   :  { %v270_v24 = vadd.f32 %v260_v31, %v192_v16  ;;  %5305 = vrcp.f32 %v5630_v23  ;;  %v315_v57 = vand.u32 2147483648, %v5630_v23  ;;  %vm5676_vm5 = vmor %vm324_vm1, %vm325_vm2  ;;  %vm309_vm8 = vweird.f32 %v5630_v23 }
 0x159   :  { %5307 = vrcp.f32 %v5632_v51  ;;  %v321_v30 = vsub.f32 1.0, %v320_v26  ;;  %v313_v62 = vand.u32 2147483647, %v5630_v23 }
 0x15a   :  { %v5634_v25 = vpop.eup %5297  ;;  %v278_v28 = vsub.f32 0.0, %v270_v24  ;;  %v375_v24 = vand.u32 2147483648, %v5632_v51  ;;  %v316_v26 = vor.u32 1.1754944e-38, %v315_v57 }
 0x15b   :  { %v5300_v27 = vpop.eup %5299  ;;  %v335_v31 = vmul.f32 %v5634_v25, %v5625_v60  ;;  %v322_v36 = vmul.f32 %v5628_v15, %v321_v30  ;;  %vm340_vm7 = vweird.f32 %v5634_v25  ;;  %vm314_vm12 = vcmp.eq.f32.partialorder %v313_v62, 8.507059e+37 }
 0x15c   :  { %v5639_v22 = vadd.f32 1.0, %v5300_v27  ;;  %v5302_v29 = vpop.eup %5301  ;;  %v292_v33 = vmul.f32 1.442695, %v278_v28  ;;  %vm5716_vm11 = vmor %vm339_vm6, %vm340_vm7  ;;  %v373_v60 = vand.u32 2147483647, %v5632_v51 }
 0x15d   :  { %v5304_v32 = vpop.eup %5303  ;;  %v336_v37 = vsub.f32 1.0, %v335_v31  ;;  %v5647_v38 = vadd.f32 1.0, %v5302_v29  ;;  %v323_v50 = vadd.f32 %v5628_v15, %v322_v36 }
 0x15e   :  { %5309 = vrcp.f32 %v5639_v22  ;;  %v5306_v34 = vpop.eup %5305  ;;  %v5651_v41 = vadd.f32 1.0, %v5304_v32  ;;  %v388_v32 = vand.u32 2147483647, %v5639_v22  ;;  %vm384_vm0 = vweird.f32 %v5639_v22 }
 0x15f   :  { %v305_v35 = vmul.f32 %v5306_v34, %v5630_v23  ;;  %v5649_v40 = vpop.eup %5307  ;;  %5311 = vpow2.f32 %v292_v33  ;;  %v337_v52 = vmul.f32 %v5634_v25, %v336_v37  ;;  %vm310_vm3 = vweird.f32 %v5306_v34 }
 0x160   :  { %5313 = vrcp.f32 %v5647_v38  ;;  %v365_v53 = vmul.f32 %v5649_v40, %v5632_v51  ;;  %v327_v3 = vsel %vm5676_vm5, %v5628_v15, %v323_v50  ;;  %vm5691_vm9 = vmor %vm309_vm8, %vm310_vm3  ;;  %v346_v23 = vor.u32 1.1754944e-38, %v345_v55 }
 0x161   :  { %v306_v17 = vsub.f32 1.0, %v305_v35  ;;  %5315 = vrcp.f32 %v5651_v41  ;;  %v338_v54 = vadd.f32 %v5634_v25, %v337_v52  ;;  %v5710_v30 = vsel %vm5669_vm4, %v331_v56, %v327_v3 }
 0x162   :  { %v366_v48 = vsub.f32 1.0, %v365_v53  ;;  %v390_v33 = vand.u32 2147483648, %v5639_v22  ;;  %vm370_vm14 = vweird.f32 %v5649_v40  ;;  %vm5748_vm1 = vcmp.eq.f32.partialorder %v388_v32, 8.507059e+37 }
 0x163   :  { %v307_v47 = vmul.f32 %v5306_v34, %v306_v17  ;;  %v376_v17 = vor.u32 1.1754944e-38, %v375_v24  ;;  %vm414_vm4 = vweird.f32 %v5647_v38  ;;  %vm5772_vm5 = vmor %vm369_vm13, %vm370_vm14  ;;  %vm354_vm6 = vweird.f32 %v5651_v41 }
 0x164   :  { %v5653_v43 = vpop.eup %5309  ;;  %v367_v35 = vmul.f32 %v5649_v40, %v366_v48  ;;  %v391_v55 = vor.u32 1.1754944e-38, %v390_v33  ;;  %v420_v3 = vand.u32 2147483648, %v5647_v38 }
 0x165   :  { %v380_v49 = vmul.f32 %v5653_v43, %v5639_v22  ;;  %v308_v39 = vadd.f32 %v5306_v34, %v307_v47  ;;  %v5312_v59 = vpop.eup %5311  ;;  %vm385_vm15 = vweird.f32 %v5653_v43 }
 0x166   :  { %v5684_v63 = vpop.eup %5313  ;;  %v5695_v8 = vadd.f32 1.0, %v5312_v59  ;;  %v368_v52 = vadd.f32 %v5649_v40, %v367_v35  ;;  %vm5753_vm2 = vmor %vm384_vm0, %vm385_vm15  ;;  %v421_v35 = vor.u32 1.1754944e-38, %v420_v3  ;;  %v5843_v59 = vmul.f32 %v5710_v30, %v5524_v14 }
 0x167   :  { %v381_v58 = vsub.f32 1.0, %v380_v49  ;;  %v312_v15 = vsel %vm5691_vm9, %v5306_v34, %v308_v39  ;;  %v410_v28 = vmul.f32 %v5684_v63, %v5647_v38  ;;  %v5316_v29 = vpop.eup %5315  ;;  %v342_v34 = vsel %vm5716_vm11, %v5634_v25, %v338_v54 }
 0x168   :  { %5317 = vrcp.f32 %v5695_v8  ;;  %v5726_v36 = vsel %vm314_vm12, %v316_v26, %v312_v15  ;;  %v350_v37 = vmul.f32 %v5316_v29, %v5651_v41  ;;  %v5736_v25 = vmul.f32 %v5710_v30, %v5522_v13  ;;  %10056 = vst [vmem:[#allocation26_spill] sm:$0xff] %v5843_v59 }
 0x169   :  { %v382_v27 = vmul.f32 %v5653_v43, %v381_v58  ;;  %v411_v46 = vsub.f32 1.0, %v410_v28  ;;  %v5740_v47 = vsel %vm5697_vm10, %v346_v23, %v342_v34  ;;  %v5744_v49 = vmul.f32 %v5726_v36, %v5506_v5 }
 0x16a   :  { %v351_v42 = vsub.f32 1.0, %v350_v37  ;;  %10036 = vst [vmem:[#allocation14_spill] sm:$0xff] %v5736_v25  ;;  %v360_v13 = vand.u32 2147483648, %v5651_v41  ;;  %vm355_vm3 = vweird.f32 %v5316_v29  ;;  %v358_v5 = vand.u32 2147483647, %v5651_v41 }
 0x16b   :  { %v383_v45 = vadd.f32 %v5653_v43, %v382_v27  ;;  %10037 = vst [vmem:[#allocation15_spill] sm:$0xff] %v5744_v49  ;;  %v5761_v56 = vmul.f32 %v5740_v47, %v5500_v2  ;;  %v412_v58 = vmul.f32 %v5684_v63, %v411_v46  ;;  %v480_v2 = vmax.f32 %v5744_v49, %v5736_v25  ;;  %vm356_vm8 = vmor %vm354_vm6, %vm355_vm3 }
 0x16c   :  { %v352_v44 = vmul.f32 %v5316_v29, %v351_v42  ;;  %vm415_vm7 = vweird.f32 %v5684_v63  ;;  %v361_v51 = vor.u32 1.1754944e-38, %v360_v13  ;;  %vm359_vm9 = vcmp.eq.f32.partialorder %v358_v5, 8.507059e+37 }
 0x16d   :  { %10042 = vst [vmem:[#allocation16_spill] sm:$0xff] %v5761_v56  ;;  %v387_v57 = vsel %vm5753_vm2, %v5653_v43, %v383_v45  ;;  %v372_v43 = vsel %vm5772_vm5, %v5649_v40, %v368_v52  ;;  %v413_v41 = vadd.f32 %v5684_v63, %v412_v58  ;;  %v405_v23 = vand.u32 2147483648, %v5695_v8  ;;  %vm5798_vm12 = vmor %vm414_vm4, %vm415_vm7 }
 0x16e   :  { %v5318_v50 = vpop.eup %5317  ;;  %v353_v61 = vadd.f32 %v5316_v29, %v352_v44  ;;  %v392_v54 = vsel %vm5748_vm1, %v391_v55, %v387_v57  ;;  %v481_v24 = vmax.f32 %v480_v2, %v5761_v56  ;;  %v403_v26 = vand.u32 2147483647, %v5695_v8 }
 0x16f   :  { %v395_v22 = vmul.f32 %v5318_v50, %v5695_v8  ;;  %vm400_vm10 = vweird.f32 %v5318_v50  ;;  %vm374_vm11 = vcmp.eq.f32.partialorder %v373_v60, 8.507059e+37  ;;  %v418_v28 = vand.u32 2147483647, %v5647_v38 }
 0x170   :  { %v357_v48 = vsel %vm356_vm8, %v5316_v29, %v353_v61  ;;  %vm399_vm13 = vweird.f32 %v5695_v8  ;;  %v5806_v31 = vmul.f32 %v392_v54, %v5514_v9  ;;  %v417_v32 = vsel %vm5798_vm12, %v5684_v63, %v413_v41 }
 0x171   :  { %v396_v62 = vsub.f32 1.0, %v395_v22  ;;  %v362_v16 = vsel %vm359_vm9, %v361_v51, %v357_v48  ;;  %vm401_vm14 = vmor %vm399_vm13, %vm400_vm10  ;;  %v406_v34 = vor.u32 1.1754944e-38, %v405_v23  ;;  %vm404_vm15 = vcmp.eq.f32.partialorder %v403_v26, 8.507059e+37 }
 0x172   :  { %v5790_v40 = vmul.f32 %v362_v16, %v5518_v11  ;;  %v377_v11 = vsel %vm374_vm11, %v376_v17, %v372_v43  ;;  %10048 = vst [vmem:[#allocation18_spill] sm:$0xff] %v5806_v31  ;;  %vm419_vm0 = vcmp.eq.f32.partialorder %v418_v28, 8.507059e+37  ;;  %v5833_v22 = vmul.f32 %v5726_v36, %v5508_v6 }
 0x173   :  { %v397_v7 = vmul.f32 %v5318_v50, %v396_v62  ;;  %v5812_v38 = vmul.f32 %v377_v11, %v5496_v0  ;;  %v422_v60 = vsel %vm419_vm0, %v421_v35, %v417_v32  ;;  %v5836_v57 = vmul.f32 %v377_v11, %v5498_v1 }
 0x174   :  { %10045 = vst [vmem:[#allocation17_spill] sm:$0xff] %v5790_v40  ;;  %v482_v29 = vmax.f32 %v481_v24, %v5790_v40  ;;  %v5820_v63 = vmul.f32 %v422_v60, %v5532_v18  ;;  %v5829_v18 = vmul.f32 %v392_v54, %v5516_v10  ;;  %v489_v6 = vmax.f32 %v5833_v22, %v5843_v59 }
 0x175   :  { %v398_v15 = vadd.f32 %v5318_v50, %v397_v7  ;;  %10049 = vst [vmem:[#allocation19_spill] sm:$0xff] %v5812_v38  ;;  %v498_v9 = vmax.f32 %v5812_v38, %v5806_v31  ;;  %v5855_v10 = vmul.f32 %v5740_v47, %v5504_v4  ;;  %v5858_v14 = vmul.f32 %v362_v16, %v5520_v12 }
 0x176   :  { %v483_v37 = vrot.slane %v482_v29, 4  ;;  %10051 = vst [vmem:[#allocation21_spill] sm:$0xff] %v5820_v63  ;;  %v507_v2 = vmax.f32 %v5836_v57, %v5829_v18  ;;  %v458_v16 = vadd.f32 %v5806_v31, %v5812_v38  ;;  %vm516_vm1 = vcmask 179200  }
 0x177   :  { %v402_v33 = vsel %vm401_vm14, %v5318_v50, %v398_v15  ;;  %10052 = vst [vmem:[#allocation22_spill] sm:$0xff] %v5829_v18  ;;  %v490_v30 = vmax.f32 %v489_v6, %v5855_v10  ;;  %v440_v15 = vadd.f32 %v5736_v25, %v5744_v49  ;;  %vm538_vm2 = vcmask 147480  }
 0x178   :  { %v407_v8 = vsel %vm404_vm15, %v406_v34, %v402_v33  ;;  %v484_v17 = vmax.f32 %v482_v29, %v483_v37  ;;  %10053 = vst [vmem:[#allocation23_spill] sm:$0xff] %v5833_v22  ;;  %v5448_v29 = vmov 0.0   ;;  %vm519_vm3 = vcmask 177152  }
 0x179   :  { %v5817_v45 = vmul.f32 %v407_v8, %v5536_v20  ;;  %10054 = vst [vmem:[#allocation24_spill] sm:$0xff] %v5836_v57  ;;  %v5839_v58 = vmul.f32 %v407_v8, %v5538_v21  ;;  %v5861_v21 = vmul.f32 %v422_v60, %v5534_v19  ;;  %v491_v61 = vmax.f32 %v490_v30, %v5858_v14 }
 0x17a   :  { %v485_v46 = vrot.slane %v484_v17, 2  ;;  %10057 = vst [vmem:[#allocation27_spill] sm:$0xff] %v5855_v10  ;;  %v441_v27 = vadd.f32 %v440_v15, %v5761_v56  ;;  %vm974_vm4 = vcmask 1042432   ;;  %vm867_vm5 = vcmask 1043456  }
 0x17b   :  { %10050 = vst [vmem:[#allocation20_spill] sm:$0xff] %v5817_v45  ;;  %v499_v42 = vmax.f32 %v498_v9, %v5817_v45  ;;  %v508_v1 = vmax.f32 %v507_v2, %v5839_v58  ;;  %v492_v47 = vrot.slane %v491_v61, 4  ;;  %v459_v23 = vadd.f32 %v458_v16, %v5817_v45 }
 0x17c   :  { %v486_v50 = vmax.f32 %v484_v17, %v485_v46  ;;  %10055 = vst [vmem:[#allocation25_spill] sm:$0xff] %v5839_v58  ;;  %v442_v28 = vadd.f32 %v441_v27, %v5790_v40  ;;  %v467_v9 = vadd.f32 %v5829_v18, %v5836_v57  ;;  %vm1007_vm6 = vcmask 1046528  }
 0x17d   :  { %v500_v0 = vmax.f32 %v499_v42, %v5820_v63  ;;  %10058 = vst [vmem:[#allocation28_spill] sm:$0xff] %v5858_v14  ;;  %v509_v36 = vmax.f32 %v508_v1, %v5861_v21  ;;  %v493_v62 = vmax.f32 %v491_v61, %v492_v47  ;;  %v460_v24 = vadd.f32 %v459_v23, %v5820_v63 }
 0x17e   :  { %v487_v52 = vrot.slane %v486_v50, 1  ;;  %10059 = vst [vmem:[#allocation29_spill] sm:$0xff] %v5861_v21  ;;  %v443_v32 = vrot.slane %v442_v28, 4  ;;  %v468_v42 = vadd.f32 %v467_v9, %v5839_v58  ;;  %v1607_v63 = vstv %s5187_s12  ;;  %s5210_s12 = sld [smem:[#allocation9 + $0x26]] }
 0x17f   :  { %v501_v53 = vrot.slane %v500_v0, 4  ;;  %v510_v4 = vrot.slane %v509_v36, 4  ;;  %v494_v43 = vrot.slane %v493_v62, 2  ;;  %v461_v26 = vrot.slane %v460_v24, 4  ;;  %527 = vst.msk [vmem:[#allocation3 + $0x18] sm:$0xff] %vm516_vm1, %v5448_v29 }
 0x180   :  { %v488_v55 = vmax.f32 %v486_v50, %v487_v52  ;;  %517 = vst.msk [vmem:[#allocation2] sm:$0xff] %vm516_vm1, %v5448_v29  ;;  %v444_v34 = vadd.f32 %v443_v32, %v442_v28  ;;  %v469_v52 = vadd.f32 %v468_v42, %v5861_v21  ;;  %vm4788_vm7 = vcmask 1045504  }
 0x181   :  { %v502_v13 = vmax.f32 %v500_v0, %v501_v53  ;;  %v511_v12 = vmax.f32 %v509_v36, %v510_v4  ;;  %v495_v51 = vmax.f32 %v493_v62, %v494_v43  ;;  %v462_v11 = vadd.f32 %v461_v26, %v460_v24  ;;  %518 = vst.msk [vmem:[#allocation2 + $0x8] sm:$0xff] %vm516_vm1, %v5448_v29 }
 0x182   :  { %543 = vrot.lane.b32.xlu1 %v488_v55, %s5440_s2  ;;  %521 = vst.msk [vmem:[#allocation2 + $0x18] sm:$0xff] %vm516_vm1, %v5448_v29  ;;  %v445_v37 = vrot.slane %v444_v34, 2  ;;  %v449_v53 = vadd.f32 %v5843_v59, %v5833_v22  ;;  %vm4815_vm8 = vcmask 1041409   ;;  %vm4817_vm9 = vcmask 1043459  }
 0x183   :  { %v503_v39 = vrot.slane %v502_v13, 2  ;;  %v512_v19 = vrot.slane %v511_v12, 2  ;;  %v496_v48 = vrot.slane %v495_v51, 1  ;;  %v463_v33 = vrot.slane %v462_v11, 2  ;;  %522 = vst.msk [vmem:[#allocation2 + $0x20] sm:$0xff] %vm516_vm1, %v5448_v29 }
 0x184   :  { %524 = vst.msk [vmem:[#allocation3] sm:$0xff] %vm516_vm1, %v5448_v29  ;;  %v446_v60 = vadd.f32 %v445_v37, %v444_v34  ;;  %vm4819_vm10 = vcmask 1045509   ;;  %vm4821_vm11 = vcmask 1047559   ;;  %vm4824_vm12 = vcmask 123904  }
 0x185   :  { %v504_v44 = vmax.f32 %v502_v13, %v503_v39  ;;  %v513_v3 = vmax.f32 %v511_v12, %v512_v19  ;;  %v497_v41 = vmax.f32 %v495_v51, %v496_v48  ;;  %525 = vst.msk [vmem:[#allocation3 + $0x8] sm:$0xff] %vm516_vm1, %v5448_v29  ;;  %v464_v35 = vadd.f32 %v463_v33, %v462_v11 }
 0x186   :  { %528 = vst.msk [vmem:[#allocation3 + $0x20] sm:$0xff] %vm516_vm1, %v5448_v29  ;;  %v447_v46 = vrot.slane %v446_v60, 1  ;;  %v450_v39 = vadd.f32 %v449_v53, %v5855_v10  ;;  %vm4836_vm13 = vcmask 255104   ;;  %vm4854_vm14 = vcmask 386304  }
 0x187   :  { %v505_v20 = vrot.slane %v504_v44, 1  ;;  %v514_v54 = vrot.slane %v513_v3, 1  ;;  %v465_v8 = vrot.slane %v464_v35, 1  ;;  %529 = vst.msk [vmem:[#allocation3 + $0x28] sm:$0x3f] %vm519_vm3, %v5448_v29  ;;  %vm4872_vm15 = vcmask 517504  }
 0x188   :  { %v448_v0 = vadd.f32 %v447_v46, %v446_v60  ;;  %520 = vst.msk [vmem:[#allocation2 + $0x10] sm:$0x3f] %vm519_vm3, %v5448_v29  ;;  %vm4890_vm0 = vcmask 648704   ;;  %vm4908_vm1 = vcmask 779904  }
 0x189   :  { %v506_v5 = vmax.f32 %v504_v44, %v505_v20  ;;  %v515_v7 = vmax.f32 %v513_v3, %v514_v54  ;;  %v466_v17 = vadd.f32 %v465_v8, %v464_v35  ;;  %v451_v44 = vadd.f32 %v450_v39, %v5858_v14  ;;  %523 = vst.msk [vmem:[#allocation2 + $0x28] sm:$0x3f] %vm519_vm3, %v5448_v29 }
 0x18a   :  { %559 = vrot.lane.b32.xlu1 %v488_v55, %s5441_s13  ;;  %v476_v13 = vmul.f32 0.03125, %v448_v0  ;;  %526 = vst.msk [vmem:[#allocation3 + $0x10] sm:$0x3f] %vm519_vm3, %v5448_v29  ;;  %vm4944_vm3 = vcmask 1042304  }
 0x18b   :  { %561 = vrot.lane.b32.xlu0 %v506_v5, %s5441_s13  ;;  %545 = vrot.lane.b32.xlu2 %v506_v5, %s5440_s2  ;;  %v478_v50 = vmul.f32 0.03125, %v466_v17  ;;  %v452_v2 = vrot.slane %v451_v44, 4 }
 0x18d   :  { %v453_v1 = vadd.f32 %v452_v2, %v451_v44 }
 0x18f   :  { %v454_v61 = vrot.slane %v453_v1, 2 }
 0x191   :  { %v455_v47 = vadd.f32 %v454_v61, %v453_v1 }
 0x192   :  { %593 = vrot.lane.b32.xlu1 %v506_v5, %s5442_s14 }
 0x193   :  { %575 = vrot.lane.b32.xlu0 %v488_v55, %s5443_s15  ;;  %577 = vrot.lane.b32.xlu2 %v506_v5, %s5443_s15  ;;  %v456_v43 = vrot.slane %v455_v47, 1 }
 0x195   :  { %v457_v51 = vadd.f32 %v456_v43, %v455_v47  ;;  %v1203_v47 = vstv %s5177_s20  ;;  %s5450_s20 = smov 126  }
 0x19a   :  { %607 = vrot.lane.b32.xlu1 %v488_v55, %s5444_s16 }
 0x19b   :  { %609 = vrot.lane.b32.xlu0 %v506_v5, %s5444_s16  ;;  %591 = vrot.lane.b32.xlu2 %v488_v55, %s5442_s14 }
 0x1a2   :  { %641 = vrot.lane.b32.xlu1 %v506_v5, %s5445_s17 }
 0x1a3   :  { %623 = vrot.lane.b32.xlu0 %v488_v55, %s5446_s18  ;;  %625 = vrot.lane.b32.xlu2 %v506_v5, %s5446_s18 }
 0x1aa   :  { %655 = vrot.lane.b32.xlu1 %v488_v55, %s5447_s19 }
 0x1ab   :  { %657 = vrot.lane.b32.xlu0 %v506_v5, %s5447_s19  ;;  %639 = vrot.lane.b32.xlu2 %v488_v55, %s5445_s17  ;;  %v470_v55 = vrot.slane %v469_v52, 4 }
 0x1ad   :  { %v471_v20 = vadd.f32 %v470_v55, %v469_v52 }
 0x1af   :  { %v472_v6 = vrot.slane %v471_v20, 2 }
 0x1b1   :  { %v473_v30 = vadd.f32 %v472_v6, %v471_v20 }
 0x1b2   :  { %693 = vrot.lane.b32.xlu1 %v515_v7, %s5441_s13 }
 0x1b3   :  { %675 = vrot.lane.b32.xlu0 %v497_v41, %s5440_s2  ;;  %677 = vrot.lane.b32.xlu2 %v515_v7, %s5440_s2  ;;  %v474_v4 = vrot.slane %v473_v30, 1 }
 0x1b5   :  { %v475_v62 = vadd.f32 %v474_v4, %v473_v30 }
 0x1b7   :  { %v479_v3 = vmul.f32 0.03125, %v475_v62 }
 0x1ba   :  { %707 = vrot.lane.b32.xlu1 %v497_v41, %s5443_s15 }
 0x1bb   :  { %709 = vrot.lane.b32.xlu0 %v515_v7, %s5443_s15  ;;  %691 = vrot.lane.b32.xlu2 %v497_v41, %s5441_s13 }
 0x1c2   :  { %741 = vrot.lane.b32.xlu1 %v515_v7, %s5444_s16 }
 0x1c3   :  { %723 = vrot.lane.b32.xlu0 %v497_v41, %s5442_s14  ;;  %725 = vrot.lane.b32.xlu2 %v515_v7, %s5442_s14 }
 0x1ca   :  { %755 = vrot.lane.b32.xlu1 %v497_v41, %s5446_s18 }
 0x1cb   :  { %757 = vrot.lane.b32.xlu0 %v515_v7, %s5446_s18  ;;  %739 = vrot.lane.b32.xlu2 %v497_v41, %s5444_s16 }
 0x1d2   :  { %789 = vrot.lane.b32.xlu1 %v515_v7, %s5447_s19 }
 0x1d3   :  { %771 = vrot.lane.b32.xlu0 %v497_v41, %s5445_s17  ;;  %773 = vrot.lane.b32.xlu2 %v515_v7, %s5445_s17 }
 0x1da   :  { %569 = vrot.lane.b32.xlu1 %v478_v50, %s5443_s15 }
 0x1db   :  { %787 = vrot.lane.b32.xlu2 %v497_v41, %s5447_s19  ;;  %534 = vrot.lane.b32.xlu0 %v478_v50, %s5440_s2  ;;  %v477_v41 = vmul.f32 0.03125, %v457_v51 }
 0x1e2   :  { %583 = vrot.lane.b32.xlu1 %v476_v13, %s5442_s14 }
 0x1e3   :  { %532 = vrot.lane.b32.xlu2 %v476_v13, %s5440_s2  ;;  %551 = vrot.lane.b32.xlu0 %v476_v13, %s5441_s13 }
 0x1e5   :  { %v546_v5 = vpop.permute.xlu2 %545 }
 0x1e6   :  { %550 = vst.msk [vmem:[#allocation3 + $0x1b] sm:$0x1] %vm538_vm2, %v546_v5 }
 0x1ea   :  { %617 = vrot.lane.b32.xlu1 %v478_v50, %s5446_s18 }
 0x1eb   :  { %553 = vrot.lane.b32.xlu2 %v478_v50, %s5441_s13  ;;  %585 = vrot.lane.b32.xlu0 %v478_v50, %s5442_s14 }
 0x1ed   :  { %v578_v36 = vpop.permute.xlu2 %577 }
 0x1ee   :  { %582 = vst.msk [vmem:[#allocation3 + $0x1d] sm:$0x1] %vm538_vm2, %v578_v36 }
 0x1f2   :  { %631 = vrot.lane.b32.xlu1 %v476_v13, %s5445_s17 }
 0x1f3   :  { %567 = vrot.lane.b32.xlu2 %v476_v13, %s5443_s15  ;;  %599 = vrot.lane.b32.xlu0 %v476_v13, %s5444_s16 }
 0x1f4   :  { %v544_v12 = vpop.permute.xlu1 %543 }
 0x1f5   :  { %549 = vst.msk [vmem:[#allocation3 + $0x3] sm:$0x1] %vm538_vm2, %v544_v12  ;;  %v592_v19 = vpop.permute.xlu2 %591 }
 0x1f6   :  { %597 = vst.msk [vmem:[#allocation3 + $0x6] sm:$0x1] %vm538_vm2, %v592_v19 }
 0x1fa   :  { %667 = vrot.lane.b32.xlu1 %v479_v3, %s5440_s2 }
 0x1fb   :  { %601 = vrot.lane.b32.xlu2 %v478_v50, %s5444_s16  ;;  %633 = vrot.lane.b32.xlu0 %v478_v50, %s5445_s17 }
 0x1fc   :  { %v560_v54 = vpop.permute.xlu1 %559 }
 0x1fd   :  { %565 = vst.msk [vmem:[#allocation3 + $0x4] sm:$0x1] %vm538_vm2, %v560_v54  ;;  %v562_v48 = vpop.permute.xlu0 %561  ;;  %v626_v7 = vpop.permute.xlu2 %625 }
 0x1fe   :  { %566 = vst.msk [vmem:[#allocation3 + $0x1c] sm:$0x1] %vm538_vm2, %v562_v48 }
 0x1ff   :  { %630 = vst.msk [vmem:[#allocation3 + $0x20] sm:$0x1] %vm538_vm2, %v626_v7 }
 0x202   :  { %683 = vrot.lane.b32.xlu1 %v477_v41, %s5441_s13 }
 0x203   :  { %615 = vrot.lane.b32.xlu2 %v476_v13, %s5446_s18  ;;  %647 = vrot.lane.b32.xlu0 %v476_v13, %s5447_s19 }
 0x204   :  { %v594_v16 = vpop.permute.xlu1 %593 }
 0x205   :  { %598 = vst.msk [vmem:[#allocation3 + $0x1e] sm:$0x1] %vm538_vm2, %v594_v16  ;;  %v576_v23 = vpop.permute.xlu0 %575  ;;  %v640_v24 = vpop.permute.xlu2 %639 }
 0x206   :  { %581 = vst.msk [vmem:[#allocation3 + $0x5] sm:$0x1] %vm538_vm2, %v576_v23 }
 0x207   :  { %645 = vst.msk [vmem:[#allocation3 + $0x9] sm:$0x1] %vm538_vm2, %v640_v24 }
 0x20a   :  { %717 = vrot.lane.b32.xlu1 %v479_v3, %s5442_s14 }
 0x20b   :  { %649 = vrot.lane.b32.xlu2 %v478_v50, %s5447_s19  ;;  %685 = vrot.lane.b32.xlu0 %v479_v3, %s5441_s13  ;;  %s5181_s13 = sld [smem:[#allocation9 + $0x1d]] }
 0x20c   :  { %v608_v15 = vpop.permute.xlu1 %607 }
 0x20d   :  { %613 = vst.msk [vmem:[#allocation3 + $0x7] sm:$0x1] %vm538_vm2, %v608_v15  ;;  %v610_v26 = vpop.permute.xlu0 %609  ;;  %v678_v27 = vpop.permute.xlu2 %677 }
 0x20e   :  { %614 = vst.msk [vmem:[#allocation3 + $0x1f] sm:$0x1] %vm538_vm2, %v610_v26 }
 0x20f   :  { %682 = vst.msk [vmem:[#allocation3 + $0x23] sm:$0x1] %vm538_vm2, %v678_v27 }
 0x212   :  { %731 = vrot.lane.b32.xlu1 %v477_v41, %s5444_s16 }
 0x213   :  { %665 = vrot.lane.b32.xlu2 %v477_v41, %s5440_s2  ;;  %699 = vrot.lane.b32.xlu0 %v477_v41, %s5443_s15  ;;  %s5188_s2 = sld [smem:[#allocation9 + $0x4e]] }
 0x214   :  { %v642_v28 = vpop.permute.xlu1 %641 }
 0x215   :  { %646 = vst.msk [vmem:[#allocation3 + $0x21] sm:$0x1] %vm538_vm2, %v642_v28  ;;  %v624_v11 = vpop.permute.xlu0 %623  ;;  %v692_v32 = vpop.permute.xlu2 %691 }
 0x216   :  { %629 = vst.msk [vmem:[#allocation3 + $0x8] sm:$0x1] %vm538_vm2, %v624_v11 }
 0x217   :  { %697 = vst.msk [vmem:[#allocation3 + $0xc] sm:$0x1] %vm538_vm2, %v692_v32 }
 0x21a   :  { %765 = vrot.lane.b32.xlu1 %v479_v3, %s5445_s17 }
 0x21b   :  { %701 = vrot.lane.b32.xlu2 %v479_v3, %s5443_s15  ;;  %733 = vrot.lane.b32.xlu0 %v479_v3, %s5444_s16  ;;  %s5189_s15 = sld [smem:[#allocation9 + $0x55]] }
 0x21c   :  { %v656_v33 = vpop.permute.xlu1 %655  ;;  %s5183_s16 = sld [smem:[#allocation9 + $0x2b]] }
 0x21d   :  { %661 = vst.msk [vmem:[#allocation3 + $0xa] sm:$0x1] %vm538_vm2, %v656_v33  ;;  %v658_v34 = vpop.permute.xlu0 %657  ;;  %v726_v29 = vpop.permute.xlu2 %725 }
 0x21e   :  { %662 = vst.msk [vmem:[#allocation3 + $0x22] sm:$0x1] %vm538_vm2, %v658_v34 }
 0x21f   :  { %730 = vst.msk [vmem:[#allocation3 + $0x26] sm:$0x1] %vm538_vm2, %v726_v29 }
 0x221   :  { %v6339_v10 = vstv %s5189_s15  ;;  %s5214_s15 = sld [smem:[#allocation9 + $0x42]] }
 0x222   :  { %779 = vrot.lane.b32.xlu1 %v477_v41, %s5447_s19 }
 0x223   :  { %715 = vrot.lane.b32.xlu2 %v477_v41, %s5442_s14  ;;  %747 = vrot.lane.b32.xlu0 %v477_v41, %s5446_s18  ;;  %s5182_s14 = sld [smem:[#allocation9 + $0x24]] }
 0x224   :  { %v694_v35 = vpop.permute.xlu1 %693 }
 0x225   :  { %698 = vst.msk [vmem:[#allocation3 + $0x24] sm:$0x1] %vm538_vm2, %v694_v35  ;;  %v676_v37 = vpop.permute.xlu0 %675  ;;  %v740_v8 = vpop.permute.xlu2 %739  ;;  %v1229_v35 = vstv %s5178_s22  ;;  %s5193_s22 = sld [smem:[#allocation9 + $0x10]] }
 0x226   :  { %681 = vst.msk [vmem:[#allocation3 + $0xb] sm:$0x1] %vm538_vm2, %v676_v37 }
 0x227   :  { %745 = vst.msk [vmem:[#allocation3 + $0xf] sm:$0x1] %vm538_vm2, %v740_v8 }
 0x22b   :  { %749 = vrot.lane.b32.xlu2 %v479_v3, %s5446_s18  ;;  %781 = vrot.lane.b32.xlu0 %v479_v3, %s5447_s19  ;;  %s5191_s18 = sld [smem:[#allocation9 + $0x2]] }
 0x22c   :  { %v708_v60 = vpop.permute.xlu1 %707  ;;  %s5192_s19 = sld [smem:[#allocation9 + $0x9]] }
 0x22d   :  { %713 = vst.msk [vmem:[#allocation3 + $0xd] sm:$0x1] %vm538_vm2, %v708_v60  ;;  %v710_v17 = vpop.permute.xlu0 %709  ;;  %v774_v9 = vpop.permute.xlu2 %773 }
 0x22e   :  { %714 = vst.msk [vmem:[#allocation3 + $0x25] sm:$0x1] %vm538_vm2, %v710_v17 }
 0x22f   :  { %778 = vst.msk [vmem:[#allocation3 + $0x29] sm:$0x1] %vm538_vm2, %v774_v9 }
 0x233   :  { %763 = vrot.lane.b32.xlu2 %v477_v41, %s5445_s17  ;;  %s5190_s17 = sld [smem:[#allocation9 + $0x5c]] }
 0x234   :  { %v742_v46 = vpop.permute.xlu1 %741 }
 0x235   :  { %746 = vst.msk [vmem:[#allocation3 + $0x27] sm:$0x1] %vm538_vm2, %v742_v46  ;;  %v724_v42 = vpop.permute.xlu0 %723  ;;  %v788_v50 = vpop.permute.xlu2 %787 }
 0x236   :  { %729 = vst.msk [vmem:[#allocation3 + $0xe] sm:$0x1] %vm538_vm2, %v724_v42 }
 0x237   :  { %793 = vst.msk [vmem:[#allocation3 + $0x12] sm:$0x1] %vm538_vm2, %v788_v50 }
 0x23c   :  { %v756_v0 = vpop.permute.xlu1 %755 }
 0x23d   :  { %761 = vst.msk [vmem:[#allocation3 + $0x10] sm:$0x1] %vm538_vm2, %v756_v0  ;;  %v758_v52 = vpop.permute.xlu0 %757  ;;  %v533_v53 = vpop.permute.xlu2 %532 }
 0x23e   :  { %762 = vst.msk [vmem:[#allocation3 + $0x28] sm:$0x1] %vm538_vm2, %v758_v52 }
 0x23f   :  { %539 = vst.msk [vmem:[#allocation2 + $0x3] sm:$0x1] %vm538_vm2, %v533_v53  ;;  %v6049_v53 = vstv %s5179_s0  ;;  %s5196_s0 = sld [smem:[#allocation9 + $0x25]] }
 0x244   :  { %v790_v55 = vpop.permute.xlu1 %789 }
 0x245   :  { %794 = vst.msk [vmem:[#allocation3 + $0x2a] sm:$0x1] %vm538_vm2, %v790_v55  ;;  %v772_v13 = vpop.permute.xlu0 %771  ;;  %v554_v39 = vpop.permute.xlu2 %553 }
 0x246   :  { %777 = vst.msk [vmem:[#allocation3 + $0x11] sm:$0x1] %vm538_vm2, %v772_v13 }
 0x247   :  { %558 = vst.msk [vmem:[#allocation2 + $0x1c] sm:$0x1] %vm538_vm2, %v554_v39 }
 0x24c   :  { %v570_v44 = vpop.permute.xlu1 %569 }
 0x24d   :  { %574 = vst.msk [vmem:[#allocation2 + $0x1d] sm:$0x1] %vm538_vm2, %v570_v44  ;;  %v568_v20 = vpop.permute.xlu2 %567  ;;  %v535_v5 = vpop.permute.xlu0 %534  ;;  %v6055_v44 = vld [vmem:[#allocation3 + $0x28] sm:$0x3f] }
 0x24e   :  { %573 = vst.msk [vmem:[#allocation2 + $0x5] sm:$0x1] %vm538_vm2, %v568_v20  ;;  %v6059_v20 = vld [vmem:[#allocation3 + $0x20] sm:$0xff] }
 0x24f   :  { %540 = vst.msk [vmem:[#allocation2 + $0x1b] sm:$0x1] %vm538_vm2, %v535_v5  ;;  %v6062_v5 = vstv %s5167_s29  ;;  %s5201_s29 = sld [smem:[#allocation9 + $0x48]] }
 0x254   :  { %v584_v2 = vpop.permute.xlu1 %583 }
 0x255   :  { %589 = vst.msk [vmem:[#allocation2 + $0x6] sm:$0x1] %vm538_vm2, %v584_v2  ;;  %v602_v6 = vpop.permute.xlu2 %601  ;;  %v552_v1 = vpop.permute.xlu0 %551  ;;  %v6065_v2 = vstv %s6035_s25  ;;  %s5195_s25 = sld [smem:[#allocation9 + $0x1e]] }
 0x256   :  { %606 = vst.msk [vmem:[#allocation2 + $0x1f] sm:$0x1] %vm538_vm2, %v602_v6  ;;  %v6067_v6 = vstv %s5175_s3  ;;  %s5197_s3 = sld [smem:[#allocation9 + $0x2c]] }
 0x257   :  { %557 = vst.msk [vmem:[#allocation2 + $0x4] sm:$0x1] %vm538_vm2, %v552_v1  ;;  %v6069_v1 = vstv %s5172_s26  ;;  %s5198_s26 = sld [smem:[#allocation9 + $0x33]] }
 0x25c   :  { %v618_v30 = vpop.permute.xlu1 %617 }
 0x25d   :  { %622 = vst.msk [vmem:[#allocation2 + $0x20] sm:$0x1] %vm538_vm2, %v618_v30  ;;  %v616_v36 = vpop.permute.xlu2 %615  ;;  %v586_v61 = vpop.permute.xlu0 %585 }
 0x25e   :  { %621 = vst.msk [vmem:[#allocation2 + $0x8] sm:$0x1] %vm538_vm2, %v616_v36  ;;  %v6075_v36 = vstv %s5176_s27  ;;  %s5199_s27 = sld [smem:[#allocation9 + $0x3a]] }
 0x25f   :  { %590 = vst.msk [vmem:[#allocation2 + $0x1e] sm:$0x1] %vm538_vm2, %v586_v61  ;;  %v6077_v61 = vstv %s5173_s28  ;;  %s5200_s28 = sld [smem:[#allocation9 + $0x41]] }
 0x264   :  { %v632_v4 = vpop.permute.xlu1 %631 }
 0x265   :  { %637 = vst.msk [vmem:[#allocation2 + $0x9] sm:$0x1] %vm538_vm2, %v632_v4  ;;  %v650_v12 = vpop.permute.xlu2 %649  ;;  %v600_v62 = vpop.permute.xlu0 %599  ;;  %v1000_v4 = vmul.f32 %v6065_v2, %v6055_v44 }
 0x266   :  { %v6003_v19 = vld [vmem:[#allocation2 + $0x18] sm:$0xff]  ;;  %654 = vst.msk [vmem:[#allocation2 + $0x22] sm:$0x1] %vm538_vm2, %v650_v12  ;;  %v6085_v12 = vstv %s801_s30  ;;  %s5202_s30 = sld [smem:[#allocation9 + $0x4f]] }
 0x267   :  { %605 = vst.msk [vmem:[#allocation2 + $0x7] sm:$0x1] %vm538_vm2, %v600_v62  ;;  %v1206_v43 = vmul.f32 %v1203_v47, %v6003_v19  ;;  %v1233_v13 = vmul.f32 %v1229_v35, %v6003_v19  ;;  %v6089_v62 = vmul.f32 %v6065_v2, %v6059_v20 }
 0x269   :  { %1216 = vrot.lane.b32.xlu1 %v1206_v43, %s5449_s21  ;;  %v6093_v43 = vmul.f32 %v6067_v6, %v6059_v20 }
 0x26c   :  { %v668_v3 = vpop.permute.xlu1 %667 }
 0x26d   :  { %672 = vst.msk [vmem:[#allocation2 + $0x23] sm:$0x1] %vm538_vm2, %v668_v3  ;;  %v666_v51 = vpop.permute.xlu2 %665  ;;  %v634_v54 = vpop.permute.xlu0 %633  ;;  %v6095_v3 = vstv %s5164_s5  ;;  %s5203_s5 = sld [smem:[#allocation9 + $0x56]] }
 0x26e   :  { %v6010_v48 = vld [vmem:[#allocation2] sm:$0xff]  ;;  %671 = vst.msk [vmem:[#allocation2 + $0xb] sm:$0x1] %vm538_vm2, %v666_v51 }
 0x26f   :  { %638 = vst.msk [vmem:[#allocation2 + $0x21] sm:$0x1] %vm538_vm2, %v634_v54  ;;  %v1204_v7 = vmul.f32 %v1203_v47, %v6010_v48  ;;  %v1230_v46 = vmul.f32 %v1229_v35, %v6010_v48  ;;  %v6098_v54 = vstv %s5168_s1  ;;  %s5204_s1 = sld [smem:[#allocation9 + $0x5d]] }
 0x271   :  { %1212 = vrot.lane.b32.xlu0 %v1204_v7, %s5449_s21  ;;  %v6104_v7 = vmul.f32 %v6069_v1, %v6055_v44 }
 0x274   :  { %v684_v41 = vpop.permute.xlu1 %683 }
 0x275   :  { %689 = vst.msk [vmem:[#allocation2 + $0xc] sm:$0x1] %vm538_vm2, %v684_v41  ;;  %v702_v16 = vpop.permute.xlu2 %701  ;;  %v648_v23 = vpop.permute.xlu0 %647  ;;  %v1141_v41 = vmul.f32 %v6067_v6, %v6055_v44 }
 0x276   :  { %706 = vst.msk [vmem:[#allocation2 + $0x25] sm:$0x1] %vm538_vm2, %v702_v16  ;;  %v1268_v16 = vmul.f32 %v6049_v53, %v6010_v48 }
 0x277   :  { %653 = vst.msk [vmem:[#allocation2 + $0xa] sm:$0x1] %vm538_vm2, %v648_v23 }
 0x27c   :  { %v718_v24 = vpop.permute.xlu1 %717 }
 0x27d   :  { %722 = vst.msk [vmem:[#allocation2 + $0x26] sm:$0x1] %vm538_vm2, %v718_v24  ;;  %v716_v15 = vpop.permute.xlu2 %715  ;;  %v686_v26 = vpop.permute.xlu0 %685 }
 0x27e   :  { %721 = vst.msk [vmem:[#allocation2 + $0xe] sm:$0x1] %vm538_vm2, %v716_v15 }
 0x27f   :  { %690 = vst.msk [vmem:[#allocation2 + $0x24] sm:$0x1] %vm538_vm2, %v686_v26 }
 0x284   :  { %v732_v27 = vpop.permute.xlu1 %731 }
 0x285   :  { %737 = vst.msk [vmem:[#allocation2 + $0xf] sm:$0x1] %vm538_vm2, %v732_v27  ;;  %v750_v28 = vpop.permute.xlu2 %749  ;;  %v700_v11 = vpop.permute.xlu0 %699  ;;  %v6119_v27 = vstv %s5169_s6  ;;  %s5205_s6 = sld [smem:[#allocation9 + $0x3]] }
 0x286   :  { %754 = vst.msk [vmem:[#allocation2 + $0x28] sm:$0x1] %vm538_vm2, %v750_v28  ;;  %v6123_v28 = vmul.f32 %v6075_v36, %v6055_v44 }
 0x287   :  { %705 = vst.msk [vmem:[#allocation2 + $0xd] sm:$0x1] %vm538_vm2, %v700_v11  ;;  %v1016_v11 = vrot.slane %v1000_v4, 1 }
 0x28c   :  { %v766_v32 = vpop.permute.xlu1 %765 }
 0x28d   :  { %770 = vst.msk [vmem:[#allocation2 + $0x29] sm:$0x1] %vm538_vm2, %v766_v32  ;;  %v764_v33 = vpop.permute.xlu2 %763  ;;  %v734_v34 = vpop.permute.xlu0 %733 }
 0x28e   :  { %v6026_v29 = vld [vmem:[#allocation2 + $0x8] sm:$0xff]  ;;  %769 = vst.msk [vmem:[#allocation2 + $0x11] sm:$0x1] %vm538_vm2, %v764_v33 }
 0x28f   :  { %738 = vst.msk [vmem:[#allocation2 + $0x27] sm:$0x1] %vm538_vm2, %v734_v34  ;;  %v1231_v37 = vmul.f32 %v1229_v35, %v6026_v29  ;;  %v1205_v8 = vmul.f32 %v1203_v47, %v6026_v29  ;;  %v1269_v39 = vmul.f32 %v6049_v53, %v6026_v29 }
 0x291   :  { %1244 = vrot.lane.b32.xlu1 %v1231_v37, %s5449_s21  ;;  %1214 = vrot.lane.b32.xlu2 %v1205_v8, %s5449_s21  ;;  %v1156_v8 = vrot.slane %v1141_v41, 5  ;;  %v1305_v41 = vstv %s6083_s7  ;;  %s5451_s7 = smov 125  }
 0x294   :  { %v780_v60 = vpop.permute.xlu1 %779 }
 0x295   :  { %785 = vst.msk [vmem:[#allocation2 + $0x12] sm:$0x1] %vm538_vm2, %v780_v60  ;;  %v748_v17 = vpop.permute.xlu0 %747  ;;  %v9963_v60 = vrot.slane %v6089_v62, 1 }
 0x296   :  { %v6037_v9 = vld [vmem:[#allocation2 + $0x20] sm:$0xff]  ;;  %753 = vst.msk [vmem:[#allocation2 + $0x10] sm:$0x1] %vm538_vm2, %v748_v17  ;;  %v9961_v17 = vrot.slane %v6104_v7, 1 }
 0x297   :  { %v1234_v42 = vmul.f32 %v1229_v35, %v6037_v9  ;;  %v1207_v50 = vmul.f32 %v1203_v47, %v6037_v9  ;;  %v6073_v30 = vmul.f32 %v6062_v5, %v6037_v9  ;;  %v1272_v23 = vmul.f32 %v6049_v53, %v6037_v9 }
 0x298   :  { %v806_v37 = vmul.f32 %v6085_v12, %v6037_v9 }
 0x299   :  { %1242 = vrot.lane.b32.xlu2 %v1230_v46, %s5449_s21  ;;  %1250 = vrot.lane.b32.xlu1 %v1234_v42, %s5449_s21  ;;  %v9958_v26 = vrot.slane %v6073_v30, 4 }
 0x29a   :  { %1218 = vrot.lane.b32.xlu0 %v1207_v50, %s5449_s21  ;;  %v9962_v50 = vrot.slane %v6093_v43, 5 }
 0x29d   :  { %v6046_v0 = vld [vmem:[#allocation2 + $0x10] sm:$0x3f]  ;;  %v782_v52 = vpop.permute.xlu0 %781 }
 0x29e   :  { %786 = vst.msk [vmem:[#allocation2 + $0x2a] sm:$0x1] %vm538_vm2, %v782_v52  ;;  %v1232_v55 = vmul.f32 %v1229_v35, %v6046_v0  ;;  %v9960_v52 = vrot.slane %v6123_v28, 5  ;;  %vm4926_vm2 = vcmask 911104  }
 0x2a1   :  { %1248 = vrot.lane.b32.xlu2 %v1233_v13, %s5449_s21  ;;  %1282 = vrot.lane.b32.xlu1 %v1269_v39, %s5449_s21  ;;  %v1017_v13 = vsel %vm1007_vm6, %v9963_v60, %v1016_v11  ;;  %v6151_v39 = vmul.f32 %v6077_v61, %v6055_v44  ;;  %v1271_v11 = vmul.f32 %v6049_v53, %v6003_v19 }
 0x2a2   :  { %1246 = vrot.lane.b32.xlu0 %v1232_v55, %s5449_s21 }
 0x2a5   :  { %v6081_v47 = vld [vmem:[#allocation2 + $0x28] sm:$0x3f] }
 0x2a6   :  { %v1235_v51 = vmul.f32 %v1229_v35, %v6081_v47  ;;  %v6114_v24 = vmul.f32 %v6098_v54, %v6081_v47  ;;  %v860_v15 = vmul.f32 %v6062_v5, %v6081_v47  ;;  %v6130_v34 = vmul.f32 %v6119_v27, %v6081_v47 }
 0x2a7   :  { %v818_v35 = vmul.f32 %v6095_v3, %v6081_v47 }
 0x2a8   :  { %10060 = vst [vmem:[#allocation30_spill] sm:$0xff] %v6114_v24  ;;  %v9957_v32 = vrot.slane %v6114_v24, 4  ;;  %v876_v33 = vrot.slane %v860_v15, 4  ;;  %v9956_v4 = vrot.slane %v6130_v34, 4  ;;  %v1157_v15 = vsel %vm974_vm4, %v9962_v50, %v1156_v8 }
 0x2a9   :  { %1280 = vrot.lane.b32.xlu2 %v1268_v16, %s5449_s21  ;;  %1288 = vrot.lane.b32.xlu1 %v1272_v23, %s5449_s21  ;;  %10061 = vst [vmem:[#allocation31_spill] sm:$0xff] %v6130_v34  ;;  %v6158_v16 = vstv %s6100_s8  ;;  %v9959_v8 = vrot.slane %v6151_v39, 1  ;;  %s5206_s8 = sld [smem:[#allocation9 + $0xa]]  ;;  %v10370_v34 = vrot.slane %v6089_v62, 1 }
 0x2aa   :  { %1252 = vrot.lane.b32.xlu0 %v1235_v51, %s5449_s21  ;;  %v877_v46 = vsel %vm867_vm5, %v9958_v26, %v876_v33  ;;  %v921_v42 = vadd.f32 %v9957_v32, %v818_v35  ;;  %v1307_v33 = vmul.f32 %v1305_v41, %v6026_v29  ;;  %v6199_v32 = vld [vmem:[#allocation3 + $0x8] sm:$0xff]  ;;  %v1308_v26 = vmul.f32 %v1305_v41, %v6046_v0 }
 0x2ab   :  { %v885_v55 = vadd.f32 %v877_v46, %v806_v37  ;;  %v832_v37 = vmul.f32 %v6158_v16, %v6081_v47  ;;  %v1270_v46 = vmul.f32 %v6049_v53, %v6046_v0 }
 0x2ac   :  { %v1061_v51 = vadd.f32 %v9961_v17, %v921_v42 }
 0x2ad   :  { %v1025_v23 = vadd.f32 %v1017_v13, %v885_v55  ;;  %v957_v55 = vadd.f32 %v9956_v4, %v832_v37  ;;  %v6197_v4 = vld [vmem:[#allocation3 + $0x18] sm:$0xff] }
 0x2ae   :  { %v6168_v35 = vadd.f32 %v9960_v52, %v1061_v51  ;;  %v1306_v51 = vmul.f32 %v1305_v41, %v6010_v48 }
 0x2af   :  { %v6174_v42 = vadd.f32 %v1157_v15, %v1025_v23  ;;  %v6184_v13 = vadd.f32 %v9959_v8, %v957_v55  ;;  %v1310_v23 = vmul.f32 %v1305_v41, %v6037_v9  ;;  %v6188_v15 = vld [vmem:[#allocation3] sm:$0xff]  ;;  %v1311_v8 = vmul.f32 %v1305_v41, %v6081_v47 }
 0x2b0   :  { %10062 = vst [vmem:[#allocation32_spill] sm:$0xff] %v6168_v35 }
 0x2b1   :  { %1286 = vrot.lane.b32.xlu2 %v1271_v11, %s5449_s21  ;;  %1320 = vrot.lane.b32.xlu1 %v1307_v33, %s5449_s21  ;;  %10063 = vst [vmem:[#allocation33_spill] sm:$0xff] %v6184_v13  ;;  %v1273_v11 = vmul.f32 %v6049_v53, %v6081_v47  ;;  %v1479_v33 = vstv %s5184_s9  ;;  %s5207_s9 = sld [smem:[#allocation9 + $0x11]] }
 0x2b2   :  { %1284 = vrot.lane.b32.xlu0 %v1270_v46, %s5449_s21  ;;  %v1480_v37 = vmul.f32 %v1479_v33, %v6188_v15  ;;  %v1309_v46 = vmul.f32 %v1305_v41, %v6003_v19  ;;  %v1481_v53 = vmul.f32 %v1479_v33, %v6199_v32 }
 0x2b4   :  { %v1488_v55 = vrot.slane %v1480_v37, 5  ;;  %v6207_v37 = vld [vmem:[#allocation3 + $0x10] sm:$0x3f] }
 0x2b9   :  { %1318 = vrot.lane.b32.xlu2 %v1306_v51, %s5449_s21  ;;  %1326 = vrot.lane.b32.xlu1 %v1310_v23, %s5449_s21  ;;  %v1482_v51 = vmul.f32 %v1479_v33, %v6197_v4  ;;  %v1489_v23 = vrot.slane %v1481_v53, 5  ;;  %v6215_v53 = vstv %s5185_s11  ;;  %s5209_s11 = sld [smem:[#allocation9 + $0x1f]] }
 0x2ba   :  { %1290 = vrot.lane.b32.xlu0 %v1273_v11, %s5449_s21 }
 0x2bb   :  { %v1491_v11 = vrot.slane %v1482_v51, 5  ;;  %v6219_v51 = vmul.f32 %v6215_v53, %v6059_v20  ;;  %v1490_v41 = vsel %vm974_vm4, %v1488_v55, %v1489_v23 }
 0x2c1   :  { %1324 = vrot.lane.b32.xlu2 %v1309_v46, %s5449_s21  ;;  %1494 = vrot.lane.b32.xlu1 %v1488_v55, %s5449_s21  ;;  %v1559_v46 = vstv %s5186_s10  ;;  %s5208_s10 = sld [smem:[#allocation9 + $0x18]] }
 0x2c2   :  { %1322 = vrot.lane.b32.xlu0 %v1308_v26, %s5449_s21  ;;  %v1483_v26 = vmul.f32 %v1479_v33, %v6059_v20  ;;  %v1562_v52 = vmul.f32 %v1559_v46, %v6207_v37  ;;  %v9966_v33 = vrot.slane %v6219_v51, 1 }
 0x2c4   :  { %v1492_v17 = vrot.slane %v1483_v26, 5  ;;  %v1575_v50 = vrot.slane %v1562_v52, 1  ;;  %v1565_v52 = vmul.f32 %v1559_v46, %v6055_v44 }
 0x2c6   :  { %v1580_v60 = vrot.slane %v1565_v52, 1  ;;  %v1493_v55 = vsel %vm974_vm4, %v1491_v11, %v1492_v17  ;;  %v1521_v52 = vmul.f32 %v6215_v53, %v6199_v32 }
 0x2c8   :  { %v1533_v58 = vrot.slane %v1521_v52, 1 }
 0x2c9   :  { %1498 = vrot.lane.b32.xlu2 %v1489_v23, %s5449_s21  ;;  %1500 = vrot.lane.b32.xlu1 %v1491_v11, %s5449_s21  ;;  %v1522_v23 = vmul.f32 %v6215_v53, %v6207_v37  ;;  %v1564_v11 = vmul.f32 %v1559_v46, %v6059_v20 }
 0x2ca   :  { %1328 = vrot.lane.b32.xlu0 %v1311_v8, %s5449_s21  ;;  %v1523_v8 = vmul.f32 %v6215_v53, %v6197_v4 }
 0x2cc   :  { %v1537_v26 = vrot.slane %v1523_v8, 1  ;;  %v1610_v8 = vmul.f32 %v1607_v63, %v6207_v37 }
 0x2ce   :  { %v1539_v21 = vsel %vm1007_vm6, %v1537_v26, %v9966_v33  ;;  %v1535_v26 = vrot.slane %v1522_v23, 1  ;;  %v1560_v23 = vmul.f32 %v1559_v46, %v6188_v15 }
 0x2d0   :  { %v1572_v52 = vrot.slane %v1560_v23, 1 }
 0x2d1   :  { %1504 = vrot.lane.b32.xlu2 %v1492_v17, %s5449_s21  ;;  %1586 = vrot.lane.b32.xlu1 %v1575_v50, %s5449_s21  ;;  %v1536_v17 = vsel %vm1007_vm6, %v1533_v58, %v1535_v26  ;;  %v1609_v26 = vmul.f32 %v1607_v63, %v6199_v32 }
 0x2d2   :  { %1496 = vrot.lane.b32.xlu0 %v1490_v41, %s5449_s21  ;;  %v1561_v41 = vmul.f32 %v1559_v46, %v6199_v32 }
 0x2d4   :  { %v1573_v33 = vrot.slane %v1561_v41, 1  ;;  %v1578_v41 = vrot.slane %v1564_v11, 1 }
 0x2d6   :  { %v1576_v45 = vsel %vm1007_vm6, %v1573_v33, %v1575_v50  ;;  %v1581_v50 = vsel %vm1007_vm6, %v1578_v41, %v1580_v60 }
 0x2d9   :  { %1546 = vrot.lane.b32.xlu2 %v1539_v21, %s5449_s21  ;;  %1592 = vrot.lane.b32.xlu1 %v1580_v60, %s5449_s21  ;;  %v1623_v21 = vrot.slane %v1610_v8, 1  ;;  %v1621_v60 = vrot.slane %v1609_v26, 1  ;;  %v1608_v26 = vmul.f32 %v1607_v63, %v6188_v15 }
 0x2da   :  { %1502 = vrot.lane.b32.xlu0 %v1493_v55, %s5449_s21  ;;  %v1613_v55 = vmul.f32 %v1607_v63, %v6055_v44 }
 0x2db   :  { %v1624_v31 = vsel %vm1007_vm6, %v1621_v60, %v1623_v21  ;;  %v6283_v57 = vpop.permute.xlu1 %1216 }
 0x2dc   :  { %v1628_v8 = vrot.slane %v1613_v55, 1  ;;  %v1563_v55 = vmul.f32 %v1559_v46, %v6197_v4  ;;  %10066 = vst [vmem:[#allocation36_spill] sm:$0xff] %v6283_v57 }
 0x2e1   :  { %1584 = vrot.lane.b32.xlu2 %v1576_v45, %s5449_s21  ;;  %1634 = vrot.lane.b32.xlu1 %v1623_v21, %s5449_s21  ;;  %v1574_v45 = vsel %vm1007_vm6, %v1572_v52, %v1573_v33  ;;  %v1612_v52 = vmul.f32 %v1607_v63, %v6059_v20  ;;  %v1620_v21 = vrot.slane %v1608_v26, 1 }
 0x2e2   :  { %1544 = vrot.lane.b32.xlu0 %v1536_v17, %s5449_s21  ;;  %v6256_v17 = vstv %s5188_s2  ;;  %s5211_s2 = sld [smem:[#allocation9 + $0x2d]] }
 0x2e3   :  { %v1658_v11 = vmul.f32 %v6256_v17, %v6207_v37  ;;  %v1661_v46 = vmul.f32 %v6256_v17, %v6055_v44 }
 0x2e5   :  { %v1671_v23 = vrot.slane %v1658_v11, 1  ;;  %v1626_v11 = vrot.slane %v1612_v52, 1 }
 0x2e9   :  { %1590 = vrot.lane.b32.xlu2 %v1581_v50, %s5449_s21  ;;  %1640 = vrot.lane.b32.xlu1 %v1628_v8, %s5449_s21  ;;  %v1577_v50 = vrot.slane %v1563_v55, 1  ;;  %v1676_v55 = vrot.slane %v1661_v46, 1 }
 0x2ea   :  { %1582 = vrot.lane.b32.xlu0 %v1574_v45, %s5449_s21 }
 0x2eb   :  { %v6258_v18 = vpop.permute.xlu2 %1214  ;;  %v1579_v33 = vsel %vm1007_vm6, %v1577_v50, %v1578_v41  ;;  %v1622_v41 = vsel %vm1007_vm6, %v1620_v21, %v1621_v60  ;;  %v1657_v50 = vmul.f32 %v6256_v17, %v6199_v32 }
 0x2ec   :  { %10064 = vst [vmem:[#allocation34_spill] sm:$0xff] %v6258_v18  ;;  %v2607_v18 = vstv %s5211_s2  ;;  %s5237_s2 = sld [smem:[#allocation9 + $0x21]] }
 0x2ed   :  { %v1669_v46 = vrot.slane %v1657_v50, 1 }
 0x2ef   :  { %v1672_v60 = vsel %vm1007_vm6, %v1669_v46, %v1671_v23 }
 0x2f1   :  { %1632 = vrot.lane.b32.xlu2 %v1624_v31, %s5449_s21  ;;  %1682 = vrot.lane.b32.xlu1 %v1671_v23, %s5449_s21  ;;  %v1629_v31 = vsel %vm1007_vm6, %v1626_v11, %v1628_v8  ;;  %v1611_v8 = vmul.f32 %v1607_v63, %v6197_v4  ;;  %v1660_v63 = vmul.f32 %v6256_v17, %v6059_v20 }
 0x2f2   :  { %1588 = vrot.lane.b32.xlu0 %v1579_v33, %s5449_s21  ;;  %v1520_v33 = vmul.f32 %v6215_v53, %v6188_v15 }
 0x2f3   :  { %v6269_v45 = vpop.permute.xlu2 %1242 }
 0x2f4   :  { %10065 = vst [vmem:[#allocation35_spill] sm:$0xff] %v6269_v45  ;;  %v1532_v26 = vrot.slane %v1520_v33, 1 }
 0x2f6   :  { %v1534_v21 = vsel %vm1007_vm6, %v1532_v26, %v1533_v58  ;;  %v1656_v58 = vmul.f32 %v6256_v17, %v6188_v15 }
 0x2f8   :  { %v1668_v26 = vrot.slane %v1656_v58, 1 }
 0x2f9   :  { %1638 = vrot.lane.b32.xlu2 %v1629_v31, %s5449_s21  ;;  %1688 = vrot.lane.b32.xlu1 %v1676_v55, %s5449_s21  ;;  %v1625_v31 = vrot.slane %v1611_v8, 1  ;;  %v1674_v8 = vrot.slane %v1660_v63, 1  ;;  %v1383_v63 = vstv %s5182_s14  ;;  %s5213_s14 = sld [smem:[#allocation9 + $0x3b]] }
 0x2fa   :  { %1630 = vrot.lane.b32.xlu0 %v1622_v41, %s5449_s21  ;;  %v1525_v41 = vmul.f32 %v6215_v53, %v6055_v44  ;;  %v6304_v53 = vpop.permute.xlu0 %1212  ;;  %v1385_v40 = vmul.f32 %v1383_v63, %v6026_v29  ;;  %v1388_v49 = vmul.f32 %v1383_v63, %v6037_v9 }
 0x2fb   :  { %v6285_v52 = vpop.permute.xlu2 %1248  ;;  %v1627_v38 = vsel %vm1007_vm6, %v1625_v31, %v1626_v11  ;;  %10070 = vst [vmem:[#allocation40_spill] sm:$0xff] %v6304_v53  ;;  %v10071_v11 = vrot.slane %v6219_v51, 1 }
 0x2fc   :  { %10067 = vst [vmem:[#allocation37_spill] sm:$0xff] %v6285_v52  ;;  %v1540_v33 = vrot.slane %v1525_v41, 1  ;;  %v1670_v41 = vsel %vm1007_vm6, %v1668_v26, %v1669_v46 }
 0x2fe   :  { %v1541_v31 = vsel %vm1007_vm6, %v10071_v11, %v1540_v33  ;;  %v6327_v33 = vmul.f32 %v1383_v63, %v6046_v0 }
 0x301   :  { %1680 = vrot.lane.b32.xlu2 %v1672_v60, %s5449_s21  ;;  %1542 = vrot.lane.b32.xlu1 %v1534_v21, %s5449_s21  ;;  %v6306_v60 = vstv %s5181_s13  ;;  %s5212_s13 = sld [smem:[#allocation9 + $0x34]] }
 0x302   :  { %1636 = vrot.lane.b32.xlu0 %v1627_v38, %s5449_s21  ;;  %v1677_v38 = vsel %vm1007_vm6, %v1674_v8, %v1676_v55  ;;  %v1346_v21 = vmul.f32 %v6306_v60, %v6046_v0  ;;  %v6320_v55 = vmul.f32 %v6306_v60, %v6026_v29 }
 0x303   :  { %v6298_v50 = vpop.permute.xlu1 %1244  ;;  %v6300_v23 = vpop.permute.xlu2 %1280 }
 0x304   :  { %10068 = vst [vmem:[#allocation38_spill] sm:$0xff] %v6298_v50  ;;  %v1359_v46 = vrot.slane %v1346_v21, 4  ;;  %v9976_v26 = vrot.slane %v6320_v55, 4  ;;  %v6346_v21 = vmul.f32 %v6339_v10, %v6199_v32 }
 0x305   :  { %10069 = vst [vmem:[#allocation39_spill] sm:$0xff] %v6300_v23 }
 0x306   :  { %v1360_v14 = vsel %vm867_vm5, %v9976_v26, %v1359_v46  ;;  %v6355_v26 = vmul.f32 %v1383_v63, %v6081_v47  ;;  %v9982_v56 = vrot.slane %v6346_v21, 5 }
 0x309   :  { %1686 = vrot.lane.b32.xlu2 %v1677_v38, %s5449_s21  ;;  %1548 = vrot.lane.b32.xlu1 %v1541_v31, %s5449_s21  ;;  %v1659_v38 = vmul.f32 %v6256_v17, %v6197_v4  ;;  %v1399_v31 = vrot.slane %v6327_v33, 4  ;;  %v1384_v33 = vmul.f32 %v1383_v63, %v6010_v48 }
 0x30a   :  { %1678 = vrot.lane.b32.xlu0 %v1670_v41, %s5449_s21 }
 0x30b   :  { %v6322_v51 = vpop.permute.xlu2 %1286  ;;  %v6324_v58 = vpop.permute.xlu1 %1250  ;;  %v1673_v41 = vrot.slane %v1659_v38, 1  ;;  %v1396_v59 = vrot.slane %v1384_v33, 4  ;;  %v1431_v33 = vstv %s5183_s16  ;;  %s5215_s16 = sld [smem:[#allocation9 + $0x49]] }
 0x30c   :  { %10072 = vst [vmem:[#allocation41_spill] sm:$0xff] %v6322_v51  ;;  %v6331_v11 = vpop.permute.xlu0 %1218  ;;  %v1436_v50 = vmul.f32 %v1431_v33, %v6037_v9 }
 0x30d   :  { %10073 = vst [vmem:[#allocation42_spill] sm:$0xff] %v6324_v58  ;;  %v1675_v17 = vsel %vm1007_vm6, %v1673_v41, %v1674_v8  ;;  %v1397_v41 = vrot.slane %v1385_v40, 4  ;;  %v1348_v40 = vmul.f32 %v6306_v60, %v6037_v9 }
 0x30e   :  { %10074 = vst [vmem:[#allocation43_spill] sm:$0xff] %v6331_v11 }
 0x30f   :  { %v1398_v22 = vsel %vm867_vm5, %v1396_v59, %v1397_v41 }
 0x311   :  { %1410 = vrot.lane.b32.xlu2 %v1399_v31, %s5449_s21  ;;  %1368 = vrot.lane.b32.xlu1 %v1360_v14, %s5449_s21  ;;  %v1704_v14 = vmul.f32 %v6339_v10, %v6188_v15 }
 0x312   :  { %1684 = vrot.lane.b32.xlu0 %v1675_v17, %s5449_s21  ;;  %v1404_v17 = vrot.slane %v6355_v26, 4  ;;  %v1387_v26 = vmul.f32 %v1383_v63, %v6003_v19  ;;  %v1433_v63 = vmul.f32 %v1431_v33, %v6026_v29 }
 0x313   :  { %v6350_v38 = vpop.permute.xlu2 %1318  ;;  %v6352_v46 = vpop.permute.xlu1 %1282  ;;  %v1716_v25 = vrot.slane %v1704_v14, 5 }
 0x314   :  { %10075 = vst [vmem:[#allocation44_spill] sm:$0xff] %v6350_v38  ;;  %v6359_v8 = vpop.permute.xlu0 %1246  ;;  %v1401_v38 = vrot.slane %v1387_v26, 4 }
 0x315   :  { %10076 = vst [vmem:[#allocation45_spill] sm:$0xff] %v6352_v46  ;;  %v1718_v13 = vsel %vm974_vm4, %v1716_v25, %v9982_v56  ;;  %v1402_v25 = vrot.slane %v1388_v49, 4  ;;  %v1362_v56 = vrot.slane %v1348_v40, 4 }
 0x316   :  { %10077 = vst [vmem:[#allocation46_spill] sm:$0xff] %v6359_v8  ;;  %v1347_v8 = vmul.f32 %v6306_v60, %v6003_v19 }
 0x318   :  { %v1361_v51 = vrot.slane %v1347_v8, 4  ;;  %v1437_v8 = vmul.f32 %v1431_v33, %v6081_v47 }
 0x319   :  { %1406 = vrot.lane.b32.xlu1 %v1398_v22, %s5449_s21  ;;  %1416 = vrot.lane.b32.xlu2 %v1404_v17, %s5449_s21  ;;  %v1434_v22 = vmul.f32 %v1431_v33, %v6046_v0 }
 0x31a   :  { %1726 = vrot.lane.b32.xlu0 %v1718_v13, %s5449_s21  ;;  %v1403_v13 = vsel %vm867_vm5, %v1401_v38, %v1402_v25  ;;  %v1445_v38 = vrot.slane %v1433_v63, 4 }
 0x31b   :  { %v6374_v14 = vpop.permute.xlu2 %1324  ;;  %v6376_v59 = vpop.permute.xlu1 %1288  ;;  %v1447_v58 = vrot.slane %v1434_v22, 4  ;;  %v1452_v22 = vrot.slane %v1437_v8, 4 }
 0x31c   :  { %10078 = vst [vmem:[#allocation47_spill] sm:$0xff] %v6374_v14  ;;  %v6381_v46 = vpop.permute.xlu0 %1252  ;;  %v1432_v14 = vmul.f32 %v1431_v33, %v6010_v48 }
 0x31d   :  { %10079 = vst [vmem:[#allocation48_spill] sm:$0xff] %v6376_v59  ;;  %v1363_v59 = vsel %vm867_vm5, %v1361_v51, %v1362_v56  ;;  %v1400_v51 = vsel %vm867_vm5, %v1397_v41, %v1399_v31  ;;  %v10087_v31 = vrot.slane %v6320_v55, 4 }
 0x31e   :  { %10080 = vst [vmem:[#allocation49_spill] sm:$0xff] %v6381_v46  ;;  %v1444_v26 = vrot.slane %v1432_v14, 4  ;;  %v7814_v46 = vld [vmem:[#allocation3 + $0x20] sm:$0xff] }
 0x31f   :  { %v7818_v35 = vmul.f32 %v7814_v46, %v6069_v1 }
 0x321   :  { %1412 = vrot.lane.b32.xlu1 %v1403_v13, %s5449_s21  ;;  %1458 = vrot.lane.b32.xlu2 %v1447_v58, %s5449_s21  ;;  %v1446_v13 = vsel %vm867_vm5, %v1444_v26, %v1445_v38  ;;  %v1450_v26 = vrot.slane %v1436_v50, 4  ;;  %v1405_v50 = vsel %vm867_vm5, %v1402_v25, %v1404_v17  ;;  %v1706_v25 = vmul.f32 %v6339_v10, %v6207_v37 }
 0x322   :  { %1370 = vrot.lane.b32.xlu0 %v1363_v59, %s5449_s21  ;;  %v1435_v59 = vmul.f32 %v1431_v33, %v6003_v19  ;;  %v1708_v33 = vmul.f32 %v6339_v10, %v6059_v20 }
 0x323   :  { %v6390_v23 = vpop.permute.xlu2 %1498  ;;  %v6392_v49 = vpop.permute.xlu1 %1320 }
 0x324   :  { %10081 = vst [vmem:[#allocation50_spill] sm:$0xff] %v6390_v23  ;;  %v6395_v40 = vpop.permute.xlu0 %1284  ;;  %v1344_v23 = vmul.f32 %v6306_v60, %v6010_v48 }
 0x325   :  { %10082 = vst [vmem:[#allocation51_spill] sm:$0xff] %v6392_v49 }
 0x326   :  { %10083 = vst [vmem:[#allocation52_spill] sm:$0xff] %v6395_v40  ;;  %v1449_v40 = vrot.slane %v1435_v59, 4 }
 0x328   :  { %v1451_v49 = vsel %vm867_vm5, %v1449_v40, %v1450_v26 }
 0x329   :  { %1454 = vrot.lane.b32.xlu1 %v1446_v13, %s5449_s21  ;;  %1464 = vrot.lane.b32.xlu2 %v1452_v22, %s5449_s21  ;;  %v1356_v13 = vrot.slane %v1344_v23, 4  ;;  %v1707_v23 = vmul.f32 %v6339_v10, %v6197_v4 }
 0x32a   :  { %1408 = vrot.lane.b32.xlu0 %v1400_v51, %s5449_s21  ;;  %v1349_v51 = vmul.f32 %v6306_v60, %v6081_v47 }
 0x32b   :  { %v6406_v63 = vpop.permute.xlu2 %1504  ;;  %v6408_v14 = vpop.permute.xlu1 %1326  ;;  %v1358_v41 = vsel %vm867_vm5, %v1356_v13, %v10087_v31  ;;  %v1722_v13 = vrot.slane %v1708_v33, 5  ;;  %v1721_v60 = vrot.slane %v1707_v23, 5 }
 0x32c   :  { %10084 = vst [vmem:[#allocation53_spill] sm:$0xff] %v6406_v63  ;;  %v6410_v8 = vpop.permute.xlu0 %1290  ;;  %v1364_v31 = vrot.slane %v1349_v51, 4  ;;  %v1743_v63 = vstv %s5190_s17  ;;  %s5216_s17 = sld [smem:[#allocation9 + $0x50]] }
 0x32d   :  { %10085 = vst [vmem:[#allocation54_spill] sm:$0xff] %v6408_v14  ;;  %v1746_v17 = vmul.f32 %v1743_v63, %v6207_v37  ;;  %v1745_v33 = vmul.f32 %v1743_v63, %v6199_v32 }
 0x32e   :  { %10086 = vst [vmem:[#allocation55_spill] sm:$0xff] %v6410_v8 }
 0x331   :  { %1460 = vrot.lane.b32.xlu1 %v1451_v49, %s5449_s21  ;;  %1366 = vrot.lane.b32.xlu2 %v1358_v41, %s5449_s21  ;;  %v1723_v49 = vsel %vm974_vm4, %v1721_v60, %v1722_v13  ;;  %v1365_v41 = vsel %vm867_vm5, %v1362_v56, %v1364_v31  ;;  %v1759_v31 = vrot.slane %v1746_v17, 5  ;;  %v1719_v60 = vrot.slane %v1706_v25, 5 }
 0x332   :  { %1414 = vrot.lane.b32.xlu0 %v1405_v50, %s5449_s21  ;;  %v1448_v50 = vsel %vm867_vm5, %v1445_v38, %v1447_v58  ;;  %v1749_v58 = vmul.f32 %v1743_v63, %v6055_v44  ;;  %v1453_v38 = vsel %vm867_vm5, %v1450_v26, %v1452_v22  ;;  %v1748_v17 = vmul.f32 %v1743_v63, %v6059_v20 }
 0x333   :  { %v6426_v55 = vpop.permute.xlu2 %1546  ;;  %v6428_v40 = vpop.permute.xlu1 %1494  ;;  %v1744_v25 = vmul.f32 %v1743_v63, %v6188_v15  ;;  %v1747_v20 = vmul.f32 %v1743_v63, %v6197_v4 }
 0x334   :  { %10088 = vst [vmem:[#allocation56_spill] sm:$0xff] %v6426_v55  ;;  %v6430_v59 = vpop.permute.xlu0 %1322 }
 0x335   :  { %10089 = vst [vmem:[#allocation57_spill] sm:$0xff] %v6428_v40 }
 0x336   :  { %10090 = vst [vmem:[#allocation58_spill] sm:$0xff] %v6430_v59  ;;  %v1757_v59 = vrot.slane %v1745_v33, 5 }
 0x338   :  { %v1760_v55 = vsel %vm974_vm4, %v1757_v59, %v1759_v31 }
 0x339   :  { %1730 = vrot.lane.b32.xlu1 %v1723_v49, %s5449_s21  ;;  %1372 = vrot.lane.b32.xlu2 %v1365_v41, %s5449_s21  ;;  %v10094_v49 = vrot.slane %v6346_v21, 5 }
 0x33a   :  { %1456 = vrot.lane.b32.xlu0 %v1448_v50, %s5449_s21  ;;  %v1709_v50 = vmul.f32 %v6339_v10, %v6055_v44 }
 0x33b   :  { %v6442_v51 = vpop.permute.xlu2 %1584  ;;  %v6444_v23 = vpop.permute.xlu1 %1500  ;;  %v1720_v41 = vsel %vm974_vm4, %v10094_v49, %v1719_v60 }
 0x33c   :  { %10091 = vst [vmem:[#allocation59_spill] sm:$0xff] %v6442_v51  ;;  %v6446_v56 = vpop.permute.xlu0 %1328  ;;  %v1724_v49 = vrot.slane %v1709_v50, 5  ;;  %v1756_v51 = vrot.slane %v1744_v25, 5  ;;  %v1791_v50 = vstv %s5191_s18  ;;  %s5217_s18 = sld [smem:[#allocation9 + $0x57]] }
 0x33d   :  { %10092 = vst [vmem:[#allocation60_spill] sm:$0xff] %v6444_v23 }
 0x33e   :  { %10093 = vst [vmem:[#allocation61_spill] sm:$0xff] %v6446_v56  ;;  %v1758_v10 = vsel %vm974_vm4, %v1756_v51, %v1757_v59  ;;  %v1725_v44 = vsel %vm974_vm4, %v1722_v13, %v1724_v49  ;;  %v1793_v59 = vmul.f32 %v1791_v50, %v6026_v29  ;;  %v1817_v49 = vstv %s5192_s19  ;;  %v6703_v56 = vld [vmem:[#allocation3 + $0x28] sm:$0x3f]  ;;  %s5218_s19 = sld [smem:[#allocation9 + $0x5e]] }
 0x341   :  { %1768 = vrot.lane.b32.xlu1 %v1760_v55, %s5449_s21  ;;  %1728 = vrot.lane.b32.xlu2 %v1720_v41, %s5449_s21  ;;  %v1764_v55 = vrot.slane %v1749_v58, 5  ;;  %v1762_v41 = vrot.slane %v1748_v17, 5  ;;  %v1761_v17 = vrot.slane %v1747_v20, 5  ;;  %v1821_v20 = vmul.f32 %v1817_v49, %v6003_v19 }
 0x342   :  { %1462 = vrot.lane.b32.xlu0 %v1453_v38, %s5449_s21 }
 0x343   :  { %v6461_v21 = vpop.permute.xlu2 %1590  ;;  %v6463_v33 = vpop.permute.xlu1 %1586  ;;  %v1765_v22 = vsel %vm974_vm4, %v1762_v41, %v1764_v55  ;;  %v1763_v51 = vsel %vm974_vm4, %v1761_v17, %v1762_v41  ;;  %v1795_v17 = vmul.f32 %v1791_v50, %v6037_v9 }
 0x344   :  { %10095 = vst [vmem:[#allocation62_spill] sm:$0xff] %v6461_v21  ;;  %v6465_v60 = vpop.permute.xlu0 %1496 }
 0x345   :  { %10096 = vst [vmem:[#allocation63_spill] sm:$0xff] %v6463_v33 }
 0x346   :  { %10097 = vst [vmem:[#allocation64_spill] sm:$0xff] %v6465_v60 }
 0x349   :  { %1774 = vrot.lane.b32.xlu1 %v1765_v22, %s5449_s21  ;;  %1766 = vrot.lane.b32.xlu2 %v1758_v10, %s5449_s21  ;;  %v1818_v22 = vmul.f32 %v1817_v49, %v6010_v48  ;;  %v1792_v10 = vmul.f32 %v1791_v50, %v6010_v48 }
 0x34a   :  { %1732 = vrot.lane.b32.xlu0 %v1725_v44, %s5449_s21 }
 0x34b   :  { %v6474_v26 = vpop.permute.xlu2 %1632  ;;  %v6476_v58 = vpop.permute.xlu1 %1592 }
 0x34c   :  { %10098 = vst [vmem:[#allocation65_spill] sm:$0xff] %v6474_v26  ;;  %v6478_v38 = vpop.permute.xlu0 %1502  ;;  %v1822_v26 = vmul.f32 %v1817_v49, %v6037_v9 }
 0x34d   :  { %10099 = vst [vmem:[#allocation66_spill] sm:$0xff] %v6476_v58 }
 0x34e   :  { %10100 = vst [vmem:[#allocation67_spill] sm:$0xff] %v6478_v38  ;;  %v2147_v38 = vstv %s5200_s28  ;;  %s5226_s28 = sld [smem:[#allocation9 + $0x35]] }
 0x351   :  { %1802 = vrot.lane.b32.xlu1 %v1793_v59, %s5450_s20  ;;  %1772 = vrot.lane.b32.xlu2 %v1763_v51, %s5449_s21  ;;  %v1794_v59 = vmul.f32 %v1791_v50, %v6003_v19 }
 0x352   :  { %1770 = vrot.lane.b32.xlu0 %v1759_v31, %s5449_s21 }
 0x353   :  { %v6485_v63 = vpop.permute.xlu2 %1638  ;;  %v6487_v13 = vpop.permute.xlu1 %1634 }
 0x354   :  { %10101 = vst [vmem:[#allocation68_spill] sm:$0xff] %v6485_v63  ;;  %v6489_v25 = vpop.permute.xlu0 %1544  ;;  %v1819_v63 = vmul.f32 %v1817_v49, %v6026_v29 }
 0x355   :  { %10102 = vst [vmem:[#allocation69_spill] sm:$0xff] %v6487_v13 }
 0x356   :  { %10103 = vst [vmem:[#allocation70_spill] sm:$0xff] %v6489_v25 }
 0x359   :  { %1830 = vrot.lane.b32.xlu1 %v1818_v22, %s5450_s20  ;;  %1800 = vrot.lane.b32.xlu2 %v1792_v10, %s5450_s20  ;;  %v1855_v10 = vstv %s5193_s22  ;;  %s5220_s22 = sld [smem:[#allocation9 + $0xb]] }
 0x35a   :  { %1776 = vrot.lane.b32.xlu0 %v1764_v55, %s5449_s21  ;;  %v1856_v13 = vmul.f32 %v1855_v10, %v6010_v48  ;;  %s5194_s21 = sld [smem:[#allocation9 + $0x17]] }
 0x35b   :  { %v6496_v41 = vpop.permute.xlu2 %1680  ;;  %v6498_v31 = vpop.permute.xlu1 %1640 }
 0x35c   :  { %10104 = vst [vmem:[#allocation71_spill] sm:$0xff] %v6496_v41  ;;  %v6500_v44 = vpop.permute.xlu0 %1582  ;;  %v1820_v41 = vmul.f32 %v1817_v49, %v6046_v0 }
 0x35d   :  { %10105 = vst [vmem:[#allocation72_spill] sm:$0xff] %v6498_v31  ;;  %v1860_v31 = vmul.f32 %v1855_v10, %v6037_v9 }
 0x35e   :  { %10106 = vst [vmem:[#allocation73_spill] sm:$0xff] %v6500_v44  ;;  %v1861_v44 = vmul.f32 %v1855_v10, %v6081_v47 }
 0x361   :  { %1836 = vrot.lane.b32.xlu1 %v1821_v20, %s5450_s20  ;;  %1806 = vrot.lane.b32.xlu2 %v1795_v17, %s5450_s20 }
 0x362   :  { %1804 = vrot.lane.b32.xlu0 %v1794_v59, %s5450_s20  ;;  %v1859_v59 = vmul.f32 %v1855_v10, %v6003_v19 }
 0x363   :  { %v6508_v55 = vpop.permute.xlu2 %1686  ;;  %v6510_v51 = vpop.permute.xlu1 %1682 }
 0x364   :  { %10107 = vst [vmem:[#allocation74_spill] sm:$0xff] %v6508_v55  ;;  %v6512_v22 = vpop.permute.xlu0 %1588 }
 0x365   :  { %10108 = vst [vmem:[#allocation75_spill] sm:$0xff] %v6510_v51  ;;  %v1823_v51 = vmul.f32 %v1817_v49, %v6081_v47  ;;  %v1857_v49 = vmul.f32 %v1855_v10, %v6026_v29 }
 0x366   :  { %10109 = vst [vmem:[#allocation76_spill] sm:$0xff] %v6512_v22  ;;  %v1858_v22 = vmul.f32 %v1855_v10, %v6046_v0 }
 0x369   :  { %1868 = vrot.lane.b32.xlu1 %v1856_v13, %s5450_s20  ;;  %1834 = vrot.lane.b32.xlu2 %v1820_v41, %s5450_s20 }
 0x36a   :  { %1832 = vrot.lane.b32.xlu0 %v1819_v63, %s5450_s20 }
 0x36b   :  { %v6520_v50 = vpop.permute.xlu1 %1688  ;;  %v6522_v20 = vpop.permute.xlu2 %1410 }
 0x36c   :  { %10110 = vst [vmem:[#allocation77_spill] sm:$0xff] %v6520_v50  ;;  %v6524_v17 = vpop.permute.xlu0 %1630 }
 0x36d   :  { %10111 = vst [vmem:[#allocation78_spill] sm:$0xff] %v6522_v20 }
 0x36e   :  { %10112 = vst [vmem:[#allocation79_spill] sm:$0xff] %v6524_v17  ;;  %v1893_v17 = vstv %s5194_s21  ;;  %s5452_s21 = smov 124  }
 0x36f   :  { %v1894_v21 = vmul.f32 %v1893_v17, %v6010_v48  ;;  %v1896_v10 = vmul.f32 %v1893_v17, %v6046_v0  ;;  %v1899_v25 = vmul.f32 %v1893_v17, %v6081_v47 }
 0x371   :  { %1874 = vrot.lane.b32.xlu1 %v1859_v59, %s5450_s20  ;;  %1840 = vrot.lane.b32.xlu2 %v1823_v51, %s5450_s20 }
 0x372   :  { %1838 = vrot.lane.b32.xlu0 %v1822_v26, %s5450_s20 }
 0x373   :  { %v6532_v63 = vpop.permute.xlu1 %1542  ;;  %v6534_v13 = vpop.permute.xlu2 %1416 }
 0x374   :  { %10113 = vst [vmem:[#allocation80_spill] sm:$0xff] %v6532_v63  ;;  %v6536_v41 = vpop.permute.xlu0 %1636  ;;  %v1931_v63 = vstv %s5195_s25  ;;  %s5221_s25 = sld [smem:[#allocation9 + $0x12]] }
 0x375   :  { %10114 = vst [vmem:[#allocation81_spill] sm:$0xff] %v6534_v13  ;;  %v1933_v33 = vmul.f32 %v1931_v63, %v6026_v29 }
 0x376   :  { %10115 = vst [vmem:[#allocation82_spill] sm:$0xff] %v6536_v41  ;;  %v1897_v41 = vmul.f32 %v1893_v17, %v6003_v19 }
 0x379   :  { %1906 = vrot.lane.b32.xlu1 %v1894_v21, %s5450_s20  ;;  %1872 = vrot.lane.b32.xlu2 %v1858_v22, %s5450_s20  ;;  %v1932_v21 = vmul.f32 %v1931_v63, %v6010_v48  ;;  %v1936_v48 = vmul.f32 %v1931_v63, %v6037_v9 }
 0x37a   :  { %1870 = vrot.lane.b32.xlu0 %v1857_v49, %s5450_s20 }
 0x37b   :  { %v6544_v26 = vpop.permute.xlu1 %1548  ;;  %v6546_v51 = vpop.permute.xlu2 %1458 }
 0x37c   :  { %10116 = vst [vmem:[#allocation83_spill] sm:$0xff] %v6544_v26  ;;  %v6548_v59 = vpop.permute.xlu0 %1678 }
 0x37d   :  { %10117 = vst [vmem:[#allocation84_spill] sm:$0xff] %v6546_v51  ;;  %v1944_v51 = vrot.slane %v1932_v21, 4 }
 0x37e   :  { %10118 = vst [vmem:[#allocation85_spill] sm:$0xff] %v6548_v59  ;;  %v1945_v59 = vrot.slane %v1933_v33, 4 }
 0x380   :  { %v1946_v50 = vsel %vm867_vm5, %v1944_v51, %v1945_v59 }
 0x381   :  { %1912 = vrot.lane.b32.xlu1 %v1897_v41, %s5450_s20  ;;  %1878 = vrot.lane.b32.xlu2 %v1861_v44, %s5450_s20  ;;  %v1895_v41 = vmul.f32 %v1893_v17, %v6026_v29  ;;  %v1937_v44 = vmul.f32 %v1931_v63, %v6081_v47 }
 0x382   :  { %1876 = vrot.lane.b32.xlu0 %v1860_v31, %s5450_s20 }
 0x383   :  { %v6558_v22 = vpop.permute.xlu1 %1368  ;;  %v6560_v49 = vpop.permute.xlu2 %1464  ;;  %v1952_v51 = vrot.slane %v1937_v44, 4 }
 0x384   :  { %10119 = vst [vmem:[#allocation86_spill] sm:$0xff] %v6558_v22  ;;  %v6562_v19 = vpop.permute.xlu0 %1684 }
 0x385   :  { %10120 = vst [vmem:[#allocation87_spill] sm:$0xff] %v6560_v49 }
 0x386   :  { %10121 = vst [vmem:[#allocation88_spill] sm:$0xff] %v6562_v19  ;;  %v1950_v19 = vrot.slane %v1936_v48, 4 }
 0x388   :  { %v1953_v49 = vsel %vm867_vm5, %v1950_v19, %v1952_v51 }
 0x389   :  { %1954 = vrot.lane.b32.xlu1 %v1946_v50, %s5450_s20  ;;  %1910 = vrot.lane.b32.xlu2 %v1896_v10, %s5450_s20  ;;  %v1898_v50 = vmul.f32 %v1893_v17, %v6037_v9  ;;  %v1934_v10 = vmul.f32 %v1931_v63, %v6046_v0 }
 0x38a   :  { %1908 = vrot.lane.b32.xlu0 %v1895_v41, %s5450_s20  ;;  %v1971_v41 = vstv %s5196_s0  ;;  %s5222_s0 = sld [smem:[#allocation9 + $0x19]] }
 0x38b   :  { %v6572_v31 = vpop.permute.xlu1 %1406  ;;  %v6574_v33 = vpop.permute.xlu2 %1366  ;;  %v1974_v51 = vmul.f32 %v1971_v41, %v6046_v0 }
 0x38c   :  { %10122 = vst [vmem:[#allocation89_spill] sm:$0xff] %v6572_v31  ;;  %v6576_v21 = vpop.permute.xlu0 %1726  ;;  %v6585_v31 = vld [vmem:[#allocation2 + $0x18] sm:$0xff] }
 0x38d   :  { %10123 = vst [vmem:[#allocation90_spill] sm:$0xff] %v6574_v33  ;;  %v1935_v44 = vmul.f32 %v6585_v31, %v1931_v63  ;;  %v1973_v63 = vmul.f32 %v1971_v41, %v6026_v29 }
 0x38e   :  { %10124 = vst [vmem:[#allocation91_spill] sm:$0xff] %v6576_v21 }
 0x38f   :  { %v1949_v33 = vrot.slane %v1935_v44, 4  ;;  %v6606_v44 = vld [vmem:[#allocation2] sm:$0xff] }
 0x391   :  { %1960 = vrot.lane.b32.xlu1 %v1953_v49, %s5450_s20  ;;  %1916 = vrot.lane.b32.xlu2 %v1899_v25, %s5450_s20  ;;  %v1947_v49 = vrot.slane %v1934_v10, 4  ;;  %v1987_v25 = vrot.slane %v1974_v51, 4  ;;  %v1951_v20 = vsel %vm867_vm5, %v1949_v33, %v1950_v19  ;;  %v1977_v10 = vmul.f32 %v1971_v41, %v6081_v47 }
 0x392   :  { %1914 = vrot.lane.b32.xlu0 %v1898_v50, %s5450_s20  ;;  %v1972_v19 = vmul.f32 %v6606_v44, %v1971_v41 }
 0x393   :  { %v6588_v48 = vpop.permute.xlu1 %1412  ;;  %v6590_v21 = vpop.permute.xlu2 %1372  ;;  %v1948_v50 = vsel %vm867_vm5, %v1945_v59, %v1947_v49  ;;  %v1992_v51 = vrot.slane %v1977_v10, 4  ;;  %v1975_v10 = vmul.f32 %v6585_v31, %v1971_v41 }
 0x394   :  { %10125 = vst [vmem:[#allocation92_spill] sm:$0xff] %v6588_v48  ;;  %v6593_v17 = vpop.permute.xlu0 %1370  ;;  %v1984_v59 = vrot.slane %v1972_v19, 4 }
 0x395   :  { %10126 = vst [vmem:[#allocation93_spill] sm:$0xff] %v6590_v21 }
 0x396   :  { %10127 = vst [vmem:[#allocation94_spill] sm:$0xff] %v6593_v17 }
 0x399   :  { %1998 = vrot.lane.b32.xlu1 %v1987_v25, %s5450_s20  ;;  %1958 = vrot.lane.b32.xlu2 %v1951_v20, %s5450_s20  ;;  %v1985_v20 = vrot.slane %v1973_v63, 4 }
 0x39a   :  { %1956 = vrot.lane.b32.xlu0 %v1948_v50, %s5450_s20  ;;  %v1976_v50 = vmul.f32 %v1971_v41, %v6037_v9 }
 0x39b   :  { %v6601_v48 = vpop.permute.xlu1 %1454  ;;  %v6603_v55 = vpop.permute.xlu2 %1728  ;;  %v1988_v29 = vsel %vm867_vm5, %v1985_v20, %v1987_v25  ;;  %v1986_v49 = vsel %vm867_vm5, %v1984_v59, %v1985_v20  ;;  %v6629_v59 = vld [vmem:[#allocation2 + $0x8] sm:$0xff] }
 0x39c   :  { %10128 = vst [vmem:[#allocation95_spill] sm:$0xff] %v6601_v48  ;;  %v6609_v33 = vpop.permute.xlu0 %1408  ;;  %v2019_v48 = vstv %s5197_s3  ;;  %v1990_v19 = vrot.slane %v1976_v50, 4  ;;  %s5223_s3 = sld [smem:[#allocation9 + $0x20]] }
 0x39d   :  { %10129 = vst [vmem:[#allocation96_spill] sm:$0xff] %v6603_v55  ;;  %v2022_v63 = vmul.f32 %v2019_v48, %v6046_v0  ;;  %v2025_v50 = vmul.f32 %v2019_v48, %v6081_v47  ;;  %v2067_v47 = vstv %s5198_s26  ;;  %s5224_s26 = sld [smem:[#allocation9 + $0x27]] }
 0x39e   :  { %10130 = vst [vmem:[#allocation97_spill] sm:$0xff] %v6609_v33  ;;  %v1993_v20 = vsel %vm867_vm5, %v1990_v19, %v1992_v51 }
 0x39f   :  { %v2035_v33 = vrot.slane %v2022_v63, 4 }
 0x3a1   :  { %2004 = vrot.lane.b32.xlu1 %v1992_v51, %s5450_s20  ;;  %1996 = vrot.lane.b32.xlu2 %v1988_v29, %s5450_s20  ;;  %v1989_v29 = vrot.slane %v1975_v10, 4  ;;  %v2020_v51 = vmul.f32 %v6606_v44, %v2019_v48 }
 0x3a2   :  { %1994 = vrot.lane.b32.xlu0 %v1986_v49, %s5450_s20  ;;  %v2021_v49 = vmul.f32 %v6629_v59, %v2019_v48 }
 0x3a3   :  { %v6617_v17 = vpop.permute.xlu1 %1460  ;;  %v6619_v55 = vpop.permute.xlu2 %1766  ;;  %v1991_v9 = vsel %vm867_vm5, %v1989_v29, %v1990_v19  ;;  %v2032_v19 = vrot.slane %v2020_v51, 4 }
 0x3a4   :  { %10131 = vst [vmem:[#allocation98_spill] sm:$0xff] %v6617_v17  ;;  %v6623_v25 = vpop.permute.xlu0 %1414  ;;  %v2033_v10 = vrot.slane %v2021_v49, 4 }
 0x3a5   :  { %10132 = vst [vmem:[#allocation99_spill] sm:$0xff] %v6619_v55 }
 0x3a6   :  { %10133 = vst [vmem:[#allocation100_spill] sm:$0xff] %v6623_v25  ;;  %v2036_v29 = vsel %vm867_vm5, %v2033_v10, %v2035_v33  ;;  %v2107_v25 = vstv %s5199_s27  ;;  %s5225_s27 = sld [smem:[#allocation9 + $0x2e]] }
 0x3a7   :  { %v2110_v23 = vmul.f32 %v2107_v25, %v6207_v37 }
 0x3a9   :  { %2046 = vrot.lane.b32.xlu1 %v2035_v33, %s5450_s20  ;;  %2002 = vrot.lane.b32.xlu2 %v1993_v20, %s5450_s20  ;;  %v2040_v20 = vrot.slane %v2025_v50, 4  ;;  %v2069_v50 = vmul.f32 %v2067_v47, %v6199_v32  ;;  %v2023_v33 = vmul.f32 %v6585_v31, %v2019_v48 }
 0x3aa   :  { %2000 = vrot.lane.b32.xlu0 %v1991_v9, %s5450_s20  ;;  %v2034_v9 = vsel %vm867_vm5, %v2032_v19, %v2033_v10 }
 0x3ab   :  { %v6633_v0 = vpop.permute.xlu1 %1730  ;;  %v6635_v41 = vpop.permute.xlu2 %1772  ;;  %v2037_v10 = vrot.slane %v2023_v33, 4 }
 0x3ac   :  { %10134 = vst [vmem:[#allocation101_spill] sm:$0xff] %v6633_v0  ;;  %v6639_v63 = vpop.permute.xlu0 %1456  ;;  %v6645_v0 = vld [vmem:[#allocation2 + $0x20] sm:$0xff] }
 0x3ad   :  { %10135 = vst [vmem:[#allocation102_spill] sm:$0xff] %v6635_v41  ;;  %v2024_v41 = vmul.f32 %v6645_v0, %v2019_v48 }
 0x3ae   :  { %10136 = vst [vmem:[#allocation103_spill] sm:$0xff] %v6639_v63  ;;  %v2077_v63 = vrot.slane %v2069_v50, 5 }
 0x3b1   :  { %2052 = vrot.lane.b32.xlu1 %v2040_v20, %s5450_s20  ;;  %2044 = vrot.lane.b32.xlu2 %v2036_v29, %s5450_s20  ;;  %v2038_v29 = vrot.slane %v2024_v41, 4  ;;  %v6667_v41 = vld [vmem:[#allocation3 + $0x20] sm:$0xff] }
 0x3b2   :  { %2042 = vrot.lane.b32.xlu0 %v2034_v9, %s5450_s20  ;;  %v2071_v50 = vmul.f32 %v6667_v41, %v2067_v47 }
 0x3b3   :  { %v6649_v17 = vpop.permute.xlu1 %1768  ;;  %v6651_v49 = vpop.permute.xlu2 %1800  ;;  %v2041_v19 = vsel %vm867_vm5, %v2038_v29, %v2040_v20  ;;  %v2039_v9 = vsel %vm867_vm5, %v2037_v10, %v2038_v29  ;;  %v2112_v10 = vmul.f32 %v6667_v41, %v2107_v25 }
 0x3b4   :  { %10137 = vst [vmem:[#allocation104_spill] sm:$0xff] %v6649_v17  ;;  %v6655_v51 = vpop.permute.xlu0 %1462 }
 0x3b5   :  { %10138 = vst [vmem:[#allocation105_spill] sm:$0xff] %v6651_v49  ;;  %v2068_v49 = vmul.f32 %v2067_v47, %v6188_v15  ;;  %v2126_v55 = vrot.slane %v2112_v10, 1  ;;  %v2149_v10 = vmul.f32 %v2147_v38, %v6199_v32 }
 0x3b6   :  { %10139 = vst [vmem:[#allocation106_spill] sm:$0xff] %v6655_v51  ;;  %v2080_v51 = vrot.slane %v2071_v50, 5 }
 0x3b7   :  { %v2076_v20 = vrot.slane %v2068_v49, 5 }
 0x3b9   :  { %2086 = vrot.lane.b32.xlu1 %v2077_v63, %s5450_s20  ;;  %2050 = vrot.lane.b32.xlu2 %v2041_v19, %s5450_s20  ;;  %v2078_v29 = vsel %vm974_vm4, %v2076_v20, %v2077_v63  ;;  %v2111_v19 = vmul.f32 %v2107_v25, %v6197_v4 }
 0x3ba   :  { %2048 = vrot.lane.b32.xlu0 %v2039_v9, %s5450_s20  ;;  %v2070_v9 = vmul.f32 %v2067_v47, %v6197_v4  ;;  %v2109_v47 = vmul.f32 %v2107_v25, %v6199_v32 }
 0x3bb   :  { %v6663_v17 = vpop.permute.xlu1 %1774  ;;  %v6665_v48 = vpop.permute.xlu2 %1806  ;;  %v2125_v63 = vrot.slane %v2111_v19, 1 }
 0x3bc   :  { %10140 = vst [vmem:[#allocation107_spill] sm:$0xff] %v6663_v17  ;;  %v6670_v33 = vpop.permute.xlu0 %1732  ;;  %v2079_v22 = vrot.slane %v2070_v9, 5 }
 0x3bd   :  { %10141 = vst [vmem:[#allocation108_spill] sm:$0xff] %v6665_v48  ;;  %v2127_v60 = vsel %vm1007_vm6, %v2125_v63, %v2126_v55 }
 0x3be   :  { %10142 = vst [vmem:[#allocation109_spill] sm:$0xff] %v6670_v33 }
 0x3c1   :  { %2092 = vrot.lane.b32.xlu1 %v2080_v51, %s5450_s20  ;;  %2084 = vrot.lane.b32.xlu2 %v2078_v29, %s5450_s20  ;;  %v2081_v29 = vsel %vm974_vm4, %v2079_v22, %v2080_v51  ;;  %v2108_v51 = vmul.f32 %v2107_v25, %v6188_v15 }
 0x3c2   :  { %2082 = vrot.lane.b32.xlu0 %v2076_v20, %s5450_s20  ;;  %v2150_v20 = vmul.f32 %v2147_v38, %v6207_v37 }
 0x3c3   :  { %v6679_v17 = vpop.permute.xlu1 %1802  ;;  %v6681_v49 = vpop.permute.xlu2 %1834  ;;  %v2120_v40 = vrot.slane %v2108_v51, 1 }
 0x3c4   :  { %10143 = vst [vmem:[#allocation110_spill] sm:$0xff] %v6679_v17  ;;  %v6683_v50 = vpop.permute.xlu0 %1770  ;;  %v2121_v17 = vrot.slane %v2109_v47, 1  ;;  %v2148_v47 = vmul.f32 %v2147_v38, %v6188_v15 }
 0x3c5   :  { %10144 = vst [vmem:[#allocation111_spill] sm:$0xff] %v6681_v49  ;;  %v2163_v49 = vrot.slane %v2150_v20, 1  ;;  %v2152_v20 = vmul.f32 %v6667_v41, %v2147_v38 }
 0x3c6   :  { %10145 = vst [vmem:[#allocation112_spill] sm:$0xff] %v6683_v50  ;;  %v2123_v50 = vrot.slane %v2110_v23, 1  ;;  %v2122_v8 = vsel %vm1007_vm6, %v2120_v40, %v2121_v17  ;;  %v2113_v23 = vmul.f32 %v6703_v56, %v2107_v25 }
 0x3c9   :  { %2134 = vrot.lane.b32.xlu1 %v2127_v60, %s5450_s20  ;;  %2090 = vrot.lane.b32.xlu2 %v2081_v29, %s5450_s20  ;;  %v2161_v60 = vrot.slane %v2149_v10, 1 }
 0x3ca   :  { %2088 = vrot.lane.b32.xlu0 %v2079_v22, %s5450_s20  ;;  %v2124_v22 = vsel %vm1007_vm6, %v2121_v17, %v2123_v50 }
 0x3cb   :  { %v6694_v19 = vpop.permute.xlu1 %1830  ;;  %v6696_v9 = vpop.permute.xlu2 %1840  ;;  %v2164_v29 = vsel %vm1007_vm6, %v2161_v60, %v2163_v49 }
 0x3cc   :  { %10146 = vst [vmem:[#allocation113_spill] sm:$0xff] %v6694_v19  ;;  %v6699_v63 = vpop.permute.xlu0 %1776  ;;  %v2153_v19 = vmul.f32 %v6703_v56, %v2147_v38 }
 0x3cd   :  { %10147 = vst [vmem:[#allocation114_spill] sm:$0xff] %v6696_v9  ;;  %v2166_v9 = vrot.slane %v2152_v20, 1 }
 0x3ce   :  { %10148 = vst [vmem:[#allocation115_spill] sm:$0xff] %v6699_v63  ;;  %v2168_v14 = vrot.slane %v2153_v19, 1  ;;  %v2195_v63 = vstv %s5201_s29  ;;  %v2151_v19 = vmul.f32 %v2147_v38, %v6197_v4  ;;  %v6741_v4 = vld [vmem:[#allocation3] sm:$0xff]  ;;  %s5227_s29 = sld [smem:[#allocation9 + $0x3c]] }
 0x3cf   :  { %v2197_v25 = vmul.f32 %v2195_v63, %v6199_v32  ;;  %v2200_v32 = vmul.f32 %v6667_v41, %v2195_v63  ;;  %v2196_v38 = vmul.f32 %v6741_v4, %v2195_v63 }
 0x3d0   :  { %v2169_v40 = vsel %vm1007_vm6, %v2166_v9, %v2168_v14 }
 0x3d1   :  { %2172 = vrot.lane.b32.xlu1 %v2164_v29, %s5450_s20  ;;  %2132 = vrot.lane.b32.xlu2 %v2124_v22, %s5450_s20  ;;  %v2128_v29 = vrot.slane %v2113_v23, 1  ;;  %v2160_v22 = vrot.slane %v2148_v47, 1 }
 0x3d2   :  { %2130 = vrot.lane.b32.xlu0 %v2122_v8, %s5450_s20  ;;  %v2198_v8 = vmul.f32 %v2195_v63, %v6207_v37  ;;  %v2209_v37 = vrot.slane %v2197_v25, 1  ;;  %v2214_v25 = vrot.slane %v2200_v32, 1  ;;  %v6761_v32 = vld [vmem:[#allocation3 + $0x18] sm:$0xff] }
 0x3d3   :  { %v6713_v10 = vpop.permute.xlu1 %1836  ;;  %v6715_v50 = vpop.permute.xlu2 %1872  ;;  %v2162_v17 = vsel %vm1007_vm6, %v2160_v22, %v2161_v60  ;;  %v2129_v15 = vsel %vm1007_vm6, %v2126_v55, %v2128_v29  ;;  %v2165_v22 = vrot.slane %v2151_v19, 1  ;;  %v2201_v29 = vmul.f32 %v6703_v56, %v2195_v63 }
 0x3d4   :  { %10149 = vst [vmem:[#allocation116_spill] sm:$0xff] %v6713_v10  ;;  %v6717_v51 = vpop.permute.xlu0 %1804  ;;  %v2211_v60 = vrot.slane %v2198_v8, 1  ;;  %v2208_v19 = vrot.slane %v2196_v38, 1  ;;  %v2199_v38 = vmul.f32 %v6761_v32, %v2195_v63 }
 0x3d5   :  { %10150 = vst [vmem:[#allocation117_spill] sm:$0xff] %v6715_v50  ;;  %v2167_v55 = vsel %vm1007_vm6, %v2165_v22, %v2166_v9  ;;  %v2216_v9 = vrot.slane %v2201_v29, 1  ;;  %v2243_v22 = vstv %s5202_s30  ;;  %s5228_s30 = sld [smem:[#allocation9 + $0x43]] }
 0x3d6   :  { %10151 = vst [vmem:[#allocation118_spill] sm:$0xff] %v6717_v51  ;;  %v2248_v63 = vmul.f32 %v6667_v41, %v2243_v22  ;;  %v2331_v51 = vstv %s5204_s1  ;;  %s5230_s1 = sld [smem:[#allocation9 + $0x51]] }
 0x3d9   :  { %2178 = vrot.lane.b32.xlu1 %v2169_v40, %s5450_s20  ;;  %2170 = vrot.lane.b32.xlu2 %v2162_v17, %s5450_s20  ;;  %v2212_v40 = vsel %vm1007_vm6, %v2209_v37, %v2211_v60 }
 0x3da   :  { %2136 = vrot.lane.b32.xlu0 %v2129_v15, %s5450_s20 }
 0x3db   :  { %v6728_v23 = vpop.permute.xlu1 %1868  ;;  %v6730_v20 = vpop.permute.xlu2 %1878 }
 0x3dc   :  { %10152 = vst [vmem:[#allocation119_spill] sm:$0xff] %v6728_v23  ;;  %v6732_v47 = vpop.permute.xlu0 %1832  ;;  %v2249_v23 = vmul.f32 %v6703_v56, %v2243_v22 }
 0x3dd   :  { %10153 = vst [vmem:[#allocation120_spill] sm:$0xff] %v6730_v20 }
 0x3de   :  { %10154 = vst [vmem:[#allocation121_spill] sm:$0xff] %v6732_v47  ;;  %v2213_v47 = vrot.slane %v2199_v38, 1 }
 0x3e1   :  { %2220 = vrot.lane.b32.xlu1 %v2212_v40, %s5450_s20  ;;  %2176 = vrot.lane.b32.xlu2 %v2167_v55, %s5450_s20  ;;  %v2217_v40 = vsel %vm1007_vm6, %v2214_v25, %v2216_v9  ;;  %v6752_v55 = vld [vmem:[#allocation3 + $0x10] sm:$0x3f] }
 0x3e2   :  { %2174 = vrot.lane.b32.xlu0 %v2163_v49, %s5450_s20  ;;  %v2210_v49 = vsel %vm1007_vm6, %v2208_v19, %v2209_v37  ;;  %v2246_v50 = vmul.f32 %v6752_v55, %v2243_v22 }
 0x3e3   :  { %v6744_v17 = vpop.permute.xlu1 %1874  ;;  %v6746_v8 = vpop.permute.xlu2 %1910 }
 0x3e4   :  { %10155 = vst [vmem:[#allocation122_spill] sm:$0xff] %v6744_v17  ;;  %v6748_v15 = vpop.permute.xlu0 %1838  ;;  %v2259_v17 = vrot.slane %v2246_v50, 1 }
 0x3e5   :  { %10156 = vst [vmem:[#allocation123_spill] sm:$0xff] %v6746_v8  ;;  %v6758_v8 = vld [vmem:[#allocation3 + $0x8] sm:$0xff] }
 0x3e6   :  { %10157 = vst [vmem:[#allocation124_spill] sm:$0xff] %v6748_v15  ;;  %v2245_v29 = vmul.f32 %v6758_v8, %v2243_v22 }
 0x3e9   :  { %2226 = vrot.lane.b32.xlu1 %v2217_v40, %s5450_s20  ;;  %2218 = vrot.lane.b32.xlu2 %v2210_v49, %s5450_s20  ;;  %v2257_v40 = vrot.slane %v2245_v29, 1  ;;  %v2215_v49 = vsel %vm1007_vm6, %v2213_v47, %v2214_v25  ;;  %v2262_v47 = vrot.slane %v2248_v63, 1 }
 0x3ea   :  { %2180 = vrot.lane.b32.xlu0 %v2168_v14, %s5450_s20 }
 0x3eb   :  { %v6764_v15 = vpop.permute.xlu1 %1906  ;;  %v6766_v37 = vpop.permute.xlu2 %1916  ;;  %v2260_v14 = vsel %vm1007_vm6, %v2257_v40, %v2259_v17 }
 0x3ec   :  { %10158 = vst [vmem:[#allocation125_spill] sm:$0xff] %v6764_v15  ;;  %v6768_v19 = vpop.permute.xlu0 %1870  ;;  %v2264_v15 = vrot.slane %v2249_v23, 1  ;;  %v2247_v23 = vmul.f32 %v6761_v32, %v2243_v22 }
 0x3ed   :  { %10159 = vst [vmem:[#allocation126_spill] sm:$0xff] %v6766_v37  ;;  %v2291_v37 = vstv %s5203_s5  ;;  %s5229_s5 = sld [smem:[#allocation9 + $0x4a]] }
 0x3ee   :  { %10160 = vst [vmem:[#allocation127_spill] sm:$0xff] %v6768_v19  ;;  %v2244_v19 = vmul.f32 %v6741_v4, %v2243_v22  ;;  %v2332_v22 = vmul.f32 %v6741_v4, %v2331_v51 }
 0x3f0   :  { %v2256_v25 = vrot.slane %v2244_v19, 1 }
 0x3f1   :  { %2268 = vrot.lane.b32.xlu1 %v2260_v14, %s5450_s20  ;;  %2224 = vrot.lane.b32.xlu2 %v2215_v49, %s5450_s20  ;;  %v2265_v14 = vsel %vm1007_vm6, %v2262_v47, %v2264_v15 }
 0x3f2   :  { %2222 = vrot.lane.b32.xlu0 %v2211_v60, %s5450_s20  ;;  %v2258_v49 = vsel %vm1007_vm6, %v2256_v25, %v2257_v40  ;;  %v2294_v60 = vmul.f32 %v6752_v55, %v2291_v37  ;;  %v2261_v25 = vrot.slane %v2247_v23, 1 }
 0x3f3   :  { %v6778_v50 = vpop.permute.xlu1 %1912  ;;  %v6780_v29 = vpop.permute.xlu2 %1958 }
 0x3f4   :  { %10161 = vst [vmem:[#allocation128_spill] sm:$0xff] %v6778_v50  ;;  %v6782_v38 = vpop.permute.xlu0 %1876  ;;  %v2293_v50 = vmul.f32 %v6758_v8, %v2291_v37 }
 0x3f5   :  { %10162 = vst [vmem:[#allocation129_spill] sm:$0xff] %v6780_v29  ;;  %v2307_v29 = vrot.slane %v2294_v60, 5 }
 0x3f6   :  { %10163 = vst [vmem:[#allocation130_spill] sm:$0xff] %v6782_v38  ;;  %v2305_v40 = vrot.slane %v2293_v50, 5 }
 0x3f9   :  { %2274 = vrot.lane.b32.xlu1 %v2265_v14, %s5450_s20  ;;  %2266 = vrot.lane.b32.xlu2 %v2258_v49, %s5450_s20  ;;  %v2308_v14 = vsel %vm974_vm4, %v2305_v40, %v2307_v29  ;;  %v2263_v49 = vsel %vm1007_vm6, %v2261_v25, %v2262_v47  ;;  %v2344_v47 = vrot.slane %v2332_v22, 5 }
 0x3fa   :  { %2228 = vrot.lane.b32.xlu0 %v2216_v9, %s5450_s20  ;;  %v2333_v9 = vmul.f32 %v6758_v8, %v2331_v51 }
 0x3fb   :  { %v6792_v63 = vpop.permute.xlu1 %1954  ;;  %v6794_v19 = vpop.permute.xlu2 %1996 }
 0x3fc   :  { %10164 = vst [vmem:[#allocation131_spill] sm:$0xff] %v6792_v63  ;;  %v6796_v38 = vpop.permute.xlu0 %1908  ;;  %v2345_v29 = vrot.slane %v2333_v9, 5  ;;  %v2296_v63 = vmul.f32 %v6667_v41, %v2291_v37  ;;  %v2335_v9 = vmul.f32 %v6761_v32, %v2331_v51 }
 0x3fd   :  { %10165 = vst [vmem:[#allocation132_spill] sm:$0xff] %v6794_v19 }
 0x3fe   :  { %10166 = vst [vmem:[#allocation133_spill] sm:$0xff] %v6796_v38  ;;  %v2292_v38 = vmul.f32 %v6741_v4, %v2291_v37  ;;  %v2346_v19 = vsel %vm974_vm4, %v2344_v47, %v2345_v29  ;;  %v2310_v10 = vrot.slane %v2296_v63, 5 }
 0x400   :  { %v2304_v25 = vrot.slane %v2292_v38, 5 }
 0x401   :  { %2316 = vrot.lane.b32.xlu1 %v2308_v14, %s5450_s20  ;;  %2272 = vrot.lane.b32.xlu2 %v2263_v49, %s5450_s20  ;;  %v2336_v49 = vmul.f32 %v6667_v41, %v2331_v51 }
 0x402   :  { %2270 = vrot.lane.b32.xlu0 %v2259_v17, %s5450_s20  ;;  %v2306_v14 = vsel %vm974_vm4, %v2304_v25, %v2305_v40  ;;  %v2297_v17 = vmul.f32 %v6703_v56, %v2291_v37  ;;  %v2295_v40 = vmul.f32 %v6761_v32, %v2291_v37  ;;  %v2334_v37 = vmul.f32 %v6752_v55, %v2331_v51 }
 0x403   :  { %v6806_v60 = vpop.permute.xlu1 %1960  ;;  %v6808_v50 = vpop.permute.xlu2 %2002  ;;  %v2350_v25 = vrot.slane %v2336_v49, 5 }
 0x404   :  { %10167 = vst [vmem:[#allocation134_spill] sm:$0xff] %v6806_v60  ;;  %v6810_v23 = vpop.permute.xlu0 %1914 }
 0x405   :  { %10168 = vst [vmem:[#allocation135_spill] sm:$0xff] %v6808_v50  ;;  %v2312_v50 = vrot.slane %v2297_v17, 5 }
 0x406   :  { %10169 = vst [vmem:[#allocation136_spill] sm:$0xff] %v6810_v23 }
 0x409   :  { %2354 = vrot.lane.b32.xlu1 %v2346_v19, %s5450_s20  ;;  %2314 = vrot.lane.b32.xlu2 %v2306_v14, %s5450_s20  ;;  %v2349_v19 = vrot.slane %v2335_v9, 5  ;;  %v2309_v14 = vrot.slane %v2295_v40, 5  ;;  %v2347_v9 = vrot.slane %v2334_v37, 5  ;;  %v2379_v40 = vstv %s5205_s6  ;;  %s5231_s6 = sld [smem:[#allocation9 + $0x58]] }
 0x40a   :  { %2276 = vrot.lane.b32.xlu0 %v2264_v15, %s5450_s20  ;;  %v2313_v15 = vsel %vm974_vm4, %v2310_v10, %v2312_v50  ;;  %v2380_v50 = vmul.f32 %v6606_v44, %v2379_v40  ;;  %v2383_v37 = vmul.f32 %v6645_v0, %v2379_v40 }
 0x40b   :  { %v6821_v22 = vpop.permute.xlu1 %1998  ;;  %v6823_v38 = vpop.permute.xlu2 %2044  ;;  %v2351_v23 = vsel %vm974_vm4, %v2349_v19, %v2350_v25 }
 0x40c   :  { %10170 = vst [vmem:[#allocation137_spill] sm:$0xff] %v6821_v22  ;;  %v6826_v47 = vpop.permute.xlu0 %1956 }
 0x40d   :  { %10171 = vst [vmem:[#allocation138_spill] sm:$0xff] %v6823_v38  ;;  %v2311_v38 = vsel %vm974_vm4, %v2309_v14, %v2310_v10  ;;  %v2348_v10 = vsel %vm974_vm4, %v2345_v29, %v2347_v9 }
 0x40e   :  { %10172 = vst [vmem:[#allocation139_spill] sm:$0xff] %v6826_v47  ;;  %v2559_v47 = vstv %s5210_s12  ;;  %s5236_s12 = sld [smem:[#allocation9 + $0x1a]] }
 0x411   :  { %2360 = vrot.lane.b32.xlu1 %v2351_v23, %s5450_s20  ;;  %2320 = vrot.lane.b32.xlu2 %v2313_v15, %s5450_s20  ;;  %v2337_v23 = vmul.f32 %v6703_v56, %v2331_v51 }
 0x412   :  { %2318 = vrot.lane.b32.xlu0 %v2311_v38, %s5450_s20 }
 0x413   :  { %v6835_v49 = vpop.permute.xlu1 %2004  ;;  %v6837_v63 = vpop.permute.xlu2 %2050  ;;  %v2352_v15 = vrot.slane %v2337_v23, 5 }
 0x414   :  { %10173 = vst [vmem:[#allocation140_spill] sm:$0xff] %v6835_v49  ;;  %v6839_v17 = vpop.permute.xlu0 %1994 }
 0x415   :  { %10174 = vst [vmem:[#allocation141_spill] sm:$0xff] %v6837_v63  ;;  %v2353_v29 = vsel %vm974_vm4, %v2350_v25, %v2352_v15  ;;  %v6878_v63 = vld [vmem:[#allocation2 + $0x28] sm:$0x3f] }
 0x416   :  { %10175 = vst [vmem:[#allocation142_spill] sm:$0xff] %v6839_v17  ;;  %v2565_v45 = vmul.f32 %v6878_v63, %v2559_v47 }
 0x419   :  { %2388 = vrot.lane.b32.xlu1 %v2380_v50, %s5451_s7  ;;  %2358 = vrot.lane.b32.xlu2 %v2347_v9, %s5450_s20 }
 0x41a   :  { %2356 = vrot.lane.b32.xlu0 %v2348_v10, %s5450_s20  ;;  %v2405_v10 = vstv %s5206_s8  ;;  %s5233_s8 = sld [smem:[#allocation9 + $0x5]] }
 0x41b   :  { %v6847_v38 = vpop.permute.xlu1 %2046  ;;  %v6849_v19 = vpop.permute.xlu2 %2084  ;;  %v2411_v22 = vmul.f32 %v6878_v63, %v2405_v10  ;;  %v2409_v17 = vmul.f32 %v6585_v31, %v2405_v10 }
 0x41c   :  { %10176 = vst [vmem:[#allocation143_spill] sm:$0xff] %v6847_v38  ;;  %v6851_v14 = vpop.permute.xlu0 %2000  ;;  %v6864_v38 = vld [vmem:[#allocation2 + $0x10] sm:$0x3f] }
 0x41d   :  { %10177 = vst [vmem:[#allocation144_spill] sm:$0xff] %v6849_v19  ;;  %v2408_v23 = vmul.f32 %v6864_v38, %v2405_v10  ;;  %v2382_v19 = vmul.f32 %v6585_v31, %v2379_v40 }
 0x41e   :  { %10178 = vst [vmem:[#allocation145_spill] sm:$0xff] %v6851_v14  ;;  %v2410_v14 = vmul.f32 %v6645_v0, %v2405_v10 }
 0x421   :  { %2394 = vrot.lane.b32.xlu1 %v2383_v37, %s5451_s7  ;;  %2364 = vrot.lane.b32.xlu2 %v2352_v15, %s5450_s20  ;;  %v2381_v37 = vmul.f32 %v6629_v59, %v2379_v40  ;;  %v2406_v40 = vmul.f32 %v6606_v44, %v2405_v10 }
 0x422   :  { %2362 = vrot.lane.b32.xlu0 %v2353_v29, %s5450_s20  ;;  %s5219_s20 = sld [smem:[#allocation9 + $0x4]] }
 0x423   :  { %v6858_v51 = vpop.permute.xlu1 %2052  ;;  %v6860_v9 = vpop.permute.xlu2 %2090 }
 0x424   :  { %10179 = vst [vmem:[#allocation146_spill] sm:$0xff] %v6858_v51  ;;  %v6862_v50 = vpop.permute.xlu0 %2042 }
 0x425   :  { %10180 = vst [vmem:[#allocation147_spill] sm:$0xff] %v6860_v9 }
 0x426   :  { %10181 = vst [vmem:[#allocation148_spill] sm:$0xff] %v6862_v50  ;;  %v2407_v50 = vmul.f32 %v6629_v59, %v2405_v10 }
 0x429   :  { %2422 = vrot.lane.b32.xlu1 %v2408_v23, %s5451_s7  ;;  %2392 = vrot.lane.b32.xlu2 %v2382_v19, %s5451_s7 }
 0x42a   :  { %2390 = vrot.lane.b32.xlu0 %v2381_v37, %s5451_s7 }
 0x42b   :  { %v6872_v25 = vpop.permute.xlu1 %2086  ;;  %v6874_v15 = vpop.permute.xlu2 %2132 }
 0x42c   :  { %10182 = vst [vmem:[#allocation149_spill] sm:$0xff] %v6872_v25  ;;  %v6876_v29 = vpop.permute.xlu0 %2048  ;;  %v2443_v25 = vstv %s5207_s9  ;;  %s5234_s9 = sld [smem:[#allocation9 + $0xc]] }
 0x42d   :  { %10183 = vst [vmem:[#allocation150_spill] sm:$0xff] %v6874_v15 }
 0x42e   :  { %10184 = vst [vmem:[#allocation151_spill] sm:$0xff] %v6876_v29  ;;  %v2446_v29 = vmul.f32 %v6864_v38, %v2443_v25 }
 0x431   :  { %2428 = vrot.lane.b32.xlu1 %v2411_v22, %s5451_s7  ;;  %2420 = vrot.lane.b32.xlu2 %v2407_v50, %s5451_s7 }
 0x432   :  { %2418 = vrot.lane.b32.xlu0 %v2406_v40, %s5451_s7 }
 0x433   :  { %v6886_v19 = vpop.permute.xlu1 %2092  ;;  %v6888_v23 = vpop.permute.xlu2 %2170 }
 0x434   :  { %10185 = vst [vmem:[#allocation152_spill] sm:$0xff] %v6886_v19  ;;  %v6890_v37 = vpop.permute.xlu0 %2082  ;;  %v2445_v19 = vmul.f32 %v6629_v59, %v2443_v25 }
 0x435   :  { %10186 = vst [vmem:[#allocation153_spill] sm:$0xff] %v6888_v23  ;;  %v2444_v23 = vmul.f32 %v6606_v44, %v2443_v25 }
 0x436   :  { %10187 = vst [vmem:[#allocation154_spill] sm:$0xff] %v6890_v37  ;;  %v2449_v37 = vmul.f32 %v6878_v63, %v2443_v25 }
 0x439   :  { %2460 = vrot.lane.b32.xlu1 %v2446_v29, %s5451_s7  ;;  %2426 = vrot.lane.b32.xlu2 %v2410_v14, %s5451_s7  ;;  %v2481_v29 = vstv %s5208_s10  ;;  %s5453_s10 = smov 123  }
 0x43a   :  { %2424 = vrot.lane.b32.xlu0 %v2409_v17, %s5451_s7  ;;  %v2486_v51 = vmul.f32 %v6645_v0, %v2481_v29 }
 0x43b   :  { %v6898_v22 = vpop.permute.xlu1 %2134  ;;  %v6900_v50 = vpop.permute.xlu2 %2176 }
 0x43c   :  { %10188 = vst [vmem:[#allocation155_spill] sm:$0xff] %v6898_v22  ;;  %v6902_v40 = vpop.permute.xlu0 %2088  ;;  %v2447_v22 = vmul.f32 %v6585_v31, %v2443_v25 }
 0x43d   :  { %10189 = vst [vmem:[#allocation156_spill] sm:$0xff] %v6900_v50  ;;  %v2448_v50 = vmul.f32 %v6645_v0, %v2443_v25  ;;  %v2482_v25 = vmul.f32 %v6606_v44, %v2481_v29 }
 0x43e   :  { %10190 = vst [vmem:[#allocation157_spill] sm:$0xff] %v6902_v40  ;;  %v2484_v40 = vmul.f32 %v6864_v38, %v2481_v29 }
 0x441   :  { %2466 = vrot.lane.b32.xlu1 %v2449_v37, %s5451_s7  ;;  %2458 = vrot.lane.b32.xlu2 %v2445_v19, %s5451_s7 }
 0x442   :  { %2456 = vrot.lane.b32.xlu0 %v2444_v23, %s5451_s7 }
 0x443   :  { %v6910_v17 = vpop.permute.xlu1 %2172  ;;  %v6912_v14 = vpop.permute.xlu2 %2218 }
 0x444   :  { %10191 = vst [vmem:[#allocation158_spill] sm:$0xff] %v6910_v17  ;;  %v6914_v10 = vpop.permute.xlu0 %2130  ;;  %v2519_v17 = vstv %s5209_s11  ;;  %s5235_s11 = sld [smem:[#allocation9 + $0x13]] }
 0x445   :  { %10192 = vst [vmem:[#allocation159_spill] sm:$0xff] %v6912_v14  ;;  %v2487_v14 = vmul.f32 %v6878_v63, %v2481_v29 }
 0x446   :  { %10193 = vst [vmem:[#allocation160_spill] sm:$0xff] %v6914_v10  ;;  %v2483_v10 = vmul.f32 %v6629_v59, %v2481_v29 }
 0x449   :  { %2498 = vrot.lane.b32.xlu1 %v2484_v40, %s5451_s7  ;;  %2464 = vrot.lane.b32.xlu2 %v2448_v50, %s5451_s7  ;;  %v2524_v40 = vmul.f32 %v6645_v0, %v2519_v17 }
 0x44a   :  { %2462 = vrot.lane.b32.xlu0 %v2447_v22, %s5451_s7  ;;  %v2523_v22 = vmul.f32 %v6585_v31, %v2519_v17 }
 0x44b   :  { %v6922_v19 = vpop.permute.xlu1 %2178  ;;  %v6924_v23 = vpop.permute.xlu2 %2224  ;;  %v2538_v15 = vrot.slane %v2524_v40, 4  ;;  %v2561_v40 = vmul.f32 %v6629_v59, %v2559_v47 }
 0x44c   :  { %10194 = vst [vmem:[#allocation161_spill] sm:$0xff] %v6922_v19  ;;  %v6926_v37 = vpop.permute.xlu0 %2136  ;;  %v2537_v9 = vrot.slane %v2523_v22, 4 }
 0x44d   :  { %10195 = vst [vmem:[#allocation162_spill] sm:$0xff] %v6924_v23 }
 0x44e   :  { %10196 = vst [vmem:[#allocation163_spill] sm:$0xff] %v6926_v37  ;;  %v2539_v20 = vsel %vm867_vm5, %v2537_v9, %v2538_v15  ;;  %v2520_v9 = vmul.f32 %v6606_v44, %v2519_v17 }
 0x450   :  { %v2532_v52 = vrot.slane %v2520_v9, 4  ;;  %v2580_v9 = vrot.slane %v2565_v45, 4  ;;  %v2609_v45 = vmul.f32 %v6629_v59, %v2607_v18 }
 0x451   :  { %2504 = vrot.lane.b32.xlu1 %v2487_v14, %s5451_s7  ;;  %2496 = vrot.lane.b32.xlu2 %v2483_v10, %s5451_s7  ;;  %v2485_v14 = vmul.f32 %v6585_v31, %v2481_v29  ;;  %v2562_v10 = vmul.f32 %v6864_v38, %v2559_v47 }
 0x452   :  { %2494 = vrot.lane.b32.xlu0 %v2482_v25, %s5451_s7  ;;  %v2522_v25 = vmul.f32 %v6864_v38, %v2519_v17 }
 0x453   :  { %v6936_v50 = vpop.permute.xlu1 %2220  ;;  %v6938_v23 = vpop.permute.xlu2 %2266 }
 0x454   :  { %10197 = vst [vmem:[#allocation164_spill] sm:$0xff] %v6936_v50  ;;  %v6940_v19 = vpop.permute.xlu0 %2174  ;;  %v2535_v49 = vrot.slane %v2522_v25, 4 }
 0x455   :  { %10198 = vst [vmem:[#allocation165_spill] sm:$0xff] %v6938_v23  ;;  %v2521_v23 = vmul.f32 %v6629_v59, %v2519_v17  ;;  %v2612_v59 = vmul.f32 %v6645_v0, %v2607_v18 }
 0x456   :  { %10199 = vst [vmem:[#allocation166_spill] sm:$0xff] %v6940_v19  ;;  %v2575_v19 = vrot.slane %v2562_v10, 4  ;;  %v2560_v10 = vmul.f32 %v6606_v44, %v2559_v47 }
 0x457   :  { %v2533_v58 = vrot.slane %v2521_v23, 4  ;;  %v2564_v23 = vmul.f32 %v6645_v0, %v2559_v47  ;;  %v2611_v0 = vmul.f32 %v6585_v31, %v2607_v18 }
 0x459   :  { %2546 = vrot.lane.b32.xlu1 %v2539_v20, %s5451_s7  ;;  %2502 = vrot.lane.b32.xlu2 %v2486_v51, %s5451_s7  ;;  %v2573_v20 = vrot.slane %v2561_v40, 4 }
 0x45a   :  { %2500 = vrot.lane.b32.xlu0 %v2485_v14, %s5451_s7  ;;  %v2536_v14 = vsel %vm867_vm5, %v2533_v58, %v2535_v49 }
 0x45b   :  { %v6952_v22 = vpop.permute.xlu1 %2226  ;;  %v6954_v50 = vpop.permute.xlu2 %2272  ;;  %v2576_v51 = vsel %vm867_vm5, %v2573_v20, %v2575_v19 }
 0x45c   :  { %10200 = vst [vmem:[#allocation167_spill] sm:$0xff] %v6952_v22  ;;  %v6957_v29 = vpop.permute.xlu0 %2180  ;;  %v2534_v22 = vsel %vm867_vm5, %v2532_v52, %v2533_v58 }
 0x45d   :  { %10201 = vst [vmem:[#allocation168_spill] sm:$0xff] %v6954_v50  ;;  %v2525_v50 = vmul.f32 %v6878_v63, %v2519_v17  ;;  %v2610_v17 = vmul.f32 %v6864_v38, %v2607_v18 }
 0x45e   :  { %10202 = vst [vmem:[#allocation169_spill] sm:$0xff] %v6957_v29  ;;  %v2578_v29 = vrot.slane %v2564_v23, 4 }
 0x460   :  { %v2581_v52 = vsel %vm867_vm5, %v2578_v29, %v2580_v9 }
 0x461   :  { %2584 = vrot.lane.b32.xlu1 %v2576_v51, %s5451_s7  ;;  %2544 = vrot.lane.b32.xlu2 %v2536_v14, %s5451_s7  ;;  %v2540_v51 = vrot.slane %v2525_v50, 4  ;;  %v2572_v14 = vrot.slane %v2560_v10, 4  ;;  %v2563_v50 = vmul.f32 %v6585_v31, %v2559_v47  ;;  %v2608_v47 = vmul.f32 %v6606_v44, %v2607_v18 }
 0x462   :  { %2542 = vrot.lane.b32.xlu0 %v2534_v22, %s5451_s7 }
 0x463   :  { %v6969_v25 = vpop.permute.xlu1 %2268  ;;  %v6971_v40 = vpop.permute.xlu2 %2314  ;;  %v2574_v58 = vsel %vm867_vm5, %v2572_v14, %v2573_v20  ;;  %v2541_v22 = vsel %vm867_vm5, %v2538_v15, %v2540_v51  ;;  %v2623_v20 = vrot.slane %v2610_v17, 4  ;;  %v2621_v14 = vrot.slane %v2609_v45, 4 }
 0x464   :  { %10203 = vst [vmem:[#allocation170_spill] sm:$0xff] %v6969_v25  ;;  %v6973_v49 = vpop.permute.xlu0 %2222  ;;  %v2577_v25 = vrot.slane %v2563_v50, 4  ;;  %v2613_v51 = vmul.f32 %v6878_v63, %v2607_v18  ;;  %v2655_v50 = vstv %s5212_s13  ;;  %s5238_s13 = sld [smem:[#allocation9 + $0x28]] }
 0x465   :  { %10204 = vst [vmem:[#allocation171_spill] sm:$0xff] %v6971_v40  ;;  %v2656_v44 = vmul.f32 %v6741_v4, %v2655_v50  ;;  %v2658_v18 = vmul.f32 %v6761_v32, %v2655_v50  ;;  %v2695_v40 = vstv %s5213_s14  ;;  %s5239_s14 = sld [smem:[#allocation9 + $0x2f]] }
 0x466   :  { %10205 = vst [vmem:[#allocation172_spill] sm:$0xff] %v6973_v49  ;;  %v2579_v15 = vsel %vm867_vm5, %v2577_v25, %v2578_v29  ;;  %v2628_v45 = vrot.slane %v2613_v51, 4  ;;  %v2626_v29 = vrot.slane %v2612_v59, 4  ;;  %v2620_v25 = vrot.slane %v2608_v47, 4 }
 0x469   :  { %2590 = vrot.lane.b32.xlu1 %v2581_v52, %s5451_s7  ;;  %2582 = vrot.lane.b32.xlu2 %v2574_v58, %s5451_s7  ;;  %v2624_v52 = vsel %vm867_vm5, %v2621_v14, %v2623_v20 }
 0x46a   :  { %2548 = vrot.lane.b32.xlu0 %v2541_v22, %s5451_s7 }
 0x46b   :  { %v6984_v23 = vpop.permute.xlu1 %2274  ;;  %v6986_v10 = vpop.permute.xlu2 %2320 }
 0x46c   :  { %10206 = vst [vmem:[#allocation173_spill] sm:$0xff] %v6984_v23  ;;  %v6988_v49 = vpop.permute.xlu0 %2228 }
 0x46d   :  { %10207 = vst [vmem:[#allocation174_spill] sm:$0xff] %v6986_v10 }
 0x46e   :  { %10208 = vst [vmem:[#allocation175_spill] sm:$0xff] %v6988_v49 }
 0x471   :  { %2632 = vrot.lane.b32.xlu1 %v2624_v52, %s5451_s7  ;;  %2588 = vrot.lane.b32.xlu2 %v2579_v15, %s5451_s7  ;;  %v2629_v52 = vsel %vm867_vm5, %v2626_v29, %v2628_v45  ;;  %v2622_v15 = vsel %vm867_vm5, %v2620_v25, %v2621_v14  ;;  %v2664_v14 = vrot.slane %v2656_v44, 5  ;;  %v2625_v25 = vrot.slane %v2611_v0, 4 }
 0x472   :  { %2586 = vrot.lane.b32.xlu0 %v2575_v19, %s5451_s7  ;;  %v2657_v19 = vmul.f32 %v6758_v8, %v2655_v50 }
 0x473   :  { %v6998_v58 = vpop.permute.xlu1 %2316  ;;  %v7000_v17 = vpop.permute.xlu2 %2358 }
 0x474   :  { %10209 = vst [vmem:[#allocation176_spill] sm:$0xff] %v6998_v58  ;;  %v7002_v22 = vpop.permute.xlu0 %2270 }
 0x475   :  { %10210 = vst [vmem:[#allocation177_spill] sm:$0xff] %v7000_v17  ;;  %v2667_v17 = vrot.slane %v2658_v18, 5 }
 0x476   :  { %10211 = vst [vmem:[#allocation178_spill] sm:$0xff] %v7002_v22  ;;  %v2665_v22 = vrot.slane %v2657_v19, 5 }
 0x479   :  { %2638 = vrot.lane.b32.xlu1 %v2629_v52, %s5451_s7  ;;  %2630 = vrot.lane.b32.xlu2 %v2622_v15, %s5451_s7  ;;  %v2666_v52 = vsel %vm974_vm4, %v2664_v14, %v2665_v22  ;;  %v2627_v15 = vsel %vm867_vm5, %v2625_v25, %v2626_v29  ;;  %v2698_v25 = vmul.f32 %v6752_v55, %v2695_v40 }
 0x47a   :  { %2592 = vrot.lane.b32.xlu0 %v2580_v9, %s5451_s7  ;;  %v2659_v9 = vmul.f32 %v6667_v41, %v2655_v50 }
 0x47b   :  { %v7012_v51 = vpop.permute.xlu1 %2354  ;;  %v7014_v59 = vpop.permute.xlu2 %2364 }
 0x47c   :  { %10212 = vst [vmem:[#allocation179_spill] sm:$0xff] %v7012_v51  ;;  %v7016_v47 = vpop.permute.xlu0 %2276  ;;  %v2668_v0 = vrot.slane %v2659_v9, 5  ;;  %v2711_v9 = vrot.slane %v2698_v25, 1 }
 0x47d   :  { %10213 = vst [vmem:[#allocation180_spill] sm:$0xff] %v7014_v59 }
 0x47e   :  { %10214 = vst [vmem:[#allocation181_spill] sm:$0xff] %v7016_v47  ;;  %v2669_v29 = vsel %vm974_vm4, %v2667_v17, %v2668_v0 }
 0x481   :  { %2672 = vrot.lane.b32.xlu1 %v2666_v52, %s5451_s7  ;;  %2636 = vrot.lane.b32.xlu2 %v2627_v15, %s5451_s7 }
 0x482   :  { %2634 = vrot.lane.b32.xlu0 %v2623_v20, %s5451_s7  ;;  %v2697_v20 = vmul.f32 %v6758_v8, %v2695_v40 }
 0x483   :  { %v7025_v31 = vpop.permute.xlu1 %2360  ;;  %v7027_v19 = vpop.permute.xlu2 %2392 }
 0x484   :  { %10215 = vst [vmem:[#allocation182_spill] sm:$0xff] %v7025_v31  ;;  %v7029_v44 = vpop.permute.xlu0 %2318  ;;  %v2709_v18 = vrot.slane %v2697_v20, 1 }
 0x485   :  { %10216 = vst [vmem:[#allocation183_spill] sm:$0xff] %v7027_v19  ;;  %v2735_v19 = vstv %s5214_s15  ;;  %s5170_s15 = sld [smem:[#allocation9 + $0x31]] }
 0x486   :  { %10217 = vst [vmem:[#allocation184_spill] sm:$0xff] %v7029_v44  ;;  %v2712_v44 = vsel %vm1007_vm6, %v2709_v18, %v2711_v9  ;;  %v2737_v31 = vmul.f32 %v6758_v8, %v2735_v19 }
 0x488   :  { %v2749_v20 = vrot.slane %v2737_v31, 1  ;;  %v2739_v31 = vmul.f32 %v6761_v32, %v2735_v19 }
 0x489   :  { %2678 = vrot.lane.b32.xlu1 %v2669_v29, %s5451_s7  ;;  %2670 = vrot.lane.b32.xlu2 %v2664_v14, %s5451_s7  ;;  %v2696_v14 = vmul.f32 %v6741_v4, %v2695_v40 }
 0x48a   :  { %2640 = vrot.lane.b32.xlu0 %v2628_v45, %s5451_s7  ;;  %v2736_v45 = vmul.f32 %v6741_v4, %v2735_v19 }
 0x48b   :  { %v7037_v50 = vpop.permute.xlu1 %2388  ;;  %v7039_v52 = vpop.permute.xlu2 %2420 }
 0x48c   :  { %10218 = vst [vmem:[#allocation185_spill] sm:$0xff] %v7037_v50  ;;  %v7041_v15 = vpop.permute.xlu0 %2356  ;;  %v2748_v9 = vrot.slane %v2736_v45, 1  ;;  %v2708_v50 = vrot.slane %v2696_v14, 1 }
 0x48d   :  { %10219 = vst [vmem:[#allocation186_spill] sm:$0xff] %v7039_v52 }
 0x48e   :  { %10220 = vst [vmem:[#allocation187_spill] sm:$0xff] %v7041_v15  ;;  %v2701_v15 = vmul.f32 %v6703_v56, %v2695_v40 }
 0x491   :  { %2720 = vrot.lane.b32.xlu1 %v2712_v44, %s5451_s7  ;;  %2676 = vrot.lane.b32.xlu2 %v2667_v17, %s5451_s7  ;;  %v2750_v44 = vsel %vm1007_vm6, %v2748_v9, %v2749_v20  ;;  %v2710_v17 = vsel %vm1007_vm6, %v2708_v50, %v2709_v18  ;;  %v2699_v50 = vmul.f32 %v6761_v32, %v2695_v40 }
 0x492   :  { %2674 = vrot.lane.b32.xlu0 %v2665_v22, %s5451_s7  ;;  %v2740_v22 = vmul.f32 %v6667_v41, %v2735_v19 }
 0x493   :  { %v7050_v29 = vpop.permute.xlu1 %2394  ;;  %v7052_v52 = vpop.permute.xlu2 %2426  ;;  %v2713_v51 = vrot.slane %v2699_v50, 1 }
 0x494   :  { %10221 = vst [vmem:[#allocation188_spill] sm:$0xff] %v7050_v29  ;;  %v7054_v25 = vpop.permute.xlu0 %2362  ;;  %v2754_v9 = vrot.slane %v2740_v22, 1 }
 0x495   :  { %10222 = vst [vmem:[#allocation189_spill] sm:$0xff] %v7052_v52  ;;  %v2700_v52 = vmul.f32 %v6667_v41, %v2695_v40 }
 0x496   :  { %10223 = vst [vmem:[#allocation190_spill] sm:$0xff] %v7054_v25  ;;  %v2716_v25 = vrot.slane %v2701_v15, 1 }
 0x497   :  { %v2714_v47 = vrot.slane %v2700_v52, 1 }
 0x499   :  { %2758 = vrot.lane.b32.xlu1 %v2750_v44, %s5451_s7  ;;  %2718 = vrot.lane.b32.xlu2 %v2710_v17, %s5451_s7  ;;  %v2753_v44 = vrot.slane %v2739_v31, 1  ;;  %v2783_v17 = vstv %s5215_s16  ;;  %v2715_v40 = vsel %vm1007_vm6, %v2713_v51, %v2714_v47  ;;  %s5174_s16 = sld [smem:[#allocation9 + $0x4d]] }
 0x49a   :  { %2680 = vrot.lane.b32.xlu0 %v2668_v0, %s5451_s7  ;;  %v2717_v0 = vsel %vm1007_vm6, %v2714_v47, %v2716_v25  ;;  %v2785_v49 = vmul.f32 %v6758_v8, %v2783_v17  ;;  %v2784_v52 = vmul.f32 %v6741_v4, %v2783_v17  ;;  %v2788_v51 = vmul.f32 %v6667_v41, %v2783_v17 }
 0x49b   :  { %v7065_v45 = vpop.permute.xlu1 %2422  ;;  %v7067_v14 = vpop.permute.xlu2 %2458  ;;  %v2755_v58 = vsel %vm1007_vm6, %v2753_v44, %v2754_v9 }
 0x49c   :  { %10224 = vst [vmem:[#allocation191_spill] sm:$0xff] %v7065_v45  ;;  %v7070_v18 = vpop.permute.xlu0 %2390  ;;  %v2797_v25 = vrot.slane %v2785_v49, 1  ;;  %v2796_v44 = vrot.slane %v2784_v52, 1 }
 0x49d   :  { %10225 = vst [vmem:[#allocation192_spill] sm:$0xff] %v7067_v14  ;;  %v2738_v14 = vmul.f32 %v6752_v55, %v2735_v19 }
 0x49e   :  { %10226 = vst [vmem:[#allocation193_spill] sm:$0xff] %v7070_v18 }
 0x49f   :  { %v2751_v50 = vrot.slane %v2738_v14, 1 }
 0x4a1   :  { %2764 = vrot.lane.b32.xlu1 %v2755_v58, %s5451_s7  ;;  %2724 = vrot.lane.b32.xlu2 %v2717_v0, %s5451_s7  ;;  %v2798_v58 = vsel %vm1007_vm6, %v2796_v44, %v2797_v25  ;;  %v2752_v47 = vsel %vm1007_vm6, %v2749_v20, %v2751_v50  ;;  %v2741_v0 = vmul.f32 %v6703_v56, %v2735_v19  ;;  %v2802_v44 = vrot.slane %v2788_v51, 1 }
 0x4a2   :  { %2722 = vrot.lane.b32.xlu0 %v2715_v40, %s5451_s7  ;;  %v2787_v40 = vmul.f32 %v6761_v32, %v2783_v17 }
 0x4a3   :  { %v7081_v15 = vpop.permute.xlu1 %2428  ;;  %v7083_v22 = vpop.permute.xlu2 %2464 }
 0x4a4   :  { %10227 = vst [vmem:[#allocation194_spill] sm:$0xff] %v7081_v15  ;;  %v7085_v31 = vpop.permute.xlu0 %2418  ;;  %v2801_v45 = vrot.slane %v2787_v40, 1 }
 0x4a5   :  { %10228 = vst [vmem:[#allocation195_spill] sm:$0xff] %v7083_v22  ;;  %v2756_v22 = vrot.slane %v2741_v0, 1 }
 0x4a6   :  { %10229 = vst [vmem:[#allocation196_spill] sm:$0xff] %v7085_v31  ;;  %v2803_v31 = vsel %vm1007_vm6, %v2801_v45, %v2802_v44 }
 0x4a7   :  { %v2757_v19 = vsel %vm1007_vm6, %v2754_v9, %v2756_v22 }
 0x4a9   :  { %2806 = vrot.lane.b32.xlu1 %v2798_v58, %s5451_s7  ;;  %2762 = vrot.lane.b32.xlu2 %v2751_v50, %s5451_s7  ;;  %v2831_v58 = vstv %s5216_s17  ;;  %v2786_v50 = vmul.f32 %v6752_v55, %v2783_v17  ;;  %s7757_s17 = sld [smem:[#allocation9 + $0x36]] }
 0x4aa   :  { %2760 = vrot.lane.b32.xlu0 %v2752_v47, %s5451_s7  ;;  %v2833_v20 = vmul.f32 %v6758_v8, %v2831_v58  ;;  %v2832_v47 = vmul.f32 %v6741_v4, %v2831_v58  ;;  %v2836_v9 = vmul.f32 %v6667_v41, %v2831_v58 }
 0x4ab   :  { %v7095_v49 = vpop.permute.xlu1 %2460  ;;  %v7097_v14 = vpop.permute.xlu2 %2496 }
 0x4ac   :  { %10230 = vst [vmem:[#allocation197_spill] sm:$0xff] %v7095_v49  ;;  %v7099_v52 = vpop.permute.xlu0 %2424  ;;  %v2845_v45 = vrot.slane %v2833_v20, 1  ;;  %v2799_v49 = vrot.slane %v2786_v50, 1 }
 0x4ad   :  { %10231 = vst [vmem:[#allocation198_spill] sm:$0xff] %v7097_v14  ;;  %v2844_v14 = vrot.slane %v2832_v47, 1 }
 0x4ae   :  { %10232 = vst [vmem:[#allocation199_spill] sm:$0xff] %v7099_v52 }
 0x4b1   :  { %2812 = vrot.lane.b32.xlu1 %v2803_v31, %s5451_s7  ;;  %2768 = vrot.lane.b32.xlu2 %v2756_v22, %s5451_s7  ;;  %v2846_v31 = vsel %vm1007_vm6, %v2844_v14, %v2845_v45  ;;  %v2800_v22 = vsel %vm1007_vm6, %v2797_v25, %v2799_v49  ;;  %v2850_v14 = vrot.slane %v2836_v9, 1 }
 0x4b2   :  { %2766 = vrot.lane.b32.xlu0 %v2757_v19, %s5451_s7  ;;  %v2789_v19 = vmul.f32 %v6703_v56, %v2783_v17 }
 0x4b3   :  { %v7109_v51 = vpop.permute.xlu1 %2466  ;;  %v7111_v0 = vpop.permute.xlu2 %2502 }
 0x4b4   :  { %10233 = vst [vmem:[#allocation200_spill] sm:$0xff] %v7109_v51  ;;  %v7113_v40 = vpop.permute.xlu0 %2456  ;;  %v2804_v52 = vrot.slane %v2789_v19, 1 }
 0x4b5   :  { %10234 = vst [vmem:[#allocation201_spill] sm:$0xff] %v7111_v0 }
 0x4b6   :  { %10235 = vst [vmem:[#allocation202_spill] sm:$0xff] %v7113_v40  ;;  %v2835_v40 = vmul.f32 %v6761_v32, %v2831_v58  ;;  %v2805_v17 = vsel %vm1007_vm6, %v2802_v44, %v2804_v52  ;;  %v2837_v44 = vmul.f32 %v6703_v56, %v2831_v58 }
 0x4b8   :  { %v2849_v0 = vrot.slane %v2835_v40, 1 }
 0x4b9   :  { %2854 = vrot.lane.b32.xlu1 %v2846_v31, %s5451_s7  ;;  %2810 = vrot.lane.b32.xlu2 %v2799_v49, %s5451_s7  ;;  %v2879_v31 = vstv %s5217_s18  ;;  %v2834_v49 = vmul.f32 %v6752_v55, %v2831_v58  ;;  %s7900_s18 = sld [smem:[#allocation9 + $0x15]] }
 0x4ba   :  { %2808 = vrot.lane.b32.xlu0 %v2800_v22, %s5451_s7  ;;  %v2851_v51 = vsel %vm1007_vm6, %v2849_v0, %v2850_v14  ;;  %v2881_v25 = vmul.f32 %v6758_v8, %v2879_v31  ;;  %v2880_v22 = vmul.f32 %v6741_v4, %v2879_v31 }
 0x4bb   :  { %v7123_v20 = vpop.permute.xlu1 %2498  ;;  %v7125_v50 = vpop.permute.xlu2 %2544 }
 0x4bc   :  { %10236 = vst [vmem:[#allocation203_spill] sm:$0xff] %v7123_v20  ;;  %v7127_v47 = vpop.permute.xlu0 %2462  ;;  %v2893_v0 = vrot.slane %v2881_v25, 5  ;;  %v2847_v20 = vrot.slane %v2834_v49, 1 }
 0x4bd   :  { %10237 = vst [vmem:[#allocation204_spill] sm:$0xff] %v7125_v50  ;;  %v2885_v50 = vmul.f32 %v6703_v56, %v2879_v31 }
 0x4be   :  { %10238 = vst [vmem:[#allocation205_spill] sm:$0xff] %v7127_v47  ;;  %v2892_v47 = vrot.slane %v2880_v22, 5 }
 0x4bf   :  { %v2900_v22 = vrot.slane %v2885_v50, 5 }
 0x4c1   :  { %2860 = vrot.lane.b32.xlu1 %v2851_v51, %s5451_s7  ;;  %2816 = vrot.lane.b32.xlu2 %v2804_v52, %s5451_s7  ;;  %v2894_v51 = vsel %vm974_vm4, %v2892_v47, %v2893_v0  ;;  %v2848_v52 = vsel %vm1007_vm6, %v2845_v45, %v2847_v20  ;;  %v2919_v45 = vstv %s5218_s19  ;;  %s7904_s19 = sld [smem:[#allocation9 + $0x3d]] }
 0x4c2   :  { %2814 = vrot.lane.b32.xlu0 %v2805_v17, %s5451_s7  ;;  %v2884_v17 = vmul.f32 %v6667_v41, %v2879_v31  ;;  %v2882_v41 = vmul.f32 %v6752_v55, %v2879_v31 }
 0x4c3   :  { %v7137_v9 = vpop.permute.xlu1 %2504  ;;  %v7139_v40 = vpop.permute.xlu2 %2582 }
 0x4c4   :  { %10239 = vst [vmem:[#allocation206_spill] sm:$0xff] %v7137_v9  ;;  %v7141_v19 = vpop.permute.xlu0 %2494 }
 0x4c5   :  { %10240 = vst [vmem:[#allocation207_spill] sm:$0xff] %v7139_v40 }
 0x4c6   :  { %10241 = vst [vmem:[#allocation208_spill] sm:$0xff] %v7141_v19  ;;  %v2852_v19 = vrot.slane %v2837_v44, 1  ;;  %v2922_v44 = vmul.f32 %v6752_v55, %v2919_v45 }
 0x4c8   :  { %v2853_v58 = vsel %vm1007_vm6, %v2850_v14, %v2852_v19 }
 0x4c9   :  { %2902 = vrot.lane.b32.xlu1 %v2894_v51, %s5451_s7  ;;  %2858 = vrot.lane.b32.xlu2 %v2847_v20, %s5451_s7  ;;  %v2898_v51 = vrot.slane %v2884_v17, 5  ;;  %v2883_v20 = vmul.f32 %v6761_v32, %v2879_v31  ;;  %v2921_v31 = vmul.f32 %v6758_v8, %v2919_v45 }
 0x4ca   :  { %2856 = vrot.lane.b32.xlu0 %v2848_v52, %s5451_s7 }
 0x4cb   :  { %v7151_v25 = vpop.permute.xlu1 %2546  ;;  %v7153_v49 = vpop.permute.xlu2 %2588  ;;  %v2901_v9 = vsel %vm974_vm4, %v2898_v51, %v2900_v22  ;;  %v2897_v22 = vrot.slane %v2883_v20, 5  ;;  %v2920_v20 = vmul.f32 %v6741_v4, %v2919_v45 }
 0x4cc   :  { %10242 = vst [vmem:[#allocation209_spill] sm:$0xff] %v7151_v25  ;;  %v7155_v47 = vpop.permute.xlu0 %2500 }
 0x4cd   :  { %10243 = vst [vmem:[#allocation210_spill] sm:$0xff] %v7153_v49  ;;  %v2899_v14 = vsel %vm974_vm4, %v2897_v22, %v2898_v51  ;;  %v2933_v51 = vrot.slane %v2921_v31, 5  ;;  %v2923_v31 = vmul.f32 %v6761_v32, %v2919_v45 }
 0x4ce   :  { %10244 = vst [vmem:[#allocation211_spill] sm:$0xff] %v7155_v47  ;;  %v2935_v47 = vrot.slane %v2922_v44, 5 }
 0x4d1   :  { %2908 = vrot.lane.b32.xlu1 %v2901_v9, %s5451_s7  ;;  %2864 = vrot.lane.b32.xlu2 %v2852_v19, %s5451_s7  ;;  %v2895_v9 = vrot.slane %v2882_v41, 5  ;;  %v2925_v41 = vmul.f32 %v6703_v56, %v2919_v45 }
 0x4d2   :  { %2862 = vrot.lane.b32.xlu0 %v2853_v58, %s5451_s7 }
 0x4d3   :  { %v7164_v52 = vpop.permute.xlu1 %2584  ;;  %v7166_v50 = vpop.permute.xlu2 %2630  ;;  %v2896_v19 = vsel %vm974_vm4, %v2893_v0, %v2895_v9  ;;  %v2940_v22 = vrot.slane %v2925_v41, 5  ;;  %v2936_v0 = vsel %vm974_vm4, %v2933_v51, %v2935_v47  ;;  %v7189_v9 = vld [vmem:[#allocation3 + $0x20] sm:$0xff] }
 0x4d4   :  { %10245 = vst [vmem:[#allocation212_spill] sm:$0xff] %v7164_v52  ;;  %v7169_v17 = vpop.permute.xlu0 %2542  ;;  %v2924_v56 = vmul.f32 %v7189_v9, %v2919_v45 }
 0x4d5   :  { %10246 = vst [vmem:[#allocation213_spill] sm:$0xff] %v7166_v50 }
 0x4d6   :  { %10247 = vst [vmem:[#allocation214_spill] sm:$0xff] %v7169_v17 }
 0x4d9   :  { %2946 = vrot.lane.b32.xlu1 %v2935_v47, %s5451_s7  ;;  %2906 = vrot.lane.b32.xlu2 %v2899_v14, %s5451_s7  ;;  %v2932_v14 = vrot.slane %v2920_v20, 5  ;;  %v2967_v47 = vstv %s5219_s20  ;;  %v2938_v20 = vrot.slane %v2924_v56, 5  ;;  %s7988_s20 = sld [smem:[#allocation9 + $0x44]] }
 0x4da   :  { %2904 = vrot.lane.b32.xlu0 %v2896_v19, %s5451_s7 }
 0x4db   :  { %v7177_v58 = vpop.permute.xlu1 %2590  ;;  %v7179_v55 = vpop.permute.xlu2 %2636  ;;  %v2934_v8 = vsel %vm974_vm4, %v2932_v14, %v2933_v51  ;;  %v2937_v14 = vrot.slane %v2923_v31, 5 }
 0x4dc   :  { %10248 = vst [vmem:[#allocation215_spill] sm:$0xff] %v7177_v58  ;;  %v7183_v44 = vpop.permute.xlu0 %2548 }
 0x4dd   :  { %10249 = vst [vmem:[#allocation216_spill] sm:$0xff] %v7179_v55  ;;  %v2941_v55 = vsel %vm974_vm4, %v2938_v20, %v2940_v22 }
 0x4de   :  { %10250 = vst [vmem:[#allocation217_spill] sm:$0xff] %v7183_v44 }
 0x4e1   :  { %2952 = vrot.lane.b32.xlu1 %v2940_v22, %s5451_s7  ;;  %2944 = vrot.lane.b32.xlu2 %v2936_v0, %s5451_s7  ;;  %v7200_v0 = vld [vmem:[#allocation2 + $0x18] sm:$0xff] }
 0x4e2   :  { %2942 = vrot.lane.b32.xlu0 %v2934_v8, %s5451_s7  ;;  %v2970_v51 = vmul.f32 %v7200_v0, %v2967_v47  ;;  %v2939_v8 = vsel %vm974_vm4, %v2937_v14, %v2938_v20 }
 0x4e3   :  { %v7193_v4 = vpop.permute.xlu1 %2632  ;;  %v7195_v19 = vpop.permute.xlu2 %2670 }
 0x4e4   :  { %10251 = vst [vmem:[#allocation218_spill] sm:$0xff] %v7193_v4  ;;  %v7198_v41 = vpop.permute.xlu0 %2586  ;;  %v7214_v4 = vld [vmem:[#allocation2 + $0x8] sm:$0xff] }
 0x4e5   :  { %10252 = vst [vmem:[#allocation219_spill] sm:$0xff] %v7195_v19  ;;  %v2993_v19 = vstv %s5220_s22  ;;  %v2969_v31 = vmul.f32 %v7214_v4, %v2967_v47  ;;  %s8181_s22 = sld [smem:[#allocation9 + $0x4b]] }
 0x4e6   :  { %10253 = vst [vmem:[#allocation220_spill] sm:$0xff] %v7198_v41  ;;  %v2995_v22 = vmul.f32 %v7214_v4, %v2993_v19  ;;  %v2999_v52 = vmul.f32 %v6878_v63, %v2993_v19 }
 0x4e9   :  { %2980 = vrot.lane.b32.xlu1 %v2970_v51, %s5452_s21  ;;  %2950 = vrot.lane.b32.xlu2 %v2941_v55, %s5451_s7  ;;  %v7218_v51 = vld [vmem:[#allocation2] sm:$0xff] }
 0x4ea   :  { %2948 = vrot.lane.b32.xlu0 %v2939_v8, %s5451_s7  ;;  %v2968_v55 = vmul.f32 %v7218_v51, %v2967_v47  ;;  %v2994_v58 = vmul.f32 %v7218_v51, %v2993_v19  ;;  %s5232_s7 = sld [smem:[#allocation9 + $0x5f]] }
 0x4eb   :  { %v7208_v32 = vpop.permute.xlu1 %2638  ;;  %v7210_v45 = vpop.permute.xlu2 %2676 }
 0x4ec   :  { %10254 = vst [vmem:[#allocation221_spill] sm:$0xff] %v7208_v32  ;;  %v7212_v56 = vpop.permute.xlu0 %2592  ;;  %v7230_v32 = vld [vmem:[#allocation2 + $0x20] sm:$0xff] }
 0x4ed   :  { %10255 = vst [vmem:[#allocation222_spill] sm:$0xff] %v7210_v45  ;;  %v2998_v41 = vmul.f32 %v7230_v32, %v2993_v19  ;;  %v2971_v50 = vmul.f32 %v7230_v32, %v2967_v47  ;;  %v2996_v45 = vmul.f32 %v6864_v38, %v2993_v19 }
 0x4ee   :  { %10256 = vst [vmem:[#allocation223_spill] sm:$0xff] %v7212_v56 }
 0x4f1   :  { %3008 = vrot.lane.b32.xlu1 %v2995_v22, %s5452_s21  ;;  %2978 = vrot.lane.b32.xlu2 %v2969_v31, %s5452_s21 }
 0x4f2   :  { %2976 = vrot.lane.b32.xlu0 %v2968_v55, %s5452_s21 }
 0x4f3   :  { %v7224_v20 = vpop.permute.xlu1 %2672  ;;  %v7226_v14 = vpop.permute.xlu2 %2718 }
 0x4f4   :  { %10257 = vst [vmem:[#allocation224_spill] sm:$0xff] %v7224_v20  ;;  %v7228_v8 = vpop.permute.xlu0 %2634 }
 0x4f5   :  { %10258 = vst [vmem:[#allocation225_spill] sm:$0xff] %v7226_v14  ;;  %v2997_v14 = vmul.f32 %v7200_v0, %v2993_v19 }
 0x4f6   :  { %10259 = vst [vmem:[#allocation226_spill] sm:$0xff] %v7228_v8  ;;  %v3031_v8 = vstv %s5221_s25  ;;  %s8444_s25 = sld [smem:[#allocation9 + $0x59]] }
 0x4f7   :  { %v3033_v20 = vmul.f32 %v7214_v4, %v3031_v8  ;;  %v3036_v47 = vmul.f32 %v7230_v32, %v3031_v8  ;;  %v3032_v17 = vmul.f32 %v7218_v51, %v3031_v8  ;;  %v3035_v25 = vmul.f32 %v7200_v0, %v3031_v8 }
 0x4f8   :  { %v3034_v19 = vmul.f32 %v6864_v38, %v3031_v8  ;;  %v3037_v40 = vmul.f32 %v6878_v63, %v3031_v8 }
 0x4f9   :  { %3014 = vrot.lane.b32.xlu1 %v2998_v41, %s5452_s21  ;;  %3006 = vrot.lane.b32.xlu2 %v2994_v58, %s5452_s21 }
 0x4fa   :  { %2982 = vrot.lane.b32.xlu0 %v2971_v50, %s5452_s21 }
 0x4fb   :  { %v7238_v22 = vpop.permute.xlu1 %2678  ;;  %v7240_v31 = vpop.permute.xlu2 %2724 }
 0x4fc   :  { %10260 = vst [vmem:[#allocation227_spill] sm:$0xff] %v7238_v22  ;;  %v7242_v55 = vpop.permute.xlu0 %2640 }
 0x4fd   :  { %10261 = vst [vmem:[#allocation228_spill] sm:$0xff] %v7240_v31 }
 0x4fe   :  { %10262 = vst [vmem:[#allocation229_spill] sm:$0xff] %v7242_v55  ;;  %v3147_v55 = vstv %s5224_s26  ;;  %s8591_s26 = sld [smem:[#allocation9 + $0x6]] }
 0x4ff   :  { %v3149_v22 = vmul.f32 %v7214_v4, %v3147_v55 }
 0x501   :  { %3046 = vrot.lane.b32.xlu1 %v3033_v20, %s5452_s21  ;;  %3012 = vrot.lane.b32.xlu2 %v2997_v14, %s5452_s21 }
 0x502   :  { %3010 = vrot.lane.b32.xlu0 %v2996_v45, %s5452_s21 }
 0x503   :  { %v7250_v50 = vpop.permute.xlu1 %2720  ;;  %v7252_v58 = vpop.permute.xlu2 %2762 }
 0x504   :  { %10263 = vst [vmem:[#allocation230_spill] sm:$0xff] %v7250_v50  ;;  %v7254_v41 = vpop.permute.xlu0 %2674 }
 0x505   :  { %10264 = vst [vmem:[#allocation231_spill] sm:$0xff] %v7252_v58 }
 0x506   :  { %10265 = vst [vmem:[#allocation232_spill] sm:$0xff] %v7254_v41  ;;  %v3069_v41 = vstv %s5222_s0  ;;  %s8471_s0 = sld [smem:[#allocation9 + $0x60]] }
 0x507   :  { %v3071_v58 = vmul.f32 %v7214_v4, %v3069_v41  ;;  %v3070_v49 = vmul.f32 %v7218_v51, %v3069_v41  ;;  %v3073_v8 = vmul.f32 %v7200_v0, %v3069_v41 }
 0x509   :  { %3052 = vrot.lane.b32.xlu1 %v3036_v47, %s5452_s21  ;;  %3044 = vrot.lane.b32.xlu2 %v3032_v17, %s5452_s21 }
 0x50a   :  { %3016 = vrot.lane.b32.xlu0 %v2999_v52, %s5452_s21 }
 0x50b   :  { %v7262_v45 = vpop.permute.xlu1 %2758  ;;  %v7264_v20 = vpop.permute.xlu2 %2768 }
 0x50c   :  { %10266 = vst [vmem:[#allocation233_spill] sm:$0xff] %v7262_v45  ;;  %v7266_v14 = vpop.permute.xlu0 %2680  ;;  %v3107_v45 = vstv %s5223_s3  ;;  %s8543_s3 = sld [smem:[#allocation9 + $0x37]] }
 0x50d   :  { %10267 = vst [vmem:[#allocation234_spill] sm:$0xff] %v7264_v20  ;;  %v3113_v20 = vmul.f32 %v6878_v63, %v3107_v45 }
 0x50e   :  { %10268 = vst [vmem:[#allocation235_spill] sm:$0xff] %v7266_v14  ;;  %v3074_v14 = vmul.f32 %v7230_v32, %v3069_v41 }
 0x511   :  { %3084 = vrot.lane.b32.xlu1 %v3071_v58, %s5452_s21  ;;  %3050 = vrot.lane.b32.xlu2 %v3035_v25, %s5452_s21  ;;  %v3110_v58 = vmul.f32 %v6864_v38, %v3107_v45  ;;  %v3109_v25 = vmul.f32 %v7214_v4, %v3107_v45 }
 0x512   :  { %3048 = vrot.lane.b32.xlu0 %v3034_v19, %s5452_s21 }
 0x513   :  { %v7274_v52 = vpop.permute.xlu1 %2764  ;;  %v7276_v17 = vpop.permute.xlu2 %2810  ;;  %v3121_v50 = vrot.slane %v3109_v25, 4 }
 0x514   :  { %10269 = vst [vmem:[#allocation236_spill] sm:$0xff] %v7274_v52  ;;  %v7278_v47 = vpop.permute.xlu0 %2722  ;;  %v3123_v52 = vrot.slane %v3110_v58, 4  ;;  %v3108_v58 = vmul.f32 %v7218_v51, %v3107_v45 }
 0x515   :  { %10270 = vst [vmem:[#allocation237_spill] sm:$0xff] %v7276_v17 }
 0x516   :  { %10271 = vst [vmem:[#allocation238_spill] sm:$0xff] %v7278_v47  ;;  %v3120_v18 = vrot.slane %v3108_v58, 4 }
 0x519   :  { %3090 = vrot.lane.b32.xlu1 %v3074_v14, %s5452_s21  ;;  %3082 = vrot.lane.b32.xlu2 %v3070_v49, %s5452_s21  ;;  %v3124_v14 = vsel %vm867_vm5, %v3121_v50, %v3123_v52  ;;  %v3072_v49 = vmul.f32 %v6864_v38, %v3069_v41 }
 0x51a   :  { %3054 = vrot.lane.b32.xlu0 %v3037_v40, %s5452_s21  ;;  %v3148_v40 = vmul.f32 %v7218_v51, %v3147_v55 }
 0x51b   :  { %v7288_v19 = vpop.permute.xlu1 %2806  ;;  %v7290_v17 = vpop.permute.xlu2 %2816 }
 0x51c   :  { %10272 = vst [vmem:[#allocation239_spill] sm:$0xff] %v7288_v19  ;;  %v7292_v47 = vpop.permute.xlu0 %2760  ;;  %v3160_v52 = vrot.slane %v3148_v40, 4  ;;  %v3151_v40 = vmul.f32 %v7200_v0, %v3147_v55 }
 0x51d   :  { %10273 = vst [vmem:[#allocation240_spill] sm:$0xff] %v7290_v17 }
 0x51e   :  { %10274 = vst [vmem:[#allocation241_spill] sm:$0xff] %v7292_v47  ;;  %v3161_v47 = vrot.slane %v3149_v22, 4  ;;  %v3112_v22 = vmul.f32 %v7230_v32, %v3107_v45 }
 0x520   :  { %v3162_v23 = vsel %vm867_vm5, %v3160_v52, %v3161_v47 }
 0x521   :  { %3132 = vrot.lane.b32.xlu1 %v3124_v14, %s5452_s21  ;;  %3088 = vrot.lane.b32.xlu2 %v3073_v8, %s5452_s21  ;;  %v3122_v8 = vsel %vm867_vm5, %v3120_v18, %v3121_v50  ;;  %v3075_v14 = vmul.f32 %v6878_v63, %v3069_v41  ;;  %v3111_v18 = vmul.f32 %v7200_v0, %v3107_v45 }
 0x522   :  { %3086 = vrot.lane.b32.xlu0 %v3072_v49, %s5452_s21  ;;  %v3152_v49 = vmul.f32 %v7230_v32, %v3147_v55 }
 0x523   :  { %v7303_v25 = vpop.permute.xlu1 %2812  ;;  %v7305_v19 = vpop.permute.xlu2 %2858 }
 0x524   :  { %10275 = vst [vmem:[#allocation242_spill] sm:$0xff] %v7303_v25  ;;  %v7307_v17 = vpop.permute.xlu0 %2766  ;;  %v3166_v41 = vrot.slane %v3152_v49, 4  ;;  %v3126_v25 = vrot.slane %v3112_v22, 4 }
 0x525   :  { %10276 = vst [vmem:[#allocation243_spill] sm:$0xff] %v7305_v19  ;;  %v3128_v19 = vrot.slane %v3113_v20, 4 }
 0x526   :  { %10277 = vst [vmem:[#allocation244_spill] sm:$0xff] %v7307_v17  ;;  %v3125_v17 = vrot.slane %v3111_v18, 4 }
 0x528   :  { %v3127_v45 = vsel %vm867_vm5, %v3125_v17, %v3126_v25 }
 0x529   :  { %3170 = vrot.lane.b32.xlu1 %v3162_v23, %s5452_s21  ;;  %3130 = vrot.lane.b32.xlu2 %v3122_v8, %s5452_s21  ;;  %v3165_v23 = vrot.slane %v3151_v40, 4  ;;  %v3195_v8 = vstv %s5225_s27  ;;  %s8597_s27 = sld [smem:[#allocation9 + $0xd]] }
 0x52a   :  { %3092 = vrot.lane.b32.xlu0 %v3075_v14, %s5452_s21  ;;  %v3129_v14 = vsel %vm867_vm5, %v3126_v25, %v3128_v19  ;;  %v3197_v15 = vmul.f32 %v7214_v4, %v3195_v8  ;;  %v3196_v20 = vmul.f32 %v7218_v51, %v3195_v8  ;;  %v3153_v25 = vmul.f32 %v6878_v63, %v3147_v55 }
 0x52b   :  { %v7319_v58 = vpop.permute.xlu1 %2854  ;;  %v7321_v52 = vpop.permute.xlu2 %2864  ;;  %v3167_v56 = vsel %vm867_vm5, %v3165_v23, %v3166_v41 }
 0x52c   :  { %10278 = vst [vmem:[#allocation245_spill] sm:$0xff] %v7319_v58  ;;  %v7324_v50 = vpop.permute.xlu0 %2808  ;;  %v3209_v19 = vrot.slane %v3197_v15, 4  ;;  %v3208_v23 = vrot.slane %v3196_v20, 4 }
 0x52d   :  { %10279 = vst [vmem:[#allocation246_spill] sm:$0xff] %v7321_v52 }
 0x52e   :  { %10280 = vst [vmem:[#allocation247_spill] sm:$0xff] %v7324_v50  ;;  %v3150_v50 = vmul.f32 %v6864_v38, %v3147_v55 }
 0x530   :  { %v3163_v18 = vrot.slane %v3150_v50, 4 }
 0x531   :  { %3176 = vrot.lane.b32.xlu1 %v3167_v56, %s5452_s21  ;;  %3136 = vrot.lane.b32.xlu2 %v3129_v14, %s5452_s21  ;;  %v3210_v56 = vsel %vm867_vm5, %v3208_v23, %v3209_v19  ;;  %v3200_v14 = vmul.f32 %v7230_v32, %v3195_v8 }
 0x532   :  { %3134 = vrot.lane.b32.xlu0 %v3127_v45, %s5452_s21  ;;  %v3164_v17 = vsel %vm867_vm5, %v3161_v47, %v3163_v18  ;;  %v3199_v45 = vmul.f32 %v7200_v0, %v3195_v8  ;;  %v3198_v47 = vmul.f32 %v6864_v38, %v3195_v8 }
 0x533   :  { %v7335_v49 = vpop.permute.xlu1 %2860  ;;  %v7337_v22 = vpop.permute.xlu2 %2906  ;;  %v3214_v23 = vrot.slane %v3200_v14, 4  ;;  %v7365_v14 = vld [vmem:[#allocation3] sm:$0xff] }
 0x534   :  { %10281 = vst [vmem:[#allocation248_spill] sm:$0xff] %v7335_v49  ;;  %v7339_v40 = vpop.permute.xlu0 %2814  ;;  %v3213_v58 = vrot.slane %v3199_v45, 4  ;;  %v3243_v49 = vstv %s5226_s28  ;;  %v3211_v45 = vrot.slane %v3198_v47, 4  ;;  %s8609_s28 = sld [smem:[#allocation9 + $0x1b]] }
 0x535   :  { %10282 = vst [vmem:[#allocation249_spill] sm:$0xff] %v7337_v22  ;;  %v7384_v22 = vld [vmem:[#allocation3 + $0x8] sm:$0xff] }
 0x536   :  { %10283 = vst [vmem:[#allocation250_spill] sm:$0xff] %v7339_v40  ;;  %v3168_v40 = vrot.slane %v3153_v25, 4  ;;  %v3244_v25 = vmul.f32 %v7365_v14, %v3243_v49  ;;  %v3212_v38 = vsel %vm867_vm5, %v3209_v19, %v3211_v45  ;;  %v7791_v29 = vmul.f32 %v7384_v22, %v6065_v2 }
 0x537   :  { %v7800_v53 = vmul.f32 %v7384_v22, %v6067_v6  ;;  %v7804_v57 = vmul.f32 %v7384_v22, %v6069_v1  ;;  %v7862_v33 = vmul.f32 %v7384_v22, %v6077_v61 }
 0x538   :  { %v3169_v55 = vsel %vm867_vm5, %v3166_v41, %v3168_v40  ;;  %v3201_v41 = vmul.f32 %v6878_v63, %v3195_v8  ;;  %v3245_v8 = vmul.f32 %v7384_v22, %v3243_v49 }
 0x539   :  { %3218 = vrot.lane.b32.xlu1 %v3210_v56, %s5452_s21  ;;  %3174 = vrot.lane.b32.xlu2 %v3163_v18, %s5452_s21  ;;  %v3215_v56 = vsel %vm867_vm5, %v3213_v58, %v3214_v23  ;;  %v1149_v60 = vrot.slane %v7800_v53, 5  ;;  %v1041_v48 = vrot.slane %v7804_v57, 1  ;;  %v7853_v53 = vld [vmem:[#allocation2 + $0x18] sm:$0xff] }
 0x53a   :  { %3172 = vrot.lane.b32.xlu0 %v3164_v17, %s5452_s21  ;;  %v3253_v52 = vrot.slane %v3245_v8, 5  ;;  %10368 = vst [vmem:[#allocation335_spill] sm:$0xff] %v7853_v53 }
 0x53b   :  { %v7349_v15 = vpop.permute.xlu1 %2902  ;;  %v7351_v50 = vpop.permute.xlu2 %2944 }
 0x53c   :  { %10284 = vst [vmem:[#allocation251_spill] sm:$0xff] %v7349_v15  ;;  %v7353_v20 = vpop.permute.xlu0 %2856  ;;  %v3283_v15 = vstv %s5227_s29  ;;  %s8639_s29 = sld [smem:[#allocation9 + $0x14]] }
 0x53d   :  { %10285 = vst [vmem:[#allocation252_spill] sm:$0xff] %v7351_v50  ;;  %v3285_v19 = vmul.f32 %v7384_v22, %v3283_v15 }
 0x53e   :  { %10286 = vst [vmem:[#allocation253_spill] sm:$0xff] %v7353_v20  ;;  %v7379_v20 = vld [vmem:[#allocation3 + $0x18] sm:$0xff] }
 0x53f   :  { %v3246_v47 = vmul.f32 %v7379_v20, %v3243_v49 }
 0x541   :  { %3224 = vrot.lane.b32.xlu1 %v3215_v56, %s5452_s21  ;;  %3180 = vrot.lane.b32.xlu2 %v3168_v40, %s5452_s21  ;;  %v3252_v56 = vrot.slane %v3244_v25, 5  ;;  %v3255_v50 = vrot.slane %v3246_v47, 5 }
 0x542   :  { %3178 = vrot.lane.b32.xlu0 %v3169_v55, %s5452_s21 }
 0x543   :  { %v7361_v18 = vpop.permute.xlu1 %2908  ;;  %v7363_v17 = vpop.permute.xlu2 %2950 }
 0x544   :  { %10287 = vst [vmem:[#allocation254_spill] sm:$0xff] %v7361_v18  ;;  %v7368_v58 = vpop.permute.xlu0 %2862  ;;  %v3507_v18 = vstv %s5232_s7  ;;  %s5251_s7 = sld [smem:[#allocation9 + $0x22]] }
 0x545   :  { %10288 = vst [vmem:[#allocation255_spill] sm:$0xff] %v7363_v17  ;;  %v3216_v17 = vrot.slane %v3201_v41, 4 }
 0x546   :  { %10289 = vst [vmem:[#allocation256_spill] sm:$0xff] %v7368_v58  ;;  %v7400_v58 = vld [vmem:[#allocation3 + $0x28] sm:$0x3f] }
 0x547   :  { %v3217_v63 = vsel %vm867_vm5, %v3214_v23, %v3216_v17  ;;  %v3289_v23 = vmul.f32 %v7400_v58, %v3283_v15 }
 0x549   :  { %3258 = vrot.lane.b32.xlu1 %v3252_v56, %s5452_s21  ;;  %3222 = vrot.lane.b32.xlu2 %v3211_v45, %s5452_s21  ;;  %v3284_v45 = vmul.f32 %v7365_v14, %v3283_v15 }
 0x54a   :  { %3220 = vrot.lane.b32.xlu0 %v3212_v38, %s5452_s21 }
 0x54b   :  { %v7375_v40 = vpop.permute.xlu1 %2946  ;;  %v7377_v55 = vpop.permute.xlu2 %2978 }
 0x54c   :  { %10290 = vst [vmem:[#allocation257_spill] sm:$0xff] %v7375_v40  ;;  %v7382_v25 = vpop.permute.xlu0 %2904  ;;  %v3297_v40 = vrot.slane %v3285_v19, 1  ;;  %v3288_v19 = vmul.f32 %v7189_v9, %v3283_v15 }
 0x54d   :  { %10291 = vst [vmem:[#allocation258_spill] sm:$0xff] %v7377_v55  ;;  %v3296_v55 = vrot.slane %v3284_v45, 1 }
 0x54e   :  { %10292 = vst [vmem:[#allocation259_spill] sm:$0xff] %v7382_v25 }
 0x54f   :  { %v3298_v25 = vsel %vm1007_vm6, %v3296_v55, %v3297_v40 }
 0x551   :  { %3264 = vrot.lane.b32.xlu1 %v3255_v50, %s5452_s21  ;;  %3228 = vrot.lane.b32.xlu2 %v3216_v17, %s5452_s21  ;;  %v3254_v17 = vsel %vm974_vm4, %v3252_v56, %v3253_v52 }
 0x552   :  { %3226 = vrot.lane.b32.xlu0 %v3217_v63, %s5452_s21  ;;  %v3247_v63 = vmul.f32 %v7189_v9, %v3243_v49  ;;  %v7419_v49 = vld [vmem:[#allocation3 + $0x10] sm:$0x3f] }
 0x553   :  { %v7393_v38 = vpop.permute.xlu1 %2952  ;;  %v7395_v41 = vpop.permute.xlu2 %3006  ;;  %v3286_v56 = vmul.f32 %v7419_v49, %v3283_v15 }
 0x554   :  { %10293 = vst [vmem:[#allocation260_spill] sm:$0xff] %v7393_v38  ;;  %v7397_v47 = vpop.permute.xlu0 %2942 }
 0x555   :  { %10294 = vst [vmem:[#allocation261_spill] sm:$0xff] %v7395_v41  ;;  %v3304_v41 = vrot.slane %v3289_v23, 1 }
 0x556   :  { %10295 = vst [vmem:[#allocation262_spill] sm:$0xff] %v7397_v47  ;;  %v3256_v47 = vrot.slane %v3247_v63, 5 }
 0x559   :  { %3306 = vrot.lane.b32.xlu1 %v3298_v25, %s5452_s21  ;;  %3262 = vrot.lane.b32.xlu2 %v3253_v52, %s5452_s21  ;;  %v3302_v25 = vrot.slane %v3288_v19, 1  ;;  %v3257_v52 = vsel %vm974_vm4, %v3255_v50, %v3256_v47  ;;  %v3299_v19 = vrot.slane %v3286_v56, 1 }
 0x55a   :  { %3260 = vrot.lane.b32.xlu0 %v3254_v17, %s5452_s21  ;;  %v3323_v17 = vstv %s5228_s30  ;;  %s5454_s30 = smov 122  }
 0x55b   :  { %v7409_v8 = vpop.permute.xlu1 %2980  ;;  %v7411_v55 = vpop.permute.xlu2 %3012  ;;  %v3305_v38 = vsel %vm1007_vm6, %v3302_v25, %v3304_v41  ;;  %v3326_v41 = vmul.f32 %v7419_v49, %v3323_v17  ;;  %v3324_v56 = vmul.f32 %v7365_v14, %v3323_v17 }
 0x55c   :  { %10296 = vst [vmem:[#allocation263_spill] sm:$0xff] %v7409_v8  ;;  %v7413_v45 = vpop.permute.xlu0 %2948 }
 0x55d   :  { %10297 = vst [vmem:[#allocation264_spill] sm:$0xff] %v7411_v55  ;;  %v3287_v55 = vmul.f32 %v7379_v20, %v3283_v15  ;;  %v3339_v50 = vrot.slane %v3326_v41, 1  ;;  %v3325_v15 = vmul.f32 %v7384_v22, %v3323_v17 }
 0x55e   :  { %10298 = vst [vmem:[#allocation265_spill] sm:$0xff] %v7413_v45 }
 0x55f   :  { %v3301_v8 = vrot.slane %v3287_v55, 1  ;;  %v3329_v55 = vmul.f32 %v7400_v58, %v3323_v17 }
 0x561   :  { %3312 = vrot.lane.b32.xlu1 %v3305_v38, %s5452_s21  ;;  %3268 = vrot.lane.b32.xlu2 %v3256_v47, %s5452_s21  ;;  %v3303_v47 = vsel %vm1007_vm6, %v3301_v8, %v3302_v25  ;;  %v3337_v25 = vrot.slane %v3325_v15, 1  ;;  %v3344_v41 = vrot.slane %v3329_v55, 1  ;;  %v3327_v55 = vmul.f32 %v7379_v20, %v3323_v17 }
 0x562   :  { %3266 = vrot.lane.b32.xlu0 %v3257_v52, %s5452_s21  ;;  %v3300_v52 = vsel %vm1007_vm6, %v3297_v40, %v3299_v19 }
 0x563   :  { %v7424_v23 = vpop.permute.xlu1 %3008  ;;  %v7426_v63 = vpop.permute.xlu2 %3044  ;;  %v3340_v40 = vsel %vm1007_vm6, %v3337_v25, %v3339_v50 }
 0x564   :  { %10299 = vst [vmem:[#allocation266_spill] sm:$0xff] %v7424_v23  ;;  %v7429_v38 = vpop.permute.xlu0 %2976 }
 0x565   :  { %10300 = vst [vmem:[#allocation267_spill] sm:$0xff] %v7426_v63 }
 0x566   :  { %10301 = vst [vmem:[#allocation268_spill] sm:$0xff] %v7429_v38 }
 0x569   :  { %3350 = vrot.lane.b32.xlu1 %v3339_v50, %s5452_s21  ;;  %3310 = vrot.lane.b32.xlu2 %v3303_v47, %s5452_s21  ;;  %v3336_v47 = vrot.slane %v3324_v56, 1 }
 0x56a   :  { %3308 = vrot.lane.b32.xlu0 %v3300_v52, %s5452_s21  ;;  %v3328_v52 = vmul.f32 %v7189_v9, %v3323_v17 }
 0x56b   :  { %v7437_v63 = vpop.permute.xlu1 %3014  ;;  %v7439_v23 = vpop.permute.xlu2 %3050  ;;  %v3338_v19 = vsel %vm1007_vm6, %v3336_v47, %v3337_v25 }
 0x56c   :  { %10302 = vst [vmem:[#allocation269_spill] sm:$0xff] %v7437_v63  ;;  %v7443_v8 = vpop.permute.xlu0 %2982  ;;  %v3342_v56 = vrot.slane %v3328_v52, 1 }
 0x56d   :  { %10303 = vst [vmem:[#allocation270_spill] sm:$0xff] %v7439_v23  ;;  %v3371_v23 = vstv %s5229_s5  ;;  %s9039_s5 = sld [smem:[#allocation9 + $0x29]] }
 0x56e   :  { %10304 = vst [vmem:[#allocation271_spill] sm:$0xff] %v7443_v8  ;;  %v3374_v15 = vmul.f32 %v7419_v49, %v3371_v23  ;;  %v3345_v25 = vsel %vm1007_vm6, %v3342_v56, %v3344_v41  ;;  %v3377_v52 = vmul.f32 %v7400_v58, %v3371_v23 }
 0x570   :  { %v3387_v45 = vrot.slane %v3374_v15, 1  ;;  %v3372_v15 = vmul.f32 %v7365_v14, %v3371_v23 }
 0x571   :  { %3356 = vrot.lane.b32.xlu1 %v3344_v41, %s5452_s21  ;;  %3348 = vrot.lane.b32.xlu2 %v3340_v40, %s5452_s21  ;;  %v3341_v40 = vrot.slane %v3327_v55, 1 }
 0x572   :  { %3346 = vrot.lane.b32.xlu0 %v3338_v19, %s5452_s21  ;;  %v3373_v19 = vmul.f32 %v7384_v22, %v3371_v23 }
 0x573   :  { %v7451_v63 = vpop.permute.xlu1 %3046  ;;  %v7453_v38 = vpop.permute.xlu2 %3082  ;;  %v3343_v47 = vsel %vm1007_vm6, %v3341_v40, %v3342_v56 }
 0x574   :  { %10305 = vst [vmem:[#allocation272_spill] sm:$0xff] %v7451_v63  ;;  %v7457_v50 = vpop.permute.xlu0 %3010  ;;  %v3385_v55 = vrot.slane %v3373_v19, 1  ;;  %v3392_v63 = vrot.slane %v3377_v52, 1  ;;  %v3375_v52 = vmul.f32 %v7379_v20, %v3371_v23 }
 0x575   :  { %10306 = vst [vmem:[#allocation273_spill] sm:$0xff] %v7453_v38 }
 0x576   :  { %10307 = vst [vmem:[#allocation274_spill] sm:$0xff] %v7457_v50  ;;  %v3388_v56 = vsel %vm1007_vm6, %v3385_v55, %v3387_v45 }
 0x579   :  { %3398 = vrot.lane.b32.xlu1 %v3387_v45, %s5452_s21  ;;  %3354 = vrot.lane.b32.xlu2 %v3345_v25, %s5452_s21  ;;  %v3384_v25 = vrot.slane %v3372_v15, 1 }
 0x57a   :  { %3352 = vrot.lane.b32.xlu0 %v3343_v47, %s5452_s21  ;;  %v3376_v47 = vmul.f32 %v7189_v9, %v3371_v23 }
 0x57b   :  { %v7465_v38 = vpop.permute.xlu1 %3052  ;;  %v7467_v17 = vpop.permute.xlu2 %3088  ;;  %v3386_v40 = vsel %vm1007_vm6, %v3384_v25, %v3385_v55 }
 0x57c   :  { %10308 = vst [vmem:[#allocation275_spill] sm:$0xff] %v7465_v38  ;;  %v7471_v41 = vpop.permute.xlu0 %3016  ;;  %v3419_v38 = vstv %s5230_s1  ;;  %v3390_v15 = vrot.slane %v3376_v47, 1  ;;  %s9196_s1 = sld [smem:[#allocation9 + $0x53]] }
 0x57d   :  { %10309 = vst [vmem:[#allocation276_spill] sm:$0xff] %v7467_v17  ;;  %v3422_v19 = vmul.f32 %v7419_v49, %v3419_v38  ;;  %v3425_v47 = vmul.f32 %v7400_v58, %v3419_v38 }
 0x57e   :  { %10310 = vst [vmem:[#allocation277_spill] sm:$0xff] %v7471_v41  ;;  %v3393_v55 = vsel %vm1007_vm6, %v3390_v15, %v3392_v63 }
 0x57f   :  { %v3435_v41 = vrot.slane %v3422_v19, 1  ;;  %v3420_v19 = vmul.f32 %v7365_v14, %v3419_v38 }
 0x581   :  { %3404 = vrot.lane.b32.xlu1 %v3392_v63, %s5452_s21  ;;  %3396 = vrot.lane.b32.xlu2 %v3388_v56, %s5452_s21  ;;  %v3389_v56 = vrot.slane %v3375_v52, 1 }
 0x582   :  { %3394 = vrot.lane.b32.xlu0 %v3386_v40, %s5452_s21  ;;  %v3421_v40 = vmul.f32 %v7384_v22, %v3419_v38 }
 0x583   :  { %v7479_v50 = vpop.permute.xlu1 %3084  ;;  %v7481_v17 = vpop.permute.xlu2 %3130  ;;  %v3391_v25 = vsel %vm1007_vm6, %v3389_v56, %v3390_v15 }
 0x584   :  { %10311 = vst [vmem:[#allocation278_spill] sm:$0xff] %v7479_v50  ;;  %v7485_v45 = vpop.permute.xlu0 %3048  ;;  %v3433_v63 = vrot.slane %v3421_v40, 1 }
 0x585   :  { %10312 = vst [vmem:[#allocation279_spill] sm:$0xff] %v7481_v17  ;;  %v3432_v17 = vrot.slane %v3420_v19, 1 }
 0x586   :  { %10313 = vst [vmem:[#allocation280_spill] sm:$0xff] %v7485_v45  ;;  %v3440_v45 = vrot.slane %v3425_v47, 1  ;;  %v3436_v15 = vsel %vm1007_vm6, %v3433_v63, %v3435_v41 }
 0x589   :  { %3446 = vrot.lane.b32.xlu1 %v3435_v41, %s5452_s21  ;;  %3402 = vrot.lane.b32.xlu2 %v3393_v55, %s5452_s21  ;;  %v3467_v55 = vstv %s5231_s6  ;;  %v3423_v41 = vmul.f32 %v7379_v20, %v3419_v38  ;;  %s5253_s6 = sld [smem:[#allocation9 + $0x30]] }
 0x58a   :  { %3400 = vrot.lane.b32.xlu0 %v3391_v25, %s5452_s21  ;;  %v3472_v56 = vmul.f32 %v7189_v9, %v3467_v55  ;;  %v3434_v25 = vsel %vm1007_vm6, %v3432_v17, %v3433_v63  ;;  %v3471_v40 = vmul.f32 %v7379_v20, %v3467_v55  ;;  %v3470_v31 = vmul.f32 %v7419_v49, %v3467_v55 }
 0x58b   :  { %v7493_v50 = vpop.permute.xlu1 %3090  ;;  %v7495_v23 = vpop.permute.xlu2 %3136 }
 0x58c   :  { %10314 = vst [vmem:[#allocation281_spill] sm:$0xff] %v7493_v50  ;;  %v7499_v52 = vpop.permute.xlu0 %3054  ;;  %v3424_v50 = vmul.f32 %v7189_v9, %v3419_v38  ;;  %v3486_v59 = vrot.slane %v3472_v56, 5  ;;  %v3485_v8 = vrot.slane %v3471_v40, 5  ;;  %v3469_v56 = vmul.f32 %v7384_v22, %v3467_v55 }
 0x58d   :  { %10315 = vst [vmem:[#allocation282_spill] sm:$0xff] %v7495_v23 }
 0x58e   :  { %10316 = vst [vmem:[#allocation283_spill] sm:$0xff] %v7499_v52  ;;  %v3438_v23 = vrot.slane %v3424_v50, 1  ;;  %v3487_v17 = vsel %vm974_vm4, %v3485_v8, %v3486_v59  ;;  %v3509_v50 = vmul.f32 %v7384_v22, %v3507_v18 }
 0x590   :  { %v3441_v63 = vsel %vm1007_vm6, %v3438_v23, %v3440_v45 }
 0x591   :  { %3452 = vrot.lane.b32.xlu1 %v3440_v45, %s5452_s21  ;;  %3444 = vrot.lane.b32.xlu2 %v3436_v15, %s5452_s21  ;;  %v3437_v15 = vrot.slane %v3423_v41, 1  ;;  %v3468_v45 = vmul.f32 %v7365_v14, %v3467_v55 }
 0x592   :  { %3442 = vrot.lane.b32.xlu0 %v3434_v25, %s5452_s21  ;;  %v3510_v25 = vmul.f32 %v7419_v49, %v3507_v18 }
 0x593   :  { %v7509_v47 = vpop.permute.xlu1 %3132  ;;  %v7511_v19 = vpop.permute.xlu2 %3174  ;;  %v3439_v38 = vsel %vm1007_vm6, %v3437_v15, %v3438_v23 }
 0x594   :  { %10317 = vst [vmem:[#allocation284_spill] sm:$0xff] %v7509_v47  ;;  %v7514_v52 = vpop.permute.xlu0 %3086  ;;  %v3480_v47 = vrot.slane %v3468_v45, 5 }
 0x595   :  { %10318 = vst [vmem:[#allocation285_spill] sm:$0xff] %v7511_v19  ;;  %v3481_v19 = vrot.slane %v3469_v56, 5 }
 0x596   :  { %10319 = vst [vmem:[#allocation286_spill] sm:$0xff] %v7514_v52  ;;  %v3523_v52 = vrot.slane %v3510_v25, 5  ;;  %v3508_v25 = vmul.f32 %v7365_v14, %v3507_v18 }
 0x599   :  { %3494 = vrot.lane.b32.xlu1 %v3487_v17, %s5452_s21  ;;  %3450 = vrot.lane.b32.xlu2 %v3441_v63, %s5452_s21  ;;  %v3483_v17 = vrot.slane %v3470_v31, 5  ;;  %v3521_v63 = vrot.slane %v3509_v50, 5  ;;  %v3512_v31 = vmul.f32 %v7189_v9, %v3507_v18 }
 0x59a   :  { %3448 = vrot.lane.b32.xlu0 %v3439_v38, %s5452_s21  ;;  %v3513_v38 = vmul.f32 %v7400_v58, %v3507_v18 }
 0x59b   :  { %v7526_v40 = vpop.permute.xlu1 %3170  ;;  %v7528_v8 = vpop.permute.xlu2 %3180  ;;  %v3524_v23 = vsel %vm974_vm4, %v3521_v63, %v3523_v52  ;;  %v3484_v15 = vsel %vm974_vm4, %v3481_v19, %v3483_v17 }
 0x59c   :  { %10320 = vst [vmem:[#allocation287_spill] sm:$0xff] %v7526_v40  ;;  %v7531_v41 = vpop.permute.xlu0 %3092  ;;  %v3482_v40 = vsel %vm974_vm4, %v3480_v47, %v3481_v19  ;;  %v3528_v17 = vrot.slane %v3513_v38, 5  ;;  %v3511_v19 = vmul.f32 %v7379_v20, %v3507_v18 }
 0x59d   :  { %10321 = vst [vmem:[#allocation288_spill] sm:$0xff] %v7528_v8  ;;  %v3473_v8 = vmul.f32 %v7400_v58, %v3467_v55 }
 0x59e   :  { %10322 = vst [vmem:[#allocation289_spill] sm:$0xff] %v7531_v41  ;;  %v3526_v41 = vrot.slane %v3512_v31, 5  ;;  %v3555_v31 = vstv %s5233_s8  ;;  %s5256_s8 = sld [smem:[#allocation9 + $0x45]] }
 0x5a0   :  { %v3529_v47 = vsel %vm974_vm4, %v3526_v41, %v3528_v17 }
 0x5a1   :  { %3532 = vrot.lane.b32.xlu1 %v3524_v23, %s5452_s21  ;;  %3492 = vrot.lane.b32.xlu2 %v3484_v15, %s5452_s21  ;;  %v3488_v23 = vrot.slane %v3473_v8, 5  ;;  %v3520_v15 = vrot.slane %v3508_v25, 5  ;;  %v3525_v25 = vrot.slane %v3511_v19, 5 }
 0x5a2   :  { %3490 = vrot.lane.b32.xlu0 %v3482_v40, %s5452_s21 }
 0x5a3   :  { %v7543_v56 = vpop.permute.xlu1 %3176  ;;  %v7545_v50 = vpop.permute.xlu2 %3222  ;;  %v3522_v55 = vsel %vm974_vm4, %v3520_v15, %v3521_v63  ;;  %v3489_v9 = vsel %vm974_vm4, %v3486_v59, %v3488_v23  ;;  %v3557_v63 = vmul.f32 %v7214_v4, %v3555_v31  ;;  %v3527_v15 = vsel %vm974_vm4, %v3525_v25, %v3526_v41 }
 0x5a4   :  { %10323 = vst [vmem:[#allocation290_spill] sm:$0xff] %v7543_v56  ;;  %v7547_v45 = vpop.permute.xlu0 %3134 }
 0x5a5   :  { %10324 = vst [vmem:[#allocation291_spill] sm:$0xff] %v7545_v50 }
 0x5a6   :  { %10325 = vst [vmem:[#allocation292_spill] sm:$0xff] %v7547_v45 }
 0x5a9   :  { %3538 = vrot.lane.b32.xlu1 %v3529_v47, %s5452_s21  ;;  %3530 = vrot.lane.b32.xlu2 %v3522_v55, %s5452_s21  ;;  %v3581_v47 = vstv %s5234_s9  ;;  %s5257_s9 = sld [smem:[#allocation9 + $0x4c]] }
 0x5aa   :  { %3496 = vrot.lane.b32.xlu0 %v3489_v9, %s5452_s21  ;;  %v3582_v55 = vmul.f32 %v7218_v51, %v3581_v47  ;;  %v3556_v9 = vmul.f32 %v7218_v51, %v3555_v31  ;;  %v3585_v25 = vmul.f32 %v7200_v0, %v3581_v47 }
 0x5ab   :  { %v7556_v40 = vpop.permute.xlu1 %3218  ;;  %v7558_v8 = vpop.permute.xlu2 %3228 }
 0x5ac   :  { %10326 = vst [vmem:[#allocation293_spill] sm:$0xff] %v7556_v40  ;;  %v7560_v38 = vpop.permute.xlu0 %3172  ;;  %v3586_v40 = vmul.f32 %v7230_v32, %v3581_v47 }
 0x5ad   :  { %10327 = vst [vmem:[#allocation294_spill] sm:$0xff] %v7558_v8  ;;  %v7742_v8 = vmul.f32 %v7379_v20, %v6069_v1 }
 0x5ae   :  { %10328 = vst [vmem:[#allocation295_spill] sm:$0xff] %v7560_v38 }
 0x5b1   :  { %3566 = vrot.lane.b32.xlu1 %v3557_v63, %s5453_s10  ;;  %3536 = vrot.lane.b32.xlu2 %v3527_v15, %s5452_s21  ;;  %v3559_v63 = vmul.f32 %v7230_v32, %v3555_v31  ;;  %v3558_v15 = vmul.f32 %v7200_v0, %v3555_v31  ;;  %v3583_v31 = vmul.f32 %v7214_v4, %v3581_v47 }
 0x5b2   :  { %3534 = vrot.lane.b32.xlu0 %v3523_v52, %s5452_s21 }
 0x5b3   :  { %v7567_v59 = vpop.permute.xlu1 %3224  ;;  %v7569_v18 = vpop.permute.xlu2 %3262 }
 0x5b4   :  { %10329 = vst [vmem:[#allocation296_spill] sm:$0xff] %v7567_v59  ;;  %v7571_v23 = vpop.permute.xlu0 %3178  ;;  %v7611_v59 = vld [vmem:[#allocation2 + $0x28] sm:$0x3f] }
 0x5b5   :  { %10330 = vst [vmem:[#allocation297_spill] sm:$0xff] %v7569_v18  ;;  %v3619_v18 = vstv %s5235_s11  ;;  %s5255_s11 = sld [smem:[#allocation9 + $0x3e]] }
 0x5b6   :  { %10331 = vst [vmem:[#allocation298_spill] sm:$0xff] %v7571_v23  ;;  %v3620_v50 = vmul.f32 %v7218_v51, %v3619_v18  ;;  %v3587_v23 = vmul.f32 %v7611_v59, %v3581_v47  ;;  %v3625_v38 = vmul.f32 %v7611_v59, %v3619_v18 }
 0x5b7   :  { %10341 = vst [vmem:[#allocation308_spill] sm:$0xff] %v7611_v59 }
 0x5b9   :  { %3594 = vrot.lane.b32.xlu1 %v3582_v55, %s5453_s10  ;;  %3564 = vrot.lane.b32.xlu2 %v3556_v9, %s5453_s10 }
 0x5ba   :  { %3540 = vrot.lane.b32.xlu0 %v3528_v17, %s5452_s21  ;;  %s8337_s21 = sld [smem:[#allocation9 + $0x52]] }
 0x5bb   :  { %v7578_v41 = vpop.permute.xlu1 %3258  ;;  %v7580_v52 = vpop.permute.xlu2 %3268 }
 0x5bc   :  { %10332 = vst [vmem:[#allocation299_spill] sm:$0xff] %v7578_v41  ;;  %v7582_v19 = vpop.permute.xlu0 %3220 }
 0x5bd   :  { %10333 = vst [vmem:[#allocation300_spill] sm:$0xff] %v7580_v52 }
 0x5be   :  { %10334 = vst [vmem:[#allocation301_spill] sm:$0xff] %v7582_v19  ;;  %v7597_v19 = vld [vmem:[#allocation2 + $0x10] sm:$0x3f] }
 0x5bf   :  { %v3584_v41 = vmul.f32 %v7597_v19, %v3581_v47  ;;  %v3621_v47 = vmul.f32 %v7214_v4, %v3619_v18 }
 0x5c1   :  { %3600 = vrot.lane.b32.xlu1 %v3585_v25, %s5453_s10  ;;  %3570 = vrot.lane.b32.xlu2 %v3559_v63, %s5453_s10 }
 0x5c2   :  { %3568 = vrot.lane.b32.xlu0 %v3558_v15, %s5453_s10 }
 0x5c3   :  { %v7590_v17 = vpop.permute.xlu1 %3264  ;;  %v7592_v55 = vpop.permute.xlu2 %3310 }
 0x5c4   :  { %10335 = vst [vmem:[#allocation302_spill] sm:$0xff] %v7590_v17  ;;  %v7594_v9 = vpop.permute.xlu0 %3226  ;;  %v3695_v17 = vstv %s5237_s2  ;;  %s5455_s2 = smov 32  }
 0x5c5   :  { %10336 = vst [vmem:[#allocation303_spill] sm:$0xff] %v7592_v55  ;;  %v3624_v55 = vmul.f32 %v7230_v32, %v3619_v18  ;;  %v3697_v45 = vmul.f32 %v7214_v4, %v3695_v17 }
 0x5c6   :  { %10337 = vst [vmem:[#allocation304_spill] sm:$0xff] %v7594_v9  ;;  %v3623_v9 = vmul.f32 %v7200_v0, %v3619_v18 }
 0x5c9   :  { %3632 = vrot.lane.b32.xlu1 %v3620_v50, %s5453_s10  ;;  %3598 = vrot.lane.b32.xlu2 %v3584_v41, %s5453_s10 }
 0x5ca   :  { %3596 = vrot.lane.b32.xlu0 %v3583_v31, %s5453_s10 }
 0x5cb   :  { %v7604_v25 = vpop.permute.xlu1 %3306  ;;  %v7606_v63 = vpop.permute.xlu2 %3348 }
 0x5cc   :  { %10338 = vst [vmem:[#allocation305_spill] sm:$0xff] %v7604_v25  ;;  %v7608_v15 = vpop.permute.xlu0 %3260  ;;  %v3622_v25 = vmul.f32 %v7597_v19, %v3619_v18 }
 0x5cd   :  { %10339 = vst [vmem:[#allocation306_spill] sm:$0xff] %v7606_v63 }
 0x5ce   :  { %10340 = vst [vmem:[#allocation307_spill] sm:$0xff] %v7608_v15  ;;  %v3657_v15 = vstv %s5236_s12  ;;  %s5259_s12 = sld [smem:[#allocation9 + $0x5a]] }
 0x5cf   :  { %v3658_v63 = vmul.f32 %v7218_v51, %v3657_v15  ;;  %v3660_v18 = vmul.f32 %v7597_v19, %v3657_v15 }
 0x5d1   :  { %3638 = vrot.lane.b32.xlu1 %v3623_v9, %s5453_s10  ;;  %3604 = vrot.lane.b32.xlu2 %v3587_v23, %s5453_s10 }
 0x5d2   :  { %3602 = vrot.lane.b32.xlu0 %v3586_v40, %s5453_s10 }
 0x5d3   :  { %v7618_v50 = vpop.permute.xlu1 %3312  ;;  %v7620_v41 = vpop.permute.xlu2 %3354 }
 0x5d4   :  { %10342 = vst [vmem:[#allocation309_spill] sm:$0xff] %v7618_v50  ;;  %v7622_v31 = vpop.permute.xlu0 %3266 }
 0x5d5   :  { %10343 = vst [vmem:[#allocation310_spill] sm:$0xff] %v7620_v41  ;;  %v3661_v41 = vmul.f32 %v7200_v0, %v3657_v15 }
 0x5d6   :  { %10344 = vst [vmem:[#allocation311_spill] sm:$0xff] %v7622_v31 }
 0x5d9   :  { %3670 = vrot.lane.b32.xlu1 %v3658_v63, %s5453_s10  ;;  %3636 = vrot.lane.b32.xlu2 %v3622_v25, %s5453_s10  ;;  %v3696_v25 = vmul.f32 %v7218_v51, %v3695_v17 }
 0x5da   :  { %3634 = vrot.lane.b32.xlu0 %v3621_v47, %s5453_s10 }
 0x5db   :  { %v7630_v40 = vpop.permute.xlu1 %3350  ;;  %v7632_v23 = vpop.permute.xlu2 %3396  ;;  %v3708_v56 = vrot.slane %v3696_v25, 4 }
 0x5dc   :  { %10345 = vst [vmem:[#allocation312_spill] sm:$0xff] %v7630_v40  ;;  %v7634_v9 = vpop.permute.xlu0 %3308  ;;  %v3709_v40 = vrot.slane %v3697_v45, 4 }
 0x5dd   :  { %10346 = vst [vmem:[#allocation313_spill] sm:$0xff] %v7632_v23 }
 0x5de   :  { %10347 = vst [vmem:[#allocation314_spill] sm:$0xff] %v7634_v9  ;;  %v3710_v52 = vsel %vm867_vm5, %v3708_v56, %v3709_v40  ;;  %v3663_v9 = vmul.f32 %v7611_v59, %v3657_v15 }
 0x5e1   :  { %3676 = vrot.lane.b32.xlu1 %v3661_v41, %s5453_s10  ;;  %3642 = vrot.lane.b32.xlu2 %v3625_v38, %s5453_s10  ;;  %v3659_v41 = vmul.f32 %v7214_v4, %v3657_v15  ;;  %v3701_v38 = vmul.f32 %v7611_v59, %v3695_v17 }
 0x5e2   :  { %3640 = vrot.lane.b32.xlu0 %v3624_v55, %s5453_s10  ;;  %v3700_v55 = vmul.f32 %v7230_v32, %v3695_v17 }
 0x5e3   :  { %v7644_v63 = vpop.permute.xlu1 %3356  ;;  %v7646_v47 = vpop.permute.xlu2 %3402  ;;  %v3716_v56 = vrot.slane %v3701_v38, 4 }
 0x5e4   :  { %10348 = vst [vmem:[#allocation315_spill] sm:$0xff] %v7644_v63  ;;  %v7648_v23 = vpop.permute.xlu0 %3346 }
 0x5e5   :  { %10349 = vst [vmem:[#allocation316_spill] sm:$0xff] %v7646_v47 }
 0x5e6   :  { %10350 = vst [vmem:[#allocation317_spill] sm:$0xff] %v7648_v23  ;;  %v3714_v23 = vrot.slane %v3700_v55, 4 }
 0x5e8   :  { %v3717_v31 = vsel %vm867_vm5, %v3714_v23, %v3716_v56 }
 0x5e9   :  { %3718 = vrot.lane.b32.xlu1 %v3710_v52, %s5453_s10  ;;  %3674 = vrot.lane.b32.xlu2 %v3660_v18, %s5453_s10  ;;  %v3662_v52 = vmul.f32 %v7230_v32, %v3657_v15  ;;  %v3698_v18 = vmul.f32 %v7597_v19, %v3695_v17 }
 0x5ea   :  { %3672 = vrot.lane.b32.xlu0 %v3659_v41, %s5453_s10  ;;  %v3735_v41 = vstv %s5238_s13  ;;  %s5456_s13 = smov 48  }
 0x5eb   :  { %v7658_v47 = vpop.permute.xlu1 %3398  ;;  %v7660_v45 = vpop.permute.xlu2 %3444  ;;  %v3738_v55 = vmul.f32 %v7597_v19, %v3735_v41  ;;  %v3711_v15 = vrot.slane %v3698_v18, 4  ;;  %v3736_v18 = vmul.f32 %v7218_v51, %v3735_v41 }
 0x5ec   :  { %10351 = vst [vmem:[#allocation318_spill] sm:$0xff] %v7658_v47  ;;  %v7662_v25 = vpop.permute.xlu0 %3352  ;;  %v3699_v47 = vmul.f32 %v7200_v0, %v3695_v17  ;;  %v3737_v17 = vmul.f32 %v7214_v4, %v3735_v41 }
 0x5ed   :  { %10352 = vst [vmem:[#allocation319_spill] sm:$0xff] %v7660_v45 }
 0x5ee   :  { %10353 = vst [vmem:[#allocation320_spill] sm:$0xff] %v7662_v25  ;;  %v3713_v25 = vrot.slane %v3699_v47, 4  ;;  %v3741_v47 = vmul.f32 %v7611_v59, %v3735_v41 }
 0x5f1   :  { %3724 = vrot.lane.b32.xlu1 %v3717_v31, %s5453_s10  ;;  %3680 = vrot.lane.b32.xlu2 %v3663_v9, %s5453_s10  ;;  %v3751_v31 = vrot.slane %v3738_v55, 4  ;;  %v3715_v9 = vsel %vm867_vm5, %v3713_v25, %v3714_v23  ;;  %v3749_v25 = vrot.slane %v3737_v17, 4  ;;  %v3756_v55 = vrot.slane %v3741_v47, 4 }
 0x5f2   :  { %3678 = vrot.lane.b32.xlu0 %v3662_v52, %s5453_s10  ;;  %v3712_v52 = vsel %vm867_vm5, %v3709_v40, %v3711_v15 }
 0x5f3   :  { %v7672_v45 = vpop.permute.xlu1 %3404  ;;  %v7674_v38 = vpop.permute.xlu2 %3450  ;;  %v3752_v40 = vsel %vm867_vm5, %v3749_v25, %v3751_v31 }
 0x5f4   :  { %10354 = vst [vmem:[#allocation321_spill] sm:$0xff] %v7672_v45  ;;  %v7677_v56 = vpop.permute.xlu0 %3394 }
 0x5f5   :  { %10355 = vst [vmem:[#allocation322_spill] sm:$0xff] %v7674_v38 }
 0x5f6   :  { %10356 = vst [vmem:[#allocation323_spill] sm:$0xff] %v7677_v56  ;;  %v7730_v56 = vmul.f32 %v7365_v14, %v6069_v1 }
 0x5f9   :  { %3762 = vrot.lane.b32.xlu1 %v3751_v31, %s5453_s10  ;;  %3722 = vrot.lane.b32.xlu2 %v3715_v9, %s5453_s10  ;;  %v3748_v9 = vrot.slane %v3736_v18, 4  ;;  %v3739_v31 = vmul.f32 %v7200_v0, %v3735_v41  ;;  %v7726_v0 = vstv %s5170_s15  ;;  %s5458_s15 = smov 80  }
 0x5fa   :  { %3720 = vrot.lane.b32.xlu0 %v3712_v52, %s5453_s10  ;;  %v3740_v52 = vmul.f32 %v7230_v32, %v3735_v41  ;;  %v7781_v44 = vmul.f32 %v7365_v14, %v7726_v0 }
 0x5fb   :  { %v7685_v38 = vpop.permute.xlu1 %3446  ;;  %v7687_v45 = vpop.permute.xlu2 %3492  ;;  %v3750_v15 = vsel %vm867_vm5, %v3748_v9, %v3749_v25  ;;  %v7712_v25 = vmul.f32 %v7365_v14, %v6065_v2  ;;  %v7716_v9 = vmul.f32 %v7379_v20, %v6065_v2 }
 0x5fc   :  { %10357 = vst [vmem:[#allocation324_spill] sm:$0xff] %v7685_v38  ;;  %v7691_v23 = vpop.permute.xlu0 %3400  ;;  %v7699_v38 = vstv %s5239_s14  ;;  %v3754_v32 = vrot.slane %v3740_v52, 4  ;;  %v7734_v52 = vmul.f32 %v7365_v14, %v6075_v36  ;;  %s5457_s14 = smov 64  }
 0x5fd   :  { %10358 = vst [vmem:[#allocation325_spill] sm:$0xff] %v7687_v45  ;;  %v3786_v47 = vmul.f32 %v7597_v19, %v7699_v38  ;;  %v1013_v63 = vrot.slane %v7716_v9, 1  ;;  %v7754_v45 = vmul.f32 %v7379_v20, %v6075_v36  ;;  %v7773_v9 = vmul.f32 %v7611_v59, %v7699_v38 }
 0x5fe   :  { %10359 = vst [vmem:[#allocation326_spill] sm:$0xff] %v7691_v23 }
 0x5ff   :  { %v3799_v41 = vrot.slane %v3786_v47, 4  ;;  %v7873_v26 = vsel %vm1007_vm6, %v1013_v63, %v10370_v34 }
 0x601   :  { %3768 = vrot.lane.b32.xlu1 %v3756_v55, %s5453_s10  ;;  %3760 = vrot.lane.b32.xlu2 %v3752_v40, %s5453_s10  ;;  %v7720_v40 = vmul.f32 %v7379_v20, %v6067_v6 }
 0x602   :  { %3758 = vrot.lane.b32.xlu0 %v3750_v15, %s5453_s10  ;;  %v7724_v15 = vmul.f32 %v7365_v14, %v6067_v6 }
 0x603   :  { %v7701_v23 = vpop.permute.xlu1 %3452  ;;  %v7703_v17 = vpop.permute.xlu2 %3530  ;;  %v1153_v50 = vrot.slane %v7720_v40, 5  ;;  %v3784_v40 = vmul.f32 %v7218_v51, %v7699_v38  ;;  %v1045_v51 = vrot.slane %v7742_v8, 1  ;;  %v1009_v8 = vrot.slane %v7791_v29, 1 }
 0x604   :  { %10360 = vst [vmem:[#allocation327_spill] sm:$0xff] %v7701_v23  ;;  %v7708_v18 = vpop.permute.xlu0 %3442  ;;  %v7736_v23 = vstv %s5174_s16  ;;  %v7837_v29 = vstv %s7757_s17  ;;  %s5459_s16 = smov 96   ;;  %s5460_s17 = smov 112  }
 0x605   :  { %10361 = vst [vmem:[#allocation328_spill] sm:$0xff] %v7703_v17  ;;  %v3757_v17 = vsel %vm867_vm5, %v3754_v32, %v3756_v55  ;;  %v1148_v55 = vrot.slane %v7724_v15, 5  ;;  %v1040_v15 = vrot.slane %v7730_v56, 1  ;;  %v7796_v56 = vmul.f32 %v7379_v20, %v7726_v0 }
 0x606   :  { %10362 = vst [vmem:[#allocation329_spill] sm:$0xff] %v7708_v18  ;;  %v3753_v18 = vrot.slane %v3739_v31, 4  ;;  %v3785_v31 = vmul.f32 %v7214_v4, %v7699_v38  ;;  %v7765_v4 = vmul.f32 %v7379_v20, %v6077_v61  ;;  %v3796_v37 = vrot.slane %v3784_v40, 4  ;;  %v7828_v40 = vld [vmem:[#allocation2 + $0x20] sm:$0xff] }
 0x607   :  { %v3788_v59 = vmul.f32 %v7828_v40, %v7699_v38  ;;  %v7851_v57 = vmul.f32 %v7384_v22, %v7837_v29  ;;  %v7886_v11 = vsel %vm974_vm4, %v1148_v55, %v1149_v60 }
 0x608   :  { %v3755_v47 = vsel %vm867_vm5, %v3753_v18, %v3754_v32 }
 0x609   :  { %3810 = vrot.lane.b32.xlu1 %v3799_v41, %s5453_s10  ;;  %3766 = vrot.lane.b32.xlu2 %v3757_v17, %s5453_s10  ;;  %v7761_v17 = vmul.f32 %v7365_v14, %v6077_v61  ;;  %v3802_v21 = vrot.slane %v3788_v59, 4  ;;  %v3841_v63 = vrot.slane %v7851_v57, 5 }
 0x60a   :  { %3764 = vrot.lane.b32.xlu0 %v3755_v47, %s5453_s10  ;;  %v1180_v47 = vrot.slane %v7734_v52, 5  ;;  %v3797_v52 = vrot.slane %v3785_v31, 4  ;;  %v3804_v31 = vrot.slane %v7773_v9, 4 }
 0x60b   :  { %v7767_v18 = vpop.permute.xlu1 %3494  ;;  %v7769_v32 = vpop.permute.xlu2 %3536 }
 0x60c   :  { %10363 = vst [vmem:[#allocation330_spill] sm:$0xff] %v7767_v18  ;;  %v7785_v18 = vmul.f32 %v7365_v14, %v7736_v23  ;;  %v3800_v10 = vsel %vm867_vm5, %v3797_v52, %v3799_v41  ;;  %v3798_v9 = vsel %vm867_vm5, %v3796_v37, %v3797_v52  ;;  %v7843_v37 = vmul.f32 %v7814_v46, %v6075_v36 }
 0x60d   :  { %10364 = vst [vmem:[#allocation331_spill] sm:$0xff] %v7769_v32  ;;  %v7787_v32 = vpop.permute.xlu0 %3448  ;;  %v10372_v41 = vrot.slane %v7712_v25, 1 }
 0x60e   :  { %10365 = vst [vmem:[#allocation332_spill] sm:$0xff] %v7787_v32  ;;  %v7808_v32 = vmul.f32 %v7384_v22, %v6075_v36  ;;  %v1186_v59 = vrot.slane %v7843_v37, 5  ;;  %v1068_v37 = vmul.f32 %v7814_v46, %v6077_v61 }
 0x60f   :  { %v7883_v24 = vsel %vm1007_vm6, %v10372_v41, %v1009_v8  ;;  %v1077_v41 = vrot.slane %v7862_v33, 1  ;;  %v1101_v33 = vmul.f32 %v7384_v22, %v7736_v23 }
 0x610   :  { %v10373_v62 = vrot.slane %v7808_v32, 5 }
 0x611   :  { %3816 = vrot.lane.b32.xlu1 %v3804_v31, %s5453_s10  ;;  %3808 = vrot.lane.b32.xlu2 %v3800_v10, %s5453_s10  ;;  %v997_v10 = vmul.f32 %v7419_v49, %v6065_v2  ;;  %v1138_v2 = vmul.f32 %v7419_v49, %v6067_v6 }
 0x612   :  { %3806 = vrot.lane.b32.xlu0 %v3798_v9, %s5453_s10  ;;  %v3787_v9 = vmul.f32 %v7853_v53, %v7699_v38  ;;  %v10371_v38 = vrot.slane %v6093_v43, 5  ;;  %v7894_v34 = vsel %vm974_vm4, %v1180_v47, %v10373_v62  ;;  %v7898_v43 = vmul.f32 %v7419_v49, %v6069_v1 }
 0x613   :  { %v7845_v52 = vpop.permute.xlu1 %3532  ;;  %v7847_v13 = vpop.permute.xlu2 %3564  ;;  %v1151_v55 = vrot.slane %v1138_v2, 5  ;;  %v3805_v1 = vsel %vm867_vm5, %v3802_v21, %v3804_v31  ;;  %v10379_v2 = vrot.slane %v7754_v45, 5 }
 0x614   :  { %10366 = vst [vmem:[#allocation333_spill] sm:$0xff] %v7845_v52  ;;  %v7878_v6 = vsel %vm974_vm4, %v1153_v50, %v10371_v38  ;;  %v1011_v50 = vrot.slane %v997_v10, 1  ;;  %v3801_v25 = vrot.slane %v3787_v9, 4  ;;  %v7915_v10 = vmul.f32 %v7419_v49, %v6075_v36 }
 0x615   :  { %10367 = vst [vmem:[#allocation334_spill] sm:$0xff] %v7847_v13  ;;  %v7866_v13 = vmul.f32 %v7379_v20, %v7736_v23  ;;  %v7868_v52 = vpop.permute.xlu0 %3490  ;;  %v9987_v9 = vrot.slane %v7898_v43, 1  ;;  %v7928_v36 = vmul.f32 %v7419_v49, %v6077_v61  ;;  %v1104_v38 = vmul.f32 %v7814_v46, %v7736_v23 }
 0x616   :  { %10369 = vst [vmem:[#allocation336_spill] sm:$0xff] %v7868_v52  ;;  %v7889_v52 = vsel %vm1007_vm6, %v1040_v15, %v1041_v48  ;;  %v10375_v15 = vrot.slane %v7818_v35, 1  ;;  %v7934_v31 = vsel %vm1007_vm6, %v1009_v8, %v1011_v50  ;;  %v10383_v8 = vrot.slane %v7761_v17, 1 }
 0x617   :  { %10374 = vst [vmem:[#allocation337_spill] sm:$0xff] %v7898_v43  ;;  %v1117_v57 = vrot.slane %v7866_v13, 1  ;;  %v3832_v13 = vmul.f32 %v7365_v14, %v7837_v29  ;;  %v7950_v14 = vsel %vm974_vm4, %v1149_v60, %v1151_v55  ;;  %v7959_v50 = vmul.f32 %v7384_v22, %v7726_v0 }
 0x618   :  { %v7909_v47 = vsel %vm1007_vm6, %v1045_v51, %v10375_v15  ;;  %10376 = vst [vmem:[#allocation338_spill] sm:$0xff] %v7915_v10  ;;  %v3803_v51 = vsel %vm867_vm5, %v3801_v25, %v3802_v21  ;;  %v7939_v21 = vsel %vm974_vm4, %v10379_v2, %v1186_v59  ;;  %v3835_v25 = vmul.f32 %v7814_v46, %v7837_v29 }
 0x619   :  { %3850 = vrot.lane.b32.xlu1 %v3841_v63, %s5453_s10  ;;  %3814 = vrot.lane.b32.xlu2 %v3805_v1, %s5453_s10  ;;  %10377 = vst [vmem:[#allocation339_spill] sm:$0xff] %v7928_v36  ;;  %v7955_v45 = vsel %vm1007_vm6, %v10383_v8, %v1077_v41  ;;  %v7963_v15 = vmul.f32 %v7419_v49, %v7736_v23  ;;  %v1082_v60 = vrot.slane %v1068_v37, 1  ;;  %v1113_v8 = vrot.slane %v1101_v33, 1 }
 0x61a   :  { %3812 = vrot.lane.b32.xlu0 %v3803_v51, %s5453_s10  ;;  %10378 = vst [vmem:[#allocation340_spill] sm:$0xff] %v7934_v31  ;;  %v7970_v17 = vmul.f32 %v7814_v46, %v7726_v0  ;;  %v7974_v55 = vmul.f32 %v7400_v58, %v7736_v23  ;;  %v7979_v2 = vsel %vm1007_vm6, %v1041_v48, %v9987_v9  ;;  %v1118_v37 = vrot.slane %v1104_v38, 1 }
 0x61b   :  { %v7943_v62 = vpop.permute.xlu1 %3538  ;;  %v7945_v61 = vpop.permute.xlu2 %3570  ;;  %10382 = vst [vmem:[#allocation343_spill] sm:$0xff] %v7950_v14  ;;  %v3844_v51 = vrot.slane %v3835_v25, 5  ;;  %v7986_v14 = vstv %s7904_s19  ;;  %v10390_v33 = vrot.slane %v7915_v10, 5  ;;  %v10393_v25 = vrot.slane %v7765_v4, 1 }
 0x61c   :  { %10380 = vst [vmem:[#allocation341_spill] sm:$0xff] %v7943_v62  ;;  %v9988_v62 = vrot.slane %v7928_v36, 1  ;;  %v7995_v48 = vmul.f32 %v7814_v46, %v7986_v14  ;;  %v9992_v0 = vrot.slane %v7970_v17, 5  ;;  %v10394_v23 = vrot.slane %v6104_v7, 1  ;;  %v8121_v36 = vld [vmem:[#allocation2] sm:$0xff] }
 0x61d   :  { %10381 = vst [vmem:[#allocation342_spill] sm:$0xff] %v7945_v61  ;;  %v7965_v1 = vpop.permute.xlu0 %3496  ;;  %v3840_v61 = vrot.slane %v3832_v13, 5  ;;  %v10391_v13 = vrot.slane %v7808_v32, 5  ;;  %v8007_v9 = vsel %vm1007_vm6, %v10393_v25, %v1082_v60  ;;  %v10395_v32 = vrot.slane %v7818_v35, 1 }
 0x61e   :  { %10384 = vst [vmem:[#allocation344_spill] sm:$0xff] %v7959_v50  ;;  %v10397_v4 = vrot.slane %v6123_v28, 5  ;;  %v3875_v25 = vmul.f32 %v7379_v20, %v7986_v14  ;;  %v10399_v7 = vrot.slane %v7785_v18, 1  ;;  %v8038_v28 = vsel %vm1007_vm6, %v1077_v41, %v9988_v62 }
 0x61f   :  { %10385 = vst [vmem:[#allocation345_spill] sm:$0xff] %v7963_v15  ;;  %v3842_v43 = vsel %vm974_vm4, %v3840_v61, %v3841_v63  ;;  %v8002_v38 = vsel %vm974_vm4, %v10391_v13, %v10390_v33  ;;  %v9991_v63 = vrot.slane %v7974_v55, 1  ;;  %v8018_v33 = vsel %vm1007_vm6, %v10395_v32, %v10394_v23 }
 0x620   :  { %10386 = vst [vmem:[#allocation346_spill] sm:$0xff] %v7965_v1  ;;  %v7983_v1 = vstv %s7900_s18  ;;  %v8023_v13 = vsel %vm974_vm4, %v1186_v59, %v10397_v4  ;;  %v8033_v35 = vsel %vm1007_vm6, %v10399_v7, %v1113_v8  ;;  %v10406_v4 = vrot.slane %v7781_v44, 5  ;;  %s5461_s18 = smov [#allocation10]  }
 0x621   :  { %10387 = vst [vmem:[#allocation347_spill] sm:$0xff] %v7970_v17  ;;  %3856 = vrot.lane.b32.xlu1 %v3844_v51, %s5453_s10  ;;  %3848 = vrot.lane.b32.xlu2 %v3842_v43, %s5453_s10  ;;  %v3834_v43 = vmul.f32 %v7379_v20, %v7837_v29  ;;  %v844_v59 = vmul.f32 %v7853_v53, %v7983_v1  ;;  %v10403_v20 = vrot.slane %v6151_v39, 1  ;;  %v10405_v29 = vrot.slane %v7959_v50, 5  ;;  %v8095_v50 = vld [vmem:[#allocation2 + $0x8] sm:$0xff]  ;;  %s5148_s19 = sshll.u32 %s5461_s18, 4  ;;  %s5149_s19 = int_to_ptr.vmem [resolvable:$true] %s5148_s19 }
 0x622   :  { %10388 = vst [vmem:[#allocation348_spill] sm:$0xff] %v7974_v55  ;;  %3846 = vrot.lane.b32.xlu0 %v3840_v61, %s5453_s10  ;;  %v1119_v61 = vsel %vm1007_vm6, %v1117_v57, %v1118_v37  ;;  %v10407_v7 = vrot.slane %v7963_v15, 1  ;;  %v8093_v39 = vmul.f32 %v7853_v53, %v6098_v54  ;;  %v3889_v15 = vrot.slane %v3875_v25, 1 }
 0x623   :  { %10389 = vst [vmem:[#allocation349_spill] sm:$0xff] %v7979_v2  ;;  %v8043_v23 = vpop.permute.xlu1 %3566  ;;  %v8045_v32 = vpop.permute.xlu2 %3598  ;;  %v8050_v18 = vsel %vm1007_vm6, %v1082_v60, %v10403_v20  ;;  %v8057_v41 = vsel %vm974_vm4, %v10406_v4, %v10405_v29  ;;  %v8069_v60 = vmul.f32 %v7853_v53, %v6085_v12  ;;  %v8073_v20 = vmul.f32 %v7853_v53, %v6062_v5 }
 0x624   :  { %10392 = vst [vmem:[#allocation350_spill] sm:$0xff] %v8002_v38  ;;  %v8062_v57 = vsel %vm1007_vm6, %v1113_v8, %v10407_v7  ;;  %v10409_v29 = vrot.slane %v7796_v56, 5  ;;  %v8085_v8 = vsel %vm1007_vm6, %v1118_v37, %v9991_v63  ;;  %v8089_v7 = vmul.f32 %v7853_v53, %v6095_v3 }
 0x625   :  { %10396 = vst [vmem:[#allocation351_spill] sm:$0xff] %v8018_v33  ;;  %v8064_v62 = vpop.permute.xlu0 %3534  ;;  %v8103_v37 = vmul.f32 %v7853_v53, %v6158_v16  ;;  %v10412_v63 = vrot.slane %v7796_v56, 5  ;;  %v855_v56 = vmul.f32 %v8121_v36, %v6062_v5 }
 0x626   :  { %10398 = vst [vmem:[#allocation352_spill] sm:$0xff] %v8023_v13  ;;  %v8080_v4 = vsel %vm974_vm4, %v10409_v29, %v9992_v0  ;;  %v8099_v29 = vmul.f32 %v8095_v50, %v6062_v5  ;;  %v841_v13 = vmul.f32 %v8121_v36, %v7983_v1 }
 0x627   :  { %10400 = vst [vmem:[#allocation353_spill] sm:$0xff] %v8038_v28  ;;  %v990_v0 = vadd.f32 %v10412_v63, %v844_v59  ;;  %v8127_v63 = vmul.f32 %v7853_v53, %v6119_v27  ;;  %v8156_v59 = vld [vmem:[#allocation3] sm:$0xff]  ;;  %v868_v17 = vrot.slane %v855_v56, 4  ;;  %v10420_v28 = vrot.slane %v7781_v44, 5 }
 0x628   :  { %10401 = vst [vmem:[#allocation354_spill] sm:$0xff] %v8043_v23  ;;  %v10413_v23 = vrot.slane %v7995_v48, 1 }
 0x629   :  { %10402 = vst [vmem:[#allocation355_spill] sm:$0xff] %v8045_v32  ;;  %v3843_v32 = vrot.slane %v3834_v43, 5  ;;  %v941_v44 = vrot.slane %v8127_v63, 4 }
 0x62a   :  { %10404 = vst [vmem:[#allocation356_spill] sm:$0xff] %v8050_v18  ;;  %v3891_v25 = vsel %vm1007_vm6, %v3889_v15, %v10413_v23  ;;  %v3873_v15 = vmul.f32 %v7384_v22, %v7986_v14 }
 0x62b   :  { %10408 = vst [vmem:[#allocation357_spill] sm:$0xff] %v8064_v62  ;;  %v8108_v62 = vstv %s7988_s20  ;;  %v3845_v43 = vsel %vm974_vm4, %v3843_v32, %v3844_v51  ;;  %3898 = vrot.lane.b32.xlu1 %v3891_v25, %s5453_s10  ;;  %v8137_v51 = vmul.f32 %v8095_v50, %v6098_v54  ;;  %3852 = vrot.lane.b32.xlu0 %v3843_v32, %s5453_s10  ;;  %v8152_v53 = vpop.permute.xlu1 %3594  ;;  %v8154_v18 = vpop.permute.xlu2 %3604 }
 0x62c   :  { %10410 = vst [vmem:[#allocation358_spill] sm:$0xff] %v8080_v4  ;;  %v8116_v55 = vmul.f32 %v7419_v49, %v8108_v62  ;;  %3854 = vrot.lane.b32.xlu2 %v3845_v43, %s5453_s10  ;;  %v8143_v23 = vmul.f32 %v7384_v22, %v8108_v62  ;;  %v8148_v43 = vmul.f32 %v8095_v50, %v6119_v27  ;;  %v3885_v4 = vrot.slane %v3873_v15, 1 }
 0x62d   :  { %10411 = vst [vmem:[#allocation359_spill] sm:$0xff] %v8085_v8  ;;  %v3874_v8 = vmul.f32 %v7419_v49, %v7986_v14  ;;  %v888_v49 = vmul.f32 %v8121_v36, %v6098_v54  ;;  %v3872_v32 = vmul.f32 %v8156_v59, %v7986_v14  ;;  %v803_v22 = vmul.f32 %v8121_v36, %v6085_v12  ;;  %v8164_v10 = vpop.permute.xlu0 %3540 }
 0x62e   :  { %10414 = vst [vmem:[#allocation360_spill] sm:$0xff] %v8121_v36  ;;  %v8162_v25 = vadd.f32 %v1119_v61, %v990_v0  ;;  %v924_v0 = vmul.f32 %v8121_v36, %v6119_v27  ;;  %v3925_v61 = vrot.slane %v8143_v23, 1  ;;  %v10001_v56 = vrot.slane %v8148_v43, 4 }
 0x62f   :  { %10415 = vst [vmem:[#allocation361_spill] sm:$0xff] %v8152_v53  ;;  %v3887_v38 = vrot.slane %v3874_v8, 1  ;;  %v813_v53 = vmul.f32 %v8121_v36, %v6095_v3  ;;  %v900_v33 = vrot.slane %v888_v49, 4  ;;  %v3884_v31 = vrot.slane %v3872_v32, 1 }
 0x630   :  { %10416 = vst [vmem:[#allocation362_spill] sm:$0xff] %v8154_v18  ;;  %v827_v18 = vmul.f32 %v8121_v36, %v6158_v16  ;;  %v8185_v15 = vmul.f32 %v7828_v40, %v6098_v54  ;;  %v10421_v49 = vrot.slane %v8116_v55, 1  ;;  %v10422_v32 = vrot.slane %v8137_v51, 4 }
 0x631   :  { %10417 = vst [vmem:[#allocation363_spill] sm:$0xff] %v8162_v25  ;;  %v987_v25 = vadd.f32 %v10420_v28, %v841_v13  ;;  %v3888_v2 = vsel %vm1007_vm6, %v3885_v4, %v3887_v38  ;;  %v3886_v13 = vsel %vm1007_vm6, %v3884_v31, %v3885_v4  ;;  %v8201_v28 = vld [vmem:[#allocation3 + $0x28] sm:$0x3f]  ;;  %v8211_v63 = vmul.f32 %v7814_v46, %v8108_v62 }
 0x632   :  { %10418 = vst [vmem:[#allocation364_spill] sm:$0xff] %v8164_v10  ;;  %v10419_v10 = vrot.slane %v8099_v29, 4  ;;  %v3928_v23 = vsel %vm1007_vm6, %v3925_v61, %v10421_v49  ;;  %v3877_v38 = vmul.f32 %v8201_v28, %v7986_v14  ;;  %v936_v49 = vrot.slane %v924_v0, 4 }
 0x633   :  { %3936 = vrot.lane.b32.xlu1 %v3928_v23, %s5453_s10  ;;  %3894 = vrot.lane.b32.xlu0 %v3886_v13, %s5453_s10  ;;  %v8217_v4 = vmul.f32 %v8095_v50, %v6085_v12  ;;  %v8221_v14 = vmul.f32 %v7828_v40, %v6119_v27  ;;  %v8226_v0 = vpop.permute.xlu1 %3600  ;;  %v8228_v23 = vpop.permute.xlu2 %3636  ;;  %v10428_v36 = vrot.slane %v8073_v20, 4  ;;  %v10430_v20 = vrot.slane %v8093_v39, 4 }
 0x634   :  { %v870_v8 = vsel %vm867_vm5, %v868_v17, %v10419_v10  ;;  %v8193_v10 = vmul.f32 %v7400_v58, %v8108_v62  ;;  %v842_v17 = vmul.f32 %v8095_v50, %v7983_v1  ;;  %3896 = vrot.lane.b32.xlu2 %v3888_v2, %s5453_s10  ;;  %v902_v58 = vsel %vm867_vm5, %v900_v33, %v10422_v32 }
 0x635   :  { %v3912_v2 = vmul.f32 %v8156_v59, %v8108_v62  ;;  %v882_v31 = vadd.f32 %v870_v8, %v803_v22  ;;  %v8224_v33 = vadd.f32 %v8033_v35, %v987_v25  ;;  %10424 = vst [vmem:[#allocation366_spill] sm:$0xff] %v8226_v0  ;;  %v8233_v22 = vmul.f32 %v8095_v50, %v6095_v3  ;;  %v8238_v8 = vpop.permute.xlu0 %3568 }
 0x636   :  { %10425 = vst [vmem:[#allocation367_spill] sm:$0xff] %v8228_v23  ;;  %v938_v12 = vsel %vm867_vm5, %v936_v49, %v10001_v56  ;;  %v857_v25 = vmul.f32 %v7597_v19, %v6062_v5  ;;  %v916_v32 = vadd.f32 %v902_v58, %v813_v53  ;;  %v988_v23 = vadd.f32 %v8057_v41, %v842_v17  ;;  %v8268_v58 = vld [vmem:[#allocation3 + $0x10] sm:$0x3f] }
 0x637   :  { %10423 = vst [vmem:[#allocation365_spill] sm:$0xff] %v8224_v33  ;;  %v3892_v13 = vrot.slane %v3877_v38, 1  ;;  %v10427_v0 = vrot.slane %v6073_v30, 4  ;;  %v8251_v49 = vmul.f32 %v7597_v19, %v6098_v54  ;;  %v3930_v56 = vrot.slane %v8211_v63, 1 }
 0x638   :  { %10426 = vst [vmem:[#allocation368_spill] sm:$0xff] %v8238_v8  ;;  %v3924_v35 = vrot.slane %v3912_v2, 1  ;;  %v1022_v8 = vadd.f32 %v7883_v24, %v882_v31  ;;  %v952_v5 = vadd.f32 %v938_v12, %v827_v18  ;;  %v942_v53 = vrot.slane %v8221_v14, 4  ;;  %v8285_v12 = vld [vmem:[#allocation3 + $0x8] sm:$0xff] }
 0x639   :  { %v875_v33 = vsel %vm867_vm5, %v10428_v36, %v10427_v0  ;;  %v8257_v41 = vstv %s8181_s22  ;;  %v10429_v30 = vrot.slane %v8185_v15, 4  ;;  %v10431_v17 = vrot.slane %v8193_v10, 1  ;;  %v10451_v14 = vld [vmem:[#allocation349_spill] sm:$0xff] }
 0x63a   :  { %v3926_v38 = vsel %vm1007_vm6, %v3924_v35, %v3925_v61  ;;  %v8272_v24 = vmul.f32 %v8268_v58, %v8257_v41  ;;  %v884_v18 = vadd.f32 %v875_v33, %v8069_v60  ;;  %v871_v63 = vrot.slane %v857_v25, 4  ;;  %v8291_v60 = vld [vmem:[#allocation3 + $0x18] sm:$0xff] }
 0x63b   :  { %v907_v36 = vsel %vm867_vm5, %v10430_v20, %v10429_v30  ;;  %v3933_v54 = vsel %vm1007_vm6, %v3930_v56, %v10431_v17  ;;  %v1056_v2 = vadd.f32 %v7889_v52, %v916_v32  ;;  %v10432_v39 = vrot.slane %v7995_v48, 1  ;;  %v8304_v32 = vpop.permute.xlu1 %3632 }
 0x63c   :  { %3942 = vrot.lane.b32.xlu1 %v3933_v54, %s5453_s10  ;;  %3934 = vrot.lane.b32.xlu2 %v3926_v38, %s5453_s10  ;;  %v903_v61 = vrot.slane %v8251_v49, 4  ;;  %v828_v0 = vmul.f32 %v8095_v50, %v6158_v16  ;;  %v8289_v52 = vmul.f32 %v8285_v12, %v8257_v41  ;;  %v3915_v48 = vmul.f32 %v8291_v60, %v8108_v62  ;;  %v8306_v49 = vpop.permute.xlu2 %3642  ;;  %v10436_v54 = vld [vmem:[#allocation93_spill] sm:$0xff] }
 0x63d   :  { %v3893_v31 = vsel %vm1007_vm6, %v10432_v39, %v3892_v13  ;;  %v919_v33 = vadd.f32 %v907_v36, %v8089_v7  ;;  %v8297_v13 = vadd.f32 %v7955_v45, %v952_v5  ;;  %v926_v35 = vmul.f32 %v7597_v19, %v6119_v27  ;;  %v10433_v45 = vld [vmem:[#allocation43_spill] sm:$0xff]  ;;  %v8315_v5 = vpop.permute.xlu0 %3596 }
 0x63e   :  { %3900 = vrot.lane.b32.xlu0 %v3893_v31, %s5453_s10  ;;  %v8302_v25 = vadd.f32 %v8062_v57, %v988_v23  ;;  %v943_v30 = vsel %vm867_vm5, %v941_v44, %v942_v53  ;;  %v817_v62 = vmul.f32 %v7828_v40, %v6095_v3  ;;  %v1227_v7 = vadd.f32 %v10433_v45, %v6174_v42 }
 0x63f   :  { %v3975_v27 = vrot.slane %v8272_v24, 1  ;;  %v1024_v57 = vadd.f32 %v7873_v26, %v884_v18  ;;  %v8320_v23 = vadd.f32 %v7886_v11, %v1022_v8  ;;  %v10434_v20 = vrot.slane %v8099_v29, 4 }
 0x640   :  { %v8326_v44 = vadd.f32 %v7894_v34, %v1056_v2  ;;  %v10435_v17 = vrot.slane %v8137_v51, 4  ;;  %v1381_v38 = vadd.f32 %v10436_v54, %v1227_v7  ;;  %v3973_v39 = vrot.slane %v8289_v52, 1 }
 0x641   :  { %v872_v36 = vsel %vm867_vm5, %v10434_v20, %v871_v63  ;;  %v3929_v31 = vrot.slane %v3915_v48, 1  ;;  %v1059_v26 = vadd.f32 %v7909_v47, %v919_v33  ;;  %v955_v11 = vadd.f32 %v943_v30, %v8103_v37  ;;  %v10440_v33 = vld [vmem:[#allocation83_spill] sm:$0xff] }
 0x642   :  { %v904_v42 = vsel %vm867_vm5, %v10435_v17, %v903_v61  ;;  %v939_v8 = vrot.slane %v926_v35, 4  ;;  %v831_v29 = vmul.f32 %v7828_v40, %v6158_v16  ;;  %v883_v34 = vadd.f32 %v872_v36, %v8217_v4  ;;  %v10437_v4 = vld [vmem:[#allocation30_spill] sm:$0xff]  ;;  %v10445_v36 = vld [vmem:[#allocation340_spill] sm:$0xff] }
 0x643   :  { %v3976_v51 = vsel %vm1007_vm6, %v3973_v39, %v3975_v27  ;;  %v3931_v18 = vsel %vm1007_vm6, %v3929_v31, %v3930_v56  ;;  %v8346_v63 = vmul.f32 %v8201_v28, %v8257_v41  ;;  %v8349_v47 = vadd.f32 %v7878_v6, %v1024_v57 }
 0x644   :  { %v917_v37 = vadd.f32 %v904_v42, %v8233_v22  ;;  %v815_v2 = vmul.f32 %v7597_v19, %v6095_v3  ;;  %3984 = vrot.lane.b32.xlu1 %v3976_v51, %s5453_s10  ;;  %3940 = vrot.lane.b32.xlu2 %v3931_v18, %s5453_s10  ;;  %v10438_v52 = vrot.slane %v10437_v4, 4  ;;  %v10439_v56 = vrot.slane %v8185_v15, 4  ;;  %v8382_v20 = vpop.permute.xlu2 %3674  ;;  %v10446_v42 = vld [vmem:[#allocation31_spill] sm:$0xff] }
 0x645   :  { %v1557_v35 = vadd.f32 %v10440_v33, %v1381_v38  ;;  %v10441_v6 = vrot.slane %v8116_v55, 1  ;;  %v8367_v22 = vmul.f32 %v7814_v46, %v8257_v41  ;;  %v3960_v3 = vmul.f32 %v8156_v59, %v8257_v41  ;;  %v8380_v55 = vpop.permute.xlu1 %3638  ;;  %10444 = vst [vmem:[#allocation93_spill] sm:$0xff] %v8382_v20  ;;  %v8391_v31 = vpop.permute.xlu0 %3602 }
 0x646   :  { %v909_v48 = vsel %vm867_vm5, %v10439_v56, %v10438_v52  ;;  %v8372_v30 = vadd.f32 %v7939_v21, %v1059_v26  ;;  %v8375_v15 = vadd.f32 %v8007_v9, %v955_v11  ;;  %v10442_v45 = vrot.slane %v8148_v43, 4  ;;  %10443 = vst [vmem:[#allocation43_spill] sm:$0xff] %v8380_v55  ;;  %v10448_v9 = vld [vmem:[#allocation109_spill] sm:$0xff] }
 0x647   :  { %3938 = vrot.lane.b32.xlu0 %v10441_v6, %s5453_s10  ;;  %v918_v57 = vadd.f32 %v903_v61, %v815_v2  ;;  %v1023_v17 = vadd.f32 %v10445_v36, %v883_v34  ;;  %v10447_v54 = vrot.slane %v10446_v42, 4  ;;  %v1741_v38 = vadd.f32 %v10448_v9, %v1557_v35  ;;  %10449 = vst [vmem:[#allocation30_spill] sm:$0xff] %v8391_v31  ;;  %v10450_v34 = vld [vmem:[#allocation308_spill] sm:$0xff]  ;;  %v10452_v52 = vld [vmem:[#allocation337_spill] sm:$0xff]  ;;  %v10459_v42 = vld [vmem:[#allocation343_spill] sm:$0xff] }
 0x648   :  { %v940_v7 = vsel %vm867_vm5, %v10442_v45, %v939_v8  ;;  %v10003_v43 = vrot.slane %v8346_v63, 1  ;;  %v920_v61 = vadd.f32 %v909_v48, %v817_v62  ;;  %v829_v26 = vmul.f32 %v7597_v19, %v6158_v16  ;;  %v10454_v16 = vld [vmem:[#allocation108_spill] sm:$0xff] }
 0x649   :  { %v945_v21 = vsel %vm867_vm5, %v942_v53, %v10447_v54  ;;  %v845_v11 = vmul.f32 %v7828_v40, %v7983_v1  ;;  %v846_v51 = vmul.f32 %v10450_v34, %v7983_v1  ;;  %v1057_v18 = vadd.f32 %v10451_v14, %v917_v37  ;;  %v10455_v37 = vld [vmem:[#allocation351_spill] sm:$0xff]  ;;  %v10463_v34 = vld [vmem:[#allocation353_spill] sm:$0xff]  ;;  %v10464_v14 = vld [vmem:[#allocation338_spill] sm:$0xff] }
 0x64a   :  { %v953_v2 = vadd.f32 %v940_v7, %v828_v0  ;;  %v3978_v53 = vrot.slane %v8367_v22, 1  ;;  %v3972_v4 = vrot.slane %v3960_v3, 1  ;;  %v10453_v56 = vrot.slane %v10452_v52, 1  ;;  %v10456_v3 = vld [vmem:[#allocation358_spill] sm:$0xff]  ;;  %v10466_v52 = vld [vmem:[#allocation356_spill] sm:$0xff] }
 0x64b   :  { %v956_v35 = vadd.f32 %v945_v21, %v831_v29  ;;  %v954_v62 = vadd.f32 %v939_v8, %v829_v26  ;;  %v8405_v48 = vstv %s8337_s21  ;;  %v1815_v6 = vadd.f32 %v10454_v16, %v1741_v38  ;;  %v10457_v29 = vld [vmem:[#allocation347_spill] sm:$0xff]  ;;  %v10460_v21 = vld [vmem:[#allocation134_spill] sm:$0xff]  ;;  %s5150_s21 = sshll.u32 %s9955_s4, 4  ;;  %s5151_s21 = int_to_ptr.hbm [resolvable:$true] %s5150_s21 }
 0x64c   :  { %v1058_v33 = vadd.f32 %v10453_v56, %v918_v57  ;;  %v3981_v45 = vsel %vm1007_vm6, %v3978_v53, %v10003_v43  ;;  %v3974_v36 = vsel %vm1007_vm6, %v3972_v4, %v3973_v39  ;;  %v8414_v0 = vmul.f32 %v8268_v58, %v8405_v48  ;;  %v10462_v26 = vld [vmem:[#allocation350_spill] sm:$0xff] }
 0x64d   :  { %v1060_v22 = vadd.f32 %v10455_v37, %v920_v61  ;;  %v991_v7 = vadd.f32 %v10456_v3, %v845_v11  ;;  %v10458_v8 = vrot.slane %v10457_v29, 5  ;;  %3990 = vrot.lane.b32.xlu1 %v3981_v45, %s5453_s10  ;;  %3982 = vrot.lane.b32.xlu2 %v3974_v36, %s5453_s10  ;;  %v1163_v54 = vadd.f32 %v10459_v42, %v1023_v17  ;;  %v8440_v16 = vpop.permute.xlu1 %3670  ;;  %v10469_v45 = vld [vmem:[#allocation49_spill] sm:$0xff]  ;;  %v8453_v29 = vpop.permute.xlu0 %3634  ;;  %v10475_v42 = vld [vmem:[#allocation359_spill] sm:$0xff] }
 0x64e   :  { %v1969_v9 = vadd.f32 %v10460_v21, %v1815_v6  ;;  %v10461_v39 = vrot.slane %v8193_v10, 1  ;;  %v8429_v38 = vmul.f32 %v8285_v12, %v8405_v48  ;;  %v3963_v61 = vmul.f32 %v8291_v60, %v8257_v41  ;;  %10467 = vst [vmem:[#allocation83_spill] sm:$0xff] %v8440_v16  ;;  %v8442_v10 = vpop.permute.xlu2 %3680  ;;  %v10468_v6 = vld [vmem:[#allocation32_spill] sm:$0xff]  ;;  %v10470_v41 = vld [vmem:[#allocation339_spill] sm:$0xff] }
 0x64f   :  { %v992_v57 = vadd.f32 %v10458_v8, %v846_v51  ;;  %v1197_v11 = vadd.f32 %v10462_v26, %v1057_v18  ;;  %v1093_v51 = vadd.f32 %v10463_v34, %v953_v2  ;;  %v10465_v4 = vrot.slane %v10464_v14, 5  ;;  %v10472_v2 = vld [vmem:[#allocation163_spill] sm:$0xff]  ;;  %10473 = vst [vmem:[#allocation340_spill] sm:$0xff] %v8453_v29  ;;  %v10477_v26 = vld [vmem:[#allocation348_spill] sm:$0xff] }
 0x650   :  { %3944 = vrot.lane.b32.xlu0 %v10461_v39, %s5453_s10  ;;  %v8438_v56 = vadd.f32 %v10466_v52, %v956_v35  ;;  %v1265_v36 = vadd.f32 %v10469_v45, %v10468_v6  ;;  %v10471_v37 = vrot.slane %v10470_v41, 1  ;;  %v2145_v3 = vadd.f32 %v10472_v2, %v1969_v9  ;;  %v10474_v35 = vld [vmem:[#allocation352_spill] sm:$0xff]  ;;  %v10480_v9 = vld [vmem:[#allocation174_spill] sm:$0xff]  ;;  %v10514_v29 = vld [vmem:[#allocation51_spill] sm:$0xff] }
 0x651   :  { %v1198_v17 = vadd.f32 %v10465_v4, %v1058_v33  ;;  %v10002_v33 = vrot.slane %v8414_v0, 1  ;;  %v1200_v8 = vadd.f32 %v10474_v35, %v1060_v22  ;;  %v8458_v21 = vadd.f32 %v10475_v42, %v991_v7  ;;  %v10481_v22 = vld [vmem:[#allocation36_spill] sm:$0xff]  ;;  %v10483_v41 = vld [vmem:[#allocation34_spill] sm:$0xff] }
 0x652   :  { %v8450_v18 = vadd.f32 %v10471_v37, %v954_v62  ;;  %v8462_v39 = vmul.f32 %v7597_v19, %v7983_v1  ;;  %v10478_v34 = vrot.slane %v10477_v26, 1  ;;  %v10479_v62 = vld [vmem:[#allocation81_spill] sm:$0xff]  ;;  %v2329_v52 = vadd.f32 %v10480_v9, %v2145_v3  ;;  %v10482_v19 = vld [vmem:[#allocation40_spill] sm:$0xff]  ;;  %v10487_v35 = vld [vmem:[#allocation38_spill] sm:$0xff] }
 0x653   :  { %v1429_v4 = vadd.f32 %v10479_v62, %v1265_v36  ;;  %v4021_v6 = vrot.slane %v8429_v38, 1  ;;  %v3977_v45 = vrot.slane %v3963_v61, 1  ;;  %v8475_v7 = vadd.f32 %v10481_v22, %v8349_v47  ;;  %v10484_v36 = vld [vmem:[#allocation35_spill] sm:$0xff]  ;;  %v10485_v2 = vld [vmem:[#allocation188_spill] sm:$0xff]  ;;  %v10490_v9 = vld [vmem:[#allocation217_spill] sm:$0xff] }
 0x654   :  { %10476 = vst [vmem:[#allocation31_spill] sm:$0xff] %v8462_v39  ;;  %v8466_v14 = vadd.f32 %v10478_v34, %v992_v57  ;;  %v8479_v1 = vadd.f32 %v10482_v19, %v8320_v23  ;;  %v8482_v57 = vadd.f32 %v10483_v41, %v1163_v54  ;;  %v8486_v37 = vadd.f32 %v10484_v36, %v8326_v44  ;;  %v10486_v23 = vld [vmem:[#allocation37_spill] sm:$0xff]  ;;  %v10489_v34 = vld [vmem:[#allocation66_spill] sm:$0xff]  ;;  %v10494_v41 = vld [vmem:[#allocation44_spill] sm:$0xff] }
 0x655   :  { %v2403_v38 = vadd.f32 %v10485_v2, %v2329_v52  ;;  %v4024_v61 = vsel %vm1007_vm6, %v4021_v6, %v10002_v33  ;;  %v3979_v47 = vsel %vm1007_vm6, %v3977_v45, %v3978_v53  ;;  %v8495_v3 = vmul.f32 %v8201_v28, %v8405_v48  ;;  %v10488_v53 = vld [vmem:[#allocation39_spill] sm:$0xff]  ;;  %v10492_v22 = vld [vmem:[#allocation42_spill] sm:$0xff] }
 0x656   :  { %v8499_v54 = vadd.f32 %v10486_v23, %v8372_v30  ;;  %v8502_v44 = vadd.f32 %v10487_v35, %v1197_v11  ;;  %4032 = vrot.lane.b32.xlu1 %v4024_v61, %s5453_s10  ;;  %3988 = vrot.lane.b32.xlu2 %v3979_v47, %s5453_s10  ;;  %v4008_v42 = vmul.f32 %v8156_v59, %v8405_v48  ;;  %v10491_v11 = vld [vmem:[#allocation41_spill] sm:$0xff]  ;;  %v8532_v2 = vpop.permute.xlu2 %3722  ;;  %v4055_v24 = vstv %s8444_s25  ;;  %v10496_v61 = vld [vmem:[#allocation115_spill] sm:$0xff]  ;;  %v8540_v35 = vpop.permute.xlu0 %3640 }
 0x657   :  { %v8510_v26 = vadd.f32 %v10488_v53, %v8297_v13  ;;  %v1605_v62 = vadd.f32 %v10489_v34, %v1429_v4  ;;  %v2557_v52 = vadd.f32 %v10490_v9, %v2403_v38  ;;  %v4012_v30 = vmul.f32 %v7814_v46, %v8405_v48  ;;  %v10493_v13 = vld [vmem:[#allocation365_spill] sm:$0xff]  ;;  %v8530_v4 = vpop.permute.xlu1 %3676  ;;  %10498 = vst [vmem:[#allocation109_spill] sm:$0xff] %v8540_v35  ;;  %v10499_v53 = vld [vmem:[#allocation46_spill] sm:$0xff]  ;;  %v10500_v9 = vld [vmem:[#allocation363_spill] sm:$0xff] }
 0x658   :  { %3986 = vrot.lane.b32.xlu0 %v3975_v27, %s5453_s10  ;;  %v8521_v45 = vadd.f32 %v10491_v11, %v8375_v15  ;;  %v8524_v19 = vadd.f32 %v10492_v22, %v1200_v8  ;;  %v8528_v36 = vadd.f32 %v10494_v41, %v10493_v13  ;;  %v10495_v27 = vld [vmem:[#allocation45_spill] sm:$0xff]  ;;  %v10497_v15 = vld [vmem:[#allocation228_spill] sm:$0xff]  ;;  %v10004_v8 = vrot.slane %v8495_v3, 1  ;;  %v10501_v11 = vld [vmem:[#allocation47_spill] sm:$0xff] }
 0x659   :  { %v8536_v38 = vadd.f32 %v10495_v27, %v1093_v51  ;;  %v1789_v47 = vadd.f32 %v10496_v61, %v1605_v62  ;;  %v2733_v23 = vadd.f32 %v10497_v15, %v2557_v52  ;;  %v8546_v34 = vadd.f32 %v10499_v53, %v1198_v17  ;;  %v10502_v62 = vld [vmem:[#allocation254_spill] sm:$0xff] }
 0x65a   :  { %v8550_v22 = vadd.f32 %v10501_v11, %v10500_v9  ;;  %v4020_v13 = vrot.slane %v4008_v42, 1  ;;  %v4011_v51 = vmul.f32 %v8291_v60, %v8405_v48  ;;  %v4026_v52 = vrot.slane %v4012_v30, 1  ;;  %v10503_v9 = vld [vmem:[#allocation114_spill] sm:$0xff]  ;;  %v10504_v11 = vld [vmem:[#allocation271_spill] sm:$0xff] }
 0x65b   :  { %v2917_v41 = vadd.f32 %v10502_v62, %v2733_v23  ;;  %v4095_v27 = vstv %s8471_s0  ;;  %v4056_v61 = vmul.f32 %v8156_v59, %v4055_v24  ;;  %v4059_v53 = vmul.f32 %v8291_v60, %v4055_v24  ;;  %v10505_v23 = vld [vmem:[#allocation48_spill] sm:$0xff] }
 0x65c   :  { %v4022_v15 = vsel %vm1007_vm6, %v4020_v13, %v4021_v6  ;;  %v4099_v33 = vmul.f32 %v8291_v60, %v4095_v27  ;;  %v8560_v17 = vmul.f32 %v7814_v46, %v4095_v27  ;;  %v1853_v42 = vadd.f32 %v10503_v9, %v1789_v47  ;;  %v10506_v62 = vld [vmem:[#allocation140_spill] sm:$0xff]  ;;  %v10507_v9 = vld [vmem:[#allocation282_spill] sm:$0xff] }
 0x65d   :  { %v2991_v43 = vadd.f32 %v10504_v11, %v2917_v41  ;;  %v4029_v48 = vsel %vm1007_vm6, %v4026_v52, %v10004_v8  ;;  %v4058_v30 = vmul.f32 %v8268_v58, %v4055_v24  ;;  %v8571_v6 = vadd.f32 %v10505_v23, %v8438_v56 }
 0x65e   :  { %4038 = vrot.lane.b32.xlu1 %v4029_v48, %s5453_s10  ;;  %4030 = vrot.lane.b32.xlu2 %v4022_v15, %s5453_s10  ;;  %v4057_v60 = vmul.f32 %v8285_v12, %v4055_v24  ;;  %v4025_v13 = vrot.slane %v4011_v51, 1  ;;  %v4096_v47 = vmul.f32 %v8156_v59, %v4095_v27  ;;  %v2017_v41 = vadd.f32 %v10506_v62, %v1853_v42  ;;  %v8587_v15 = vpop.permute.xlu2 %3760 }
 0x65f   :  { %v3145_v11 = vadd.f32 %v10507_v9, %v2991_v43  ;;  %v10508_v8 = vrot.slane %v8346_v63, 1  ;;  %v4068_v56 = vrot.slane %v4056_v61, 5  ;;  %v8583_v23 = vmul.f32 %v7814_v46, %v4055_v24  ;;  %v8585_v48 = vpop.permute.xlu1 %3718  ;;  %v10510_v43 = vld [vmem:[#allocation169_spill] sm:$0xff]  ;;  %v8595_v61 = vpop.permute.xlu0 %3672 }
 0x660   :  { %10509 = vst [vmem:[#allocation308_spill] sm:$0xff] %v8585_v48  ;;  %v4097_v51 = vmul.f32 %v8285_v12, %v4095_v27  ;;  %v4113_v20 = vrot.slane %v4099_v33, 5  ;;  %v4114_v42 = vrot.slane %v8560_v17, 5  ;;  %v4073_v62 = vrot.slane %v4059_v53, 5  ;;  %v10511_v9 = vld [vmem:[#allocation309_spill] sm:$0xff]  ;;  %v10515_v33 = vld [vmem:[#allocation52_spill] sm:$0xff] }
 0x661   :  { %3992 = vrot.lane.b32.xlu0 %v10508_v8, %s5453_s10  ;;  %v2193_v63 = vadd.f32 %v10510_v43, %v2017_v41  ;;  %v3321_v8 = vadd.f32 %v10511_v9, %v3145_v11  ;;  %10512 = vst [vmem:[#allocation349_spill] sm:$0xff] %v8595_v61  ;;  %v4071_v46 = vrot.slane %v4058_v30, 5  ;;  %v8600_v35 = vstv %s8543_s3  ;;  %v10516_v41 = vld [vmem:[#allocation180_spill] sm:$0xff]  ;;  %v10517_v43 = vld [vmem:[#allocation346_spill] sm:$0xff] }
 0x662   :  { %10513 = vst [vmem:[#allocation337_spill] sm:$0xff] %v8600_v35  ;;  %v1337_v16 = vadd.f32 %v10514_v29, %v8302_v25  ;;  %v8606_v17 = vadd.f32 %v10515_v33, %v8450_v18  ;;  %v4069_v53 = vrot.slane %v4057_v60, 5  ;;  %v4027_v39 = vsel %vm1007_vm6, %v4025_v13, %v4026_v52  ;;  %v10518_v52 = vld [vmem:[#allocation54_spill] sm:$0xff] }
 0x663   :  { %v2377_v11 = vadd.f32 %v10516_v41, %v2193_v63  ;;  %v3505_v30 = vadd.f32 %v10517_v43, %v3321_v8  ;;  %v4061_v9 = vmul.f32 %v8201_v28, %v4055_v24  ;;  %v4074_v61 = vrot.slane %v8583_v23, 5  ;;  %v10519_v13 = vld [vmem:[#allocation194_spill] sm:$0xff]  ;;  %v10520_v23 = vld [vmem:[#allocation33_spill] sm:$0xff] }
 0x664   :  { %v4109_v31 = vrot.slane %v4097_v51, 5  ;;  %v8616_v25 = vsel %vm974_vm4, %v4113_v20, %v4114_v42  ;;  %v8619_v18 = vmul.f32 %v8268_v58, %v4095_v27  ;;  %v8622_v29 = vmul.f32 %v8201_v28, %v4095_v27  ;;  %v10521_v20 = vld [vmem:[#allocation55_spill] sm:$0xff]  ;;  %v10522_v58 = vld [vmem:[#allocation61_spill] sm:$0xff]  ;;  %v10525_v41 = vld [vmem:[#allocation342_spill] sm:$0xff] }
 0x665   :  { %v1340_v60 = vadd.f32 %v10518_v52, %v8458_v21  ;;  %v2441_v63 = vadd.f32 %v10519_v13, %v2377_v11  ;;  %v4072_v8 = vsel %vm974_vm4, %v4069_v53, %v4071_v46  ;;  %v8630_v24 = vmul.f32 %v8156_v59, %v8600_v35  ;;  %v10523_v27 = vld [vmem:[#allocation223_spill] sm:$0xff] }
 0x666   :  { %v1303_v51 = vadd.f32 %v10521_v20, %v10520_v23  ;;  %v1341_v33 = vadd.f32 %v10522_v58, %v8466_v14  ;;  %4080 = vrot.lane.b32.xlu1 %v4072_v8, %s5453_s10  ;;  %4036 = vrot.lane.b32.xlu2 %v4027_v39, %s5453_s10  ;;  %v4108_v28 = vrot.slane %v4096_v47, 5  ;;  %v4070_v21 = vsel %vm974_vm4, %v4068_v56, %v4069_v53  ;;  %v10526_v39 = vld [vmem:[#allocation57_spill] sm:$0xff]  ;;  %v8651_v53 = vpop.permute.xlu2 %3766 }
 0x667   :  { %v2605_v46 = vadd.f32 %v10523_v27, %v2441_v63  ;;  %v10524_v59 = vrot.slane %v8414_v0, 1  ;;  %v3579_v11 = vadd.f32 %v10525_v41, %v3505_v30  ;;  %v4076_v14 = vrot.slane %v4061_v9, 5  ;;  %v3725_v56 = vpop.permute.xlu1 %3724  ;;  %10527 = vst [vmem:[#allocation108_spill] sm:$0xff] %v8651_v53  ;;  %v10528_v30 = vld [vmem:[#allocation60_spill] sm:$0xff]  ;;  %v10529_v9 = vld [vmem:[#allocation234_spill] sm:$0xff]  ;;  %v10533_v27 = vld [vmem:[#allocation53_spill] sm:$0xff] }
 0x668   :  { %v8647_v43 = vsel %vm974_vm4, %v4073_v62, %v4074_v61  ;;  %v1512_v47 = vadd.f32 %v10526_v39, %v8528_v36  ;;  %v4110_v52 = vsel %vm974_vm4, %v4108_v28, %v4109_v31  ;;  %v10005_v13 = vrot.slane %v8619_v18, 5  ;;  %v8661_v62 = vpop.permute.xlu0 %3678  ;;  %v10531_v36 = vld [vmem:[#allocation64_spill] sm:$0xff]  ;;  %v10536_v39 = vld [vmem:[#allocation67_spill] sm:$0xff]  ;;  %v10552_v53 = vld [vmem:[#allocation90_spill] sm:$0xff] }
 0x669   :  { %4034 = vrot.lane.b32.xlu0 %v10524_v59, %s5453_s10  ;;  %v1515_v63 = vadd.f32 %v10528_v30, %v8550_v22  ;;  %v2781_v8 = vadd.f32 %v10529_v9, %v2605_v46  ;;  %v8659_v23 = vadd.f32 %v3725_v56, %v3579_v11  ;;  %v4143_v20 = vstv %s8591_s26  ;;  %v10537_v22 = vld [vmem:[#allocation86_spill] sm:$0xff]  ;;  %v10538_v46 = vld [vmem:[#allocation260_spill] sm:$0xff] }
 0x66a   :  { %v8665_v58 = vadd.f32 %v10531_v36, %v1337_v16  ;;  %v1517_v59 = vadd.f32 %v10533_v27, %v1341_v33  ;;  %v8669_v28 = vstv %s8597_s27  ;;  %v8672_v41 = vstv %s8609_s28  ;;  %v10540_v36 = vld [vmem:[#allocation335_spill] sm:$0xff] }
 0x66b   :  { %10530 = vst [vmem:[#allocation351_spill] sm:$0xff] %v8659_v23  ;;  %v1516_v0 = vadd.f32 %v10536_v39, %v1340_v60  ;;  %v1379_v30 = vadd.f32 %v10537_v22, %v8482_v57  ;;  %v2965_v11 = vadd.f32 %v10538_v46, %v2781_v8  ;;  %v4077_v56 = vsel %vm974_vm4, %v4074_v61, %v4076_v14  ;;  %v10542_v8 = vld [vmem:[#allocation277_spill] sm:$0xff]  ;;  %v10543_v61 = vld [vmem:[#allocation360_spill] sm:$0xff]  ;;  %v10544_v39 = vld [vmem:[#allocation74_spill] sm:$0xff] }
 0x66c   :  { %10532 = vst [vmem:[#allocation358_spill] sm:$0xff] %v8665_v58  ;;  %v8682_v16 = vsel %vm974_vm4, %v4109_v31, %v10005_v13  ;;  %v10539_v33 = vrot.slane %v8622_v29, 5  ;;  %v8690_v60 = vmul.f32 %v10540_v36, %v4143_v20  ;;  %v8694_v57 = vmul.f32 %v8285_v12, %v8600_v35  ;;  %v10551_v23 = vld [vmem:[#allocation77_spill] sm:$0xff] }
 0x66d   :  { %10534 = vst [vmem:[#allocation347_spill] sm:$0xff] %v8669_v28  ;;  %v3029_v27 = vadd.f32 %v10542_v8, %v2965_v11  ;;  %v8698_v14 = vmul.f32 %v10543_v61, %v4143_v20  ;;  %v8702_v31 = vmul.f32 %v10540_v36, %v8672_v41  ;;  %v1700_v22 = vadd.f32 %v10544_v39, %v1516_v0  ;;  %v10547_v8 = vld [vmem:[#allocation87_spill] sm:$0xff]  ;;  %v10548_v0 = vld [vmem:[#allocation70_spill] sm:$0xff] }
 0x66e   :  { %10535 = vst [vmem:[#allocation343_spill] sm:$0xff] %v8672_v41  ;;  %v8687_v9 = vsel %vm974_vm4, %v4114_v42, %v10539_v33  ;;  %v8706_v42 = vmul.f32 %v10540_v36, %v8669_v28  ;;  %4118 = vrot.lane.b32.xlu1 %v4110_v52, %s5453_s10  ;;  %4078 = vrot.lane.b32.xlu2 %v4070_v21, %s5453_s10  ;;  %v8720_v11 = vstv %s8639_s29  ;;  %v10546_v33 = vld [vmem:[#allocation78_spill] sm:$0xff]  ;;  %v10549_v52 = vld [vmem:[#allocation288_spill] sm:$0xff]  ;;  %v10550_v21 = vrot.slane %v8495_v3, 1  ;;  %v8737_v48 = vpop.permute.xlu2 %3808 }
 0x66f   :  { %10541 = vst [vmem:[#allocation134_spill] sm:$0xff] %v8694_v57  ;;  %v8713_v12 = vmul.f32 %v10543_v61, %v8672_v41  ;;  %v8717_v46 = vmul.f32 %v10543_v61, %v8669_v28  ;;  %v1426_v36 = vadd.f32 %v10546_v33, %v8546_v34  ;;  %v1477_v13 = vadd.f32 %v10547_v8, %v1303_v51  ;;  %v8735_v55 = vpop.permute.xlu1 %3762  ;;  %v10556_v3 = vld [vmem:[#allocation84_spill] sm:$0xff]  ;;  %v10560_v8 = vld [vmem:[#allocation85_spill] sm:$0xff] }
 0x670   :  { %10545 = vst [vmem:[#allocation350_spill] sm:$0xff] %v8720_v11  ;;  %v1555_v39 = vadd.f32 %v10548_v0, %v1379_v30  ;;  %v3193_v35 = vadd.f32 %v10549_v52, %v3029_v27  ;;  %v8731_v58 = vadd.f32 %v10551_v23, %v1517_v59  ;;  %v1378_v57 = vadd.f32 %v10552_v53, %v8479_v1  ;;  %v10558_v23 = vld [vmem:[#allocation96_spill] sm:$0xff]  ;;  %v10559_v27 = vld [vmem:[#allocation315_spill] sm:$0xff]  ;;  %v8752_v1 = vpop.permute.xlu0 %3720 }
 0x671   :  { %4040 = vrot.lane.b32.xlu0 %v10550_v21, %s5453_s10  ;;  %10553 = vst [vmem:[#allocation353_spill] sm:$0xff] %v8735_v55  ;;  %v8740_v34 = vmul.f32 %v8095_v50, %v4143_v20  ;;  %v8744_v51 = vmul.f32 %v10543_v61, %v8720_v11  ;;  %v8748_v30 = vadd.f32 %v10556_v3, %v8606_v17  ;;  %v10561_v61 = vld [vmem:[#allocation89_spill] sm:$0xff]  ;;  %v10563_v3 = vld [vmem:[#allocation63_spill] sm:$0xff]  ;;  %v10565_v55 = vld [vmem:[#allocation364_spill] sm:$0xff] }
 0x672   :  { %10554 = vst [vmem:[#allocation338_spill] sm:$0xff] %v8737_v48  ;;  %v1739_v59 = vadd.f32 %v10558_v23, %v1555_v39  ;;  %v3369_v33 = vadd.f32 %v10559_v27, %v3193_v35  ;;  %v8756_v53 = vmul.f32 %v8095_v50, %v8669_v28  ;;  %v8759_v0 = vadd.f32 %v10560_v8, %v1512_v47  ;;  %v10562_v35 = vld [vmem:[#allocation110_spill] sm:$0xff]  ;;  %v10564_v27 = vld [vmem:[#allocation72_spill] sm:$0xff] }
 0x673   :  { %10555 = vst [vmem:[#allocation356_spill] sm:$0xff] %v8744_v51  ;;  %v1424_v52 = vadd.f32 %v10561_v61, %v8486_v37  ;;  %v8764_v21 = vmul.f32 %v7828_v40, %v4143_v20  ;;  %v8768_v17 = vmul.f32 %v7828_v40, %v8669_v28  ;;  %v8772_v23 = vadd.f32 %v10563_v3, %v1426_v36  ;;  %v10566_v8 = vld [vmem:[#allocation88_spill] sm:$0xff]  ;;  %v10572_v51 = vld [vmem:[#allocation139_spill] sm:$0xff] }
 0x674   :  { %10557 = vst [vmem:[#allocation32_spill] sm:$0xff] %v8748_v30  ;;  %v1813_v39 = vadd.f32 %v10562_v35, %v1739_v59  ;;  %v1653_v11 = vadd.f32 %v10564_v27, %v1477_v13  ;;  %v3553_v47 = vadd.f32 %v10565_v55, %v3369_v33  ;;  %v8777_v48 = vadd.f32 %v10566_v8, %v1515_v63  ;;  %v10567_v37 = vld [vmem:[#allocation80_spill] sm:$0xff]  ;;  %v10574_v63 = vld [vmem:[#allocation94_spill] sm:$0xff] }
 0x675   :  { %v1554_v61 = vadd.f32 %v10567_v37, %v1378_v57  ;;  %v10568_v20 = vld [vmem:[#allocation92_spill] sm:$0xff]  ;;  %v8784_v40 = vmul.f32 %v8095_v50, %v8672_v41  ;;  %v1380_v57 = vadd.f32 %v10574_v63, %v8475_v7  ;;  %v10576_v50 = vld [vmem:[#allocation73_spill] sm:$0xff]  ;;  %v10579_v37 = vld [vmem:[#allocation150_spill] sm:$0xff] }
 0x676   :  { %v1427_v30 = vadd.f32 %v10568_v20, %v8499_v54  ;;  %v10570_v59 = vld [vmem:[#allocation120_spill] sm:$0xff]  ;;  %v1967_v13 = vadd.f32 %v10572_v51, %v1813_v39  ;;  %v10575_v54 = vld [vmem:[#allocation97_spill] sm:$0xff]  ;;  %v1600_v8 = vadd.f32 %v10576_v50, %v1424_v52  ;;  %4124 = vrot.lane.b32.xlu1 %v8616_v25, %s5453_s10  ;;  %4084 = vrot.lane.b32.xlu2 %v4077_v56, %s5453_s10  ;;  %v10578_v51 = vld [vmem:[#allocation147_spill] sm:$0xff] }
 0x677   :  { %10569 = vst [vmem:[#allocation49_spill] sm:$0xff] %v8784_v40  ;;  %v1891_v35 = vadd.f32 %v10570_v59, %v1653_v11  ;;  %v10571_v36 = vld [vmem:[#allocation136_spill] sm:$0xff]  ;;  %v1425_v33 = vadd.f32 %v10575_v54, %v8502_v44  ;;  %v10580_v7 = vld [vmem:[#allocation362_spill] sm:$0xff]  ;;  %v10582_v63 = vld [vmem:[#allocation99_spill] sm:$0xff] }
 0x678   :  { %v1928_v3 = vadd.f32 %v10571_v36, %v1700_v22  ;;  %v8789_v27 = vld [vmem:[#allocation2 + $0x10] sm:$0x3f]  ;;  %v10577_v22 = vld [vmem:[#allocation146_spill] sm:$0xff]  ;;  %v2143_v20 = vadd.f32 %v10579_v37, %v1967_v13  ;;  %v3617_v59 = vadd.f32 %v10580_v7, %v3553_v47  ;;  %v1784_v52 = vadd.f32 %v10582_v63, %v1600_v8  ;;  %v8821_v47 = vpop.permute.xlu0 %3758 }
 0x679   :  { %10573 = vst [vmem:[#allocation339_spill] sm:$0xff] %v8789_v27  ;;  %v8793_v55 = vmul.f32 %v8789_v27, %v8669_v28  ;;  %v2065_v11 = vadd.f32 %v10577_v22, %v1891_v35  ;;  %4082 = vrot.lane.b32.xlu0 %v8647_v43, %s5453_s10  ;;  %v10581_v36 = vld [vmem:[#allocation91_spill] sm:$0xff]  ;;  %v10583_v54 = vld [vmem:[#allocation100_spill] sm:$0xff]  ;;  %v3769_v28 = vpop.permute.xlu1 %3768  ;;  %v8814_v35 = vpop.permute.xlu2 %3814  ;;  %v8829_v63 = vmul.f32 %v8789_v27, %v8672_v41 }
 0x67a   :  { %v2104_v39 = vadd.f32 %v10578_v51, %v1928_v3  ;;  %v1738_v44 = vadd.f32 %v10581_v36, %v1554_v61  ;;  %v1428_v25 = vadd.f32 %v10583_v54, %v8524_v19  ;;  %v10584_v50 = vld [vmem:[#allocation76_spill] sm:$0xff]  ;;  %10585 = vst [vmem:[#allocation163_spill] sm:$0xff] %v8814_v35  ;;  %v10586_v3 = vld [vmem:[#allocation173_spill] sm:$0xff]  ;;  %v10587_v13 = vld [vmem:[#allocation175_spill] sm:$0xff]  ;;  %v8819_v40 = vadd.f32 %v3769_v28, %v3617_v59 }
 0x67b   :  { %v1603_v56 = vadd.f32 %v10584_v50, %v1427_v30  ;;  %v2241_v51 = vadd.f32 %v10587_v13, %v2065_v11  ;;  %v10588_v37 = vld [vmem:[#allocation176_spill] sm:$0xff]  ;;  %v10590_v61 = vld [vmem:[#allocation95_spill] sm:$0xff]  ;;  %v10594_v11 = vld [vmem:[#allocation193_spill] sm:$0xff] }
 0x67c   :  { %v2288_v22 = vadd.f32 %v10586_v3, %v2104_v39  ;;  %v2327_v43 = vadd.f32 %v10588_v37, %v2143_v20  ;;  %10589 = vst [vmem:[#allocation352_spill] sm:$0xff] %v8819_v40  ;;  %v1472_v8 = vadd.f32 %v10590_v61, %v8510_v26  ;;  %v10591_v7 = vld [vmem:[#allocation56_spill] sm:$0xff]  ;;  %v10592_v36 = vld [vmem:[#allocation59_spill] sm:$0xff]  ;;  %v10593_v39 = vld [vmem:[#allocation113_spill] sm:$0xff] }
 0x67d   :  { %v1556_v19 = vadd.f32 %v10591_v7, %v1380_v57  ;;  %v1601_v30 = vadd.f32 %v10592_v36, %v1425_v33  ;;  %v1848_v54 = vadd.f32 %v10593_v39, %v1784_v52  ;;  %v10595_v20 = vld [vmem:[#allocation200_spill] sm:$0xff]  ;;  %v10596_v59 = vld [vmem:[#allocation201_spill] sm:$0xff]  ;;  %v10597_v13 = vld [vmem:[#allocation98_spill] sm:$0xff] }
 0x67e   :  { %v2401_v50 = vadd.f32 %v10594_v11, %v2327_v43  ;;  %v2479_v28 = vadd.f32 %v10595_v20, %v2241_v51  ;;  %v2516_v3 = vadd.f32 %v10596_v59, %v2288_v22  ;;  %v1475_v37 = vadd.f32 %v10597_v13, %v8521_v45  ;;  %v10598_v26 = vld [vmem:[#allocation101_spill] sm:$0xff]  ;;  %v10599_v57 = vld [vmem:[#allocation102_spill] sm:$0xff]  ;;  %v10602_v27 = vld [vmem:[#allocation204_spill] sm:$0xff]  ;;  %4152 = vrot.lane.b32.xlu1 %v8698_v14, %s5454_s30 }
 0x67f   :  { %v1740_v61 = vadd.f32 %v10598_v26, %v1556_v19  ;;  %v1787_v7 = vadd.f32 %v10599_v57, %v1603_v56  ;;  %v10600_v33 = vld [vmem:[#allocation62_spill] sm:$0xff]  ;;  %v10603_v52 = vld [vmem:[#allocation227_spill] sm:$0xff]  ;;  %v10604_v43 = vld [vmem:[#allocation229_spill] sm:$0xff] }
 0x680   :  { %v1604_v36 = vadd.f32 %v10600_v33, %v1428_v25  ;;  %v10601_v40 = vld [vmem:[#allocation142_spill] sm:$0xff]  ;;  %v2555_v41 = vadd.f32 %v10602_v27, %v2401_v50  ;;  %v2692_v39 = vadd.f32 %v10603_v52, %v2516_v3  ;;  %v2653_v11 = vadd.f32 %v10604_v43, %v2479_v28  ;;  %v10605_v51 = vld [vmem:[#allocation103_spill] sm:$0xff]  ;;  %v10606_v20 = vld [vmem:[#allocation104_spill] sm:$0xff] }
 0x681   :  { %v2012_v35 = vadd.f32 %v10601_v40, %v1848_v54  ;;  %v1473_v22 = vadd.f32 %v10605_v51, %v8536_v38  ;;  %v1785_v59 = vadd.f32 %v10606_v20, %v1601_v30  ;;  %v10607_v45 = vld [vmem:[#allocation105_spill] sm:$0xff]  ;;  %v10608_v40 = vrot.slane %v8619_v18, 5  ;;  %v10610_v56 = vld [vmem:[#allocation230_spill] sm:$0xff]  ;;  %v10611_v54 = vld [vmem:[#allocation240_spill] sm:$0xff]  ;;  %4120 = vrot.lane.b32.xlu0 %v8682_v16, %s5453_s10 }
 0x682   :  { %v8848_v13 = vadd.f32 %v10607_v45, %v1738_v44  ;;  %v10609_v27 = vld [vmem:[#allocation153_spill] sm:$0xff]  ;;  %v2731_v19 = vadd.f32 %v10610_v56, %v2555_v41  ;;  %v2829_v50 = vadd.f32 %v10611_v54, %v2653_v11  ;;  %v10612_v38 = vld [vmem:[#allocation256_spill] sm:$0xff]  ;;  %v10613_v44 = vld [vmem:[#allocation106_spill] sm:$0xff]  ;;  %v8870_v41 = vpop.permute.xlu2 %3848 }
 0x683   :  { %4122 = vrot.lane.b32.xlu2 %v10608_v40, %s5453_s10  ;;  %v2188_v25 = vadd.f32 %v10609_v27, %v2012_v35  ;;  %v2876_v28 = vadd.f32 %v10612_v38, %v2692_v39  ;;  %v8863_v30 = vadd.f32 %v10613_v44, %v8571_v6  ;;  %v10614_v14 = vld [vmem:[#allocation107_spill] sm:$0xff]  ;;  %v10616_v57 = vld [vmem:[#allocation82_spill] sm:$0xff]  ;;  %v8868_v35 = vpop.permute.xlu1 %3810  ;;  %v10619_v51 = vld [vmem:[#allocation281_spill] sm:$0xff]  ;;  %v8876_v6 = vpop.permute.xlu0 %3764 }
 0x684   :  { %v1788_v3 = vadd.f32 %v10614_v14, %v1604_v36  ;;  %v10615_v26 = vld [vmem:[#allocation79_spill] sm:$0xff]  ;;  %v1651_v33 = vadd.f32 %v10616_v57, %v1475_v37  ;;  %v10621_v36 = vld [vmem:[#allocation112_spill] sm:$0xff]  ;;  %v10623_v37 = vld [vmem:[#allocation118_spill] sm:$0xff] }
 0x685   :  { %v1648_v18 = vadd.f32 %v10615_v26, %v1472_v8  ;;  %v10617_v52 = vld [vmem:[#allocation179_spill] sm:$0xff]  ;;  %v3104_v16 = vadd.f32 %v10619_v51, %v2876_v28  ;;  %v1786_v40 = vadd.f32 %v10621_v36, %v8772_v23  ;;  %v10622_v8 = vld [vmem:[#allocation116_spill] sm:$0xff]  ;;  %v1814_v56 = vadd.f32 %v10623_v37, %v1740_v61  ;;  %v10624_v54 = vld [vmem:[#allocation65_spill] sm:$0xff] }
 0x686   :  { %v2372_v43 = vadd.f32 %v10617_v52, %v2188_v25  ;;  %v10618_v39 = vld [vmem:[#allocation259_spill] sm:$0xff]  ;;  %v1851_v27 = vadd.f32 %v10622_v8, %v1787_v7  ;;  %v1649_v38 = vadd.f32 %v10624_v54, %v1473_v22  ;;  %v10626_v25 = vld [vmem:[#allocation196_spill] sm:$0xff]  ;;  %v10630_v51 = vld [vmem:[#allocation126_spill] sm:$0xff]  ;;  %4158 = vrot.lane.b32.xlu1 %v8764_v21, %s5454_s30 }
 0x687   :  { %v2915_v11 = vadd.f32 %v10618_v39, %v2731_v19  ;;  %v10620_v20 = vld [vmem:[#allocation283_spill] sm:$0xff]  ;;  %v10627_v19 = vld [vmem:[#allocation294_spill] sm:$0xff]  ;;  %v10631_v23 = vld [vmem:[#allocation129_spill] sm:$0xff] }
 0x688   :  { %v3067_v45 = vadd.f32 %v10620_v20, %v2829_v50  ;;  %v10625_v44 = vld [vmem:[#allocation119_spill] sm:$0xff]  ;;  %v2436_v26 = vadd.f32 %v10626_v25, %v2372_v43  ;;  %v10629_v50 = vld [vmem:[#allocation121_spill] sm:$0xff]  ;;  %v1929_v20 = vadd.f32 %v10630_v51, %v8731_v58  ;;  %v1968_v36 = vadd.f32 %v10631_v23, %v1814_v56  ;;  %v10634_v22 = vld [vmem:[#allocation258_spill] sm:$0xff] }
 0x689   :  { %v1886_v14 = vadd.f32 %v10625_v44, %v1648_v18  ;;  %v10628_v28 = vld [vmem:[#allocation311_spill] sm:$0xff]  ;;  %v1849_v39 = vadd.f32 %v10629_v50, %v1785_v59  ;;  %v10632_v7 = vld [vmem:[#allocation145_spill] sm:$0xff]  ;;  %v2989_v54 = vadd.f32 %v10634_v22, %v2915_v11  ;;  %v10636_v43 = vld [vmem:[#allocation322_spill] sm:$0xff]  ;;  %v10640_v58 = vrot.slane %v8622_v29, 5  ;;  %4126 = vrot.lane.b32.xlu0 %v8687_v9, %s5453_s10 }
 0x68a   :  { %v3241_v57 = vadd.f32 %v10627_v19, %v3067_v45  ;;  %v3280_v52 = vadd.f32 %v10628_v28, %v3104_v16  ;;  %v2015_v8 = vadd.f32 %v10632_v7, %v1851_v27  ;;  %v10633_v61 = vld [vmem:[#allocation207_spill] sm:$0xff]  ;;  %v10635_v18 = vld [vmem:[#allocation321_spill] sm:$0xff]  ;;  %v10637_v45 = vld [vmem:[#allocation152_spill] sm:$0xff]  ;;  %v3855_v22 = vpop.permute.xlu2 %3854 }
 0x68b   :  { %v2600_v37 = vadd.f32 %v10633_v61, %v2436_v26  ;;  %v2105_v19 = vadd.f32 %v10637_v45, %v1929_v20  ;;  %v10638_v16 = vld [vmem:[#allocation155_spill] sm:$0xff]  ;;  %v10639_v59 = vld [vmem:[#allocation156_spill] sm:$0xff]  ;;  %4128 = vrot.lane.b32.xlu2 %v10640_v58, %s5453_s10  ;;  %v10641_v27 = vld [vmem:[#allocation233_spill] sm:$0xff]  ;;  %v3817_v61 = vpop.permute.xlu1 %3816  ;;  %s5260_s10 = sld [smem:[#allocation9 + $0x61]] }
 0x68c   :  { %v3417_v44 = vadd.f32 %v10635_v18, %v3241_v57  ;;  %v3464_v25 = vadd.f32 %v10636_v43, %v3280_v52  ;;  %v2144_v28 = vadd.f32 %v10638_v16, %v1968_v36  ;;  %v2191_v50 = vadd.f32 %v10639_v59, %v2015_v8  ;;  %v10642_v11 = vld [vmem:[#allocation284_spill] sm:$0xff]  ;;  %v10643_v51 = vld [vmem:[#allocation122_spill] sm:$0xff]  ;;  %v10644_v23 = vld [vmem:[#allocation181_spill] sm:$0xff] }
 0x68d   :  { %v2776_v56 = vadd.f32 %v10641_v27, %v2600_v37  ;;  %v3143_v26 = vadd.f32 %v10642_v11, %v2989_v54  ;;  %v1889_v20 = vadd.f32 %v10643_v51, %v1651_v33  ;;  %v2289_v36 = vadd.f32 %v10644_v23, %v2105_v19  ;;  %v10645_v21 = vld [vmem:[#allocation182_spill] sm:$0xff]  ;;  %v10646_v8 = vld [vmem:[#allocation184_spill] sm:$0xff]  ;;  %v10651_v19 = vld [vmem:[#allocation127_spill] sm:$0xff] }
 0x68e   :  { %v3655_v57 = vadd.f32 %v8306_v49, %v3417_v44  ;;  %v3692_v52 = vadd.f32 %v8661_v62, %v3464_v25  ;;  %v2375_v7 = vadd.f32 %v10645_v21, %v2191_v50  ;;  %v2328_v29 = vadd.f32 %v10646_v8, %v2144_v28  ;;  %v10647_v37 = vld [vmem:[#allocation262_spill] sm:$0xff]  ;;  %v8920_v44 = vpop.permute.xlu0 %3806  ;;  %v10649_v9 = vld [vmem:[#allocation124_spill] sm:$0xff]  ;;  %v10650_v25 = vld [vmem:[#allocation125_spill] sm:$0xff]  ;;  %4186 = vrot.lane.b32.xlu1 %v8793_v55, %s5454_s30 }
 0x68f   :  { %v2960_v18 = vadd.f32 %v10647_v37, %v2776_v56  ;;  %v10648_v54 = vld [vmem:[#allocation314_spill] sm:$0xff]  ;;  %v1852_v33 = vadd.f32 %v10649_v9, %v1788_v3  ;;  %v8925_v45 = vadd.f32 %v10650_v25, %v8759_v0  ;;  %v8928_v16 = vadd.f32 %v10651_v19, %v1649_v38  ;;  %v10652_v28 = vld [vmem:[#allocation111_spill] sm:$0xff]  ;;  %v10653_v50 = vld [vmem:[#allocation128_spill] sm:$0xff] }
 0x690   :  { %v3319_v43 = vadd.f32 %v10648_v54, %v3143_v26  ;;  %v8916_v49 = vadd.f32 %v3817_v61, %v3655_v57  ;;  %v8918_v62 = vadd.f32 %v3855_v22, %v3692_v52  ;;  %v8931_v59 = vadd.f32 %v10652_v28, %v1786_v40  ;;  %v10654_v27 = vld [vmem:[#allocation199_spill] sm:$0xff]  ;;  %v10655_v11 = vld [vmem:[#allocation206_spill] sm:$0xff]  ;;  %v10656_v57 = vld [vmem:[#allocation325_spill] sm:$0xff] }
 0x691   :  { %v1927_v58 = vadd.f32 %v10653_v50, %v8777_v48  ;;  %v2439_v56 = vadd.f32 %v10654_v27, %v2375_v7  ;;  %v2517_v26 = vadd.f32 %v10655_v11, %v2289_v36  ;;  %v10657_v3 = vld [vmem:[#allocation131_spill] sm:$0xff]  ;;  %v10658_v0 = vld [vmem:[#allocation132_spill] sm:$0xff]  ;;  %v10661_v40 = vld [vmem:[#allocation210_spill] sm:$0xff]  ;;  %4154 = vrot.lane.b32.xlu0 %v8740_v34, %s5454_s30 }
 0x692   :  { %v3503_v52 = vadd.f32 %v10656_v57, %v3319_v43  ;;  %v1966_v51 = vadd.f32 %v10657_v3, %v8848_v13  ;;  %v2013_v23 = vadd.f32 %v10658_v0, %v1849_v39  ;;  %v10659_v21 = vld [vmem:[#allocation135_spill] sm:$0xff]  ;;  %v10663_v48 = vld [vmem:[#allocation261_spill] sm:$0xff]  ;;  %v10664_v7 = vld [vmem:[#allocation354_spill] sm:$0xff] }
 0x693   :  { %v2016_v38 = vadd.f32 %v10659_v21, %v1852_v33  ;;  %v10660_v8 = vld [vmem:[#allocation183_spill] sm:$0xff]  ;;  %v2603_v22 = vadd.f32 %v10661_v40, %v2439_v56  ;;  %v3024_v9 = vadd.f32 %v10663_v48, %v2960_v18  ;;  %v10665_v36 = vld [vmem:[#allocation148_spill] sm:$0xff]  ;;  %v10666_v43 = vld [vmem:[#allocation158_spill] sm:$0xff]  ;;  %4156 = vrot.lane.b32.xlu2 %v8690_v60, %s5454_s30  ;;  %v8964_v60 = vpop.permute.xlu1 %3850  ;;  %v3897_v21 = vpop.permute.xlu2 %3896 }
 0x694   :  { %v2402_v61 = vadd.f32 %v10660_v8, %v2328_v29  ;;  %v10662_v37 = vld [vmem:[#allocation235_spill] sm:$0xff]  ;;  %v3577_v25 = vadd.f32 %v10664_v7, %v3503_v52  ;;  %v2060_v19 = vadd.f32 %v10665_v36, %v1886_v14  ;;  %v2189_v28 = vadd.f32 %v10666_v43, %v2013_v23  ;;  %v10667_v50 = vld [vmem:[#allocation209_spill] sm:$0xff]  ;;  %v10668_v39 = vld [vmem:[#allocation236_spill] sm:$0xff] }
 0x695   :  { %v2693_v54 = vadd.f32 %v10662_v37, %v2517_v26  ;;  %v2779_v29 = vadd.f32 %v10668_v39, %v2603_v22  ;;  %v10669_v33 = vld [vmem:[#allocation246_spill] sm:$0xff]  ;;  %v10670_v56 = vld [vmem:[#allocation287_spill] sm:$0xff]  ;;  %v10671_v14 = vld [vmem:[#allocation157_spill] sm:$0xff] }
 0x696   :  { %v2556_v13 = vadd.f32 %v10667_v50, %v2402_v61  ;;  %v3188_v18 = vadd.f32 %v10670_v56, %v3024_v9  ;;  %v3731_v11 = vadd.f32 %v8752_v1, %v3577_v25  ;;  %v2103_v26 = vadd.f32 %v10671_v14, %v1927_v58  ;;  %v10672_v57 = vld [vmem:[#allocation160_spill] sm:$0xff]  ;;  %v10673_v3 = vld [vmem:[#allocation187_spill] sm:$0xff]  ;;  %v10674_v0 = vld [vmem:[#allocation238_spill] sm:$0xff]  ;;  %v8971_v34 = vpop.permute.xlu0 %3812  ;;  %4258 = vrot.lane.b32.xlu1 %v8713_v12, %s5454_s30 }
 0x697   :  { %v2877_v27 = vadd.f32 %v10669_v33, %v2693_v54  ;;  %v2142_v52 = vadd.f32 %v10672_v57, %v1966_v51  ;;  %v2373_v55 = vadd.f32 %v10673_v3, %v2189_v28  ;;  %v10675_v8 = vld [vmem:[#allocation265_spill] sm:$0xff]  ;;  %v10678_v58 = vld [vmem:[#allocation151_spill] sm:$0xff]  ;;  %v10680_v7 = vld [vmem:[#allocation168_spill] sm:$0xff] }
 0x698   :  { %v2732_v23 = vadd.f32 %v10674_v0, %v2556_v13  ;;  %v2963_v61 = vadd.f32 %v10675_v8, %v2779_v29  ;;  %v10676_v40 = vld [vmem:[#allocation289_spill] sm:$0xff]  ;;  %v8969_v54 = vadd.f32 %v3897_v21, %v3731_v11  ;;  %v2063_v48 = vadd.f32 %v10678_v58, %v1889_v20  ;;  %v10681_v36 = vld [vmem:[#allocation171_spill] sm:$0xff]  ;;  %v10684_v29 = vld [vmem:[#allocation300_spill] sm:$0xff] }
 0x699   :  { %v3105_v22 = vadd.f32 %v10676_v40, %v2877_v27  ;;  %v10677_v37 = vld [vmem:[#allocation317_spill] sm:$0xff]  ;;  %v2287_v25 = vadd.f32 %v10680_v7, %v2103_v26  ;;  %v2326_v43 = vadd.f32 %v10681_v36, %v2142_v52  ;;  %v10682_v28 = vld [vmem:[#allocation159_spill] sm:$0xff]  ;;  %v10685_v27 = vld [vmem:[#allocation328_spill] sm:$0xff]  ;;  %4182 = vrot.lane.b32.xlu0 %v8717_v46, %s5454_s30 }
 0x69a   :  { %v3364_v1 = vadd.f32 %v10677_v37, %v3188_v18  ;;  %v10679_v51 = vld [vmem:[#allocation161_spill] sm:$0xff]  ;;  %v2236_v50 = vadd.f32 %v10682_v28, %v2060_v19  ;;  %v10687_v14 = vld [vmem:[#allocation190_spill] sm:$0xff]  ;;  %v10688_v3 = vld [vmem:[#allocation211_spill] sm:$0xff] }
 0x69b   :  { %v2192_v9 = vadd.f32 %v10679_v51, %v2016_v38  ;;  %v10683_v13 = vld [vmem:[#allocation249_spill] sm:$0xff]  ;;  %v3281_v33 = vadd.f32 %v10684_v29, %v3105_v22  ;;  %v2515_v20 = vadd.f32 %v10688_v3, %v2287_v25  ;;  %v10689_v0 = vld [vmem:[#allocation186_spill] sm:$0xff]  ;;  %v10690_v21 = vld [vmem:[#allocation263_spill] sm:$0xff]  ;;  %4184 = vrot.lane.b32.xlu2 %v8756_v53, %s5454_s30  ;;  %v3857_v53 = vpop.permute.xlu1 %3856 }
 0x69c   :  { %v2916_v39 = vadd.f32 %v10683_v13, %v2732_v23  ;;  %v3548_v56 = vadd.f32 %v10685_v27, %v3364_v1  ;;  %v10686_v18 = vld [vmem:[#allocation185_spill] sm:$0xff]  ;;  %v2437_v38 = vadd.f32 %v10689_v0, %v2373_v55  ;;  %v10691_v8 = vld [vmem:[#allocation264_spill] sm:$0xff]  ;;  %v10692_v40 = vld [vmem:[#allocation327_spill] sm:$0xff] }
 0x69d   :  { %v2400_v11 = vadd.f32 %v10686_v18, %v2326_v43  ;;  %v2376_v57 = vadd.f32 %v10687_v14, %v2192_v9  ;;  %v3027_v52 = vadd.f32 %v10691_v8, %v2963_v61  ;;  %v3465_v19 = vadd.f32 %v10692_v40, %v3281_v33  ;;  %v10693_v37 = vld [vmem:[#allocation361_spill] sm:$0xff]  ;;  %v10694_v58 = vld [vmem:[#allocation212_spill] sm:$0xff]  ;;  %v10695_v51 = vld [vmem:[#allocation214_spill] sm:$0xff] }
 0x69e   :  { %v2990_v26 = vadd.f32 %v10690_v21, %v2916_v39  ;;  %v3612_v23 = vadd.f32 %v10693_v37, %v3548_v56  ;;  %v2601_v22 = vadd.f32 %v10694_v58, %v2437_v38  ;;  %v10696_v7 = vld [vmem:[#allocation222_spill] sm:$0xff]  ;;  %v10698_v25 = vld [vmem:[#allocation292_spill] sm:$0xff]  ;;  %v10700_v29 = vld [vmem:[#allocation225_spill] sm:$0xff]  ;;  %v9012_v38 = vpop.permute.xlu0 %3846  ;;  %4264 = vrot.lane.b32.xlu1 %v8702_v31, %s5454_s30 }
 0x69f   :  { %v2554_v1 = vadd.f32 %v10695_v51, %v2400_v11  ;;  %v2691_v36 = vadd.f32 %v10696_v7, %v2515_v20  ;;  %v10697_v55 = vld [vmem:[#allocation290_spill] sm:$0xff]  ;;  %v3693_v43 = vadd.f32 %v8442_v10, %v3465_v19  ;;  %v10701_v27 = vld [vmem:[#allocation241_spill] sm:$0xff]  ;;  %v10702_v56 = vld [vmem:[#allocation248_spill] sm:$0xff]  ;;  %v3935_v11 = vpop.permute.xlu2 %3934 }
 0x6a0   :  { %v3191_v9 = vadd.f32 %v10697_v55, %v3027_v52  ;;  %v3144_v61 = vadd.f32 %v10698_v25, %v2990_v26  ;;  %v3776_v28 = vadd.f32 %v8821_v47, %v3612_v23  ;;  %v10699_v13 = vld [vmem:[#allocation202_spill] sm:$0xff]  ;;  %v2777_v12 = vadd.f32 %v10701_v27, %v2601_v22  ;;  %v10703_v14 = vld [vmem:[#allocation303_spill] sm:$0xff]  ;;  %v10704_v20 = vld [vmem:[#allocation320_spill] sm:$0xff] }
 0x6a1   :  { %v2474_v39 = vadd.f32 %v10699_v13, %v2236_v50  ;;  %v2730_v33 = vadd.f32 %v10700_v29, %v2554_v1  ;;  %v2875_v18 = vadd.f32 %v10702_v56, %v2691_v36  ;;  %v9008_v10 = vadd.f32 %v3857_v53, %v3693_v43  ;;  %v10705_v46 = vld [vmem:[#allocation137_spill] sm:$0xff]  ;;  %v10706_v21 = vld [vmem:[#allocation162_spill] sm:$0xff]  ;;  %v10707_v8 = vld [vmem:[#allocation251_spill] sm:$0xff]  ;;  %4188 = vrot.lane.b32.xlu0 %v8706_v42, %s5454_s30 }
 0x6a2   :  { %v3320_v3 = vadd.f32 %v10703_v14, %v3144_v61  ;;  %v3367_v0 = vadd.f32 %v10704_v20, %v3191_v9  ;;  %v9010_v47 = vadd.f32 %v3935_v11, %v3776_v28  ;;  %v2014_v50 = vadd.f32 %v10705_v46, %v8931_v59  ;;  %v10708_v40 = vld [vmem:[#allocation276_spill] sm:$0xff]  ;;  %v10709_v37 = vld [vmem:[#allocation213_spill] sm:$0xff]  ;;  %v10711_v51 = vld [vmem:[#allocation330_spill] sm:$0xff] }
 0x6a3   :  { %v2239_v26 = vadd.f32 %v10706_v21, %v2063_v48  ;;  %v2914_v52 = vadd.f32 %v10707_v8, %v2730_v33  ;;  %v3103_v19 = vadd.f32 %v10708_v40, %v2875_v18  ;;  %v2648_v23 = vadd.f32 %v10709_v37, %v2474_v39  ;;  %v10710_v58 = vld [vmem:[#allocation252_spill] sm:$0xff]  ;;  %v10712_v7 = vld [vmem:[#allocation331_spill] sm:$0xff]  ;;  %v10713_v55 = vld [vmem:[#allocation166_spill] sm:$0xff]  ;;  %4190 = vrot.lane.b32.xlu2 %v8768_v17, %s5454_s30 }
 0x6a4   :  { %v2961_v22 = vadd.f32 %v10710_v58, %v2777_v12  ;;  %v3504_v1 = vadd.f32 %v10711_v51, %v3320_v3  ;;  %v3551_v36 = vadd.f32 %v10712_v7, %v3367_v0  ;;  %v2190_v9 = vadd.f32 %v10713_v55, %v2014_v50  ;;  %v10714_v25 = vld [vmem:[#allocation189_spill] sm:$0xff]  ;;  %v10715_v43 = vld [vmem:[#allocation268_spill] sm:$0xff]  ;;  %v10716_v28 = vld [vmem:[#allocation302_spill] sm:$0xff]  ;;  %v3899_v51 = vpop.permute.xlu1 %3898 }
 0x6a5   :  { %v2440_v61 = vadd.f32 %v10714_v25, %v2376_v57  ;;  %v2988_v59 = vadd.f32 %v10715_v43, %v2914_v52  ;;  %v3279_v48 = vadd.f32 %v10716_v28, %v3103_v19  ;;  %v10717_v13 = vld [vmem:[#allocation239_spill] sm:$0xff]  ;;  %v10718_v33 = vld [vmem:[#allocation266_spill] sm:$0xff]  ;;  %v10720_v18 = vld [vmem:[#allocation368_spill] sm:$0xff]  ;;  %v4428_v57 = vrot.slane %v8630_v24, 5 }
 0x6a6   :  { %v2824_v29 = vadd.f32 %v10717_v13, %v2648_v23  ;;  %v3025_v27 = vadd.f32 %v10718_v33, %v2961_v22  ;;  %v10719_v56 = vld [vmem:[#allocation366_spill] sm:$0xff]  ;;  %v3578_v12 = vadd.f32 %v10720_v18, %v3504_v1  ;;  %v10721_v53 = vld [vmem:[#allocation215_spill] sm:$0xff]  ;;  %v10723_v20 = vld [vmem:[#allocation332_spill] sm:$0xff] }
 0x6a7   :  { %v3615_v39 = vadd.f32 %v10719_v56, %v3551_v36  ;;  %v2604_v11 = vadd.f32 %v10721_v53, %v2440_v61  ;;  %v10722_v14 = vld [vmem:[#allocation279_spill] sm:$0xff]  ;;  %v3463_v0 = vadd.f32 %v10723_v20, %v3279_v48  ;;  %v10726_v19 = vld [vmem:[#allocation205_spill] sm:$0xff]  ;;  %v10727_v37 = vld [vmem:[#allocation244_spill] sm:$0xff]  ;;  %v3941_v1 = vpop.permute.xlu2 %3940  ;;  %v3853_v61 = vpop.permute.xlu0 %3852  ;;  %4434 = vrot.lane.b32.xlu1 %v4428_v57, %s5454_s30 }
 0x6a8   :  { %v3142_v3 = vadd.f32 %v10722_v14, %v2988_v59  ;;  %v10724_v46 = vld [vmem:[#allocation267_spill] sm:$0xff]  ;;  %v3732_v52 = vadd.f32 %v8532_v2, %v3578_v12  ;;  %v2477_v31 = vadd.f32 %v10726_v19, %v2239_v26  ;;  %v10728_v17 = vld [vmem:[#allocation305_spill] sm:$0xff]  ;;  %v10730_v55 = vld [vmem:[#allocation306_spill] sm:$0xff] }
 0x6a9   :  { %v3062_v50 = vadd.f32 %v10724_v46, %v2824_v29  ;;  %v10725_v21 = vld [vmem:[#allocation295_spill] sm:$0xff]  ;;  %v3779_v40 = vadd.f32 %v8876_v6, %v3615_v39  ;;  %v2780_v23 = vadd.f32 %v10727_v37, %v2604_v11  ;;  %v3691_v22 = vadd.f32 %v8530_v4, %v3463_v0  ;;  %v10729_v7 = vld [vmem:[#allocation293_spill] sm:$0xff]  ;;  %v10731_v42 = vld [vmem:[#allocation138_spill] sm:$0xff] }
 0x6aa   :  { %v3189_v8 = vadd.f32 %v10725_v21, %v3025_v27  ;;  %v3318_v58 = vadd.f32 %v10728_v17, %v3142_v3  ;;  %v9053_v2 = vadd.f32 %v3899_v51, %v3732_v52  ;;  %v2061_v26 = vadd.f32 %v10731_v42, %v8928_v16  ;;  %v10732_v43 = vld [vmem:[#allocation177_spill] sm:$0xff]  ;;  %v10733_v28 = vld [vmem:[#allocation336_spill] sm:$0xff]  ;;  %v10735_v33 = vld [vmem:[#allocation255_spill] sm:$0xff] }
 0x6ab   :  { %v3236_v36 = vadd.f32 %v10729_v7, %v3062_v50  ;;  %v9055_v6 = vadd.f32 %v3941_v1, %v3779_v40  ;;  %v2374_v59 = vadd.f32 %v10732_v43, %v2190_v9  ;;  %v9061_v13 = vadd.f32 %v3853_v61, %v3691_v22  ;;  %v10734_v4 = vld [vmem:[#allocation216_spill] sm:$0xff]  ;;  %v10736_v56 = vld [vmem:[#allocation323_spill] sm:$0xff]  ;;  %v10737_v18 = vld [vmem:[#allocation333_spill] sm:$0xff]  ;;  %4262 = vrot.lane.b32.xlu2 %v8829_v63, %s5454_s30 }
 0x6ac   :  { %v3365_v25 = vadd.f32 %v10730_v55, %v3189_v8  ;;  %v3502_v48 = vadd.f32 %v10733_v28, %v3318_v58  ;;  %v2651_v29 = vadd.f32 %v10734_v4, %v2477_v31  ;;  %v2964_v27 = vadd.f32 %v10735_v33, %v2780_v23  ;;  %v10738_v53 = vld [vmem:[#allocation68_spill] sm:$0xff]  ;;  %v10739_v16 = vld [vmem:[#allocation154_spill] sm:$0xff]  ;;  %v10741_v20 = vld [vmem:[#allocation191_spill] sm:$0xff] }
 0x6ad   :  { %v3412_v39 = vadd.f32 %v10736_v56, %v3236_v36  ;;  %v1652_v11 = vadd.f32 %v10738_v53, %v8863_v30  ;;  %v2100_v14 = vadd.f32 %v10739_v16, %v8925_v45  ;;  %v10740_v9 = vld [vmem:[#allocation164_spill] sm:$0xff]  ;;  %v2438_v0 = vadd.f32 %v10741_v20, %v2374_v59  ;;  %v10742_v46 = vld [vmem:[#allocation242_spill] sm:$0xff]  ;;  %v10743_v21 = vld [vmem:[#allocation269_spill] sm:$0xff]  ;;  %v3937_v59 = vpop.permute.xlu1 %3936 }
 0x6ae   :  { %v3549_v12 = vadd.f32 %v10737_v18, %v3365_v25  ;;  %v2237_v3 = vadd.f32 %v10740_v9, %v2061_v26  ;;  %v2827_v50 = vadd.f32 %v10742_v46, %v2651_v29  ;;  %v3028_v8 = vadd.f32 %v10743_v21, %v2964_v27  ;;  %v10744_v19 = vld [vmem:[#allocation165_spill] sm:$0xff]  ;;  %v10745_v37 = vld [vmem:[#allocation220_spill] sm:$0xff]  ;;  %v10746_v30 = vld [vmem:[#allocation334_spill] sm:$0xff] }
 0x6af   :  { %v3650_v52 = vadd.f32 %v8304_v32, %v3412_v39  ;;  %v2284_v31 = vadd.f32 %v10744_v19, %v2100_v14  ;;  %v2602_v23 = vadd.f32 %v10745_v37, %v2438_v0  ;;  %v3576_v17 = vadd.f32 %v10746_v30, %v3502_v48  ;;  %v10747_v58 = vld [vmem:[#allocation270_spill] sm:$0xff]  ;;  %v10749_v7 = vld [vmem:[#allocation49_spill] sm:$0xff]  ;;  %v10750_v36 = vld [vmem:[#allocation192_spill] sm:$0xff]  ;;  %v3983_v28 = vpop.permute.xlu2 %3982  ;;  %v3895_v27 = vpop.permute.xlu0 %3894 }
 0x6b0   :  { %v3613_v40 = vadd.f32 %v8315_v5, %v3549_v12  ;;  %v9086_v45 = vstv %s9039_s5  ;;  %v3065_v22 = vadd.f32 %v10747_v58, %v2827_v50  ;;  %v10748_v32 = vld [vmem:[#allocation298_spill] sm:$0xff]  ;;  %4260 = vrot.lane.b32.xlu0 %v10749_v7, %s5454_s30  ;;  %v2475_v55 = vadd.f32 %v10750_v36, %v2237_v3  ;;  %v10751_v25 = vld [vmem:[#allocation208_spill] sm:$0xff]  ;;  %v10752_v42 = vld [vmem:[#allocation231_spill] sm:$0xff] }
 0x6b1   :  { %v3192_v51 = vadd.f32 %v10748_v32, %v3028_v8  ;;  %v3824_v1 = vadd.f32 %v8920_v44, %v3650_v52  ;;  %v2512_v61 = vadd.f32 %v10751_v25, %v2284_v31  ;;  %v2778_v26 = vadd.f32 %v10752_v42, %v2602_v23  ;;  %v10753_v63 = vld [vmem:[#allocation308_spill] sm:$0xff]  ;;  %v10755_v29 = vld [vmem:[#allocation310_spill] sm:$0xff]  ;;  %v10757_v18 = vld [vmem:[#allocation257_spill] sm:$0xff] }
 0x6b2   :  { %v3777_v5 = vadd.f32 %v8587_v15, %v3613_v40  ;;  %v3730_v43 = vadd.f32 %v10753_v63, %v3576_v17  ;;  %v10754_v48 = vld [vmem:[#allocation296_spill] sm:$0xff]  ;;  %v10756_v56 = vld [vmem:[#allocation130_spill] sm:$0xff]  ;;  %v10758_v14 = vld [vmem:[#allocation343_spill] sm:$0xff] }
 0x6b3   :  { %v3239_v4 = vadd.f32 %v10754_v48, %v3065_v22  ;;  %v3368_v33 = vadd.f32 %v10755_v29, %v3192_v51  ;;  %v9102_v44 = vadd.f32 %v3983_v28, %v3824_v1  ;;  %v1890_v39 = vadd.f32 %v10756_v56, %v1652_v11  ;;  %v9108_v16 = vld [vmem:[#allocation2 + $0x20] sm:$0xff]  ;;  %v10760_v0 = vld [vmem:[#allocation219_spill] sm:$0xff]  ;;  %v10774_v48 = vld [vmem:[#allocation272_spill] sm:$0xff] }
 0x6b4   :  { %v9100_v15 = vadd.f32 %v3937_v59, %v3777_v5  ;;  %v2962_v12 = vadd.f32 %v10757_v18, %v2778_v26  ;;  %v9106_v53 = vadd.f32 %v3895_v27, %v3730_v43  ;;  %v4250_v9 = vmul.f32 %v9108_v16, %v10758_v14  ;;  %v10759_v3 = vld [vmem:[#allocation218_spill] sm:$0xff]  ;;  %v10762_v8 = vld [vmem:[#allocation341_spill] sm:$0xff]  ;;  %v10765_v30 = vld [vmem:[#allocation339_spill] sm:$0xff] }
 0x6b5   :  { %v2649_v20 = vadd.f32 %v10759_v3, %v2475_v55  ;;  %v2688_v46 = vadd.f32 %v10760_v0, %v2512_v61  ;;  %v10761_v50 = vld [vmem:[#allocation326_spill] sm:$0xff]  ;;  %v3552_v52 = vadd.f32 %v10762_v8, %v3368_v33  ;;  %v10763_v40 = vld [vmem:[#allocation141_spill] sm:$0xff]  ;;  %v9124_v17 = vmul.f32 %v10765_v30, %v9086_v45  ;;  %v10767_v32 = vld [vmem:[#allocation247_spill] sm:$0xff] }
 0x6b6   :  { %v3415_v21 = vadd.f32 %v10761_v50, %v3239_v4  ;;  %v2064_v19 = vadd.f32 %v10763_v40, %v1890_v39  ;;  %v10764_v11 = vld [vmem:[#allocation274_spill] sm:$0xff]  ;;  %v10766_v58 = vld [vmem:[#allocation245_spill] sm:$0xff]  ;;  %v10768_v5 = vld [vmem:[#allocation43_spill] sm:$0xff]  ;;  %v3943_v50 = vpop.permute.xlu1 %3942 }
 0x6b7   :  { %v3026_v31 = vadd.f32 %v10764_v11, %v2962_v12  ;;  %v9118_v37 = vld [vmem:[#allocation2 + $0x28] sm:$0x3f]  ;;  %v2872_v22 = vadd.f32 %v10766_v58, %v2688_v46  ;;  %v2825_v51 = vadd.f32 %v10767_v32, %v2649_v20  ;;  %v10771_v61 = vld [vmem:[#allocation285_spill] sm:$0xff]  ;;  %v10772_v26 = vld [vmem:[#allocation356_spill] sm:$0xff]  ;;  %v10024_v8 = vrot.slane %v9124_v17, 4 }
 0x6b8   :  { %v4251_v23 = vmul.f32 %v9118_v37, %v10758_v14  ;;  %v3653_v1 = vadd.f32 %v10768_v5, %v3415_v21  ;;  %v10769_v7 = vld [vmem:[#allocation30_spill] sm:$0xff]  ;;  %v10770_v55 = vld [vmem:[#allocation167_spill] sm:$0xff]  ;;  %4220 = vrot.lane.b32.xlu1 %v10772_v26, %s5454_s30  ;;  %v10775_v29 = vld [vmem:[#allocation273_spill] sm:$0xff]  ;;  %4266 = vrot.lane.b32.xlu0 %v4250_v9, %s5454_s30  ;;  %v3989_v21 = vpop.permute.xlu2 %3988  ;;  %v3901_v9 = vpop.permute.xlu0 %3900 }
 0x6b9   :  { %v3616_v36 = vadd.f32 %v10769_v7, %v3552_v52  ;;  %v2240_v25 = vadd.f32 %v10770_v55, %v2064_v19  ;;  %v3190_v42 = vadd.f32 %v10771_v61, %v3026_v31  ;;  %v9135_v63 = vld [vmem:[#allocation2 + $0x8] sm:$0xff]  ;;  %v3063_v4 = vadd.f32 %v10774_v48, %v2825_v51  ;;  %v10776_v27 = vld [vmem:[#allocation108_spill] sm:$0xff]  ;;  %v10782_v19 = vld [vmem:[#allocation301_spill] sm:$0xff] }
 0x6ba   :  { %4268 = vrot.lane.b32.xlu2 %v4251_v23, %s5454_s30  ;;  %v9139_v43 = vmul.f32 %v9135_v63, %v9086_v45  ;;  %v10773_v59 = vld [vmem:[#allocation134_spill] sm:$0xff]  ;;  %v3100_v33 = vadd.f32 %v10775_v29, %v2872_v22  ;;  %v3827_v39 = vadd.f32 %v8971_v34, %v3653_v1  ;;  %v10778_v12 = vld [vmem:[#allocation71_spill] sm:$0xff]  ;;  %v10780_v0 = vld [vmem:[#allocation312_spill] sm:$0xff] }
 0x6bb   :  { %v4429_v28 = vrot.slane %v10773_v59, 5  ;;  %v3780_v56 = vadd.f32 %v10776_v27, %v3616_v36  ;;  %v10777_v18 = vld [vmem:[#allocation358_spill] sm:$0xff]  ;;  %v10779_v3 = vld [vmem:[#allocation195_spill] sm:$0xff]  ;;  %v3366_v46 = vadd.f32 %v10780_v0, %v3190_v42  ;;  %v3237_v11 = vadd.f32 %v10782_v19, %v3063_v4  ;;  %v10783_v23 = vld [vmem:[#allocation32_spill] sm:$0xff] }
 0x6bc   :  { %v1697_v14 = vadd.f32 %v10778_v12, %v10777_v18  ;;  %v2478_v20 = vadd.f32 %v10779_v3, %v2240_v25  ;;  %v10781_v52 = vld [vmem:[#allocation299_spill] sm:$0xff]  ;;  %v9156_v34 = vadd.f32 %v3989_v21, %v3827_v39  ;;  %v10784_v58 = vld [vmem:[#allocation69_spill] sm:$0xff]  ;;  %v4337_v7 = vrot.slane %v9139_v43, 4  ;;  %v10792_v29 = vld [vmem:[#allocation344_spill] sm:$0xff] }
 0x6bd   :  { %v3276_v40 = vadd.f32 %v10781_v52, %v3100_v33  ;;  %v9154_v31 = vadd.f32 %v3943_v50, %v3780_v56  ;;  %v1650_v22 = vadd.f32 %v10784_v58, %v10783_v23  ;;  %v10785_v32 = vld [vmem:[#allocation357_spill] sm:$0xff]  ;;  %v10786_v5 = vld [vmem:[#allocation351_spill] sm:$0xff]  ;;  %v10793_v33 = vrot.slane %v10792_v29, 5  ;;  %v10795_v12 = vld [vmem:[#allocation144_spill] sm:$0xff] }
 0x6be   :  { %v3550_v51 = vadd.f32 %v10785_v32, %v3366_v46  ;;  %v9162_v1 = vadd.f32 %v3901_v9, %v10786_v5  ;;  %v10787_v36 = vld [vmem:[#allocation133_spill] sm:$0xff]  ;;  %v10791_v4 = vld [vmem:[#allocation31_spill] sm:$0xff]  ;;  %v4340_v18 = vsel %vm867_vm5, %v4337_v7, %v10024_v8  ;;  %v4430_v43 = vsel %vm974_vm4, %v4428_v57, %v4429_v28  ;;  %v10796_v3 = vld [vmem:[#allocation250_spill] sm:$0xff] }
 0x6bf   :  { %v1925_v55 = vadd.f32 %v10787_v36, %v1697_v14  ;;  %v10788_v25 = vld [vmem:[#allocation221_spill] sm:$0xff]  ;;  %v989_v27 = vadd.f32 %v10793_v33, %v10791_v4  ;;  %v10797_v0 = vld [vmem:[#allocation83_spill] sm:$0xff]  ;;  %v10798_v50 = vld [vmem:[#allocation340_spill] sm:$0xff] }
 0x6c0   :  { %v2652_v61 = vadd.f32 %v10788_v25, %v2478_v20  ;;  %v10789_v42 = vld [vmem:[#allocation313_spill] sm:$0xff]  ;;  %v10799_v52 = vld [vmem:[#allocation143_spill] sm:$0xff]  ;;  %4348 = vrot.lane.b32.xlu1 %v4340_v18, %s5454_s30  ;;  %v10801_v57 = vld [vmem:[#allocation170_spill] sm:$0xff]  ;;  %4436 = vrot.lane.b32.xlu0 %v4430_v43, %s5454_s30  ;;  %v3939_v18 = vpop.permute.xlu0 %3938 }
 0x6c1   :  { %v3413_v26 = vadd.f32 %v10789_v42, %v3237_v11  ;;  %v10790_v59 = vld [vmem:[#allocation329_spill] sm:$0xff]  ;;  %v2101_v14 = vadd.f32 %v10795_v12, %v1925_v55  ;;  %v10800_v19 = vld [vmem:[#allocation355_spill] sm:$0xff]  ;;  %v10803_v32 = vld [vmem:[#allocation338_spill] sm:$0xff]  ;;  %v4031_v42 = vpop.permute.xlu2 %4030 }
 0x6c2   :  { %v3460_v48 = vadd.f32 %v10790_v59, %v3276_v40  ;;  %v10794_v56 = vld [vmem:[#allocation117_spill] sm:$0xff]  ;;  %v2828_v20 = vadd.f32 %v10796_v3, %v2652_v61  ;;  %v3614_v11 = vadd.f32 %v10800_v19, %v3550_v51  ;;  %4438 = vrot.lane.b32.xlu2 %v4429_v28, %s5454_s30  ;;  %v10802_v58 = vld [vmem:[#allocation275_spill] sm:$0xff]  ;;  %v10804_v51 = vld [vmem:[#allocation172_spill] sm:$0xff]  ;;  %v3985_v61 = vpop.permute.xlu1 %3984 }
 0x6c3   :  { %v1888_v39 = vadd.f32 %v10794_v56, %v1650_v22  ;;  %v3651_v21 = vadd.f32 %v10798_v50, %v3413_v26  ;;  %v9187_v9 = vld [vmem:[#allocation2] sm:$0xff]  ;;  %v2285_v23 = vadd.f32 %v10801_v57, %v2101_v14  ;;  %v9200_v26 = vld [vmem:[#allocation3 + $0x20] sm:$0xff] }
 0x6c4   :  { %v3688_v46 = vadd.f32 %v10797_v0, %v3460_v48  ;;  %v4324_v24 = vmul.f32 %v9187_v9, %v9086_v45  ;;  %v3066_v22 = vadd.f32 %v10802_v58, %v2828_v20  ;;  %v10805_v28 = vld [vmem:[#allocation353_spill] sm:$0xff]  ;;  %v10807_v4 = vld [vmem:[#allocation198_spill] sm:$0xff]  ;;  %v10808_v33 = vld [vmem:[#allocation304_spill] sm:$0xff] }
 0x6c5   :  { %v2062_v40 = vadd.f32 %v10799_v52, %v1888_v39  ;;  %v3825_v5 = vadd.f32 %v10803_v32, %v3651_v21  ;;  %v3778_v25 = vadd.f32 %v10805_v28, %v3614_v11  ;;  %v10806_v59 = vld [vmem:[#allocation337_spill] sm:$0xff]  ;;  %v2513_v29 = vadd.f32 %v10807_v4, %v2285_v23  ;;  %v10813_v21 = vld [vmem:[#allocation316_spill] sm:$0xff]  ;;  %v10814_v19 = vld [vmem:[#allocation58_spill] sm:$0xff] }
 0x6c6   :  { %v3864_v36 = vadd.f32 %v9012_v38, %v3688_v46  ;;  %v4423_v48 = vmul.f32 %v9200_v26, %v10806_v59  ;;  %v3240_v56 = vadd.f32 %v10808_v33, %v3066_v22  ;;  %v10809_v43 = vld [vmem:[#allocation345_spill] sm:$0xff]  ;;  %v10812_v46 = vld [vmem:[#allocation224_spill] sm:$0xff]  ;;  %v10815_v57 = vld [vmem:[#allocation226_spill] sm:$0xff] }
 0x6c7   :  { %v2238_v55 = vadd.f32 %v10804_v51, %v2062_v40  ;;  %v9206_v38 = vadd.f32 %v3985_v61, %v3825_v5  ;;  %v10810_v12 = vrot.slane %v10809_v43, 1  ;;  %v10811_v3 = vld [vmem:[#allocation197_spill] sm:$0xff]  ;;  %v9213_v0 = vadd.f32 %v3939_v18, %v3778_v25  ;;  %v10818_v51 = vld [vmem:[#allocation350_spill] sm:$0xff]  ;;  %v10823_v18 = vld [vmem:[#allocation280_spill] sm:$0xff] }
 0x6c8   :  { %v9208_v39 = vadd.f32 %v4031_v42, %v3864_v36  ;;  %v2689_v50 = vadd.f32 %v10812_v46, %v2513_v29  ;;  %v3416_v52 = vadd.f32 %v10813_v21, %v3240_v56  ;;  %v4336_v40 = vrot.slane %v4324_v24, 4  ;;  %v10816_v22 = vld [vmem:[#allocation253_spill] sm:$0xff]  ;;  %v10820_v24 = vld [vmem:[#allocation278_spill] sm:$0xff]  ;;  %v10821_v42 = vld [vmem:[#allocation163_spill] sm:$0xff] }
 0x6c9   :  { %v1130_v14 = vadd.f32 %v10810_v12, %v989_v27  ;;  %v2476_v20 = vadd.f32 %v10811_v3, %v2238_v55  ;;  %v4432_v58 = vrot.slane %v4423_v48, 5  ;;  %v10817_v5 = vld [vmem:[#allocation109_spill] sm:$0xff]  ;;  %v4209_v55 = vmul.f32 %v9135_v63, %v10818_v51  ;;  %v9233_v29 = vld [vmem:[#allocation3 + $0x18] sm:$0xff] }
 0x6ca   :  { %v2873_v32 = vadd.f32 %v10816_v22, %v2689_v50  ;;  %v3654_v36 = vadd.f32 %v10817_v5, %v3416_v52  ;;  %v4338_v27 = vsel %vm867_vm5, %v4336_v40, %v4337_v7  ;;  %v10819_v28 = vld [vmem:[#allocation237_spill] sm:$0xff]  ;;  %v9231_v48 = vstv %s9196_s1  ;;  %v10822_v33 = vld [vmem:[#allocation50_spill] sm:$0xff]  ;;  %v3991_v12 = vpop.permute.xlu1 %3990  ;;  %v10824_v46 = vld [vmem:[#allocation307_spill] sm:$0xff]  ;;  %v3945_v40 = vpop.permute.xlu0 %3944 }
 0x6cb   :  { %v1338_v11 = vadd.f32 %v10814_v19, %v1130_v14  ;;  %v2650_v23 = vadd.f32 %v10815_v57, %v2476_v20  ;;  %4444 = vrot.lane.b32.xlu1 %v4432_v58, %s5454_s30  ;;  %4346 = vrot.lane.b32.xlu2 %v4338_v27, %s5454_s30  ;;  %v4422_v7 = vmul.f32 %v9233_v29, %v10806_v59  ;;  %v4037_v14 = vpop.permute.xlu2 %4036  ;;  %v9239_v3 = vld [vmem:[#allocation3 + $0x10] sm:$0x3f]  ;;  %v10825_v59 = vld [vmem:[#allocation75_spill] sm:$0xff] }
 0x6cc   :  { %v3101_v61 = vadd.f32 %v10820_v24, %v2873_v32  ;;  %v3828_v4 = vadd.f32 %v10821_v42, %v3654_v36  ;;  %4222 = vrot.lane.b32.xlu0 %v4209_v55, %s5454_s30  ;;  %v4598_v20 = vmul.f32 %v9239_v3, %v9231_v48  ;;  %v9247_v52 = vadd.f32 %v4037_v14, %v9061_v13  ;;  %v10828_v32 = vld [vmem:[#allocation319_spill] sm:$0xff] }
 0x6cd   :  { %v2826_v25 = vadd.f32 %v10819_v28, %v2650_v23  ;;  %v1514_v56 = vadd.f32 %v10822_v33, %v1338_v11  ;;  %v10826_v11 = vld [vmem:[#allocation291_spill] sm:$0xff]  ;;  %v10827_v23 = vld [vmem:[#allocation352_spill] sm:$0xff]  ;;  %v4431_v36 = vrot.slane %v4422_v7, 5  ;;  %v10830_v28 = vld [vmem:[#allocation318_spill] sm:$0xff] }
 0x6ce   :  { %v3277_v50 = vadd.f32 %v10824_v46, %v3101_v61  ;;  %v9244_v21 = vadd.f32 %v3991_v12, %v3828_v4  ;;  %v9252_v22 = vadd.f32 %v3945_v40, %v10827_v23  ;;  %v10829_v27 = vld [vmem:[#allocation123_spill] sm:$0xff]  ;;  %v4611_v24 = vrot.slane %v4598_v20, 1  ;;  %v10831_v61 = vld [vmem:[#allocation349_spill] sm:$0xff]  ;;  %v10834_v46 = vld [vmem:[#allocation178_spill] sm:$0xff] }
 0x6cf   :  { %v3064_v43 = vadd.f32 %v10823_v18, %v2826_v25  ;;  %v1698_v19 = vadd.f32 %v10825_v59, %v1514_v56  ;;  %v4433_v42 = vsel %vm974_vm4, %v4431_v36, %v4432_v58  ;;  %v9261_v4 = vmul.f32 %v9108_v16, %v9086_v45  ;;  %v10832_v33 = vld [vmem:[#allocation149_spill] sm:$0xff]  ;;  %v10833_v18 = vld [vmem:[#allocation367_spill] sm:$0xff] }
 0x6d0   :  { %v3461_v5 = vadd.f32 %v10828_v32, %v3277_v50  ;;  %v9267_v7 = vld [vmem:[#allocation3 + $0x8] sm:$0xff] }
 0x6d1   :  { %v3238_v57 = vadd.f32 %v10826_v11, %v3064_v43  ;;  %v1926_v55 = vadd.f32 %v10829_v27, %v1698_v19  ;;  %v4597_v12 = vmul.f32 %v9267_v7, %v9231_v48  ;;  %v9273_v58 = vld [vmem:[#allocation2 + $0x18] sm:$0xff]  ;;  %v9279_v11 = vld [vmem:[#allocation3] sm:$0xff] }
 0x6d2   :  { %v3689_v13 = vadd.f32 %v10831_v61, %v3461_v5  ;;  %v4327_v20 = vmul.f32 %v9273_v58, %v9086_v45  ;;  %v4033_v59 = vpop.permute.xlu1 %4032  ;;  %v3987_v32 = vpop.permute.xlu0 %3986  ;;  %v4342_v5 = vrot.slane %v9261_v4, 4  ;;  %v10837_v4 = vld [vmem:[#allocation243_spill] sm:$0xff] }
 0x6d3   :  { %v3414_v25 = vadd.f32 %v10830_v28, %v3238_v57  ;;  %v2102_v56 = vadd.f32 %v10832_v33, %v1926_v55  ;;  %4622 = vrot.lane.b32.xlu1 %v4611_v24, %s5454_s30  ;;  %4442 = vrot.lane.b32.xlu2 %v4433_v42, %s5454_s30  ;;  %v4079_v19 = vpop.permute.xlu2 %4078  ;;  %v4596_v57 = vmul.f32 %v9279_v11, %v9231_v48  ;;  %v9293_v42 = vstv %s5253_s6 }
 0x6d4   :  { %v3865_v14 = vadd.f32 %v8870_v41, %v3689_v13  ;;  %4440 = vrot.lane.b32.xlu0 %v4431_v36, %s5454_s30  ;;  %v9286_v41 = vadd.f32 %v4079_v19, %v9106_v53  ;;  %v10835_v36 = vld [vmem:[#allocation203_spill] sm:$0xff]  ;;  %v4341_v28 = vrot.slane %v4327_v20, 4  ;;  %v10839_v19 = vld [vmem:[#allocation297_spill] sm:$0xff] }
 0x6d5   :  { %v3652_v43 = vadd.f32 %v10833_v18, %v3414_v25  ;;  %v2286_v50 = vadd.f32 %v10834_v46, %v2102_v56  ;;  %v10836_v25 = vld [vmem:[#allocation232_spill] sm:$0xff]  ;;  %v4608_v13 = vrot.slane %v4596_v57, 1  ;;  %v9299_v56 = vmul.f32 %v10765_v30, %v9293_v42 }
 0x6d6   :  { %v9283_v23 = vadd.f32 %v4033_v59, %v3865_v14  ;;  %v4343_v33 = vsel %vm867_vm5, %v4341_v28, %v4342_v5  ;;  %v10838_v14 = vld [vmem:[#allocation286_spill] sm:$0xff]  ;;  %v4212_v28 = vmul.f32 %v9108_v16, %v10818_v51 }
 0x6d7   :  { %v3826_v40 = vadd.f32 %v8868_v35, %v3652_v43  ;;  %v2514_v27 = vadd.f32 %v10835_v36, %v2286_v50  ;;  %v4609_v35 = vrot.slane %v4597_v12, 1  ;;  %v4373_v12 = vmul.f32 %v9135_v63, %v9293_v42 }
 0x6d8   :  { %v10020_v59 = vrot.slane %v9299_v56, 4 }
 0x6d9   :  { %v9290_v55 = vadd.f32 %v3987_v32, %v3826_v40  ;;  %v2690_v61 = vadd.f32 %v10836_v25, %v2514_v27  ;;  %v4612_v53 = vsel %vm1007_vm6, %v4609_v35, %v4611_v24  ;;  %v4610_v43 = vsel %vm1007_vm6, %v4608_v13, %v4609_v35  ;;  %v10840_v27 = vld [vmem:[#allocation324_spill] sm:$0xff] }
 0x6da   :  { %v4039_v24 = vpop.permute.xlu1 %4038  ;;  %v3993_v40 = vpop.permute.xlu0 %3992  ;;  %v4385_v36 = vrot.slane %v4373_v12, 4  ;;  %v9323_v25 = vstv %s5251_s7 }
 0x6db   :  { %v2874_v18 = vadd.f32 %v10837_v4, %v2690_v61  ;;  %4352 = vrot.lane.b32.xlu1 %v4343_v33, %s5454_s30  ;;  %4620 = vrot.lane.b32.xlu2 %v4612_v53, %s5454_s30  ;;  %v4085_v46 = vpop.permute.xlu2 %4084  ;;  %v9310_v30 = vadd.f32 %v4039_v24, %v8918_v62  ;;  %v9318_v32 = vadd.f32 %v3993_v40, %v8916_v49  ;;  %v10841_v61 = vld [vmem:[#allocation93_spill] sm:$0xff] }
 0x6dc   :  { %4618 = vrot.lane.b32.xlu0 %v4610_v43, %s5454_s30  ;;  %v9313_v50 = vadd.f32 %v4085_v46, %v9162_v1  ;;  %v4388_v62 = vsel %vm867_vm5, %v4385_v36, %v10020_v59  ;;  %v4211_v1 = vmul.f32 %v9273_v58, %v10818_v51  ;;  %v9332_v49 = vmul.f32 %v9135_v63, %v9323_v25 }
 0x6dd   :  { %v3102_v20 = vadd.f32 %v10838_v14, %v2874_v18  ;;  %v9339_v33 = vmul.f32 %v9118_v37, %v9086_v45  ;;  %v4284_v53 = vmul.f32 %v9187_v9, %v9323_v25  ;;  %v4372_v4 = vmul.f32 %v9187_v9, %v9293_v42 }
 0x6de   :  { %v9357_v9 = vstv %s5256_s8 }
 0x6df   :  { %v3278_v57 = vadd.f32 %v10839_v19, %v3102_v20  ;;  %v10016_v20 = vrot.slane %v9332_v49, 4  ;;  %v10019_v46 = vrot.slane %v9339_v33, 4  ;;  %v4296_v40 = vrot.slane %v4284_v53, 4 }
 0x6e0   :  { %v4384_v19 = vrot.slane %v4372_v4, 4 }
 0x6e1   :  { %v3462_v35 = vadd.f32 %v10840_v27, %v3278_v57  ;;  %v4345_v57 = vsel %vm867_vm5, %v4342_v5, %v10019_v46  ;;  %v4501_v27 = vmul.f32 %v9267_v7, %v9357_v9 }
 0x6e2   :  { %v4081_v18 = vpop.permute.xlu1 %4080  ;;  %v4035_v45 = vpop.permute.xlu0 %4034 }
 0x6e3   :  { %v3690_v13 = vadd.f32 %v10841_v61, %v3462_v35  ;;  %4396 = vrot.lane.b32.xlu1 %v4388_v62, %s5454_s30  ;;  %4228 = vrot.lane.b32.xlu2 %v4212_v28, %s5454_s30  ;;  %v4123_v43 = vpop.permute.xlu2 %4122  ;;  %v9348_v12 = vadd.f32 %v4081_v18, %v8969_v54  ;;  %v4386_v54 = vsel %vm867_vm5, %v4384_v19, %v4385_v36  ;;  %v9375_v36 = vld [vmem:[#allocation3 + $0x28] sm:$0x3f] }
 0x6e4   :  { %4226 = vrot.lane.b32.xlu0 %v4211_v1, %s5454_s30  ;;  %v9351_v14 = vadd.f32 %v4123_v43, %v9213_v0  ;;  %v9365_v0 = vmul.f32 %v9239_v3, %v9357_v9  ;;  %v4601_v62 = vmul.f32 %v9375_v36, %v9231_v48  ;;  %v4500_v1 = vmul.f32 %v9279_v11, %v9357_v9 }
 0x6e5   :  { %v3866_v63 = vadd.f32 %v8964_v60, %v3690_v13  ;;  %v4298_v60 = vsel %vm867_vm5, %v4296_v40, %v10016_v20  ;;  %v4503_v40 = vmul.f32 %v9233_v29, %v9357_v9 }
 0x6e6   :  { %v10025_v53 = vrot.slane %v9365_v0, 1  ;;  %v4616_v18 = vrot.slane %v4601_v62, 1  ;;  %v4512_v43 = vrot.slane %v4500_v1, 1 }
 0x6e7   :  { %v9354_v24 = vadd.f32 %v4035_v45, %v3866_v63  ;;  %v4513_v63 = vrot.slane %v4501_v27, 1  ;;  %v4517_v1 = vrot.slane %v4503_v40, 1  ;;  %v4375_v40 = vmul.f32 %v9273_v58, %v9293_v42 }
 0x6e9   :  { %v4516_v45 = vsel %vm1007_vm6, %v4513_v63, %v10025_v53 }
 0x6ea   :  { %v4119_v35 = vpop.permute.xlu1 %4118  ;;  %v4041_v13 = vpop.permute.xlu0 %4040 }
 0x6eb   :  { %4306 = vrot.lane.b32.xlu1 %v4298_v60, %s5454_s30  ;;  %4394 = vrot.lane.b32.xlu2 %v4386_v54, %s5454_s30  ;;  %v4129_v28 = vpop.permute.xlu2 %4128  ;;  %v9382_v61 = vadd.f32 %v4119_v35, %v9010_v47  ;;  %v9389_v4 = vadd.f32 %v4041_v13, %v9008_v10  ;;  %v9396_v47 = vmul.f32 %v9200_v26, %v9357_v9 }
 0x6ec   :  { %4354 = vrot.lane.b32.xlu0 %v4345_v57, %s5454_s30  ;;  %v9385_v5 = vadd.f32 %v4129_v28, %v9252_v22  ;;  %v4514_v22 = vsel %vm1007_vm6, %v4512_v43, %v4513_v63  ;;  %v4600_v10 = vmul.f32 %v9200_v26, %v9231_v48  ;;  %v4599_v54 = vmul.f32 %v9233_v29, %v9231_v48 }
 0x6ed   :  { %v4518_v35 = vrot.slane %v9396_v47, 1  ;;  %v9417_v63 = vstv %s5257_s9  ;;  %v4376_v47 = vmul.f32 %v9108_v16, %v9293_v42 }
 0x6ee   :  { %v4614_v62 = vrot.slane %v4600_v10, 1  ;;  %v4613_v13 = vrot.slane %v4599_v54, 1  ;;  %v9423_v48 = vmul.f32 %v9239_v3, %v9417_v63 }
 0x6ef   :  { %v4519_v43 = vsel %vm1007_vm6, %v4517_v1, %v4518_v35 }
 0x6f2   :  { %v4125_v19 = vpop.permute.xlu1 %4124  ;;  %v4083_v27 = vpop.permute.xlu0 %4082 }
 0x6f3   :  { %4628 = vrot.lane.b32.xlu1 %v4616_v18, %s5454_s30  ;;  %4524 = vrot.lane.b32.xlu2 %v4516_v45, %s5454_s30  ;;  %v9406_v60 = vpop.permute.xlu2 %4156  ;;  %v9411_v57 = vadd.f32 %v4125_v19, %v9055_v6  ;;  %v9415_v28 = vadd.f32 %v4083_v27, %v9053_v2  ;;  %v4617_v45 = vsel %vm1007_vm6, %v4614_v62, %v4616_v18  ;;  %v10015_v27 = vrot.slane %v9423_v48, 1 }
 0x6f4   :  { %4522 = vrot.lane.b32.xlu0 %v4514_v22, %s5454_s30  ;;  %v9427_v6 = vmul.f32 %v9118_v37, %v9293_v42  ;;  %v4615_v2 = vsel %vm1007_vm6, %v4613_v13, %v4614_v62  ;;  %v4549_v18 = vmul.f32 %v9267_v7, %v9417_v63  ;;  %v4390_v13 = vrot.slane %v4376_v47, 4 }
 0x6f5   :  { %v9455_v42 = vmul.f32 %v9108_v16, %v9323_v25  ;;  %v9462_v47 = vmul.f32 %v9375_v36, %v9357_v9 }
 0x6f6   :  { %v10017_v62 = vrot.slane %v9427_v6, 4 }
 0x6fa   :  { %v4153_v22 = vpop.permute.xlu1 %4152  ;;  %v4121_v54 = vpop.permute.xlu0 %4120 }
 0x6fb   :  { %4528 = vrot.lane.b32.xlu1 %v4519_v43, %s5454_s30  ;;  %4626 = vrot.lane.b32.xlu2 %v4617_v45, %s5454_s30  ;;  %v9437_v10 = vpop.permute.xlu2 %4184  ;;  %v9442_v19 = vadd.f32 %v4153_v22, %v9286_v41  ;;  %v4137_v1 = vadd.f32 %v4121_v54, %v9100_v15  ;;  %v4561_v43 = vrot.slane %v4549_v18, 1  ;;  %v4389_v45 = vrot.slane %v4375_v40, 4 }
 0x6fc   :  { %4624 = vrot.lane.b32.xlu0 %v4615_v2, %s5454_s30  ;;  %v4393_v41 = vsel %vm867_vm5, %v4390_v13, %v10017_v62  ;;  %v4287_v18 = vmul.f32 %v9273_v58, %v9323_v25  ;;  %v4548_v22 = vmul.f32 %v9279_v11, %v9417_v63  ;;  %v4683_v58 = vstv %s5260_s10 }
 0x6fd   :  { %v4564_v2 = vsel %vm1007_vm6, %v4561_v43, %v10015_v27  ;;  %v4391_v15 = vsel %vm867_vm5, %v4389_v45, %v4390_v13  ;;  %v10018_v13 = vrot.slane %v9455_v42, 4  ;;  %v10021_v45 = vrot.slane %v9462_v47, 1 }
 0x702   :  { %v4159_v16 = vpop.permute.xlu1 %4158 }
 0x703   :  { %4572 = vrot.lane.b32.xlu1 %v4564_v2, %s5454_s30  ;;  %4402 = vrot.lane.b32.xlu2 %v4393_v41, %s5454_s30  ;;  %v9469_v40 = vpop.permute.xlu2 %4190  ;;  %v9472_v54 = vadd.f32 %v4159_v16, %v9313_v50  ;;  %v4127_v2 = vpop.permute.xlu0 %4126  ;;  %v4301_v41 = vrot.slane %v4287_v18, 4  ;;  %v9485_v50 = vmul.f32 %v9375_v36, %v9417_v63  ;;  %v9488_v16 = vmul.f32 %v9239_v3, %v4683_v58 }
 0x704   :  { %4400 = vrot.lane.b32.xlu0 %v4391_v15, %s5454_s30  ;;  %v9476_v9 = vadd.f32 %v4127_v2, %v9154_v31  ;;  %v4560_v15 = vrot.slane %v4548_v22, 1  ;;  %v4521_v31 = vsel %vm1007_vm6, %v4518_v35, %v10021_v45  ;;  %v4685_v18 = vmul.f32 %v9267_v7, %v4683_v58 }
 0x705   :  { %10842 = vst [vmem:[#allocation359_spill] sm:$0xff] %v9472_v54  ;;  %v4303_v27 = vsel %vm867_vm5, %v4301_v41, %v10018_v13  ;;  %v4684_v41 = vmul.f32 %v9279_v11, %v4683_v58  ;;  %v10022_v62 = vrot.slane %v9485_v50, 1  ;;  %v10023_v35 = vrot.slane %v9488_v16, 5 }
 0x706   :  { %v4562_v20 = vsel %vm1007_vm6, %v4560_v15, %v4561_v43  ;;  %v4552_v43 = vmul.f32 %v9200_v26, %v9417_v63  ;;  %v9509_v45 = vstv %s5255_s11 }
 0x707   :  { %v4696_v59 = vrot.slane %v4684_v41, 5 }
 0x708   :  { %v4566_v46 = vrot.slane %v4552_v43, 1  ;;  %v4463_v43 = vmul.f32 %v9233_v29, %v9509_v45 }
 0x70a   :  { %v4187_v22 = vpop.permute.xlu1 %4186  ;;  %v4477_v8 = vrot.slane %v4463_v43, 1 }
 0x70b   :  { %4310 = vrot.lane.b32.xlu1 %v4303_v27, %s5454_s30  ;;  %4570 = vrot.lane.b32.xlu2 %v4562_v20, %s5454_s30  ;;  %v4263_v2 = vpop.permute.xlu2 %4262  ;;  %v9501_v15 = vadd.f32 %v4187_v22, %v9351_v14  ;;  %v4155_v27 = vpop.permute.xlu0 %4154  ;;  %v4569_v14 = vsel %vm1007_vm6, %v4566_v46, %v10022_v62  ;;  %v9519_v22 = vmul.f32 %v9200_v26, %v9509_v45 }
 0x70c   :  { %4530 = vrot.lane.b32.xlu0 %v4521_v31, %s5454_s30  ;;  %v4278_v20 = vadd.f32 %v4263_v2, %v9354_v24  ;;  %v9507_v13 = vadd.f32 %v4155_v27, %v9348_v12  ;;  %v4697_v31 = vrot.slane %v4685_v18, 5  ;;  %v9526_v18 = vmul.f32 %v9267_v7, %v9509_v45 }
 0x70d   :  { %v4551_v2 = vmul.f32 %v9233_v29, %v9417_v63  ;;  %v4478_v62 = vrot.slane %v9519_v22, 1 }
 0x70e   :  { %v4700_v24 = vsel %vm974_vm4, %v4697_v31, %v10023_v35  ;;  %v4698_v12 = vsel %vm974_vm4, %v4696_v59, %v4697_v31  ;;  %v4473_v63 = vrot.slane %v9526_v18, 1 }
 0x70f   :  { %v4565_v53 = vrot.slane %v4551_v2, 1 }
 0x712   :  { %v4259_v41 = vpop.permute.xlu1 %4258 }
 0x713   :  { %4578 = vrot.lane.b32.xlu1 %v4569_v14, %s5454_s30  ;;  %4708 = vrot.lane.b32.xlu2 %v4700_v24, %s5454_s30  ;;  %v4460_v14 = vmul.f32 %v9279_v11, %v9509_v45  ;;  %v9536_v24 = vadd.f32 %v9437_v10, %v4137_v1  ;;  %v4276_v59 = vadd.f32 %v4259_v41, %v9208_v39 }
 0x714   :  { %4706 = vrot.lane.b32.xlu0 %v4698_v12, %s5454_s30  ;;  %v4269_v27 = vpop.permute.xlu2 %4268  ;;  %v4183_v12 = vpop.permute.xlu0 %4182  ;;  %v4479_v10 = vsel %vm1007_vm6, %v4477_v8, %v4478_v62  ;;  %v4567_v39 = vsel %vm1007_vm6, %v4565_v53, %v4566_v46  ;;  %v4688_v1 = vmul.f32 %v9200_v26, %v4683_v58  ;;  %v4687_v8 = vmul.f32 %v9233_v29, %v4683_v58 }
 0x715   :  { %v9540_v31 = vadd.f32 %v4269_v27, %v9389_v4  ;;  %v4200_v35 = vadd.f32 %v4183_v12, %v9382_v61  ;;  %v4472_v54 = vrot.slane %v4460_v14, 1  ;;  %v9550_v4 = vmul.f32 %v9375_v36, %v4683_v58  ;;  %v10843_v12 = vld [vmem:[#allocation347_spill] sm:$0xff] }
 0x717   :  { %v4474_v61 = vsel %vm1007_vm6, %v4472_v54, %v4473_v63  ;;  %v4704_v27 = vrot.slane %v9550_v4, 5  ;;  %v4702_v54 = vrot.slane %v4688_v1, 5 }
 0x71a   :  { %v4265_v43 = vpop.permute.xlu1 %4264 }
 0x71b   :  { %4486 = vrot.lane.b32.xlu1 %v4479_v10, %s5454_s30  ;;  %4576 = vrot.lane.b32.xlu2 %v4567_v39, %s5454_s30  ;;  %v9561_v46 = vadd.f32 %v4265_v43, %v9247_v52  ;;  %v4175_v10 = vmul.f32 %v9118_v37, %v10843_v12  ;;  %v4701_v39 = vrot.slane %v4687_v8, 5  ;;  %v4705_v52 = vsel %vm974_vm4, %v4702_v54, %v4704_v27 }
 0x71c   :  { %4482 = vrot.lane.b32.xlu0 %v4474_v61, %s5454_s30  ;;  %v4439_v2 = vpop.permute.xlu2 %4438  ;;  %v4189_v41 = vpop.permute.xlu0 %4188  ;;  %v9571_v61 = vstv %s5259_s12 }
 0x71d   :  { %v9563_v53 = vadd.f32 %v4439_v2, %v4278_v20  ;;  %v9567_v14 = vadd.f32 %v4189_v41, %v9411_v57  ;;  %v9578_v58 = vmul.f32 %v9200_v26, %v9571_v61  ;;  %v4703_v57 = vsel %vm974_vm4, %v4701_v39, %v4702_v54 }
 0x71e   :  { %v9585_v20 = vmul.f32 %v9267_v7, %v9571_v61  ;;  %v4647_v1 = vmul.f32 %v9233_v29, %v9571_v61  ;;  %v4644_v26 = vmul.f32 %v9279_v11, %v9571_v61  ;;  %v4213_v29 = vmul.f32 %v9118_v37, %v10818_v51 }
 0x71f   :  { %v4662_v54 = vrot.slane %v9578_v58, 5 }
 0x720   :  { %v4661_v39 = vrot.slane %v4647_v1, 5 }
 0x722   :  { %v4435_v43 = vpop.permute.xlu1 %4434  ;;  %v4663_v11 = vsel %vm974_vm4, %v4661_v39, %v4662_v54  ;;  %v10845_v39 = vrot.slane %v9124_v17, 4  ;;  %v10847_v17 = vrot.slane %v9299_v56, 4 }
 0x723   :  { %4192 = vrot.lane.b32.xlu1 %v4175_v10, %s5454_s30  ;;  %4714 = vrot.lane.b32.xlu2 %v4705_v52, %s5454_s30  ;;  %v9592_v8 = vadd.f32 %v4435_v43, %v4276_v59  ;;  %v4657_v10 = vrot.slane %v9585_v20, 5  ;;  %v4656_v52 = vrot.slane %v4644_v26, 5 }
 0x724   :  { %4712 = vrot.lane.b32.xlu0 %v4703_v57, %s5454_s30  ;;  %v4261_v12 = vpop.permute.xlu0 %4260 }
 0x725   :  { %v4347_v2 = vpop.permute.xlu2 %4346  ;;  %v4277_v7 = vadd.f32 %v4261_v12, %v9283_v23  ;;  %v10844_v12 = vrot.slane %v9365_v0, 1  ;;  %v4289_v0 = vmul.f32 %v9118_v37, %v9323_v25 }
 0x726   :  { %v9594_v41 = vadd.f32 %v4347_v2, %v4200_v35  ;;  %v4658_v35 = vsel %vm974_vm4, %v4656_v52, %v4657_v10  ;;  %v5369_v2 = vld [vmem:[#allocation2 + $0x10] sm:$0x3f] }
 0x727   :  { %v4210_v26 = vmul.f32 %v5369_v2, %v10818_v51 }
 0x72a   :  { %v4221_v23 = vpop.permute.xlu1 %4220 }
 0x72b   :  { %4230 = vrot.lane.b32.xlu1 %v4213_v29, %s5454_s30  ;;  %4670 = vrot.lane.b32.xlu2 %v4663_v11, %s5454_s30  ;;  %v4238_v57 = vadd.f32 %v4221_v23, %v9102_v44  ;;  %v10846_v23 = vrot.slane %v9462_v47, 1  ;;  %v4304_v47 = vrot.slane %v4289_v0, 4 }
 0x72c   :  { %4666 = vrot.lane.b32.xlu0 %v4658_v35, %s5454_s30  ;;  %v4267_v1 = vpop.permute.xlu0 %4266 }
 0x72d   :  { %v4443_v59 = vpop.permute.xlu2 %4442  ;;  %v4280_v43 = vadd.f32 %v4267_v1, %v9310_v30  ;;  %v4286_v1 = vmul.f32 %v5369_v2, %v9323_v25 }
 0x72f   :  { %v9623_v30 = vadd.f32 %v4443_v59, %v4280_v43  ;;  %v4299_v25 = vrot.slane %v4286_v1, 4 }
 0x732   :  { %v4349_v29 = vpop.permute.xlu1 %4348 }
 0x733   :  { %4526 = vrot.lane.b32.xlu1 %v10844_v12, %s5454_s30  ;;  %4350 = vrot.lane.b32.xlu2 %v10845_v39, %s5454_s30  ;;  %v9621_v44 = vadd.f32 %v4349_v29, %v9536_v24  ;;  %v10848_v24 = vrot.slane %v9339_v33, 4  ;;  %v9643_v12 = vadd.f32 %v9469_v40, %v9476_v9  ;;  %v10849_v33 = vrot.slane %v9455_v42, 4 }
 0x734   :  { %4224 = vrot.lane.b32.xlu0 %v4210_v26, %s5454_s30  ;;  %v4437_v11 = vpop.permute.xlu0 %4436 }
 0x735   :  { %v4621_v52 = vpop.permute.xlu2 %4620  ;;  %v4453_v35 = vadd.f32 %v4437_v11, %v4277_v7  ;;  %v4305_v2 = vsel %vm867_vm5, %v10849_v33, %v4304_v47  ;;  %v4649_v11 = vmul.f32 %v9375_v36, %v9571_v61 }
 0x737   :  { %v4637_v51 = vadd.f32 %v4621_v52, %v4453_v35  ;;  %v4664_v0 = vrot.slane %v4649_v11, 5 }
 0x739   :  { %v4665_v1 = vsel %vm974_vm4, %v4662_v54, %v4664_v0 }
 0x73b   :  { %4532 = vrot.lane.b32.xlu1 %v10846_v23, %s5454_s30  ;;  %4398 = vrot.lane.b32.xlu2 %v10847_v17, %s5454_s30  ;;  %v4761_v23 = vrot.slane %v4637_v51, 1  ;;  %v4465_v51 = vmul.f32 %v9375_v36, %v9509_v45 }
 0x73c   :  { %4356 = vrot.lane.b32.xlu0 %v10848_v24, %s5454_s30  ;;  %v10854_v24 = vrot.slane %v9485_v50, 1 }
 0x73d   :  { %v4445_v59 = vpop.permute.xlu1 %4444  ;;  %v4229_v7 = vpop.permute.xlu2 %4228 }
 0x73e   :  { %v4457_v43 = vadd.f32 %v4445_v59, %v9540_v31  ;;  %v9639_v37 = vadd.f32 %v4229_v7, %v9244_v21  ;;  %v4223_v26 = vpop.permute.xlu0 %4222  ;;  %v10850_v21 = vrot.slane %v9427_v6, 4  ;;  %v10851_v31 = vrot.slane %v9332_v49, 4 }
 0x73f   :  { %v9646_v56 = vadd.f32 %v4223_v26, %v9206_v38  ;;  %v10852_v49 = vrot.slane %v9488_v16, 5  ;;  %v4462_v6 = vmul.f32 %v9239_v3, %v9509_v45  ;;  %v4480_v7 = vrot.slane %v4465_v51, 1 }
 0x740   :  { %v4300_v39 = vsel %vm867_vm5, %v10851_v31, %v4299_v25 }
 0x741   :  { %v4481_v36 = vsel %vm1007_vm6, %v4478_v62, %v4480_v7 }
 0x743   :  { %4312 = vrot.lane.b32.xlu1 %v4305_v2, %s5454_s30  ;;  %4404 = vrot.lane.b32.xlu2 %v10850_v21, %s5454_s30 }
 0x744   :  { %4308 = vrot.lane.b32.xlu0 %v4300_v39, %s5454_s30 }
 0x745   :  { %v4623_v40 = vpop.permute.xlu1 %4622  ;;  %v4395_v38 = vpop.permute.xlu2 %4394 }
 0x746   :  { %v9660_v9 = vadd.f32 %v4623_v40, %v9563_v53  ;;  %v4412_v42 = vadd.f32 %v4395_v38, %v4238_v57  ;;  %v4441_v29 = vpop.permute.xlu0 %4440  ;;  %v10853_v53 = vrot.slane %v9423_v48, 1  ;;  %v4646_v48 = vmul.f32 %v9239_v3, %v9571_v61 }
 0x747   :  { %v4455_v52 = vadd.f32 %v4441_v29, %v9561_v46 }
 0x748   :  { %v4763_v16 = vrot.slane %v9660_v9, 1  ;;  %v4659_v61 = vrot.slane %v4646_v48, 5 }
 0x74a   :  { %v4764_v50 = vsel %vm1007_vm6, %v4761_v23, %v4763_v16  ;;  %v4660_v18 = vsel %vm974_vm4, %v4657_v10, %v4659_v61 }
 0x74b   :  { %4716 = vrot.lane.b32.xlu1 %v4704_v27, %s5454_s30  ;;  %4710 = vrot.lane.b32.xlu2 %v10852_v49, %s5454_s30  ;;  %v4475_v27 = vrot.slane %v4462_v6, 1 }
 0x74c   :  { %4574 = vrot.lane.b32.xlu0 %v10853_v53, %s5454_s30 }
 0x74d   :  { %v9676_v57 = vpop.permute.xlu1 %4352  ;;  %v9678_v46 = vpop.permute.xlu2 %4524 }
 0x74e   :  { %v4619_v35 = vpop.permute.xlu0 %4618 }
 0x74f   :  { %v4636_v4 = vadd.f32 %v4619_v35, %v9592_v8  ;;  %v4476_v8 = vsel %vm1007_vm6, %v4473_v63, %v4475_v27 }
 0x751   :  { %v4760_v17 = vrot.slane %v4636_v4, 1 }
 0x753   :  { %4672 = vrot.lane.b32.xlu1 %v4665_v1, %s5454_s30  ;;  %4580 = vrot.lane.b32.xlu2 %v10854_v24, %s5454_s30  ;;  %v4762_v58 = vsel %vm1007_vm6, %v4760_v17, %v4761_v23 }
 0x754   :  { %4484 = vrot.lane.b32.xlu0 %v4476_v8, %s5454_s30 }
 0x755   :  { %v4397_v54 = vpop.permute.xlu1 %4396  ;;  %v4627_v59 = vpop.permute.xlu2 %4626 }
 0x756   :  { %v4227_v3 = vpop.permute.xlu0 %4226  ;;  %v4640_v47 = vadd.f32 %v4627_v59, %v9623_v30 }
 0x758   :  { %v4766_v21 = vrot.slane %v4640_v47, 1 }
 0x75b   :  { %4668 = vrot.lane.b32.xlu2 %v4660_v18, %s5454_s30 }
 0x75c   :  { %4488 = vrot.lane.b32.xlu0 %v4481_v36, %s5454_s30 }
 0x75d   :  { %v9709_v45 = vpop.permute.xlu1 %4306  ;;  %v4403_v63 = vpop.permute.xlu2 %4402 }
 0x75e   :  { %v4355_v26 = vpop.permute.xlu0 %4354  ;;  %v4416_v8 = vadd.f32 %v4403_v63, %v9639_v37 }
 0x765   :  { %v4629_v25 = vpop.permute.xlu1 %4628  ;;  %v4571_v33 = vpop.permute.xlu2 %4570 }
 0x766   :  { %v9712_v2 = vadd.f32 %v4629_v25, %v4457_v43  ;;  %v4588_v20 = vadd.f32 %v4571_v33, %v4412_v42  ;;  %v4523_v10 = vpop.permute.xlu0 %4522  ;;  %v4413_v43 = vadd.f32 %v4397_v54, %v9646_v56  ;;  %v4241_v42 = vadd.f32 %v4227_v3, %v9156_v34 }
 0x767   :  { %v4541_v56 = vadd.f32 %v9678_v46, %v9621_v44  ;;  %v4540_v51 = vadd.f32 %v4523_v10, %v9594_v41  ;;  %v4368_v46 = vadd.f32 %v4355_v26, %v9643_v12  ;;  %v4166_v10 = vadd.f32 %v9406_v60, %v9415_v28 }
 0x768   :  { %v4768_v31 = vrot.slane %v9712_v2, 1  ;;  %v4776_v22 = vadd.f32 %v4762_v58, %v4588_v20  ;;  %v4318_v60 = vadd.f32 %v9709_v45, %v9442_v19 }
 0x76a   :  { %v4769_v62 = vsel %vm1007_vm6, %v4766_v21, %v4768_v31  ;;  %v4789_v48 = vrot.slane %v4776_v22, 2 }
 0x76d   :  { %v4529_v39 = vpop.permute.xlu1 %4528  ;;  %v4709_v40 = vpop.permute.xlu2 %4708 }
 0x76e   :  { %v4625_v38 = vpop.permute.xlu0 %4624  ;;  %v9731_v58 = vadd.f32 %v4709_v40, %v4541_v56 }
 0x76f   :  { %v4639_v29 = vadd.f32 %v4625_v38, %v4455_v52 }
 0x770   :  { %v4737_v18 = vrot.slane %v9731_v58, 1 }
 0x771   :  { %v4765_v11 = vrot.slane %v4639_v29, 1 }
 0x773   :  { %v4767_v30 = vsel %vm1007_vm6, %v4765_v11, %v4766_v21  ;;  %v4367_v21 = vadd.f32 %v9676_v57, %v9567_v14 }
 0x775   :  { %v4573_v49 = vpop.permute.xlu1 %4572  ;;  %v4577_v6 = vpop.permute.xlu2 %4576 }
 0x776   :  { %v4589_v53 = vadd.f32 %v4573_v49, %v4413_v43  ;;  %v4401_v35 = vpop.permute.xlu0 %4400 }
 0x777   :  { %v4415_v0 = vadd.f32 %v4401_v35, %v4241_v42 }
 0x778   :  { %v9721_v4 = vadd.f32 %v4764_v50, %v4589_v53 }
 0x779   :  { %v4591_v27 = vadd.f32 %v4577_v6, %v4415_v0 }
 0x77a   :  { %v4790_v17 = vrot.slane %v9721_v4, 2 }
 0x77b   :  { %v4779_v23 = vadd.f32 %v4767_v30, %v4591_v27 }
 0x77c   :  { %v4791_v34 = vsel %vm4788_vm7, %v4789_v48, %v4790_v17 }
 0x77d   :  { %v4311_v1 = vpop.permute.xlu1 %4310  ;;  %v4715_v52 = vpop.permute.xlu2 %4714  ;;  %v4794_v47 = vrot.slane %v4779_v23, 2 }
 0x77e   :  { %v4531_v24 = vpop.permute.xlu0 %4530  ;;  %v4320_v22 = vadd.f32 %v4311_v1, %v4166_v10 }
 0x77f   :  { %v4544_v20 = vadd.f32 %v4531_v24, %v4368_v46 }
 0x781   :  { %v9748_v40 = vadd.f32 %v4715_v52, %v4544_v20 }
 0x783   :  { %v4742_v30 = vrot.slane %v9748_v40, 1 }
 0x785   :  { %v4579_v54 = vpop.permute.xlu1 %4578  ;;  %v4671_v59 = vpop.permute.xlu2 %4670 }
 0x786   :  { %v4592_v3 = vadd.f32 %v4579_v54, %v4416_v8  ;;  %v4707_v61 = vpop.permute.xlu0 %4706 }
 0x787   :  { %v4724_v50 = vadd.f32 %v4707_v61, %v4540_v51 }
 0x788   :  { %v9733_v7 = vadd.f32 %v4769_v62, %v4592_v3  ;;  %v4543_v62 = vadd.f32 %v4529_v39, %v4367_v21 }
 0x789   :  { %v4736_v36 = vrot.slane %v4724_v50, 1 }
 0x78a   :  { %v4795_v25 = vrot.slane %v9733_v7, 2 }
 0x78b   :  { %v4738_v44 = vsel %vm1007_vm6, %v4736_v36, %v4737_v18 }
 0x78c   :  { %v4796_v41 = vsel %vm4788_vm7, %v4794_v47, %v4795_v25 }
 0x78d   :  { %v4487_v63 = vpop.permute.xlu1 %4486  ;;  %v4351_v33 = vpop.permute.xlu2 %4350 }
 0x78e   :  { %v4483_v37 = vpop.permute.xlu0 %4482  ;;  %v4496_v38 = vadd.f32 %v4487_v63, %v4320_v22  ;;  %v4366_v19 = vadd.f32 %v4351_v33, %v9501_v15 }
 0x78f   :  { %v4494_v57 = vadd.f32 %v4483_v37, %v4318_v60 }
 0x790   :  { %v4680_v42 = vadd.f32 %v4671_v59, %v4496_v38 }
 0x795   :  { %v4193_v43 = vpop.permute.xlu1 %4192  ;;  %v9751_v12 = vpop.permute.xlu2 %4398 }
 0x796   :  { %v4713_v29 = vpop.permute.xlu0 %4712 }
 0x797   :  { %v4727_v11 = vadd.f32 %v4713_v29, %v4543_v62  ;;  %v4205_v62 = vadd.f32 %v4193_v43, %v9385_v5 }
 0x799   :  { %v4741_v26 = vrot.slane %v4727_v11, 1 }
 0x79b   :  { %v4743_v28 = vsel %vm1007_vm6, %v4741_v26, %v4742_v30 }
 0x79c   :  { %v4752_v14 = vadd.f32 %v4743_v28, %v4680_v42 }
 0x79d   :  { %v4231_v35 = vpop.permute.xlu1 %4230  ;;  %v4405_v0 = vpop.permute.xlu2 %4404 }
 0x79e   :  { %v9758_v39 = vadd.f32 %v4796_v41, %v4752_v14  ;;  %v4667_v49 = vpop.permute.xlu0 %4666 }
 0x79f   :  { %v4678_v6 = vadd.f32 %v4667_v49, %v4494_v57 }
 0x7a0   :  { %4841 = vst.sshfl [vmem:[#allocation1 + $0x20] sm:$0xff pattern:$0x73625140] %v9758_v39 }
 0x7a1   :  { %v4750_v53 = vadd.f32 %v4738_v44, %v4678_v6 }
 0x7a3   :  { %v9761_v27 = vadd.f32 %v4791_v34, %v4750_v53  ;;  %v4243_v34 = vadd.f32 %v4231_v35, %v9318_v32 }
 0x7a5   :  { %4838 = vst.sshfl [vmem:[#allocation1] sm:$0xff pattern:$0x73625140] %v9761_v27  ;;  %v4527_v23 = vpop.permute.xlu1 %4526  ;;  %v4711_v1 = vpop.permute.xlu2 %4710  ;;  %v4826_v24 = vrot.slane %v9761_v27, 1  ;;  %v4417_v47 = vadd.f32 %v4405_v0, %v4243_v34 }
 0x7a6   :  { %v4542_v52 = vadd.f32 %v4527_v23, %v4366_v19  ;;  %v4225_v48 = vpop.permute.xlu0 %4224  ;;  %v10855_v19 = vld [vmem:[#allocation359_spill] sm:$0xff] }
 0x7a7   :  { %v4843_v56 = vld [vmem:[#allocation1 + $0x21] ss:$4 sm:$0xff]  ;;  %v4829_v15 = vsel %vm4815_vm8, %v9758_v39, %v4826_v24  ;;  %v4240_v11 = vadd.f32 %v4225_v48, %v9290_v55 }
 0x7a8   :  { %v4846_v8 = vrot.slane %v4843_v56, 7  ;;  %4859 = vst.sshfl [vmem:[#allocation1 + $0x20] sm:$0xff pattern:$0x73625140] %v9758_v39  ;;  %v4726_v51 = vadd.f32 %v4711_v1, %v4542_v52  ;;  %v4830_v54 = vsel %vm4817_vm9, %v9758_v39, %v4829_v15 }
 0x7a9   :  { %v4831_v61 = vsel %vm4819_vm10, %v9758_v39, %v4830_v54  ;;  %v4414_v7 = vadd.f32 %v9751_v12, %v4240_v11 }
 0x7aa   :  { %v4739_v3 = vrot.slane %v4726_v51, 1  ;;  %v4832_v32 = vsel %vm4821_vm11, %v9758_v39, %v4831_v61 }
 0x7ab   :  { %4833 = vrot.lane.b32.xlu0 %v4832_v32, %s5438_s24 }
 0x7ac   :  { %v4840_v45 = vld [vmem:[#allocation1 + $0x1] ss:$4 sm:$0xff]  ;;  %v4740_v37 = vsel %vm1007_vm6, %v4737_v18, %v4739_v3 }
 0x7ad   :  { %4856 = vst.sshfl [vmem:[#allocation1] sm:$0xff pattern:$0x73625140] %v9761_v27  ;;  %v4847_v59 = vsel %vm4815_vm8, %v4846_v8, %v4840_v45  ;;  %v4533_v46 = vpop.permute.xlu1 %4532  ;;  %v4581_v63 = vpop.permute.xlu2 %4580 }
 0x7ae   :  { %v4848_v50 = vsel %vm4817_vm9, %v4846_v8, %v4847_v59  ;;  %v4593_v33 = vadd.f32 %v4581_v63, %v4417_v47  ;;  %v4357_v20 = vpop.permute.xlu0 %4356 }
 0x7af   :  { %v4849_v36 = vsel %vm4819_vm10, %v4846_v8, %v4848_v50  ;;  %v4369_v29 = vadd.f32 %v4357_v20, %v4205_v62  ;;  %v4861_v26 = vld [vmem:[#allocation1 + $0x21] ss:$4 sm:$0xff] }
 0x7b0   :  { %v4850_v41 = vsel %vm4821_vm11, %v4846_v8, %v4849_v36  ;;  %v4781_v10 = vadd.f32 %v4768_v31, %v4593_v33  ;;  %4877 = vst.sshfl [vmem:[#allocation1 + $0x20] sm:$0xff pattern:$0x73625140] %v9758_v39 }
 0x7b1   :  { %4851 = vrot.lane.b32.xlu1 %v4850_v41, %s5455_s2  ;;  %v4545_v2 = vadd.f32 %v4533_v46, %v4369_v29 }
 0x7b2   :  { %v4797_v21 = vrot.slane %v4781_v10, 2 }
 0x7b4   :  { %v9780_v44 = vld [vmem:[#allocation1 + $0x1] ss:$4 sm:$0xff]  ;;  %v4798_v58 = vsel %vm4788_vm7, %v4795_v25, %v4797_v21 }
 0x7b5   :  { %4874 = vst.sshfl [vmem:[#allocation1] sm:$0xff pattern:$0x73625140] %v9761_v27  ;;  %v4313_v18 = vpop.permute.xlu1 %4312  ;;  %v4669_v53 = vpop.permute.xlu2 %4668  ;;  %v4862_v8 = vrot.slane %v9780_v44, 1 }
 0x7b6   :  { %v4309_v38 = vpop.permute.xlu0 %4308  ;;  %v4321_v45 = vadd.f32 %v4313_v18, %v10855_v19 }
 0x7b7   :  { %v4879_v57 = vld [vmem:[#allocation1 + $0x22] ss:$4 sm:$0xff]  ;;  %v4319_v12 = vadd.f32 %v4309_v38, %v9507_v13  ;;  %v4865_v59 = vsel %vm4815_vm8, %v4861_v26, %v4862_v8 }
 0x7b8   :  { %4895 = vst.sshfl [vmem:[#allocation1 + $0x20] sm:$0xff pattern:$0x73625140] %v9758_v39  ;;  %v4866_v50 = vsel %vm4817_vm9, %v4861_v26, %v4865_v59  ;;  %v4882_v46 = vrot.slane %v4879_v57, 7 }
 0x7b9   :  { %v4867_v36 = vsel %vm4819_vm10, %v4861_v26, %v4866_v50 }
 0x7ba   :  { %v4868_v47 = vsel %vm4821_vm11, %v4861_v26, %v4867_v36 }
 0x7bc   :  { %v9791_v22 = vld [vmem:[#allocation1 + $0x2] ss:$4 sm:$0xff] }
 0x7bd   :  { %4892 = vst.sshfl [vmem:[#allocation1] sm:$0xff pattern:$0x73625140] %v9761_v27  ;;  %v4717_v31 = vpop.permute.xlu1 %4716  ;;  %v4883_v21 = vsel %vm4815_vm8, %v4882_v46, %v9791_v22 }
 0x7be   :  { %v4729_v25 = vadd.f32 %v4717_v31, %v4545_v2  ;;  %v4575_v60 = vpop.permute.xlu0 %4574  ;;  %v4884_v38 = vsel %vm4817_vm9, %v4882_v46, %v4883_v21 }
 0x7bf   :  { %v4590_v28 = vadd.f32 %v4575_v60, %v4414_v7  ;;  %v4885_v2 = vsel %vm4819_vm10, %v4882_v46, %v4884_v38 }
 0x7c0   :  { %v4744_v14 = vrot.slane %v4729_v25, 1  ;;  %v4886_v25 = vsel %vm4821_vm11, %v4882_v46, %v4885_v2 }
 0x7c1   :  { %v4778_v5 = vadd.f32 %v4763_v16, %v4590_v28 }
 0x7c2   :  { %v4745_v55 = vsel %vm1007_vm6, %v4742_v30, %v4744_v14  ;;  %v9817_v30 = vld [vmem:[#allocation1 + $0x22] ss:$4 sm:$0xff] }
 0x7c3   :  { %v4792_v43 = vrot.slane %v4778_v5, 2  ;;  %4913 = vst.sshfl [vmem:[#allocation1 + $0x20] sm:$0xff pattern:$0x73625140] %v9758_v39 }
 0x7c4   :  { %v9799_v42 = vld [vmem:[#allocation1 + $0x2] ss:$4 sm:$0xff] }
 0x7c5   :  { %4910 = vst.sshfl [vmem:[#allocation1] sm:$0xff pattern:$0x73625140] %v9761_v27  ;;  %v4793_v6 = vsel %vm4788_vm7, %v4790_v17, %v4792_v43  ;;  %v4673_v17 = vpop.permute.xlu1 %4672  ;;  %v4898_v18 = vrot.slane %v9799_v42, 1  ;;  %v4814_v42 = vrot.slane %v9758_v39, 7 }
 0x7c6   :  { %v4485_v9 = vpop.permute.xlu0 %4484 }
 0x7c7   :  { %v4495_v16 = vadd.f32 %v4485_v9, %v4319_v12  ;;  %v4901_v22 = vsel %vm4815_vm8, %v9817_v30, %v4898_v18  ;;  %v4816_v28 = vsel %vm4815_vm8, %v4814_v42, %v9761_v27 }
 0x7c8   :  { %v4902_v60 = vsel %vm4817_vm9, %v9817_v30, %v4901_v22  ;;  %v4818_v5 = vsel %vm4817_vm9, %v4814_v42, %v4816_v28 }
 0x7c9   :  { %v4679_v40 = vadd.f32 %v4669_v53, %v4495_v16 }
 0x7ca   :  { %v9826_v48 = vld [vmem:[#allocation1 + $0x23] ss:$4 sm:$0xff] }
 0x7cb   :  { %v4751_v35 = vadd.f32 %v4740_v37, %v4679_v40  ;;  %4931 = vst.sshfl [vmem:[#allocation1 + $0x20] sm:$0xff pattern:$0x73625140] %v9758_v39  ;;  %v4820_v39 = vsel %vm4819_vm10, %v4814_v42, %v4818_v5 }
 0x7cc   :  { %v9809_v49 = vld [vmem:[#allocation1 + $0x3] ss:$4 sm:$0xff]  ;;  %v4822_v57 = vsel %vm4821_vm11, %v4814_v42, %v4820_v39 }
 0x7cd   :  { %4928 = vst.sshfl [vmem:[#allocation1] sm:$0xff pattern:$0x73625140] %v9761_v27  ;;  %v9823_v23 = vadd.f32 %v4793_v6, %v4751_v35  ;;  %v4918_v6 = vrot.slane %v9826_v48, 7 }
 0x7ce   :  { %v4489_v13 = vpop.permute.xlu0 %4488  ;;  %4825 = vst.msk [vmem:[#allocation4] sm:$0x3] %vm4824_vm12, %v4822_v57 }
 0x7cf   :  { %v4497_v4 = vadd.f32 %v4489_v13, %v4321_v45  ;;  %v4957_v56 = vrot.slane %v9823_v23, 1  ;;  %v4919_v35 = vsel %vm4815_vm8, %v4918_v6, %v9809_v49 }
 0x7d1   :  { %v4681_v1 = vadd.f32 %v4673_v17, %v4497_v4 }
 0x7d2   :  { %v9844_v61 = vld [vmem:[#allocation1 + $0x23] ss:$4 sm:$0xff] }
 0x7d3   :  { %v4753_v52 = vadd.f32 %v4745_v55, %v4681_v1  ;;  %v4903_v55 = vsel %vm4819_vm10, %v9817_v30, %v4902_v60 }
 0x7d4   :  { %v9819_v0 = vld [vmem:[#allocation1 + $0x3] ss:$4 sm:$0xff]  ;;  %v4904_v27 = vsel %vm4821_vm11, %v9817_v30, %v4903_v55  ;;  %v4920_v30 = vsel %vm4817_vm9, %v4918_v6, %v4919_v35 }
 0x7d5   :  { %4968 = vst.sshfl [vmem:[#allocation1] sm:$0xff pattern:$0x73625140] %v9823_v23  ;;  %v9829_v24 = vadd.f32 %v4798_v58, %v4753_v52  ;;  %v4934_v45 = vrot.slane %v9819_v0, 1  ;;  %v4921_v52 = vsel %vm4819_vm10, %v4918_v6, %v4920_v30 }
 0x7d6   :  { %v4922_v0 = vsel %vm4821_vm11, %v4918_v6, %v4921_v52 }
 0x7d7   :  { %v4960_v51 = vsel %vm4815_vm8, %v9829_v24, %v4957_v56  ;;  %4971 = vst.sshfl [vmem:[#allocation1 + $0x20] sm:$0xff pattern:$0x73625140] %v9829_v24  ;;  %v4937_v49 = vsel %vm4815_vm8, %v9844_v61, %v4934_v45 }
 0x7d8   :  { %v4961_v15 = vsel %vm4817_vm9, %v9829_v24, %v4960_v51  ;;  %v4938_v56 = vsel %vm4817_vm9, %v9844_v61, %v4937_v49 }
 0x7d9   :  { %v4962_v54 = vsel %vm4819_vm10, %v9829_v24, %v4961_v15 }
 0x7da   :  { %v4963_v3 = vsel %vm4821_vm11, %v9829_v24, %v4962_v54 }
 0x7db   :  { %4964 = vrot.lane.b32.xlu2 %v4963_v3, %s5438_s24 }
 0x7dc   :  { %v4970_v34 = vld [vmem:[#allocation1 + $0x1] ss:$4 sm:$0xff] }
 0x7dd   :  { %4985 = vst.sshfl [vmem:[#allocation1] sm:$0xff pattern:$0x73625140] %v9823_v23 }
 0x7de   :  { %v4973_v44 = vld [vmem:[#allocation1 + $0x21] ss:$4 sm:$0xff] }
 0x7df   :  { %v4976_v41 = vrot.slane %v4973_v44, 7  ;;  %4988 = vst.sshfl [vmem:[#allocation1 + $0x20] sm:$0xff pattern:$0x73625140] %v9829_v24 }
 0x7e1   :  { %v4977_v37 = vsel %vm4815_vm8, %v4976_v41, %v4970_v34  ;;  %v4939_v34 = vsel %vm4819_vm10, %v9844_v61, %v4938_v56  ;;  %v10857_v56 = vld [vmem:[#allocation23_spill] sm:$0xff] }
 0x7e2   :  { %v4978_v33 = vsel %vm4817_vm9, %v4976_v41, %v4977_v37  ;;  %v4940_v59 = vsel %vm4821_vm11, %v9844_v61, %v4939_v34  ;;  %v4950_v61 = vrot.slane %v9829_v24, 7  ;;  %v10858_v34 = vld [vmem:[#allocation14_spill] sm:$0xff] }
 0x7e3   :  { %4869 = vrot.lane.b32.xlu2 %v4868_v47, %s5456_s13  ;;  %v4979_v20 = vsel %vm4819_vm10, %v4976_v41, %v4978_v33 }
 0x7e4   :  { %v4987_v32 = vld [vmem:[#allocation1 + $0x1] ss:$4 sm:$0xff]  ;;  %v4980_v58 = vsel %vm4821_vm11, %v4976_v41, %v4979_v20 }
 0x7e5   :  { %5002 = vst.sshfl [vmem:[#allocation1] sm:$0xff pattern:$0x73625140] %v9823_v23  ;;  %v4991_v10 = vrot.slane %v4987_v32, 1  ;;  %4981 = vrot.lane.b32.xlu0 %v4980_v58, %s5455_s2 }
 0x7e6   :  { %v4990_v62 = vld [vmem:[#allocation1 + $0x21] ss:$4 sm:$0xff] }
 0x7e7   :  { %v4994_v29 = vsel %vm4815_vm8, %v4990_v62, %v4991_v10  ;;  %5005 = vst.sshfl [vmem:[#allocation1 + $0x20] sm:$0xff pattern:$0x73625140] %v9829_v24 }
 0x7e8   :  { %v4995_v11 = vsel %vm4817_vm9, %v4990_v62, %v4994_v29 }
 0x7e9   :  { %v4996_v26 = vsel %vm4819_vm10, %v4990_v62, %v4995_v11 }
 0x7ea   :  { %v4997_v7 = vsel %vm4821_vm11, %v4990_v62, %v4996_v26 }
 0x7eb   :  { %4998 = vrot.lane.b32.xlu1 %v4997_v7, %s5456_s13 }
 0x7ec   :  { %v5004_v63 = vld [vmem:[#allocation1 + $0x2] ss:$4 sm:$0xff] }
 0x7ed   :  { %5019 = vst.sshfl [vmem:[#allocation1] sm:$0xff pattern:$0x73625140] %v9823_v23  ;;  %4887 = vrot.lane.b32.xlu0 %v4886_v25, %s5457_s14 }
 0x7ee   :  { %v5007_v14 = vld [vmem:[#allocation1 + $0x22] ss:$4 sm:$0xff] }
 0x7ef   :  { %v5010_v43 = vrot.slane %v5007_v14, 7  ;;  %5022 = vst.sshfl [vmem:[#allocation1 + $0x20] sm:$0xff pattern:$0x73625140] %v9829_v24 }
 0x7f1   :  { %v5011_v12 = vsel %vm4815_vm8, %v5010_v43, %v5004_v63  ;;  %v4951_v63 = vsel %vm4815_vm8, %v4950_v61, %v9823_v23 }
 0x7f2   :  { %v5012_v16 = vsel %vm4817_vm9, %v5010_v43, %v5011_v12  ;;  %v4952_v33 = vsel %vm4817_vm9, %v4950_v61, %v4951_v63 }
 0x7f3   :  { %4905 = vrot.lane.b32.xlu1 %v4904_v27, %s5458_s15  ;;  %v5013_v53 = vsel %vm4819_vm10, %v5010_v43, %v5012_v16  ;;  %v4953_v20 = vsel %vm4819_vm10, %v4950_v61, %v4952_v33  ;;  %v10865_v33 = vld [vmem:[#allocation24_spill] sm:$0xff] }
 0x7f4   :  { %v5021_v31 = vld [vmem:[#allocation1 + $0x2] ss:$4 sm:$0xff]  ;;  %v5014_v19 = vsel %vm4821_vm11, %v5010_v43, %v5013_v53  ;;  %v4954_v10 = vsel %vm4821_vm11, %v4950_v61, %v4953_v20 }
 0x7f5   :  { %5036 = vst.sshfl [vmem:[#allocation1] sm:$0xff pattern:$0x73625140] %v9823_v23  ;;  %v5025_v40 = vrot.slane %v5021_v31, 1  ;;  %5015 = vrot.lane.b32.xlu2 %v5014_v19, %s5457_s14  ;;  %v10864_v61 = vld [vmem:[#allocation19_spill] sm:$0xff] }
 0x7f6   :  { %v5024_v13 = vld [vmem:[#allocation1 + $0x22] ss:$4 sm:$0xff]  ;;  %4956 = vst.msk [vmem:[#allocation4 + $0x2] sm:$0x3] %vm4824_vm12, %v4954_v10  ;;  %vm5097_vm12 = vcmask 1041408  }
 0x7f7   :  { %v5028_v4 = vsel %vm4815_vm8, %v5024_v13, %v5025_v40  ;;  %5039 = vst.sshfl [vmem:[#allocation1 + $0x20] sm:$0xff pattern:$0x73625140] %v9829_v24  ;;  %v10866_v10 = vld [vmem:[#allocation18_spill] sm:$0xff] }
 0x7f8   :  { %v5029_v17 = vsel %vm4817_vm9, %v5024_v13, %v5028_v4 }
 0x7f9   :  { %v5030_v1 = vsel %vm4819_vm10, %v5024_v13, %v5029_v17 }
 0x7fa   :  { %v5031_v48 = vsel %vm4821_vm11, %v5024_v13, %v5030_v1 }
 0x7fb   :  { %5032 = vrot.lane.b32.xlu0 %v5031_v48, %s5458_s15  ;;  %v10856_v48 = vld [vmem:[#allocation15_spill] sm:$0xff] }
 0x7fc   :  { %v5038_v9 = vld [vmem:[#allocation1 + $0x3] ss:$4 sm:$0xff] }
 0x7fd   :  { %5053 = vst.sshfl [vmem:[#allocation1] sm:$0xff pattern:$0x73625140] %v9823_v23  ;;  %4923 = vrot.lane.b32.xlu2 %v4922_v0, %s5459_s16 }
 0x7fe   :  { %v5041_v8 = vld [vmem:[#allocation1 + $0x23] ss:$4 sm:$0xff] }
 0x7ff   :  { %v5044_v51 = vrot.slane %v5041_v8, 7  ;;  %5056 = vst.sshfl [vmem:[#allocation1 + $0x20] sm:$0xff pattern:$0x73625140] %v9829_v24 }
 0x801   :  { %v5045_v54 = vsel %vm4815_vm8, %v5044_v51, %v5038_v9 }
 0x802   :  { %v5046_v3 = vsel %vm4817_vm9, %v5044_v51, %v5045_v54 }
 0x803   :  { %4941 = vrot.lane.b32.xlu0 %v4940_v59, %s5460_s17  ;;  %v5047_v50 = vsel %vm4819_vm10, %v5044_v51, %v5046_v3  ;;  %v10860_v3 = vld [vmem:[#allocation16_spill] sm:$0xff] }
 0x804   :  { %v5055_v15 = vld [vmem:[#allocation1 + $0x3] ss:$4 sm:$0xff]  ;;  %v5048_v36 = vsel %vm4821_vm11, %v5044_v51, %v5047_v50 }
 0x805   :  { %v5059_v32 = vrot.slane %v5055_v15, 1  ;;  %5049 = vrot.lane.b32.xlu1 %v5048_v36, %s5459_s16  ;;  %v10859_v15 = vld [vmem:[#allocation26_spill] sm:$0xff]  ;;  %v10861_v36 = vld [vmem:[#allocation27_spill] sm:$0xff] }
 0x806   :  { %v5058_v47 = vld [vmem:[#allocation1 + $0x23] ss:$4 sm:$0xff] }
 0x807   :  { %v5062_v44 = vsel %vm4815_vm8, %v5058_v47, %v5059_v32 }
 0x808   :  { %v5063_v41 = vsel %vm4817_vm9, %v5058_v47, %v5062_v44  ;;  %v10862_v44 = vld [vmem:[#allocation17_spill] sm:$0xff] }
 0x809   :  { %v5064_v37 = vsel %vm4819_vm10, %v5058_v47, %v5063_v41  ;;  %vm4809_vm10 = vcmask 1042434  }
 0x80a   :  { %v5065_v46 = vsel %vm4821_vm11, %v5058_v47, %v5064_v37  ;;  %vm5094_vm11 = vcmask 1040384   ;;  %v10863_v37 = vld [vmem:[#allocation28_spill] sm:$0xff] }
 0x80b   :  { %5066 = vrot.lane.b32.xlu2 %v5065_v46, %s5460_s17 }
 0x81d   :  { %v4834_v21 = vpop.permute.xlu0 %4833 }
 0x81e   :  { %4837 = vst.msk [vmem:[#allocation4] sm:$0x3] %vm4836_vm13, %v4834_v21 }
 0x823   :  { %v4852_v58 = vpop.permute.xlu1 %4851 }
 0x824   :  { %4855 = vst.msk [vmem:[#allocation4] sm:$0x3] %vm4854_vm14, %v4852_v58  ;;  %v10867_v58 = vld [vmem:[#allocation22_spill] sm:$0xff] }
 0x835   :  { %v4965_v18 = vpop.permute.xlu2 %4964 }
 0x836   :  { %4967 = vst.msk [vmem:[#allocation4 + $0x2] sm:$0x3] %vm4836_vm13, %v4965_v18  ;;  %vm5101_vm13 = vcmask 1042433  }
 0x83d   :  { %v4870_v24 = vpop.permute.xlu2 %4869 }
 0x83e   :  { %4873 = vst.msk [vmem:[#allocation4] sm:$0x3] %vm4872_vm15, %v4870_v24  ;;  %v10868_v24 = vld [vmem:[#allocation20_spill] sm:$0xff] }
 0x84f   :  { %v5016_v62 = vpop.permute.xlu2 %5015 }
 0x857   :  { %v4982_v23 = vpop.permute.xlu0 %4981  ;;  %v4924_v26 = vpop.permute.xlu2 %4923 }
 0x858   :  { %4984 = vst.msk [vmem:[#allocation4 + $0x2] sm:$0x3] %vm4854_vm14, %v4982_v23 }
 0x85d   :  { %v4999_v38 = vpop.permute.xlu1 %4998 }
 0x85e   :  { %5001 = vst.msk [vmem:[#allocation4 + $0x2] sm:$0x3] %vm4872_vm15, %v4999_v38 }
 0x85f   :  { %v4888_v29 = vpop.permute.xlu0 %4887  ;;  %5018 = vst.msk [vmem:[#allocation4 + $0x2] sm:$0x3] %vm4890_vm0, %v5016_v62  ;;  %v10869_v62 = vld [vmem:[#allocation25_spill] sm:$0xff] }
 0x860   :  { %4891 = vst.msk [vmem:[#allocation4] sm:$0x3] %vm4890_vm0, %v4888_v29  ;;  %v10870_v29 = vld [vmem:[#allocation21_spill] sm:$0xff] }
 0x865   :  { %v4906_v11 = vpop.permute.xlu1 %4905  ;;  %v5067_v7 = vpop.permute.xlu2 %5066 }
 0x866   :  { %4909 = vst.msk [vmem:[#allocation4] sm:$0x3] %vm4908_vm1, %v4906_v11 }
 0x867   :  { %4927 = vst.msk [vmem:[#allocation4] sm:$0x3] %vm4926_vm2, %v4924_v26  ;;  %v10871_v26 = vld [vmem:[#allocation29_spill] sm:$0xff] }
 0x86d   :  { %v5033_v2 = vpop.permute.xlu0 %5032 }
 0x86e   :  { %5035 = vst.msk [vmem:[#allocation4 + $0x2] sm:$0x3] %vm4908_vm1, %v5033_v2 }
 0x875   :  { %v4942_v22 = vpop.permute.xlu0 %4941 }
 0x876   :  { %4945 = vst.msk [vmem:[#allocation4] sm:$0x3] %vm4944_vm3, %v4942_v22 }
 0x877   :  { %v5050_v31 = vpop.permute.xlu1 %5049 }
 0x878   :  { %5052 = vst.msk [vmem:[#allocation4 + $0x2] sm:$0x3] %vm4926_vm2, %v5050_v31 }
 0x879   :  { %5069 = vst.msk [vmem:[#allocation4 + $0x2] sm:$0x3] %vm4944_vm3, %v5067_v7 }
 0x880   :  { %v5070_v42 = vld [vmem:[#allocation4] sm:$0xf] }
 0x881   :  { %v5071_v25 = vsub.f32 0.0, %v5070_v42 }
 0x883   :  { %v5072_v60 = vmul.f32 1.442695, %v5071_v25 }
 0x885   :  { %5319 = vpow2.f32 %v5072_v60 }
 0x88b   :  { %v5320_v28 = vpop.eup %5319 }
 0x88c   :  { %v5074_v14 = vadd.f32 1.0, %v5320_v28 }
 0x88e   :  { %5321 = vrcp.f32 %v5074_v14  ;;  %v5086_v39 = vand.u32 2147483648, %v5074_v14  ;;  %v5084_v12 = vand.u32 2147483647, %v5074_v14  ;;  %vm5080_vm5 = vweird.f32 %v5074_v14 }
 0x890   :  { %v5087_v9 = vor.u32 1.1754944e-38, %v5086_v39  ;;  %vm5085_vm7 = vcmp.eq.f32.partialorder %v5084_v12, 8.507059e+37 }
 0x894   :  { %v5322_v5 = vpop.eup %5321 }
 0x895   :  { %v5076_v55 = vmul.f32 %v5322_v5, %v5074_v14  ;;  %vm5081_vm4 = vweird.f32 %v5322_v5 }
 0x896   :  { %vm5082_vm6 = vmor %vm5080_vm5, %vm5081_vm4 }
 0x897   :  { %v5077_v43 = vsub.f32 1.0, %v5076_v55 }
 0x899   :  { %v5078_v57 = vmul.f32 %v5322_v5, %v5077_v43 }
 0x89b   :  { %v5079_v6 = vadd.f32 %v5322_v5, %v5078_v57 }
 0x89d   :  { %v5083_v27 = vsel %vm5082_vm6, %v5322_v5, %v5079_v6 }
 0x89e   :  { %v5088_v16 = vsel %vm5085_vm7, %v5087_v9, %v5083_v27 }
 0x89f   :  { %v5091_v53 = vrot.slane %v5088_v16, 1  ;;  %v5092_v40 = vrot.slane %v5088_v16, 2  ;;  %v5093_v35 = vrot.slane %v5088_v16, 3 }
 0x8a1   :  { %v5095_v19 = vsel %vm5094_vm11, %v5088_v16, %v5091_v53  ;;  %v5096_v45 = vsel %vm4809_vm10, %v5092_v40, %v5093_v35  ;;  %v5099_v13 = vsel %vm4815_vm8, %v5088_v16, %v5091_v53  ;;  %v5100_v30 = vsel %vm4817_vm9, %v5092_v40, %v5093_v35 }
 0x8a2   :  { %v5098_v4 = vsel %vm5097_vm12, %v5095_v19, %v5096_v45  ;;  %v5102_v17 = vsel %vm5101_vm13, %v5099_v13, %v5100_v30 }
 0x8a3   :  { %v5103_v1 = vrot.slane %v5102_v17, 1  ;;  %v5104_v52 = vperm.slane %v5098_v4, 0  ;;  %v5105_v49 = vperm.slane %v5098_v4, 1 }
 0x8a5   :  { %v5112_v0 = vmul.f32 %v5104_v52, %v10856_v48  ;;  %v5113_v8 = vmul.f32 %v5105_v49, %v10857_v56  ;;  %v5114_v51 = vmul.f32 %v5104_v52, %v10858_v34  ;;  %v5115_v54 = vmul.f32 %v5105_v49, %v10859_v15 }
 0x8a6   :  { %v5106_v59 = vperm.slane %v5103_v1, 0  ;;  %v5116_v50 = vmul.f32 %v5104_v52, %v10860_v3  ;;  %v5107_v32 = vperm.slane %v5103_v1, 1  ;;  %v5117_v47 = vmul.f32 %v5105_v49, %v10861_v36 }
 0x8a7   :  { %5128 = vst [vmem:[#allocation10] sm:$0xff] %v5112_v0  ;;  %v5118_v41 = vmul.f32 %v5104_v52, %v10862_v44  ;;  %v5119_v46 = vmul.f32 %v5105_v49, %v10863_v37 }
 0x8a8   :  { %5129 = vst [vmem:[#allocation10 + $0x8] sm:$0xff] %v5113_v8  ;;  %v5120_v63 = vmul.f32 %v5106_v59, %v10864_v61  ;;  %v5121_v20 = vmul.f32 %v5107_v32, %v10865_v33  ;;  %v5122_v21 = vmul.f32 %v5106_v59, %v10866_v10  ;;  %v5123_v18 = vmul.f32 %v5107_v32, %v10867_v58 }
 0x8a9   :  { %5130 = vst [vmem:[#allocation10 + $0x10] sm:$0xff] %v5114_v51  ;;  %v5124_v23 = vmul.f32 %v5106_v59, %v10868_v24  ;;  %v5125_v38 = vmul.f32 %v5107_v32, %v10869_v62  ;;  %v5126_v11 = vmul.f32 %v5106_v59, %v10870_v29  ;;  %v5127_v2 = vmul.f32 %v5107_v32, %v10871_v26 }
 0x8aa   :  { %5131 = vst [vmem:[#allocation10 + $0x18] sm:$0xff] %v5115_v54 }
 0x8ab   :  { %5132 = vst [vmem:[#allocation10 + $0x20] sm:$0xff] %v5116_v50 }
 0x8ac   :  { %5133 = vst [vmem:[#allocation10 + $0x28] sm:$0xff] %v5117_v47 }
 0x8ad   :  { %5134 = vst [vmem:[#allocation10 + $0x30] sm:$0xff] %v5118_v41 }
 0x8ae   :  { %5135 = vst [vmem:[#allocation10 + $0x38] sm:$0xff] %v5119_v46 }
 0x8af   :  { %5136 = vst [vmem:[#allocation10 + $0x40] sm:$0xff] %v5120_v63 }
 0x8b0   :  { %5137 = vst [vmem:[#allocation10 + $0x48] sm:$0xff] %v5121_v20 }
 0x8b1   :  { %5138 = vst [vmem:[#allocation10 + $0x50] sm:$0xff] %v5122_v21 }
 0x8b2   :  { %5139 = vst [vmem:[#allocation10 + $0x58] sm:$0xff] %v5123_v18 }
 0x8b3   :  { %5140 = vst [vmem:[#allocation10 + $0x60] sm:$0xff] %v5124_v23 }
 0x8b4   :  { %5141 = vst [vmem:[#allocation10 + $0x68] sm:$0xff] %v5125_v38 }
 0x8b5   :  { %5142 = vst [vmem:[#allocation10 + $0x70] sm:$0xff] %v5126_v11 }
 0x8b6   :  { %5143 = vst [vmem:[#allocation10 + $0x78] sm:$0xff] %v5127_v2 }
 0x8b7   :  { %5156 = dma.vmem_to_hbm [thread:$0]  %s5149_s19, 2048, %s5151_s21, [#allocation7], %s5437_s23, %s5437_s23, %s5438_s24  }
 0x8b8   :  { %5434 = dma.done.wait [#allocation7], 2048  }
 0x8b9   :  { %5435 = vsyncadd [#allocation7], 4294965248 }
 0x8ba   :  { %5161 = vsyncpa [#allocation6], 1 }
 0x8bb   :  { %5162 = vsyncpa [#allocation7], 1 }
 0x8bc   :  { %5163 = vsyncpa [#allocation8], 1 }

</bundles_post_ra>
